<compile_context>
chip_gen: v6e
topology: v6e:2x2x1
jax: 0.10.0
libtpu: 0.0.40
codegen_flags: <defaults>
</compile_context>

<pallas_src>
import functools

import jax
import jax.numpy as jnp
from jax.experimental import pallas as pl
from jax.experimental.pallas import tpu as pltpu

BN_EPS = 1e-5
F32 = jnp.float32
BF16 = jnp.bfloat16


def _round_up(x, m):
    return (x + m - 1) // m * m


def _gemm_dims(K, N):
    """Tile and padded sizes for an (M,K)@(K,N) GEMM (K, N are static)."""
    TK = min(512, _round_up(K, 128))
    TN = min(256, _round_up(N, 128))
    Kp = _round_up(K, TK)
    Np = _round_up(N, TN)
    return TK, TN, Kp, Np


# ---------------------------------------------------------------------------
# Fused GEMM kernel:  out = epilogue( prologue(A) @ B )
#   prologue: per-K-column affine (+ optional ReLU)  -> BN+ReLU preceding a 1x1 conv
#   epilogue: per-N-column affine (+ optional ReLU)  -> BN+ReLU following a conv / fc bias
# ---------------------------------------------------------------------------
def _fused_matmul_kernel(a_ref, b_ref, asc_ref, abi_ref, osc_ref, obi_ref,
                         o_ref, acc_ref, *, relu_a, relu_out):
    k = pl.program_id(2)

    @pl.when(k == 0)
    def _():
        acc_ref[...] = jnp.zeros_like(acc_ref)

    a = a_ref[...].astype(F32) * asc_ref[...] + abi_ref[...]
    if relu_a:
        a = jnp.maximum(a, 0.0)
    acc_ref[...] += jnp.dot(a.astype(BF16), b_ref[...],
                            preferred_element_type=F32)

    @pl.when(k == pl.num_programs(2) - 1)
    def _():
        y = acc_ref[...] * osc_ref[...] + obi_ref[...]
        if relu_out:
            y = jnp.maximum(y, 0.0)
        o_ref[...] = y.astype(o_ref.dtype)


def fused_matmul(a, b_p, K, N, a_scale, a_bias, o_scale, o_bias,
                 *, relu_a=False, relu_out=False):
    """a: (M, K) activations; b_p: pre-padded (Kp, Np) bf16 weight; returns (M, N) f32."""
    M = a.shape[0]
    TK, TN, Kp, Np = _gemm_dims(K, N)
    assert b_p.shape == (Kp, Np), (b_p.shape, Kp, Np)
    assert a_scale.shape == (1, Kp) and a_bias.shape == (1, Kp)
    assert o_scale.shape == (1, Np) and o_bias.shape == (1, Np)

    TM = min(256, _round_up(M, 8))
    Mp = _round_up(M, TM)
    a_p = jnp.pad(a.astype(BF16), ((0, Mp - M), (0, Kp - K)))

    out = pl.pallas_call(
        functools.partial(_fused_matmul_kernel, relu_a=relu_a, relu_out=relu_out),
        out_shape=jax.ShapeDtypeStruct((Mp, Np), F32),
        grid=(Mp // TM, Np // TN, Kp // TK),
        in_specs=[
            pl.BlockSpec((TM, TK), lambda i, j, k: (i, k)),
            pl.BlockSpec((TK, TN), lambda i, j, k: (k, j)),
            pl.BlockSpec((1, TK), lambda i, j, k: (0, k)),
            pl.BlockSpec((1, TK), lambda i, j, k: (0, k)),
            pl.BlockSpec((1, TN), lambda i, j, k: (0, j)),
            pl.BlockSpec((1, TN), lambda i, j, k: (0, j)),
        ],
        out_specs=pl.BlockSpec((TM, TN), lambda i, j, k: (i, j)),
        scratch_shapes=[pltpu.VMEM((TM, TN), F32)],
        compiler_params=pltpu.CompilerParams(
            dimension_semantics=("parallel", "parallel", "arbitrary")),
    )(a_p, b_p, a_scale, a_bias, o_scale, o_bias)
    return out[:M, :N]


# ---------------------------------------------------------------------------
# Pooling kernels
# ---------------------------------------------------------------------------
def _pool_kernel(p_ref, o_ref, *, op):
    p = p_ref[...]
    if op == "max":
        o_ref[...] = jnp.max(p, axis=1)
    else:
        o_ref[...] = jnp.mean(p, axis=1)


def pallas_pool(patches, op):
    """Reduce (M, Kw, C) over the window axis -> (M, C); tiled over M."""
    M, Kw, C = patches.shape
    Cp = _round_up(C, 128)
    TM = min(256, _round_up(M, 8))
    Mp = _round_up(M, TM)
    p_p = jnp.pad(patches, ((0, Mp - M), (0, 0), (0, Cp - C)))
    out = pl.pallas_call(
        functools.partial(_pool_kernel, op=op),
        out_shape=jax.ShapeDtypeStruct((Mp, Cp), F32),
        grid=(Mp // TM,),
        in_specs=[pl.BlockSpec((TM, Kw, Cp), lambda i: (i, 0, 0))],
        out_specs=pl.BlockSpec((TM, Cp), lambda i: (i, 0)),
        compiler_params=pltpu.CompilerParams(dimension_semantics=("parallel",)),
    )(p_p)
    return out[:M, :C]


def _gap_kernel(x_ref, s_ref, b_ref, o_ref, *, inv_hw):
    y = x_ref[...] * s_ref[...] + b_ref[...]        # BN affine
    y = jnp.maximum(y, 0.0)                         # final F.relu
    o_ref[...] = jnp.sum(y, axis=1) * inv_hw        # adaptive_avg_pool2d(1,1)


def global_pool_bn_relu(x, scale_row, bias_row):
    """norm5 + ReLU + global average pool, fused into one kernel. x: (N,H,W,C) -> (N,C)."""
    Nb, H, W, C = x.shape
    Cp = scale_row.shape[1]
    x2 = jnp.pad(x.reshape(Nb, H * W, C), ((0, 0), (0, 0), (0, Cp - C)))
    s3 = scale_row.reshape(1, 1, Cp)
    b3 = bias_row.reshape(1, 1, Cp)
    out = pl.pallas_call(
        functools.partial(_gap_kernel, inv_hw=1.0 / (H * W)),
        out_shape=jax.ShapeDtypeStruct((Nb, Cp), F32),
        grid=(1,),
        in_specs=[
            pl.BlockSpec((Nb, H * W, Cp), lambda i: (0, 0, 0)),
            pl.BlockSpec((1, 1, Cp), lambda i: (0, 0, 0)),
            pl.BlockSpec((1, 1, Cp), lambda i: (0, 0, 0)),
        ],
        out_specs=pl.BlockSpec((Nb, Cp), lambda i: (0, 0)),
    )(x2, s3, b3)
    return out[:, :C]


# ---------------------------------------------------------------------------
# Plain-JAX glue: patch extraction and layer wrappers
# ---------------------------------------------------------------------------
def _extract_patches(x, kh, kw, stride, pad, pad_value=0.0):
    """x: (N, H, W, C) -> patches (N, Ho, Wo, kh*kw, C)."""
    N, H, W, C = x.shape
    xp = jnp.pad(x, ((0, 0), (pad, pad), (pad, pad), (0, 0)), constant_values=pad_value)
    Ho = (H + 2 * pad - kh) // stride + 1
    Wo = (W + 2 * pad - kw) // stride + 1
    cols = []
    for i in range(kh):
        for j in range(kw):
            cols.append(xp[:, i:i + (Ho - 1) * stride + 1:stride,
                              j:j + (Wo - 1) * stride + 1:stride, :])
    patches = jnp.stack(cols, axis=3)
    return patches, Ho, Wo


def conv2d(x, w_p, cin, cout, kh, kw, stride, pad,
           a_scale=None, a_bias=None, o_scale=None, o_bias=None,
           relu_a=False, relu_out=False):
    """NHWC conv (bias=False) via fused GEMM; optional fused BN+ReLU prologue/epilogue."""
    Nb, H, W, C = x.shape
    assert C == cin
    K = kh * kw * cin
    TK, TN, Kp, Np = _gemm_dims(K, cout)
    if a_scale is None:
        a_scale = jnp.ones((1, Kp), F32)
        a_bias = jnp.zeros((1, Kp), F32)
    if o_scale is None:
        o_scale = jnp.ones((1, Np), F32)
        o_bias = jnp.zeros((1, Np), F32)

    if kh == 1 and kw == 1 and stride == 1 and pad == 0:
        cols = x.reshape(Nb * H * W, cin)          # 1x1 conv: no im2col needed
        Ho, Wo = H, W
    else:
        # TODO(synk): lower 3x3/7x7 convs as a direct halo'd kernel instead of
        # materializing kh*kw im2col copies in HBM (patches kept in bf16 to halve traffic).
        patches, Ho, Wo = _extract_patches(x.astype(BF16), kh, kw, stride, pad, 0.0)
        cols = patches.reshape(Nb * Ho * Wo, K)

    out = fused_matmul(cols, w_p, K, cout, a_scale, a_bias, o_scale, o_bias,
                       relu_a=relu_a, relu_out=relu_out)
    return out.reshape(Nb, Ho, Wo, cout)


def maxpool2d(x, k, stride, pad):
    Nb, H, W, C = x.shape
    patches, Ho, Wo = _extract_patches(x, k, k, stride, pad, -jnp.inf)
    out = pallas_pool(patches.reshape(Nb * Ho * Wo, k * k, C), "max")
    return out.reshape(Nb, Ho, Wo, C)


def avgpool2d(x, k, stride):
    Nb, H, W, C = x.shape
    patches, Ho, Wo = _extract_patches(x, k, k, stride, 0, 0.0)
    out = pallas_pool(patches.reshape(Nb * Ho * Wo, k * k, C), "mean")
    return out.reshape(Nb, Ho, Wo, C)


# ---------------------------------------------------------------------------
# Parameter init (deterministic; weights pre-reshaped / pre-padded to GEMM layout, bf16)
# ---------------------------------------------------------------------------
def _bn_rows(c, pad_to):
    # inference BN with weight=1, bias=0, running stats (0, 1):  y = x / sqrt(1 + eps)
    scale = jnp.full((c,), 1.0 / (1.0 + BN_EPS) ** 0.5, F32)
    bias = jnp.zeros((c,), F32)
    scale = jnp.pad(scale, (0, pad_to - c), constant_values=1.0).reshape(1, pad_to)
    bias = jnp.pad(bias, (0, pad_to - c)).reshape(1, pad_to)
    return scale, bias


def _kaiming_conv(key, kh, kw, cin, cout):
    fan_out = cout * kh * kw
    std = (2.0 / fan_out) ** 0.5
    return jax.random.normal(key, (kh, kw, cin, cout), F32) * std


def _prep_conv_weight(key, kh, kw, cin, cout):
    w = _kaiming_conv(key, kh, kw, cin, cout)
    K = kh * kw * cin
    _, _, Kp, Np = _gemm_dims(K, cout)
    w2 = w.reshape(K, cout).astype(BF16)
    return jnp.pad(w2, ((0, Kp - K), (0, Np - cout)))


def init_params(key, cfg):
    g, bn_size = cfg["growth_rate"], cfg["bn_size"]
    nif, ncls = cfg["num_init_features"], cfg["num_classes"]
    params = {}

    key, k = jax.random.split(key)
    params["conv0_w"] = _prep_conv_weight(k, 7, 7, 3, nif)
    _, _, _, Np0 = _gemm_dims(7 * 7 * 3, nif)
    params["bn0"] = _bn_rows(nif, Np0)                    # epilogue of conv0

    blocks = []
    nf = nif
    for bi, num_layers in enumerate(cfg["block_config"]):
        layers = []
        for li in range(num_layers):
            cin = nf + li * g
            inter = bn_size * g
            _, _, Kp1, Np1 = _gemm_dims(cin, inter)
            key, k1 = jax.random.split(key)
            key, k2 = jax.random.split(key)
            layers.append({
                "bn1": _bn_rows(cin, Kp1),                 # prologue of 1x1 conv
                "conv1_w": _prep_conv_weight(k1, 1, 1, cin, inter),
                "bn2": _bn_rows(inter, Np1),               # epilogue of 1x1 conv
                "conv2_w": _prep_conv_weight(k2, 3, 3, inter, g),
            })
        blk = {"layers": layers}
        nf = nf + num_layers * g
        if bi != len(cfg["block_config"]) - 1:
            _, _, Kpt, _ = _gemm_dims(nf, nf // 2)
            key, kt = jax.random.split(key)
            blk["transition"] = {
                "bn": _bn_rows(nf, Kpt),                   # prologue of transition conv
                "conv_w": _prep_conv_weight(kt, 1, 1, nf, nf // 2),
            }
            nf //= 2
        blocks.append(blk)
    params["blocks"] = blocks

    params["norm5"] = _bn_rows(nf, _round_up(nf, 128))

    key, kf = jax.random.split(key)
    std = (2.0 / ncls) ** 0.5                              # kaiming_normal_ fan_out on Linear
    fc_w = jax.random.normal(kf, (nf, ncls), F32) * std
    _, _, Kpf, Npf = _gemm_dims(nf, ncls)
    params["fc_w"] = jnp.pad(fc_w.astype(BF16), ((0, Kpf - nf), (0, Npf - ncls)))
    params["fc_b"] = jnp.zeros((1, Npf), F32)
    return params


# ---------------------------------------------------------------------------
# Forward pass (mirrors DenseNet.forward)
# ---------------------------------------------------------------------------
def densenet_forward(x_nchw, params, cfg):
    g, bn_size = cfg["growth_rate"], cfg["bn_size"]
    nif, ncls = cfg["num_init_features"], cfg["num_classes"]

    x = jnp.transpose(x_nchw, (0, 2, 3, 1)).astype(F32)    # NCHW -> NHWC

    # stem: conv0 -> (fused) norm0+relu0 -> pool0
    bn0_s, bn0_b = params["bn0"]
    x = conv2d(x, params["conv0_w"], 3, nif, 7, 7, 2, 3,
               o_scale=bn0_s, o_bias=bn0_b, relu_out=True)
    x = maxpool2d(x, 3, 2, 1)

    nf = nif
    for bi, num_layers in enumerate(cfg["block_config"]):
        blk = params["blocks"][bi]
        for li in range(num_layers):
            lp = blk["layers"][li]
            cin = nf + li * g
            inter = bn_size * g
            # BN1+ReLU (prologue) -> 1x1 conv -> BN2+ReLU (epilogue): single pallas_call
            h = conv2d(x, lp["conv1_w"], cin, inter, 1, 1, 1, 0,
                       a_scale=lp["bn1"][0], a_bias=lp["bn1"][1], relu_a=True,
                       o_scale=lp["bn2"][0], o_bias=lp["bn2"][1], relu_out=True)
            # 3x3 conv producing growth_rate new features
            h = conv2d(h, lp["conv2_w"], inter, g, 3, 3, 1, 1)
            # TODO(synk): write h into a pre-allocated channel slice (input_output_aliases)
            # instead of re-concatenating the whole feature map every layer.
            x = jnp.concatenate([x, h], axis=-1)
        nf = nf + num_layers * g
        if "transition" in blk:
            tp = blk["transition"]
            # BN+ReLU prologue fused into the 1x1 transition conv
            x = conv2d(x, tp["conv_w"], nf, nf // 2, 1, 1, 1, 0,
                       a_scale=tp["bn"][0], a_bias=tp["bn"][1], relu_a=True)
            x = avgpool2d(x, 2, 2)
            nf //= 2

    # norm5 + final F.relu + adaptive_avg_pool2d(1,1): one fused kernel
    n5_s, n5_b = params["norm5"]
    pooled = global_pool_bn_relu(x, n5_s, n5_b)            # (N, nf)

    # classifier: bias folded into the GEMM epilogue
    _, _, Kpf, Npf = _gemm_dims(nf, ncls)
    ones_k = jnp.ones((1, Kpf), F32)
    zeros_k = jnp.zeros((1, Kpf), F32)
    ones_n = jnp.ones((1, Npf), F32)
    logits = fused_matmul(pooled, params["fc_w"], nf, ncls,
                          ones_k, zeros_k, ones_n, params["fc_b"])
    return logits


if __name__ == "__main__":
    # Small synthetic DenseNet-BC config (same architecture, reduced sizes)
    cfg = dict(growth_rate=8, block_config=(2, 2), num_init_features=16,
               bn_size=4, num_classes=10)

    key = jax.random.PRNGKey(0)
    kx, kp = jax.random.split(key)
    params = init_params(kp, cfg)

    x = jax.random.normal(kx, (2, 3, 32, 32), F32)          # NCHW like PyTorch
    fwd = jax.jit(functools.partial(densenet_forward, cfg=cfg))
    out = jax.block_until_ready(fwd(x, params))

    assert out.shape == (2, cfg["num_classes"]), out.shape
    assert bool(jnp.all(jnp.isfinite(out)))
    print("KERNEL_OK")
</pallas_src>

<mosaic_0001>
module attributes {stable_mosaic.version = 11 : i64} {
  func.func @_fused_matmul_kernel(%arg0: i32, %arg1: i32, %arg2: i32, %arg3: memref<256x256xbf16, #tpu.memory_space<vmem>>, %arg4: memref<256x128xbf16, #tpu.memory_space<vmem>>, %arg5: memref<1x256xf32, #tpu.memory_space<vmem>>, %arg6: memref<1x256xf32, #tpu.memory_space<vmem>>, %arg7: memref<1x128xf32, #tpu.memory_space<vmem>>, %arg8: memref<1x128xf32, #tpu.memory_space<vmem>>, %arg9: memref<256x128xf32, #tpu.memory_space<vmem>>, %arg10: memref<256x128xf32, #tpu.memory_space<vmem>>) attributes {dimension_semantics = [#tpu.dimension_semantics<parallel>, #tpu.dimension_semantics<parallel>, #tpu.dimension_semantics<arbitrary>], iteration_bounds = array<i64: 2, 1, 1>, scalar_prefetch = 0 : i64, scratch_operands = 1 : i64, tpu.core_type = #tpu.core_type<tc>, window_params = [{transform_indices = @transform_0, window_bounds = array<i64: 256, 256>}, {transform_indices = @transform_1, window_bounds = array<i64: 256, 128>}, {transform_indices = @transform_2, window_bounds = array<i64: 1, 256>}, {transform_indices = @transform_3, window_bounds = array<i64: 1, 256>}, {transform_indices = @transform_4, window_bounds = array<i64: 1, 128>}, {transform_indices = @transform_5, window_bounds = array<i64: 1, 128>}, {transform_indices = @transform_6, window_bounds = array<i64: 256, 128>}]} {
    %c0_i32 = arith.constant 0 : i32
    %0 = arith.cmpi eq, %arg2, %c0_i32 : i32
    %1 = arith.extui %0 : i1 to i32
    %c0_i32_0 = arith.constant 0 : i32
    %2 = arith.cmpi ne, %1, %c0_i32_0 : i32
    scf.if %2 {
      %cst_14 = arith.constant 0.000000e+00 : f32
      %20 = vector.broadcast %cst_14 : f32 to vector<256x128xf32>
      %c0_15 = arith.constant 0 : index
      %c0_16 = arith.constant 0 : index
      %21 = vector.load %arg10[%c0_15, %c0_16] : memref<256x128xf32, #tpu.memory_space<vmem>>, vector<256x128xf32>
      tpu.vector_store %arg10[%c0_15, %c0_16], %20 {strides = array<i32>} : memref<256x128xf32, #tpu.memory_space<vmem>>, vector<256x128xf32>,
    } else {
    }
    %c0 = arith.constant 0 : index
    %c0_1 = arith.constant 0 : index
    %3 = vector.load %arg3[%c0, %c0_1] : memref<256x256xbf16, #tpu.memory_space<vmem>>, vector<256x256xbf16>
    %4 = arith.extf %3 : vector<256x256xbf16> to vector<256x256xf32>
    %c0_2 = arith.constant 0 : index
    %c0_3 = arith.constant 0 : index
    %5 = vector.load %arg5[%c0_2, %c0_3] : memref<1x256xf32, #tpu.memory_space<vmem>>, vector<1x256xf32>
    %6 = vector.broadcast %5 : vector<1x256xf32> to vector<256x256xf32>
    %7 = arith.mulf %4, %6 : vector<256x256xf32>
    %c0_4 = arith.constant 0 : index
    %c0_5 = arith.constant 0 : index
    %8 = vector.load %arg6[%c0_4, %c0_5] : memref<1x256xf32, #tpu.memory_space<vmem>>, vector<1x256xf32>
    %9 = vector.broadcast %8 : vector<1x256xf32> to vector<256x256xf32>
    %10 = arith.addf %7, %9 : vector<256x256xf32>
    %c0_6 = arith.constant 0 : index
    %c0_7 = arith.constant 0 : index
    %11 = vector.load %arg10[%c0_6, %c0_7] : memref<256x128xf32, #tpu.memory_space<vmem>>, vector<256x128xf32>
    %12 = arith.truncf %10 : vector<256x256xf32> to vector<256x256xbf16>
    %c0_8 = arith.constant 0 : index
    %c0_9 = arith.constant 0 : index
    %13 = vector.load %arg4[%c0_8, %c0_9] : memref<256x128xbf16, #tpu.memory_space<vmem>>, vector<256x128xbf16>
    %cst = arith.constant dense<0.000000e+00> : vector<256x128xf32>
    %14 = tpu.matmul %12, %13, %cst {dimension_numbers = #tpu.dot_dimension_numbers<[1], [0], [0], [1], [0, 0, 1, 1], [], []>} : vector<256x256xbf16>, vector<256x128xbf16>, vector<256x128xf32> -> vector<256x128xf32>
    %15 = arith.addf %11, %14 : vector<256x128xf32>
    %c0_10 = arith.constant 0 : index
    %c0_11 = arith.constant 0 : index
    %16 = vector.load %arg10[%c0_10, %c0_11] : memref<256x128xf32, #tpu.memory_space<vmem>>, vector<256x128xf32>
    tpu.vector_store %arg10[%c0_10, %c0_11], %15 {strides = array<i32>} : memref<256x128xf32, #tpu.memory_space<vmem>>, vector<256x128xf32>,
    %c0_i32_12 = arith.constant 0 : i32
    %17 = arith.cmpi eq, %arg2, %c0_i32_12 : i32
    %18 = arith.extui %17 : i1 to i32
    %c0_i32_13 = arith.constant 0 : i32
    %19 = arith.cmpi ne, %18, %c0_i32_13 : i32
    scf.if %19 {
      %c0_14 = arith.constant 0 : index
      %c0_15 = arith.constant 0 : index
      %20 = vector.load %arg10[%c0_14, %c0_15] : memref<256x128xf32, #tpu.memory_space<vmem>>, vector<256x128xf32>
      %c0_16 = arith.constant 0 : index
      %c0_17 = arith.constant 0 : index
      %21 = vector.load %arg7[%c0_16, %c0_17] : memref<1x128xf32, #tpu.memory_space<vmem>>, vector<1x128xf32>
      %22 = vector.broadcast %21 : vector<1x128xf32> to vector<256x128xf32>
      %23 = arith.mulf %20, %22 : vector<256x128xf32>
      %c0_18 = arith.constant 0 : index
      %c0_19 = arith.constant 0 : index
      %24 = vector.load %arg8[%c0_18, %c0_19] : memref<1x128xf32, #tpu.memory_space<vmem>>, vector<1x128xf32>
      %25 = vector.broadcast %24 : vector<1x128xf32> to vector<256x128xf32>
      %26 = arith.addf %23, %25 : vector<256x128xf32>
      %cst_20 = arith.constant 0.000000e+00 : f32
      %27 = vector.broadcast %cst_20 : f32 to vector<256x128xf32>
      %28 = arith.maximumf %26, %27 : vector<256x128xf32>
      %c0_21 = arith.constant 0 : index
      %c0_22 = arith.constant 0 : index
      %29 = vector.load %arg9[%c0_21, %c0_22] : memref<256x128xf32, #tpu.memory_space<vmem>>, vector<256x128xf32>
      tpu.vector_store %arg9[%c0_21, %c0_22], %28 {strides = array<i32>} : memref<256x128xf32, #tpu.memory_space<vmem>>, vector<256x128xf32>,
    } else {
    }
    return
  }
  func.func @transform_0(%arg0: i32, %arg1: i32, %arg2: i32) -> (i32, i32) {
    %c0_i32 = arith.constant 0 : i32
    return %arg0, %arg2 : i32, i32
  }
  func.func @transform_1(%arg0: i32, %arg1: i32, %arg2: i32) -> (i32, i32) {
    %c0_i32 = arith.constant 0 : i32
    return %arg2, %arg1 : i32, i32
  }
  func.func @transform_2(%arg0: i32, %arg1: i32, %arg2: i32) -> (i32, i32) {
    %c0_i32 = arith.constant 0 : i32
    %c0_i32_0 = arith.constant 0 : i32
    return %c0_i32, %arg2 : i32, i32
  }
  func.func @transform_3(%arg0: i32, %arg1: i32, %arg2: i32) -> (i32, i32) {
    %c0_i32 = arith.constant 0 : i32
    %c0_i32_0 = arith.constant 0 : i32
    return %c0_i32, %arg2 : i32, i32
  }
  func.func @transform_4(%arg0: i32, %arg1: i32, %arg2: i32) -> (i32, i32) {
    %c0_i32 = arith.constant 0 : i32
    %c0_i32_0 = arith.constant 0 : i32
    return %c0_i32, %arg1 : i32, i32
  }
  func.func @transform_5(%arg0: i32, %arg1: i32, %arg2: i32) -> (i32, i32) {
    %c0_i32 = arith.constant 0 : i32
    %c0_i32_0 = arith.constant 0 : i32
    return %c0_i32, %arg1 : i32, i32
  }
  func.func @transform_6(%arg0: i32, %arg1: i32, %arg2: i32) -> (i32, i32) {
    %c0_i32 = arith.constant 0 : i32
    return %arg0, %arg1 : i32, i32
  }
}

module attributes {stable_mosaic.version = 11 : i64} {
  func.func @_pool_kernel(%arg0: i32, %arg1: memref<128x9x128xf32, #tpu.memory_space<vmem>>, %arg2: memref<128x128xf32, #tpu.memory_space<vmem>>) attributes {dimension_semantics = [#tpu.dimension_semantics<parallel>], iteration_bounds = array<i64: 1>, scalar_prefetch = 0 : i64, scratch_operands = 0 : i64, tpu.core_type = #tpu.core_type<tc>, window_params = [{transform_indices = @transform_0, window_bounds = array<i64: 128, 9, 128>}, {transform_indices = @transform_1, window_bounds = array<i64: 128, 128>}]} {
    %c0 = arith.constant 0 : index
    %c0_0 = arith.constant 0 : index
    %c0_1 = arith.constant 0 : index
    %0 = vector.load %arg1[%c0, %c0_0, %c0_1] : memref<128x9x128xf32, #tpu.memory_space<vmem>>, vector<128x9x128xf32>
    %cst = arith.constant dense<0xFF800000> : vector<128x128xf32>
    %1 = vector.multi_reduction <maximumf>, %0, %cst [1] : vector<128x9x128xf32> to vector<128x128xf32>
    %c0_2 = arith.constant 0 : index
    %c0_3 = arith.constant 0 : index
    %2 = vector.load %arg2[%c0_2, %c0_3] : memref<128x128xf32, #tpu.memory_space<vmem>>, vector<128x128xf32>
    tpu.vector_store %arg2[%c0_2, %c0_3], %1 {strides = array<i32>} : memref<128x128xf32, #tpu.memory_space<vmem>>, vector<128x128xf32>,
    return
  }
  func.func @transform_0(%arg0: i32) -> (i32, i32, i32) {
    %c0_i32 = arith.constant 0 : i32
    %c0_i32_0 = arith.constant 0 : i32
    %c0_i32_1 = arith.constant 0 : i32
    return %arg0, %c0_i32, %c0_i32_0 : i32, i32, i32
  }
  func.func @transform_1(%arg0: i32) -> (i32, i32) {
    %c0_i32 = arith.constant 0 : i32
    %c0_i32_0 = arith.constant 0 : i32
    return %arg0, %c0_i32 : i32, i32
  }
}

module attributes {stable_mosaic.version = 11 : i64} {
  func.func @_fused_matmul_kernel(%arg0: i32, %arg1: i32, %arg2: i32, %arg3: memref<128x128xbf16, #tpu.memory_space<vmem>>, %arg4: memref<128x128xbf16, #tpu.memory_space<vmem>>, %arg5: memref<1x128xf32, #tpu.memory_space<vmem>>, %arg6: memref<1x128xf32, #tpu.memory_space<vmem>>, %arg7: memref<1x128xf32, #tpu.memory_space<vmem>>, %arg8: memref<1x128xf32, #tpu.memory_space<vmem>>, %arg9: memref<128x128xf32, #tpu.memory_space<vmem>>, %arg10: memref<128x128xf32, #tpu.memory_space<vmem>>) attributes {dimension_semantics = [#tpu.dimension_semantics<parallel>, #tpu.dimension_semantics<parallel>, #tpu.dimension_semantics<arbitrary>], iteration_bounds = array<i64: 1, 1, 1>, scalar_prefetch = 0 : i64, scratch_operands = 1 : i64, tpu.core_type = #tpu.core_type<tc>, window_params = [{transform_indices = @transform_0, window_bounds = array<i64: 128, 128>}, {transform_indices = @transform_1, window_bounds = array<i64: 128, 128>}, {transform_indices = @transform_2, window_bounds = array<i64: 1, 128>}, {transform_indices = @transform_3, window_bounds = array<i64: 1, 128>}, {transform_indices = @transform_4, window_bounds = array<i64: 1, 128>}, {transform_indices = @transform_5, window_bounds = array<i64: 1, 128>}, {transform_indices = @transform_6, window_bounds = array<i64: 128, 128>}]} {
    %c0_i32 = arith.constant 0 : i32
    %0 = arith.cmpi eq, %arg2, %c0_i32 : i32
    %1 = arith.extui %0 : i1 to i32
    %c0_i32_0 = arith.constant 0 : i32
    %2 = arith.cmpi ne, %1, %c0_i32_0 : i32
    scf.if %2 {
      %cst_15 = arith.constant 0.000000e+00 : f32
      %22 = vector.broadcast %cst_15 : f32 to vector<128x128xf32>
      %c0_16 = arith.constant 0 : index
      %c0_17 = arith.constant 0 : index
      %23 = vector.load %arg10[%c0_16, %c0_17] : memref<128x128xf32, #tpu.memory_space<vmem>>, vector<128x128xf32>
      tpu.vector_store %arg10[%c0_16, %c0_17], %22 {strides = array<i32>} : memref<128x128xf32, #tpu.memory_space<vmem>>, vector<128x128xf32>,
    } else {
    }
    %c0 = arith.constant 0 : index
    %c0_1 = arith.constant 0 : index
    %3 = vector.load %arg3[%c0, %c0_1] : memref<128x128xbf16, #tpu.memory_space<vmem>>, vector<128x128xbf16>
    %4 = arith.extf %3 : vector<128x128xbf16> to vector<128x128xf32>
    %c0_2 = arith.constant 0 : index
    %c0_3 = arith.constant 0 : index
    %5 = vector.load %arg5[%c0_2, %c0_3] : memref<1x128xf32, #tpu.memory_space<vmem>>, vector<1x128xf32>
    %6 = vector.broadcast %5 : vector<1x128xf32> to vector<128x128xf32>
    %7 = arith.mulf %4, %6 : vector<128x128xf32>
    %c0_4 = arith.constant 0 : index
    %c0_5 = arith.constant 0 : index
    %8 = vector.load %arg6[%c0_4, %c0_5] : memref<1x128xf32, #tpu.memory_space<vmem>>, vector<1x128xf32>
    %9 = vector.broadcast %8 : vector<1x128xf32> to vector<128x128xf32>
    %10 = arith.addf %7, %9 : vector<128x128xf32>
    %cst = arith.constant 0.000000e+00 : f32
    %11 = vector.broadcast %cst : f32 to vector<128x128xf32>
    %12 = arith.maximumf %10, %11 : vector<128x128xf32>
    %c0_6 = arith.constant 0 : index
    %c0_7 = arith.constant 0 : index
    %13 = vector.load %arg10[%c0_6, %c0_7] : memref<128x128xf32, #tpu.memory_space<vmem>>, vector<128x128xf32>
    %14 = arith.truncf %12 : vector<128x128xf32> to vector<128x128xbf16>
    %c0_8 = arith.constant 0 : index
    %c0_9 = arith.constant 0 : index
    %15 = vector.load %arg4[%c0_8, %c0_9] : memref<128x128xbf16, #tpu.memory_space<vmem>>, vector<128x128xbf16>
    %cst_10 = arith.constant dense<0.000000e+00> : vector<128x128xf32>
    %16 = tpu.matmul %14, %15, %cst_10 {dimension_numbers = #tpu.dot_dimension_numbers<[1], [0], [0], [1], [0, 0, 1, 1], [], []>} : vector<128x128xbf16>, vector<128x128xbf16>, vector<128x128xf32> -> vector<128x128xf32>
    %17 = arith.addf %13, %16 : vector<128x128xf32>
    %c0_11 = arith.constant 0 : index
    %c0_12 = arith.constant 0 : index
    %18 = vector.load %arg10[%c0_11, %c0_12] : memref<128x128xf32, #tpu.memory_space<vmem>>, vector<128x128xf32>
    tpu.vector_store %arg10[%c0_11, %c0_12], %17 {strides = array<i32>} : memref<128x128xf32, #tpu.memory_space<vmem>>, vector<128x128xf32>,
    %c0_i32_13 = arith.constant 0 : i32
    %19 = arith.cmpi eq, %arg2, %c0_i32_13 : i32
    %20 = arith.extui %19 : i1 to i32
    %c0_i32_14 = arith.constant 0 : i32
    %21 = arith.cmpi ne, %20, %c0_i32_14 : i32
    scf.if %21 {
      %c0_15 = arith.constant 0 : index
      %c0_16 = arith.constant 0 : index
      %22 = vector.load %arg10[%c0_15, %c0_16] : memref<128x128xf32, #tpu.memory_space<vmem>>, vector<128x128xf32>
      %c0_17 = arith.constant 0 : index
      %c0_18 = arith.constant 0 : index
      %23 = vector.load %arg7[%c0_17, %c0_18] : memref<1x128xf32, #tpu.memory_space<vmem>>, vector<1x128xf32>
      %24 = vector.broadcast %23 : vector<1x128xf32> to vector<128x128xf32>
      %25 = arith.mulf %22, %24 : vector<128x128xf32>
      %c0_19 = arith.constant 0 : index
      %c0_20 = arith.constant 0 : index
      %26 = vector.load %arg8[%c0_19, %c0_20] : memref<1x128xf32, #tpu.memory_space<vmem>>, vector<1x128xf32>
      %27 = vector.broadcast %26 : vector<1x128xf32> to vector<128x128xf32>
      %28 = arith.addf %25, %27 : vector<128x128xf32>
      %cst_21 = arith.constant 0.000000e+00 : f32
      %29 = vector.broadcast %cst_21 : f32 to vector<128x128xf32>
      %30 = arith.maximumf %28, %29 : vector<128x128xf32>
      %c0_22 = arith.constant 0 : index
      %c0_23 = arith.constant 0 : index
      %31 = vector.load %arg9[%c0_22, %c0_23] : memref<128x128xf32, #tpu.memory_space<vmem>>, vector<128x128xf32>
      tpu.vector_store %arg9[%c0_22, %c0_23], %30 {strides = array<i32>} : memref<128x128xf32, #tpu.memory_space<vmem>>, vector<128x128xf32>,
    } else {
    }
    return
  }
  func.func @transform_0(%arg0: i32, %arg1: i32, %arg2: i32) -> (i32, i32) {
    %c0_i32 = arith.constant 0 : i32
    return %arg0, %arg2 : i32, i32
  }
  func.func @transform_1(%arg0: i32, %arg1: i32, %arg2: i32) -> (i32, i32) {
    %c0_i32 = arith.constant 0 : i32
    return %arg2, %arg1 : i32, i32
  }
  func.func @transform_2(%arg0: i32, %arg1: i32, %arg2: i32) -> (i32, i32) {
    %c0_i32 = arith.constant 0 : i32
    %c0_i32_0 = arith.constant 0 : i32
    return %c0_i32, %arg2 : i32, i32
  }
  func.func @transform_3(%arg0: i32, %arg1: i32, %arg2: i32) -> (i32, i32) {
    %c0_i32 = arith.constant 0 : i32
    %c0_i32_0 = arith.constant 0 : i32
    return %c0_i32, %arg2 : i32, i32
  }
  func.func @transform_4(%arg0: i32, %arg1: i32, %arg2: i32) -> (i32, i32) {
    %c0_i32 = arith.constant 0 : i32
    %c0_i32_0 = arith.constant 0 : i32
    return %c0_i32, %arg1 : i32, i32
  }
  func.func @transform_5(%arg0: i32, %arg1: i32, %arg2: i32) -> (i32, i32) {
    %c0_i32 = arith.constant 0 : i32
    %c0_i32_0 = arith.constant 0 : i32
    return %c0_i32, %arg1 : i32, i32
  }
  func.func @transform_6(%arg0: i32, %arg1: i32, %arg2: i32) -> (i32, i32) {
    %c0_i32 = arith.constant 0 : i32
    return %arg0, %arg1 : i32, i32
  }
}

module attributes {stable_mosaic.version = 11 : i64} {
  func.func @_fused_matmul_kernel(%arg0: i32, %arg1: i32, %arg2: i32, %arg3: memref<128x384xbf16, #tpu.memory_space<vmem>>, %arg4: memref<384x128xbf16, #tpu.memory_space<vmem>>, %arg5: memref<1x384xf32, #tpu.memory_space<vmem>>, %arg6: memref<1x384xf32, #tpu.memory_space<vmem>>, %arg7: memref<1x128xf32, #tpu.memory_space<vmem>>, %arg8: memref<1x128xf32, #tpu.memory_space<vmem>>, %arg9: memref<128x128xf32, #tpu.memory_space<vmem>>, %arg10: memref<128x128xf32, #tpu.memory_space<vmem>>) attributes {dimension_semantics = [#tpu.dimension_semantics<parallel>, #tpu.dimension_semantics<parallel>, #tpu.dimension_semantics<arbitrary>], iteration_bounds = array<i64: 1, 1, 1>, scalar_prefetch = 0 : i64, scratch_operands = 1 : i64, tpu.core_type = #tpu.core_type<tc>, window_params = [{transform_indices = @transform_0, window_bounds = array<i64: 128, 384>}, {transform_indices = @transform_1, window_bounds = array<i64: 384, 128>}, {transform_indices = @transform_2, window_bounds = array<i64: 1, 384>}, {transform_indices = @transform_3, window_bounds = array<i64: 1, 384>}, {transform_indices = @transform_4, window_bounds = array<i64: 1, 128>}, {transform_indices = @transform_5, window_bounds = array<i64: 1, 128>}, {transform_indices = @transform_6, window_bounds = array<i64: 128, 128>}]} {
    %c0_i32 = arith.constant 0 : i32
    %0 = arith.cmpi eq, %arg2, %c0_i32 : i32
    %1 = arith.extui %0 : i1 to i32
    %c0_i32_0 = arith.constant 0 : i32
    %2 = arith.cmpi ne, %1, %c0_i32_0 : i32
    scf.if %2 {
      %cst_14 = arith.constant 0.000000e+00 : f32
      %20 = vector.broadcast %cst_14 : f32 to vector<128x128xf32>
      %c0_15 = arith.constant 0 : index
      %c0_16 = arith.constant 0 : index
      %21 = vector.load %arg10[%c0_15, %c0_16] : memref<128x128xf32, #tpu.memory_space<vmem>>, vector<128x128xf32>
      tpu.vector_store %arg10[%c0_15, %c0_16], %20 {strides = array<i32>} : memref<128x128xf32, #tpu.memory_space<vmem>>, vector<128x128xf32>,
    } else {
    }
    %c0 = arith.constant 0 : index
    %c0_1 = arith.constant 0 : index
    %3 = vector.load %arg3[%c0, %c0_1] : memref<128x384xbf16, #tpu.memory_space<vmem>>, vector<128x384xbf16>
    %4 = arith.extf %3 : vector<128x384xbf16> to vector<128x384xf32>
    %c0_2 = arith.constant 0 : index
    %c0_3 = arith.constant 0 : index
    %5 = vector.load %arg5[%c0_2, %c0_3] : memref<1x384xf32, #tpu.memory_space<vmem>>, vector<1x384xf32>
    %6 = vector.broadcast %5 : vector<1x384xf32> to vector<128x384xf32>
    %7 = arith.mulf %4, %6 : vector<128x384xf32>
    %c0_4 = arith.constant 0 : index
    %c0_5 = arith.constant 0 : index
    %8 = vector.load %arg6[%c0_4, %c0_5] : memref<1x384xf32, #tpu.memory_space<vmem>>, vector<1x384xf32>
    %9 = vector.broadcast %8 : vector<1x384xf32> to vector<128x384xf32>
    %10 = arith.addf %7, %9 : vector<128x384xf32>
    %c0_6 = arith.constant 0 : index
    %c0_7 = arith.constant 0 : index
    %11 = vector.load %arg10[%c0_6, %c0_7] : memref<128x128xf32, #tpu.memory_space<vmem>>, vector<128x128xf32>
    %12 = arith.truncf %10 : vector<128x384xf32> to vector<128x384xbf16>
    %c0_8 = arith.constant 0 : index
    %c0_9 = arith.constant 0 : index
    %13 = vector.load %arg4[%c0_8, %c0_9] : memref<384x128xbf16, #tpu.memory_space<vmem>>, vector<384x128xbf16>
    %cst = arith.constant dense<0.000000e+00> : vector<128x128xf32>
    %14 = tpu.matmul %12, %13, %cst {dimension_numbers = #tpu.dot_dimension_numbers<[1], [0], [0], [1], [0, 0, 1, 1], [], []>} : vector<128x384xbf16>, vector<384x128xbf16>, vector<128x128xf32> -> vector<128x128xf32>
    %15 = arith.addf %11, %14 : vector<128x128xf32>
    %c0_10 = arith.constant 0 : index
    %c0_11 = arith.constant 0 : index
    %16 = vector.load %arg10[%c0_10, %c0_11] : memref<128x128xf32, #tpu.memory_space<vmem>>, vector<128x128xf32>
    tpu.vector_store %arg10[%c0_10, %c0_11], %15 {strides = array<i32>} : memref<128x128xf32, #tpu.memory_space<vmem>>, vector<128x128xf32>,
    %c0_i32_12 = arith.constant 0 : i32
    %17 = arith.cmpi eq, %arg2, %c0_i32_12 : i32
    %18 = arith.extui %17 : i1 to i32
    %c0_i32_13 = arith.constant 0 : i32
    %19 = arith.cmpi ne, %18, %c0_i32_13 : i32
    scf.if %19 {
      %c0_14 = arith.constant 0 : index
      %c0_15 = arith.constant 0 : index
      %20 = vector.load %arg10[%c0_14, %c0_15] : memref<128x128xf32, #tpu.memory_space<vmem>>, vector<128x128xf32>
      %c0_16 = arith.constant 0 : index
      %c0_17 = arith.constant 0 : index
      %21 = vector.load %arg7[%c0_16, %c0_17] : memref<1x128xf32, #tpu.memory_space<vmem>>, vector<1x128xf32>
      %22 = vector.broadcast %21 : vector<1x128xf32> to vector<128x128xf32>
      %23 = arith.mulf %20, %22 : vector<128x128xf32>
      %c0_18 = arith.constant 0 : index
      %c0_19 = arith.constant 0 : index
      %24 = vector.load %arg8[%c0_18, %c0_19] : memref<1x128xf32, #tpu.memory_space<vmem>>, vector<1x128xf32>
      %25 = vector.broadcast %24 : vector<1x128xf32> to vector<128x128xf32>
      %26 = arith.addf %23, %25 : vector<128x128xf32>
      %c0_20 = arith.constant 0 : index
      %c0_21 = arith.constant 0 : index
      %27 = vector.load %arg9[%c0_20, %c0_21] : memref<128x128xf32, #tpu.memory_space<vmem>>, vector<128x128xf32>
      tpu.vector_store %arg9[%c0_20, %c0_21], %26 {strides = array<i32>} : memref<128x128xf32, #tpu.memory_space<vmem>>, vector<128x128xf32>,
    } else {
    }
    return
  }
  func.func @transform_0(%arg0: i32, %arg1: i32, %arg2: i32) -> (i32, i32) {
    %c0_i32 = arith.constant 0 : i32
    return %arg0, %arg2 : i32, i32
  }
  func.func @transform_1(%arg0: i32, %arg1: i32, %arg2: i32) -> (i32, i32) {
    %c0_i32 = arith.constant 0 : i32
    return %arg2, %arg1 : i32, i32
  }
  func.func @transform_2(%arg0: i32, %arg1: i32, %arg2: i32) -> (i32, i32) {
    %c0_i32 = arith.constant 0 : i32
    %c0_i32_0 = arith.constant 0 : i32
    return %c0_i32, %arg2 : i32, i32
  }
  func.func @transform_3(%arg0: i32, %arg1: i32, %arg2: i32) -> (i32, i32) {
    %c0_i32 = arith.constant 0 : i32
    %c0_i32_0 = arith.constant 0 : i32
    return %c0_i32, %arg2 : i32, i32
  }
  func.func @transform_4(%arg0: i32, %arg1: i32, %arg2: i32) -> (i32, i32) {
    %c0_i32 = arith.constant 0 : i32
    %c0_i32_0 = arith.constant 0 : i32
    return %c0_i32, %arg1 : i32, i32
  }
  func.func @transform_5(%arg0: i32, %arg1: i32, %arg2: i32) -> (i32, i32) {
    %c0_i32 = arith.constant 0 : i32
    %c0_i32_0 = arith.constant 0 : i32
    return %c0_i32, %arg1 : i32, i32
  }
  func.func @transform_6(%arg0: i32, %arg1: i32, %arg2: i32) -> (i32, i32) {
    %c0_i32 = arith.constant 0 : i32
    return %arg0, %arg1 : i32, i32
  }
}

module attributes {stable_mosaic.version = 11 : i64} {
  func.func @_fused_matmul_kernel(%arg0: i32, %arg1: i32, %arg2: i32, %arg3: memref<128x128xbf16, #tpu.memory_space<vmem>>, %arg4: memref<128x128xbf16, #tpu.memory_space<vmem>>, %arg5: memref<1x128xf32, #tpu.memory_space<vmem>>, %arg6: memref<1x128xf32, #tpu.memory_space<vmem>>, %arg7: memref<1x128xf32, #tpu.memory_space<vmem>>, %arg8: memref<1x128xf32, #tpu.memory_space<vmem>>, %arg9: memref<128x128xf32, #tpu.memory_space<vmem>>, %arg10: memref<128x128xf32, #tpu.memory_space<vmem>>) attributes {dimension_semantics = [#tpu.dimension_semantics<parallel>, #tpu.dimension_semantics<parallel>, #tpu.dimension_semantics<arbitrary>], iteration_bounds = array<i64: 1, 1, 1>, scalar_prefetch = 0 : i64, scratch_operands = 1 : i64, tpu.core_type = #tpu.core_type<tc>, window_params = [{transform_indices = @transform_0, window_bounds = array<i64: 128, 128>}, {transform_indices = @transform_1, window_bounds = array<i64: 128, 128>}, {transform_indices = @transform_2, window_bounds = array<i64: 1, 128>}, {transform_indices = @transform_3, window_bounds = array<i64: 1, 128>}, {transform_indices = @transform_4, window_bounds = array<i64: 1, 128>}, {transform_indices = @transform_5, window_bounds = array<i64: 1, 128>}, {transform_indices = @transform_6, window_bounds = array<i64: 128, 128>}]} {
    %c0_i32 = arith.constant 0 : i32
    %0 = arith.cmpi eq, %arg2, %c0_i32 : i32
    %1 = arith.extui %0 : i1 to i32
    %c0_i32_0 = arith.constant 0 : i32
    %2 = arith.cmpi ne, %1, %c0_i32_0 : i32
    scf.if %2 {
      %cst_15 = arith.constant 0.000000e+00 : f32
      %22 = vector.broadcast %cst_15 : f32 to vector<128x128xf32>
      %c0_16 = arith.constant 0 : index
      %c0_17 = arith.constant 0 : index
      %23 = vector.load %arg10[%c0_16, %c0_17] : memref<128x128xf32, #tpu.memory_space<vmem>>, vector<128x128xf32>
      tpu.vector_store %arg10[%c0_16, %c0_17], %22 {strides = array<i32>} : memref<128x128xf32, #tpu.memory_space<vmem>>, vector<128x128xf32>,
    } else {
    }
    %c0 = arith.constant 0 : index
    %c0_1 = arith.constant 0 : index
    %3 = vector.load %arg3[%c0, %c0_1] : memref<128x128xbf16, #tpu.memory_space<vmem>>, vector<128x128xbf16>
    %4 = arith.extf %3 : vector<128x128xbf16> to vector<128x128xf32>
    %c0_2 = arith.constant 0 : index
    %c0_3 = arith.constant 0 : index
    %5 = vector.load %arg5[%c0_2, %c0_3] : memref<1x128xf32, #tpu.memory_space<vmem>>, vector<1x128xf32>
    %6 = vector.broadcast %5 : vector<1x128xf32> to vector<128x128xf32>
    %7 = arith.mulf %4, %6 : vector<128x128xf32>
    %c0_4 = arith.constant 0 : index
    %c0_5 = arith.constant 0 : index
    %8 = vector.load %arg6[%c0_4, %c0_5] : memref<1x128xf32, #tpu.memory_space<vmem>>, vector<1x128xf32>
    %9 = vector.broadcast %8 : vector<1x128xf32> to vector<128x128xf32>
    %10 = arith.addf %7, %9 : vector<128x128xf32>
    %cst = arith.constant 0.000000e+00 : f32
    %11 = vector.broadcast %cst : f32 to vector<128x128xf32>
    %12 = arith.maximumf %10, %11 : vector<128x128xf32>
    %c0_6 = arith.constant 0 : index
    %c0_7 = arith.constant 0 : index
    %13 = vector.load %arg10[%c0_6, %c0_7] : memref<128x128xf32, #tpu.memory_space<vmem>>, vector<128x128xf32>
    %14 = arith.truncf %12 : vector<128x128xf32> to vector<128x128xbf16>
    %c0_8 = arith.constant 0 : index
    %c0_9 = arith.constant 0 : index
    %15 = vector.load %arg4[%c0_8, %c0_9] : memref<128x128xbf16, #tpu.memory_space<vmem>>, vector<128x128xbf16>
    %cst_10 = arith.constant dense<0.000000e+00> : vector<128x128xf32>
    %16 = tpu.matmul %14, %15, %cst_10 {dimension_numbers = #tpu.dot_dimension_numbers<[1], [0], [0], [1], [0, 0, 1, 1], [], []>} : vector<128x128xbf16>, vector<128x128xbf16>, vector<128x128xf32> -> vector<128x128xf32>
    %17 = arith.addf %13, %16 : vector<128x128xf32>
    %c0_11 = arith.constant 0 : index
    %c0_12 = arith.constant 0 : index
    %18 = vector.load %arg10[%c0_11, %c0_12] : memref<128x128xf32, #tpu.memory_space<vmem>>, vector<128x128xf32>
    tpu.vector_store %arg10[%c0_11, %c0_12], %17 {strides = array<i32>} : memref<128x128xf32, #tpu.memory_space<vmem>>, vector<128x128xf32>,
    %c0_i32_13 = arith.constant 0 : i32
    %19 = arith.cmpi eq, %arg2, %c0_i32_13 : i32
    %20 = arith.extui %19 : i1 to i32
    %c0_i32_14 = arith.constant 0 : i32
    %21 = arith.cmpi ne, %20, %c0_i32_14 : i32
    scf.if %21 {
      %c0_15 = arith.constant 0 : index
      %c0_16 = arith.constant 0 : index
      %22 = vector.load %arg10[%c0_15, %c0_16] : memref<128x128xf32, #tpu.memory_space<vmem>>, vector<128x128xf32>
      %c0_17 = arith.constant 0 : index
      %c0_18 = arith.constant 0 : index
      %23 = vector.load %arg7[%c0_17, %c0_18] : memref<1x128xf32, #tpu.memory_space<vmem>>, vector<1x128xf32>
      %24 = vector.broadcast %23 : vector<1x128xf32> to vector<128x128xf32>
      %25 = arith.mulf %22, %24 : vector<128x128xf32>
      %c0_19 = arith.constant 0 : index
      %c0_20 = arith.constant 0 : index
      %26 = vector.load %arg8[%c0_19, %c0_20] : memref<1x128xf32, #tpu.memory_space<vmem>>, vector<1x128xf32>
      %27 = vector.broadcast %26 : vector<1x128xf32> to vector<128x128xf32>
      %28 = arith.addf %25, %27 : vector<128x128xf32>
      %c0_21 = arith.constant 0 : index
      %c0_22 = arith.constant 0 : index
      %29 = vector.load %arg9[%c0_21, %c0_22] : memref<128x128xf32, #tpu.memory_space<vmem>>, vector<128x128xf32>
      tpu.vector_store %arg9[%c0_21, %c0_22], %28 {strides = array<i32>} : memref<128x128xf32, #tpu.memory_space<vmem>>, vector<128x128xf32>,
    } else {
    }
    return
  }
  func.func @transform_0(%arg0: i32, %arg1: i32, %arg2: i32) -> (i32, i32) {
    %c0_i32 = arith.constant 0 : i32
    return %arg0, %arg2 : i32, i32
  }
  func.func @transform_1(%arg0: i32, %arg1: i32, %arg2: i32) -> (i32, i32) {
    %c0_i32 = arith.constant 0 : i32
    return %arg2, %arg1 : i32, i32
  }
  func.func @transform_2(%arg0: i32, %arg1: i32, %arg2: i32) -> (i32, i32) {
    %c0_i32 = arith.constant 0 : i32
    %c0_i32_0 = arith.constant 0 : i32
    return %c0_i32, %arg2 : i32, i32
  }
  func.func @transform_3(%arg0: i32, %arg1: i32, %arg2: i32) -> (i32, i32) {
    %c0_i32 = arith.constant 0 : i32
    %c0_i32_0 = arith.constant 0 : i32
    return %c0_i32, %arg2 : i32, i32
  }
  func.func @transform_4(%arg0: i32, %arg1: i32, %arg2: i32) -> (i32, i32) {
    %c0_i32 = arith.constant 0 : i32
    %c0_i32_0 = arith.constant 0 : i32
    return %c0_i32, %arg1 : i32, i32
  }
  func.func @transform_5(%arg0: i32, %arg1: i32, %arg2: i32) -> (i32, i32) {
    %c0_i32 = arith.constant 0 : i32
    %c0_i32_0 = arith.constant 0 : i32
    return %c0_i32, %arg1 : i32, i32
  }
  func.func @transform_6(%arg0: i32, %arg1: i32, %arg2: i32) -> (i32, i32) {
    %c0_i32 = arith.constant 0 : i32
    return %arg0, %arg1 : i32, i32
  }
}

module attributes {stable_mosaic.version = 11 : i64} {
  func.func @_pool_kernel(%arg0: i32, %arg1: memref<32x4x128xf32, #tpu.memory_space<vmem>>, %arg2: memref<32x128xf32, #tpu.memory_space<vmem>>) attributes {dimension_semantics = [#tpu.dimension_semantics<parallel>], iteration_bounds = array<i64: 1>, scalar_prefetch = 0 : i64, scratch_operands = 0 : i64, tpu.core_type = #tpu.core_type<tc>, window_params = [{transform_indices = @transform_0, window_bounds = array<i64: 32, 4, 128>}, {transform_indices = @transform_1, window_bounds = array<i64: 32, 128>}]} {
    %c0 = arith.constant 0 : index
    %c0_0 = arith.constant 0 : index
    %c0_1 = arith.constant 0 : index
    %0 = vector.load %arg1[%c0, %c0_0, %c0_1] : memref<32x4x128xf32, #tpu.memory_space<vmem>>, vector<32x4x128xf32>
    %cst = arith.constant dense<0.000000e+00> : vector<32x128xf32>
    %1 = vector.multi_reduction <add>, %0, %cst [1] : vector<32x4x128xf32> to vector<32x128xf32>
    %cst_2 = arith.constant 4.000000e+00 : f32
    %2 = vector.broadcast %cst_2 : f32 to vector<32x128xf32>
    %3 = arith.divf %1, %2 : vector<32x128xf32>
    %c0_3 = arith.constant 0 : index
    %c0_4 = arith.constant 0 : index
    %4 = vector.load %arg2[%c0_3, %c0_4] : memref<32x128xf32, #tpu.memory_space<vmem>>, vector<32x128xf32>
    tpu.vector_store %arg2[%c0_3, %c0_4], %3 {strides = array<i32>} : memref<32x128xf32, #tpu.memory_space<vmem>>, vector<32x128xf32>,
    return
  }
  func.func @transform_0(%arg0: i32) -> (i32, i32, i32) {
    %c0_i32 = arith.constant 0 : i32
    %c0_i32_0 = arith.constant 0 : i32
    %c0_i32_1 = arith.constant 0 : i32
    return %arg0, %c0_i32, %c0_i32_0 : i32, i32, i32
  }
  func.func @transform_1(%arg0: i32) -> (i32, i32) {
    %c0_i32 = arith.constant 0 : i32
    %c0_i32_0 = arith.constant 0 : i32
    return %arg0, %c0_i32 : i32, i32
  }
}

module attributes {stable_mosaic.version = 11 : i64} {
  func.func @_fused_matmul_kernel(%arg0: i32, %arg1: i32, %arg2: i32, %arg3: memref<32x128xbf16, #tpu.memory_space<vmem>>, %arg4: memref<128x128xbf16, #tpu.memory_space<vmem>>, %arg5: memref<1x128xf32, #tpu.memory_space<vmem>>, %arg6: memref<1x128xf32, #tpu.memory_space<vmem>>, %arg7: memref<1x128xf32, #tpu.memory_space<vmem>>, %arg8: memref<1x128xf32, #tpu.memory_space<vmem>>, %arg9: memref<32x128xf32, #tpu.memory_space<vmem>>, %arg10: memref<32x128xf32, #tpu.memory_space<vmem>>) attributes {dimension_semantics = [#tpu.dimension_semantics<parallel>, #tpu.dimension_semantics<parallel>, #tpu.dimension_semantics<arbitrary>], iteration_bounds = array<i64: 1, 1, 1>, scalar_prefetch = 0 : i64, scratch_operands = 1 : i64, tpu.core_type = #tpu.core_type<tc>, window_params = [{transform_indices = @transform_0, window_bounds = array<i64: 32, 128>}, {transform_indices = @transform_1, window_bounds = array<i64: 128, 128>}, {transform_indices = @transform_2, window_bounds = array<i64: 1, 128>}, {transform_indices = @transform_3, window_bounds = array<i64: 1, 128>}, {transform_indices = @transform_4, window_bounds = array<i64: 1, 128>}, {transform_indices = @transform_5, window_bounds = array<i64: 1, 128>}, {transform_indices = @transform_6, window_bounds = array<i64: 32, 128>}]} {
    %c0_i32 = arith.constant 0 : i32
    %0 = arith.cmpi eq, %arg2, %c0_i32 : i32
    %1 = arith.extui %0 : i1 to i32
    %c0_i32_0 = arith.constant 0 : i32
    %2 = arith.cmpi ne, %1, %c0_i32_0 : i32
    scf.if %2 {
      %cst_15 = arith.constant 0.000000e+00 : f32
      %22 = vector.broadcast %cst_15 : f32 to vector<32x128xf32>
      %c0_16 = arith.constant 0 : index
      %c0_17 = arith.constant 0 : index
      %23 = vector.load %arg10[%c0_16, %c0_17] : memref<32x128xf32, #tpu.memory_space<vmem>>, vector<32x128xf32>
      tpu.vector_store %arg10[%c0_16, %c0_17], %22 {strides = array<i32>} : memref<32x128xf32, #tpu.memory_space<vmem>>, vector<32x128xf32>,
    } else {
    }
    %c0 = arith.constant 0 : index
    %c0_1 = arith.constant 0 : index
    %3 = vector.load %arg3[%c0, %c0_1] : memref<32x128xbf16, #tpu.memory_space<vmem>>, vector<32x128xbf16>
    %4 = arith.extf %3 : vector<32x128xbf16> to vector<32x128xf32>
    %c0_2 = arith.constant 0 : index
    %c0_3 = arith.constant 0 : index
    %5 = vector.load %arg5[%c0_2, %c0_3] : memref<1x128xf32, #tpu.memory_space<vmem>>, vector<1x128xf32>
    %6 = vector.broadcast %5 : vector<1x128xf32> to vector<32x128xf32>
    %7 = arith.mulf %4, %6 : vector<32x128xf32>
    %c0_4 = arith.constant 0 : index
    %c0_5 = arith.constant 0 : index
    %8 = vector.load %arg6[%c0_4, %c0_5] : memref<1x128xf32, #tpu.memory_space<vmem>>, vector<1x128xf32>
    %9 = vector.broadcast %8 : vector<1x128xf32> to vector<32x128xf32>
    %10 = arith.addf %7, %9 : vector<32x128xf32>
    %cst = arith.constant 0.000000e+00 : f32
    %11 = vector.broadcast %cst : f32 to vector<32x128xf32>
    %12 = arith.maximumf %10, %11 : vector<32x128xf32>
    %c0_6 = arith.constant 0 : index
    %c0_7 = arith.constant 0 : index
    %13 = vector.load %arg10[%c0_6, %c0_7] : memref<32x128xf32, #tpu.memory_space<vmem>>, vector<32x128xf32>
    %14 = arith.truncf %12 : vector<32x128xf32> to vector<32x128xbf16>
    %c0_8 = arith.constant 0 : index
    %c0_9 = arith.constant 0 : index
    %15 = vector.load %arg4[%c0_8, %c0_9] : memref<128x128xbf16, #tpu.memory_space<vmem>>, vector<128x128xbf16>
    %cst_10 = arith.constant dense<0.000000e+00> : vector<32x128xf32>
    %16 = tpu.matmul %14, %15, %cst_10 {dimension_numbers = #tpu.dot_dimension_numbers<[1], [0], [0], [1], [0, 0, 1, 1], [], []>} : vector<32x128xbf16>, vector<128x128xbf16>, vector<32x128xf32> -> vector<32x128xf32>
    %17 = arith.addf %13, %16 : vector<32x128xf32>
    %c0_11 = arith.constant 0 : index
    %c0_12 = arith.constant 0 : index
    %18 = vector.load %arg10[%c0_11, %c0_12] : memref<32x128xf32, #tpu.memory_space<vmem>>, vector<32x128xf32>
    tpu.vector_store %arg10[%c0_11, %c0_12], %17 {strides = array<i32>} : memref<32x128xf32, #tpu.memory_space<vmem>>, vector<32x128xf32>,
    %c0_i32_13 = arith.constant 0 : i32
    %19 = arith.cmpi eq, %arg2, %c0_i32_13 : i32
    %20 = arith.extui %19 : i1 to i32
    %c0_i32_14 = arith.constant 0 : i32
    %21 = arith.cmpi ne, %20, %c0_i32_14 : i32
    scf.if %21 {
      %c0_15 = arith.constant 0 : index
      %c0_16 = arith.constant 0 : index
      %22 = vector.load %arg10[%c0_15, %c0_16] : memref<32x128xf32, #tpu.memory_space<vmem>>, vector<32x128xf32>
      %c0_17 = arith.constant 0 : index
      %c0_18 = arith.constant 0 : index
      %23 = vector.load %arg7[%c0_17, %c0_18] : memref<1x128xf32, #tpu.memory_space<vmem>>, vector<1x128xf32>
      %24 = vector.broadcast %23 : vector<1x128xf32> to vector<32x128xf32>
      %25 = arith.mulf %22, %24 : vector<32x128xf32>
      %c0_19 = arith.constant 0 : index
      %c0_20 = arith.constant 0 : index
      %26 = vector.load %arg8[%c0_19, %c0_20] : memref<1x128xf32, #tpu.memory_space<vmem>>, vector<1x128xf32>
      %27 = vector.broadcast %26 : vector<1x128xf32> to vector<32x128xf32>
      %28 = arith.addf %25, %27 : vector<32x128xf32>
      %cst_21 = arith.constant 0.000000e+00 : f32
      %29 = vector.broadcast %cst_21 : f32 to vector<32x128xf32>
      %30 = arith.maximumf %28, %29 : vector<32x128xf32>
      %c0_22 = arith.constant 0 : index
      %c0_23 = arith.constant 0 : index
      %31 = vector.load %arg9[%c0_22, %c0_23] : memref<32x128xf32, #tpu.memory_space<vmem>>, vector<32x128xf32>
      tpu.vector_store %arg9[%c0_22, %c0_23], %30 {strides = array<i32>} : memref<32x128xf32, #tpu.memory_space<vmem>>, vector<32x128xf32>,
    } else {
    }
    return
  }
  func.func @transform_0(%arg0: i32, %arg1: i32, %arg2: i32) -> (i32, i32) {
    %c0_i32 = arith.constant 0 : i32
    return %arg0, %arg2 : i32, i32
  }
  func.func @transform_1(%arg0: i32, %arg1: i32, %arg2: i32) -> (i32, i32) {
    %c0_i32 = arith.constant 0 : i32
    return %arg2, %arg1 : i32, i32
  }
  func.func @transform_2(%arg0: i32, %arg1: i32, %arg2: i32) -> (i32, i32) {
    %c0_i32 = arith.constant 0 : i32
    %c0_i32_0 = arith.constant 0 : i32
    return %c0_i32, %arg2 : i32, i32
  }
  func.func @transform_3(%arg0: i32, %arg1: i32, %arg2: i32) -> (i32, i32) {
    %c0_i32 = arith.constant 0 : i32
    %c0_i32_0 = arith.constant 0 : i32
    return %c0_i32, %arg2 : i32, i32
  }
  func.func @transform_4(%arg0: i32, %arg1: i32, %arg2: i32) -> (i32, i32) {
    %c0_i32 = arith.constant 0 : i32
    %c0_i32_0 = arith.constant 0 : i32
    return %c0_i32, %arg1 : i32, i32
  }
  func.func @transform_5(%arg0: i32, %arg1: i32, %arg2: i32) -> (i32, i32) {
    %c0_i32 = arith.constant 0 : i32
    %c0_i32_0 = arith.constant 0 : i32
    return %c0_i32, %arg1 : i32, i32
  }
  func.func @transform_6(%arg0: i32, %arg1: i32, %arg2: i32) -> (i32, i32) {
    %c0_i32 = arith.constant 0 : i32
    return %arg0, %arg1 : i32, i32
  }
}

module attributes {stable_mosaic.version = 11 : i64} {
  func.func @_fused_matmul_kernel(%arg0: i32, %arg1: i32, %arg2: i32, %arg3: memref<32x384xbf16, #tpu.memory_space<vmem>>, %arg4: memref<384x128xbf16, #tpu.memory_space<vmem>>, %arg5: memref<1x384xf32, #tpu.memory_space<vmem>>, %arg6: memref<1x384xf32, #tpu.memory_space<vmem>>, %arg7: memref<1x128xf32, #tpu.memory_space<vmem>>, %arg8: memref<1x128xf32, #tpu.memory_space<vmem>>, %arg9: memref<32x128xf32, #tpu.memory_space<vmem>>, %arg10: memref<32x128xf32, #tpu.memory_space<vmem>>) attributes {dimension_semantics = [#tpu.dimension_semantics<parallel>, #tpu.dimension_semantics<parallel>, #tpu.dimension_semantics<arbitrary>], iteration_bounds = array<i64: 1, 1, 1>, scalar_prefetch = 0 : i64, scratch_operands = 1 : i64, tpu.core_type = #tpu.core_type<tc>, window_params = [{transform_indices = @transform_0, window_bounds = array<i64: 32, 384>}, {transform_indices = @transform_1, window_bounds = array<i64: 384, 128>}, {transform_indices = @transform_2, window_bounds = array<i64: 1, 384>}, {transform_indices = @transform_3, window_bounds = array<i64: 1, 384>}, {transform_indices = @transform_4, window_bounds = array<i64: 1, 128>}, {transform_indices = @transform_5, window_bounds = array<i64: 1, 128>}, {transform_indices = @transform_6, window_bounds = array<i64: 32, 128>}]} {
    %c0_i32 = arith.constant 0 : i32
    %0 = arith.cmpi eq, %arg2, %c0_i32 : i32
    %1 = arith.extui %0 : i1 to i32
    %c0_i32_0 = arith.constant 0 : i32
    %2 = arith.cmpi ne, %1, %c0_i32_0 : i32
    scf.if %2 {
      %cst_14 = arith.constant 0.000000e+00 : f32
      %20 = vector.broadcast %cst_14 : f32 to vector<32x128xf32>
      %c0_15 = arith.constant 0 : index
      %c0_16 = arith.constant 0 : index
      %21 = vector.load %arg10[%c0_15, %c0_16] : memref<32x128xf32, #tpu.memory_space<vmem>>, vector<32x128xf32>
      tpu.vector_store %arg10[%c0_15, %c0_16], %20 {strides = array<i32>} : memref<32x128xf32, #tpu.memory_space<vmem>>, vector<32x128xf32>,
    } else {
    }
    %c0 = arith.constant 0 : index
    %c0_1 = arith.constant 0 : index
    %3 = vector.load %arg3[%c0, %c0_1] : memref<32x384xbf16, #tpu.memory_space<vmem>>, vector<32x384xbf16>
    %4 = arith.extf %3 : vector<32x384xbf16> to vector<32x384xf32>
    %c0_2 = arith.constant 0 : index
    %c0_3 = arith.constant 0 : index
    %5 = vector.load %arg5[%c0_2, %c0_3] : memref<1x384xf32, #tpu.memory_space<vmem>>, vector<1x384xf32>
    %6 = vector.broadcast %5 : vector<1x384xf32> to vector<32x384xf32>
    %7 = arith.mulf %4, %6 : vector<32x384xf32>
    %c0_4 = arith.constant 0 : index
    %c0_5 = arith.constant 0 : index
    %8 = vector.load %arg6[%c0_4, %c0_5] : memref<1x384xf32, #tpu.memory_space<vmem>>, vector<1x384xf32>
    %9 = vector.broadcast %8 : vector<1x384xf32> to vector<32x384xf32>
    %10 = arith.addf %7, %9 : vector<32x384xf32>
    %c0_6 = arith.constant 0 : index
    %c0_7 = arith.constant 0 : index
    %11 = vector.load %arg10[%c0_6, %c0_7] : memref<32x128xf32, #tpu.memory_space<vmem>>, vector<32x128xf32>
    %12 = arith.truncf %10 : vector<32x384xf32> to vector<32x384xbf16>
    %c0_8 = arith.constant 0 : index
    %c0_9 = arith.constant 0 : index
    %13 = vector.load %arg4[%c0_8, %c0_9] : memref<384x128xbf16, #tpu.memory_space<vmem>>, vector<384x128xbf16>
    %cst = arith.constant dense<0.000000e+00> : vector<32x128xf32>
    %14 = tpu.matmul %12, %13, %cst {dimension_numbers = #tpu.dot_dimension_numbers<[1], [0], [0], [1], [0, 0, 1, 1], [], []>} : vector<32x384xbf16>, vector<384x128xbf16>, vector<32x128xf32> -> vector<32x128xf32>
    %15 = arith.addf %11, %14 : vector<32x128xf32>
    %c0_10 = arith.constant 0 : index
    %c0_11 = arith.constant 0 : index
    %16 = vector.load %arg10[%c0_10, %c0_11] : memref<32x128xf32, #tpu.memory_space<vmem>>, vector<32x128xf32>
    tpu.vector_store %arg10[%c0_10, %c0_11], %15 {strides = array<i32>} : memref<32x128xf32, #tpu.memory_space<vmem>>, vector<32x128xf32>,
    %c0_i32_12 = arith.constant 0 : i32
    %17 = arith.cmpi eq, %arg2, %c0_i32_12 : i32
    %18 = arith.extui %17 : i1 to i32
    %c0_i32_13 = arith.constant 0 : i32
    %19 = arith.cmpi ne, %18, %c0_i32_13 : i32
    scf.if %19 {
      %c0_14 = arith.constant 0 : index
      %c0_15 = arith.constant 0 : index
      %20 = vector.load %arg10[%c0_14, %c0_15] : memref<32x128xf32, #tpu.memory_space<vmem>>, vector<32x128xf32>
      %c0_16 = arith.constant 0 : index
      %c0_17 = arith.constant 0 : index
      %21 = vector.load %arg7[%c0_16, %c0_17] : memref<1x128xf32, #tpu.memory_space<vmem>>, vector<1x128xf32>
      %22 = vector.broadcast %21 : vector<1x128xf32> to vector<32x128xf32>
      %23 = arith.mulf %20, %22 : vector<32x128xf32>
      %c0_18 = arith.constant 0 : index
      %c0_19 = arith.constant 0 : index
      %24 = vector.load %arg8[%c0_18, %c0_19] : memref<1x128xf32, #tpu.memory_space<vmem>>, vector<1x128xf32>
      %25 = vector.broadcast %24 : vector<1x128xf32> to vector<32x128xf32>
      %26 = arith.addf %23, %25 : vector<32x128xf32>
      %c0_20 = arith.constant 0 : index
      %c0_21 = arith.constant 0 : index
      %27 = vector.load %arg9[%c0_20, %c0_21] : memref<32x128xf32, #tpu.memory_space<vmem>>, vector<32x128xf32>
      tpu.vector_store %arg9[%c0_20, %c0_21], %26 {strides = array<i32>} : memref<32x128xf32, #tpu.memory_space<vmem>>, vector<32x128xf32>,
    } else {
    }
    return
  }
  func.func @transform_0(%arg0: i32, %arg1: i32, %arg2: i32) -> (i32, i32) {
    %c0_i32 = arith.constant 0 : i32
    return %arg0, %arg2 : i32, i32
  }
  func.func @transform_1(%arg0: i32, %arg1: i32, %arg2: i32) -> (i32, i32) {
    %c0_i32 = arith.constant 0 : i32
    return %arg2, %arg1 : i32, i32
  }
  func.func @transform_2(%arg0: i32, %arg1: i32, %arg2: i32) -> (i32, i32) {
    %c0_i32 = arith.constant 0 : i32
    %c0_i32_0 = arith.constant 0 : i32
    return %c0_i32, %arg2 : i32, i32
  }
  func.func @transform_3(%arg0: i32, %arg1: i32, %arg2: i32) -> (i32, i32) {
    %c0_i32 = arith.constant 0 : i32
    %c0_i32_0 = arith.constant 0 : i32
    return %c0_i32, %arg2 : i32, i32
  }
  func.func @transform_4(%arg0: i32, %arg1: i32, %arg2: i32) -> (i32, i32) {
    %c0_i32 = arith.constant 0 : i32
    %c0_i32_0 = arith.constant 0 : i32
    return %c0_i32, %arg1 : i32, i32
  }
  func.func @transform_5(%arg0: i32, %arg1: i32, %arg2: i32) -> (i32, i32) {
    %c0_i32 = arith.constant 0 : i32
    %c0_i32_0 = arith.constant 0 : i32
    return %c0_i32, %arg1 : i32, i32
  }
  func.func @transform_6(%arg0: i32, %arg1: i32, %arg2: i32) -> (i32, i32) {
    %c0_i32 = arith.constant 0 : i32
    return %arg0, %arg1 : i32, i32
  }
}

module attributes {stable_mosaic.version = 11 : i64} {
  func.func @_gap_kernel(%arg0: i32, %arg1: memref<2x16x128xf32, #tpu.memory_space<vmem>>, %arg2: memref<1x1x128xf32, #tpu.memory_space<vmem>>, %arg3: memref<1x1x128xf32, #tpu.memory_space<vmem>>, %arg4: memref<2x128xf32, #tpu.memory_space<vmem>>) attributes {dimension_semantics = [#tpu.dimension_semantics<arbitrary>], iteration_bounds = array<i64: 1>, scalar_prefetch = 0 : i64, scratch_operands = 0 : i64, tpu.core_type = #tpu.core_type<tc>, window_params = [{pipeline_mode = #tpu.pipeline_mode<synchronous>, transform_indices = @transform_0, window_bounds = array<i64: 2, 16, 128>}, {pipeline_mode = #tpu.pipeline_mode<synchronous>, transform_indices = @transform_1, window_bounds = array<i64: 1, 1, 128>}, {pipeline_mode = #tpu.pipeline_mode<synchronous>, transform_indices = @transform_2, window_bounds = array<i64: 1, 1, 128>}, {pipeline_mode = #tpu.pipeline_mode<synchronous>, transform_indices = @transform_3, window_bounds = array<i64: 2, 128>}]} {
    %c0 = arith.constant 0 : index
    %c0_0 = arith.constant 0 : index
    %c0_1 = arith.constant 0 : index
    %0 = vector.load %arg1[%c0, %c0_0, %c0_1] : memref<2x16x128xf32, #tpu.memory_space<vmem>>, vector<2x16x128xf32>
    %c0_2 = arith.constant 0 : index
    %c0_3 = arith.constant 0 : index
    %c0_4 = arith.constant 0 : index
    %1 = vector.load %arg2[%c0_2, %c0_3, %c0_4] : memref<1x1x128xf32, #tpu.memory_space<vmem>>, vector<1x1x128xf32>
    %2 = vector.broadcast %1 : vector<1x1x128xf32> to vector<2x16x128xf32>
    %3 = arith.mulf %0, %2 : vector<2x16x128xf32>
    %c0_5 = arith.constant 0 : index
    %c0_6 = arith.constant 0 : index
    %c0_7 = arith.constant 0 : index
    %4 = vector.load %arg3[%c0_5, %c0_6, %c0_7] : memref<1x1x128xf32, #tpu.memory_space<vmem>>, vector<1x1x128xf32>
    %5 = vector.broadcast %4 : vector<1x1x128xf32> to vector<2x16x128xf32>
    %6 = arith.addf %3, %5 : vector<2x16x128xf32>
    %cst = arith.constant 0.000000e+00 : f32
    %7 = vector.broadcast %cst : f32 to vector<2x16x128xf32>
    %8 = arith.maximumf %6, %7 : vector<2x16x128xf32>
    %cst_8 = arith.constant dense<0.000000e+00> : vector<2x128xf32>
    %9 = vector.multi_reduction <add>, %8, %cst_8 [1] : vector<2x16x128xf32> to vector<2x128xf32>
    %cst_9 = arith.constant 6.250000e-02 : f32
    %10 = vector.broadcast %cst_9 : f32 to vector<2x128xf32>
    %11 = arith.mulf %9, %10 : vector<2x128xf32>
    %c0_10 = arith.constant 0 : index
    %c0_11 = arith.constant 0 : index
    %12 = vector.load %arg4[%c0_10, %c0_11] : memref<2x128xf32, #tpu.memory_space<vmem>>, vector<2x128xf32>
    tpu.vector_store %arg4[%c0_10, %c0_11], %11 {strides = array<i32>} : memref<2x128xf32, #tpu.memory_space<vmem>>, vector<2x128xf32>,
    return
  }
  func.func @transform_0(%arg0: i32) -> (i32, i32, i32) {
    %c0_i32 = arith.constant 0 : i32
    %c0_i32_0 = arith.constant 0 : i32
    %c0_i32_1 = arith.constant 0 : i32
    %c0_i32_2 = arith.constant 0 : i32
    return %c0_i32, %c0_i32_0, %c0_i32_1 : i32, i32, i32
  }
  func.func @transform_1(%arg0: i32) -> (i32, i32, i32) {
    %c0_i32 = arith.constant 0 : i32
    %c0_i32_0 = arith.constant 0 : i32
    %c0_i32_1 = arith.constant 0 : i32
    %c0_i32_2 = arith.constant 0 : i32
    return %c0_i32, %c0_i32_0, %c0_i32_1 : i32, i32, i32
  }
  func.func @transform_2(%arg0: i32) -> (i32, i32, i32) {
    %c0_i32 = arith.constant 0 : i32
    %c0_i32_0 = arith.constant 0 : i32
    %c0_i32_1 = arith.constant 0 : i32
    %c0_i32_2 = arith.constant 0 : i32
    return %c0_i32, %c0_i32_0, %c0_i32_1 : i32, i32, i32
  }
  func.func @transform_3(%arg0: i32) -> (i32, i32) {
    %c0_i32 = arith.constant 0 : i32
    %c0_i32_0 = arith.constant 0 : i32
    %c0_i32_1 = arith.constant 0 : i32
    return %c0_i32, %c0_i32_0 : i32, i32
  }
}

module attributes {stable_mosaic.version = 11 : i64} {
  func.func @_fused_matmul_kernel(%arg0: i32, %arg1: i32, %arg2: i32, %arg3: memref<8x128xbf16, #tpu.memory_space<vmem>>, %arg4: memref<128x128xbf16, #tpu.memory_space<vmem>>, %arg5: memref<1x128xf32, #tpu.memory_space<vmem>>, %arg6: memref<1x128xf32, #tpu.memory_space<vmem>>, %arg7: memref<1x128xf32, #tpu.memory_space<vmem>>, %arg8: memref<1x128xf32, #tpu.memory_space<vmem>>, %arg9: memref<8x128xf32, #tpu.memory_space<vmem>>, %arg10: memref<8x128xf32, #tpu.memory_space<vmem>>) attributes {dimension_semantics = [#tpu.dimension_semantics<parallel>, #tpu.dimension_semantics<parallel>, #tpu.dimension_semantics<arbitrary>], iteration_bounds = array<i64: 1, 1, 1>, scalar_prefetch = 0 : i64, scratch_operands = 1 : i64, tpu.core_type = #tpu.core_type<tc>, window_params = [{transform_indices = @transform_0, window_bounds = array<i64: 8, 128>}, {transform_indices = @transform_1, window_bounds = array<i64: 128, 128>}, {transform_indices = @transform_2, window_bounds = array<i64: 1, 128>}, {transform_indices = @transform_3, window_bounds = array<i64: 1, 128>}, {transform_indices = @transform_4, window_bounds = array<i64: 1, 128>}, {transform_indices = @transform_5, window_bounds = array<i64: 1, 128>}, {transform_indices = @transform_6, window_bounds = array<i64: 8, 128>}]} {
    %c0_i32 = arith.constant 0 : i32
    %0 = arith.cmpi eq, %arg2, %c0_i32 : i32
    %1 = arith.extui %0 : i1 to i32
    %c0_i32_0 = arith.constant 0 : i32
    %2 = arith.cmpi ne, %1, %c0_i32_0 : i32
    scf.if %2 {
      %cst_14 = arith.constant 0.000000e+00 : f32
      %20 = vector.broadcast %cst_14 : f32 to vector<8x128xf32>
      %c0_15 = arith.constant 0 : index
      %c0_16 = arith.constant 0 : index
      %21 = vector.load %arg10[%c0_15, %c0_16] : memref<8x128xf32, #tpu.memory_space<vmem>>, vector<8x128xf32>
      tpu.vector_store %arg10[%c0_15, %c0_16], %20 {strides = array<i32>} : memref<8x128xf32, #tpu.memory_space<vmem>>, vector<8x128xf32>,
    } else {
    }
    %c0 = arith.constant 0 : index
    %c0_1 = arith.constant 0 : index
    %3 = vector.load %arg3[%c0, %c0_1] : memref<8x128xbf16, #tpu.memory_space<vmem>>, vector<8x128xbf16>
    %4 = arith.extf %3 : vector<8x128xbf16> to vector<8x128xf32>
    %c0_2 = arith.constant 0 : index
    %c0_3 = arith.constant 0 : index
    %5 = vector.load %arg5[%c0_2, %c0_3] : memref<1x128xf32, #tpu.memory_space<vmem>>, vector<1x128xf32>
    %6 = vector.broadcast %5 : vector<1x128xf32> to vector<8x128xf32>
    %7 = arith.mulf %4, %6 : vector<8x128xf32>
    %c0_4 = arith.constant 0 : index
    %c0_5 = arith.constant 0 : index
    %8 = vector.load %arg6[%c0_4, %c0_5] : memref<1x128xf32, #tpu.memory_space<vmem>>, vector<1x128xf32>
    %9 = vector.broadcast %8 : vector<1x128xf32> to vector<8x128xf32>
    %10 = arith.addf %7, %9 : vector<8x128xf32>
    %c0_6 = arith.constant 0 : index
    %c0_7 = arith.constant 0 : index
    %11 = vector.load %arg10[%c0_6, %c0_7] : memref<8x128xf32, #tpu.memory_space<vmem>>, vector<8x128xf32>
    %12 = arith.truncf %10 : vector<8x128xf32> to vector<8x128xbf16>
    %c0_8 = arith.constant 0 : index
    %c0_9 = arith.constant 0 : index
    %13 = vector.load %arg4[%c0_8, %c0_9] : memref<128x128xbf16, #tpu.memory_space<vmem>>, vector<128x128xbf16>
    %cst = arith.constant dense<0.000000e+00> : vector<8x128xf32>
    %14 = tpu.matmul %12, %13, %cst {dimension_numbers = #tpu.dot_dimension_numbers<[1], [0], [0], [1], [0, 0, 1, 1], [], []>} : vector<8x128xbf16>, vector<128x128xbf16>, vector<8x128xf32> -> vector<8x128xf32>
    %15 = arith.addf %11, %14 : vector<8x128xf32>
    %c0_10 = arith.constant 0 : index
    %c0_11 = arith.constant 0 : index
    %16 = vector.load %arg10[%c0_10, %c0_11] : memref<8x128xf32, #tpu.memory_space<vmem>>, vector<8x128xf32>
    tpu.vector_store %arg10[%c0_10, %c0_11], %15 {strides = array<i32>} : memref<8x128xf32, #tpu.memory_space<vmem>>, vector<8x128xf32>,
    %c0_i32_12 = arith.constant 0 : i32
    %17 = arith.cmpi eq, %arg2, %c0_i32_12 : i32
    %18 = arith.extui %17 : i1 to i32
    %c0_i32_13 = arith.constant 0 : i32
    %19 = arith.cmpi ne, %18, %c0_i32_13 : i32
    scf.if %19 {
      %c0_14 = arith.constant 0 : index
      %c0_15 = arith.constant 0 : index
      %20 = vector.load %arg10[%c0_14, %c0_15] : memref<8x128xf32, #tpu.memory_space<vmem>>, vector<8x128xf32>
      %c0_16 = arith.constant 0 : index
      %c0_17 = arith.constant 0 : index
      %21 = vector.load %arg7[%c0_16, %c0_17] : memref<1x128xf32, #tpu.memory_space<vmem>>, vector<1x128xf32>
      %22 = vector.broadcast %21 : vector<1x128xf32> to vector<8x128xf32>
      %23 = arith.mulf %20, %22 : vector<8x128xf32>
      %c0_18 = arith.constant 0 : index
      %c0_19 = arith.constant 0 : index
      %24 = vector.load %arg8[%c0_18, %c0_19] : memref<1x128xf32, #tpu.memory_space<vmem>>, vector<1x128xf32>
      %25 = vector.broadcast %24 : vector<1x128xf32> to vector<8x128xf32>
      %26 = arith.addf %23, %25 : vector<8x128xf32>
      %c0_20 = arith.constant 0 : index
      %c0_21 = arith.constant 0 : index
      %27 = vector.load %arg9[%c0_20, %c0_21] : memref<8x128xf32, #tpu.memory_space<vmem>>, vector<8x128xf32>
      tpu.vector_store %arg9[%c0_20, %c0_21], %26 {strides = array<i32>} : memref<8x128xf32, #tpu.memory_space<vmem>>, vector<8x128xf32>,
    } else {
    }
    return
  }
  func.func @transform_0(%arg0: i32, %arg1: i32, %arg2: i32) -> (i32, i32) {
    %c0_i32 = arith.constant 0 : i32
    return %arg0, %arg2 : i32, i32
  }
  func.func @transform_1(%arg0: i32, %arg1: i32, %arg2: i32) -> (i32, i32) {
    %c0_i32 = arith.constant 0 : i32
    return %arg2, %arg1 : i32, i32
  }
  func.func @transform_2(%arg0: i32, %arg1: i32, %arg2: i32) -> (i32, i32) {
    %c0_i32 = arith.constant 0 : i32
    %c0_i32_0 = arith.constant 0 : i32
    return %c0_i32, %arg2 : i32, i32
  }
  func.func @transform_3(%arg0: i32, %arg1: i32, %arg2: i32) -> (i32, i32) {
    %c0_i32 = arith.constant 0 : i32
    %c0_i32_0 = arith.constant 0 : i32
    return %c0_i32, %arg2 : i32, i32
  }
  func.func @transform_4(%arg0: i32, %arg1: i32, %arg2: i32) -> (i32, i32) {
    %c0_i32 = arith.constant 0 : i32
    %c0_i32_0 = arith.constant 0 : i32
    return %c0_i32, %arg1 : i32, i32
  }
  func.func @transform_5(%arg0: i32, %arg1: i32, %arg2: i32) -> (i32, i32) {
    %c0_i32 = arith.constant 0 : i32
    %c0_i32_0 = arith.constant 0 : i32
    return %c0_i32, %arg1 : i32, i32
  }
  func.func @transform_6(%arg0: i32, %arg1: i32, %arg2: i32) -> (i32, i32) {
    %c0_i32 = arith.constant 0 : i32
    return %arg0, %arg1 : i32, i32
  }
}

</mosaic_0001>

<bundles_post_ra>
// kernel: densenet_forward.14
= control target key start
LH: loop header
LB: loop body
LE: loop exit
PB: predicated region body
PF: predicated region fallthrough
CT: control target
= control target key end

     0   :  { %s1692_s21 = smov 0   ;;  %s1694_s22 = smov 0   ;;  %s2064_s0 = inlined_call_operand.vmem [shape: bf16[512,256], index: 0, kind: input, shape index: {}]   ;;  %s2065_s1 = inlined_call_operand.vmem [shape: bf16[256,128], index: 1, kind: input, shape index: {}]   ;;  %s2066_s2 = inlined_call_operand.vmem [shape: f32[1,256], index: 2, kind: input, shape index: {}]   ;;  %s2067_s3 = inlined_call_operand.vmem [shape: f32[1,256], index: 3, kind: input, shape index: {}]   ;;  %s2068_s4 = inlined_call_operand.vmem [shape: f32[1,128], index: 4, kind: input, shape index: {}]   ;;  %s2069_s5 = inlined_call_operand.vmem [shape: f32[1,128], index: 5, kind: input, shape index: {}]   ;;  %s2070_s6 = inlined_call_operand.vmem [shape: f32[512,128], index: 6, kind: output, shape index: {}]  }
   0x1   :  { %s1696_s23 = smov 0  }
   0x2 LB: > { %s35_s24 = sadd.s32 1, %s1651_s22  ;;  %p1438_p0 = scmp.ge.s32.totalorder %s1655_s23, 1  ;;  %s1655_s23 = sphi %s1696_s23, %s16_s23   ;;  %s1651_s22 = sphi %s1694_s22, %s2072_s22   ;;  %s1647_s21 = sphi %s1692_s21, %s2071_s21  }
   0x3   : > { %p37_p1 = scmp.ge.s32.totalorder %s35_s24, 2  ;;  %p294_p2 = scmp.lt.s32.totalorder %s1655_s23, 3 }
   0x5   : > { %s2074_s24 = smov (%p37_p1, %s35_s24), 0  ;;  %p295_p3 = pnand %p1438_p0, %p294_p2 }
   0x6   : > { %s1439_s27 = sshll.u32 (!%p295_p3), %s1647_s21, 5 }
   0x7   : > { %298 = sbr.rel (%p295_p3) target bundleno = 309 (0x135), region = 44  ;;  %p356_p4 = scmp.lt.s32.totalorder (!%p295_p3), %s1439_s27, 63 }
   0xc   : > { %v1617_v0 = vld [vmem:[%s2065_s1 + $0x78] sm:$0xff]   ;;  %v1619_v2 = vld [vmem:[%s2065_s1 + $0x70] sm:$0xff]   ;;  %v1621_v4 = vld [vmem:[%s2065_s1 + $0x68] sm:$0xff]   ;;  %v535_v5 = vlaneseq  ;;  %s2076_s27 = smov (!%p356_p4, %s1439_s27), 63 }
   0xd   : > { %v1618_v1 = vld [vmem:[%s2065_s1 + $0x38] sm:$0xff]   ;;  %1465 = vmatprep.subr.bf16.mxu0 %v1617_v0  ;;  %1577 = vmatprep.subr.bf16.mxu1 %v1617_v0  ;;  %v1620_v3 = vld [vmem:[%s2065_s1 + $0x30] sm:$0xff]   ;;  %v1622_v6 = vld [vmem:[%s2065_s1 + $0x28] sm:$0xff]   ;;  %s1464_s16 = sshll.u32 %s2076_s27, 3 }
   0xe   : > { %1466 = vmatpush3.bf16.msra.mxu0 %v1618_v1  ;;  %1585 = vmatpush3.bf16.msra.mxu1 %v1618_v1  ;;  %v1623_v7 = vld [vmem:[%s2065_s1 + $0x60] sm:$0xff]   ;;  %v536_v8 = vshrl.u32 %v535_v5, 7  ;;  %v1625_v10 = vld [vmem:[%s2065_s1 + $0x58] sm:$0xff]   ;;  %s1745_s26 = scalar_lea.vmem %s2064_s0, %s1464_s16  ;;  %v1627_v14 = vld [vmem:[%s2065_s1 + $0x50] sm:$0xff]   ;;  %s1961_s9 = scalar_lea.vmem %s2070_s6, %s1464_s16 }
   0xf   : > { %1467 = vmatprep.subr.bf16.mxu0 %v1619_v2  ;;  %1578 = vmatprep.subr.bf16.mxu1 %v1619_v2  ;;  %v1624_v9 = vld [vmem:[%s2065_s1 + $0x20] sm:$0xff]   ;;  %v1626_v12 = vld [vmem:[%s2065_s1 + $0x18] sm:$0xff]   ;;  %v438_v16 = vld [vmem:[%s1745_s26 + $0x8] sm:$0xff] }
  0x10   : > { %v537_v11 = vsub.s32 0, %v536_v8  ;;  %v541_v13 = vsub.s32 1, %v536_v8  ;;  %v437_v15 = vld [vmem:[%s1745_s26] sm:$0xff]  ;;  %v471_v20 = vunpack.c.l.bf16 %v438_v16  ;;  %v472_v21 = vunpack.c.h.bf16 %v438_v16  ;;  %v454_v24 = vld [vmem:[%s1745_s26 + $0x88] sm:$0xff]  ;;  %v439_v29 = vld [vmem:[%s1745_s26 + $0x10] sm:$0xff] }
  0x11   : > { %v533_v17 = vld [vmem:[%s2066_s2] sm:$0x3]  ;;  %v469_v18 = vunpack.c.l.bf16 %v437_v15  ;;  %v470_v19 = vunpack.c.h.bf16 %v437_v15  ;;  %v1628_v30 = vld [vmem:[%s2065_s1 + $0x10] sm:$0xff]   ;;  %v503_v33 = vunpack.c.l.bf16 %v454_v24  ;;  %v504_v34 = vunpack.c.h.bf16 %v454_v24  ;;  %v1629_v35 = vld [vmem:[%s2065_s1 + $0x48] sm:$0xff]  }
  0x12   : > { %1468 = vmatpush3.bf16.msra.mxu0 %v1620_v3  ;;  %1586 = vmatpush3.bf16.msra.mxu1 %v1620_v3  ;;  %v609_v22 = vld [vmem:[%s2067_s3] sm:$0x3]  ;;  %v1763_v25 = vrot.slane %v533_v17, %v537_v11  ;;  %v1765_v26 = vrot.slane %v533_v17, %v541_v13  ;;  %v440_v39 = vld [vmem:[%s1745_s26 + $0x18] sm:$0xff]  ;;  %v474_v40 = vunpack.c.h.bf16 %v439_v29  ;;  %v455_v45 = vld [vmem:[%s1745_s26 + $0x90] sm:$0xff]  ;;  %v473_v2 = vunpack.c.l.bf16 %v439_v29 }
  0x13   : > { %1469 = vmatprep.subr.bf16.mxu0 %v1621_v4  ;;  %1579 = vmatprep.subr.bf16.mxu1 %v1621_v4  ;;  %v453_v23 = vld [vmem:[%s1745_s26 + $0x80] sm:$0xff]  ;;  %v1767_v27 = vrot.slane %v609_v22, %v537_v11  ;;  %v1769_v28 = vrot.slane %v609_v22, %v541_v13  ;;  %v1630_v49 = vld [vmem:[%s2065_s1 + $0x8] sm:$0xff]   ;;  %v476_v52 = vunpack.c.h.bf16 %v440_v39  ;;  %v456_v53 = vld [vmem:[%s1745_s26 + $0x98] sm:$0xff]  ;;  %v506_v58 = vunpack.c.h.bf16 %v455_v45 }
  0x14   : > { %v501_v31 = vunpack.c.l.bf16 %v453_v23  ;;  %v502_v32 = vunpack.c.h.bf16 %v453_v23  ;;  %v546_v36 = vmul.f32 %v1765_v26, %v470_v19  ;;  %v548_v37 = vmul.f32 %v1765_v26, %v472_v21  ;;  %v1631_v54 = vld [vmem:[%s2065_s1 + $0x40] sm:$0xff]   ;;  %v458_v19 = vld [vmem:[%s1745_s26 + $0xa8] sm:$0xff] }
  0x15   : > { %v545_v38 = vmul.f32 %v1763_v25, %v469_v18  ;;  %v580_v42 = vmul.f32 %v1765_v26, %v504_v34  ;;  %v547_v43 = vmul.f32 %v1763_v25, %v471_v20  ;;  %v579_v48 = vmul.f32 %v1763_v25, %v503_v33  ;;  %v441_v3 = vld [vmem:[%s1745_s26 + $0x20] sm:$0xff] }
  0x16   : > { %1470 = vmatpush3.bf16.msra.mxu0 %v1622_v6  ;;  %1587 = vmatpush3.bf16.msra.mxu1 %v1622_v6  ;;  %v578_v41 = vmul.f32 %v1765_v26, %v502_v32  ;;  %v577_v44 = vmul.f32 %v1763_v25, %v501_v31  ;;  %v622_v46 = vadd.f32 %v1769_v28, %v546_v36  ;;  %v508_v0 = vunpack.c.h.bf16 %v456_v53  ;;  %v1632_v4 = vld [vmem:[%s2065_s1] sm:$0xff]  }
  0x17   : > { %1471 = vmatprep.subr.bf16.mxu0 %v1623_v7  ;;  %1580 = vmatprep.subr.bf16.mxu1 %v1623_v7  ;;  %v624_v47 = vadd.f32 %v1769_v28, %v548_v37  ;;  %v656_v51 = vadd.f32 %v1769_v28, %v580_v42  ;;  %v621_v56 = vadd.f32 %v1767_v27, %v545_v38  ;;  %v475_v7 = vunpack.c.l.bf16 %v440_v39  ;;  %v443_v39 = vld [vmem:[%s1745_s26 + $0x30] sm:$0xff] }
  0x18   : > { %v654_v50 = vadd.f32 %v1769_v28, %v578_v41  ;;  %v623_v57 = vadd.f32 %v1767_v27, %v547_v43  ;;  %v653_v60 = vadd.f32 %v1767_v27, %v577_v44  ;;  %v550_v61 = vmul.f32 %v1765_v26, %v474_v40  ;;  %v444_v44 = vld [vmem:[%s1745_s26 + $0x38] sm:$0xff] }
  0x19   : > { %v718_v55 = vpack.c.bf16 %v624_v47, %v622_v46  ;;  %v552_v62 = vmul.f32 %v1765_v26, %v476_v52  ;;  %v655_v63 = vadd.f32 %v1767_v27, %v579_v48  ;;  %v582_v1 = vmul.f32 %v1765_v26, %v506_v58 }
  0x1a   : > { %1472 = vmatpush3.bf16.msra.mxu0 %v1624_v9  ;;  %1588 = vmatpush3.bf16.msra.mxu1 %v1624_v9  ;;  %v734_v59 = vpack.c.bf16 %v656_v51, %v654_v50  ;;  %v626_v5 = vadd.f32 %v1769_v28, %v550_v61  ;;  %v505_v8 = vunpack.c.l.bf16 %v455_v45  ;;  %v442_v9 = vld [vmem:[%s1745_s26 + $0x28] sm:$0xff]  ;;  %v507_v13 = vunpack.c.l.bf16 %v456_v53  ;;  %v460_v53 = vld [vmem:[%s1745_s26 + $0xb8] sm:$0xff] }
  0x1b   : > { %1473 = vmatprep.subr.bf16.mxu0 %v1625_v10  ;;  %1581 = vmatprep.subr.bf16.mxu1 %v1625_v10  ;;  %v628_v6 = vadd.f32 %v1769_v28, %v552_v62  ;;  %v584_v10 = vmul.f32 %v1765_v26, %v508_v0  ;;  %v658_v11 = vadd.f32 %v1769_v28, %v582_v1  ;;  %v478_v18 = vunpack.c.h.bf16 %v441_v3 }
  0x1c   : > { %909 = vmatprep.mubr.bf16.mxu0 %v718_v55  ;;  %973 = vmatprep.mubr.bf16.mxu1 %v734_v59  ;;  %v717_v15 = vpack.c.bf16 %v623_v57, %v621_v56  ;;  %v551_v16 = vmul.f32 %v1763_v25, %v475_v7  ;;  %v581_v17 = vmul.f32 %v1763_v25, %v505_v8  ;;  %v480_v23 = vunpack.c.h.bf16 %v442_v9 }
  0x1d   : > { %v733_v20 = vpack.c.bf16 %v655_v63, %v653_v60  ;;  %v660_v21 = vadd.f32 %v1769_v28, %v584_v10  ;;  %v583_v22 = vmul.f32 %v1763_v25, %v507_v13  ;;  %v720_v24 = vpack.c.bf16 %v628_v6, %v626_v5  ;;  %v445_v5 = vld [vmem:[%s1745_s26 + $0x40] sm:$0xff]  ;;  %v446_v10 = vld [vmem:[%s1745_s26 + $0x48] sm:$0xff] }
  0x1e   : > { %1474 = vmatpush3.bf16.msra.mxu0 %v1626_v12  ;;  %1589 = vmatpush3.bf16.msra.mxu1 %v1626_v12  ;;  %v549_v12 = vmul.f32 %v1763_v25, %v473_v2  ;;  %v554_v29 = vmul.f32 %v1765_v26, %v478_v18  ;;  %v556_v33 = vmul.f32 %v1765_v26, %v480_v23  ;;  %v512_v34 = vunpack.c.h.bf16 %v458_v19 }
  0x1f   : > { %1475 = vmatprep.subr.bf16.mxu0 %v1627_v14  ;;  %1582 = vmatprep.subr.bf16.mxu1 %v1627_v14  ;;  %v457_v14 = vld [vmem:[%s1745_s26 + $0xa0] sm:$0xff]  ;;  %v736_v31 = vpack.c.bf16 %v660_v21, %v658_v11  ;;  %v657_v36 = vadd.f32 %v1767_v27, %v581_v17  ;;  %v477_v38 = vunpack.c.l.bf16 %v441_v3  ;;  %v659_v40 = vadd.f32 %v1767_v27, %v583_v22 }
  0x20   : > { %v625_v32 = vadd.f32 %v1767_v27, %v549_v12  ;;  %v630_v41 = vadd.f32 %v1769_v28, %v554_v29  ;;  %v588_v42 = vmul.f32 %v1765_v26, %v512_v34  ;;  %v479_v43 = vunpack.c.l.bf16 %v442_v9 }
  0x21   : > { %v632_v45 = vadd.f32 %v1769_v28, %v556_v33  ;;  %v509_v47 = vunpack.c.l.bf16 %v457_v14  ;;  %v511_v48 = vunpack.c.l.bf16 %v458_v19  ;;  %v553_v51 = vmul.f32 %v1763_v25, %v477_v38 }
  0x22   : > { %1476 = vmatpush3.bf16.msra.mxu0 %v1628_v30  ;;  %1590 = vmatpush3.bf16.msra.mxu1 %v1628_v30  ;;  %v510_v30 = vunpack.c.h.bf16 %v457_v14  ;;  %v664_v50 = vadd.f32 %v1769_v28, %v588_v42  ;;  %v482_v52 = vunpack.c.h.bf16 %v443_v39  ;;  %v555_v55 = vmul.f32 %v1763_v25, %v479_v43 }
  0x23   : > { %1477 = vmatprep.subr.bf16.mxu0 %v1629_v35  ;;  %1583 = vmatprep.subr.bf16.mxu1 %v1629_v35  ;;  %v627_v35 = vadd.f32 %v1767_v27, %v551_v16  ;;  %v585_v56 = vmul.f32 %v1763_v25, %v509_v47  ;;  %v484_v57 = vunpack.c.h.bf16 %v444_v44  ;;  %v735_v58 = vpack.c.bf16 %v659_v40, %v657_v36 }
  0x24   : > { %v586_v37 = vmul.f32 %v1765_v26, %v510_v30  ;;  %v587_v59 = vmul.f32 %v1763_v25, %v511_v48  ;;  %v558_v60 = vmul.f32 %v1765_v26, %v482_v52  ;;  %v722_v62 = vpack.c.bf16 %v632_v45, %v630_v41 }
  0x25   : > { %v560_v0 = vmul.f32 %v1765_v26, %v484_v57  ;;  %v516_v1 = vunpack.c.h.bf16 %v460_v53  ;;  %v629_v2 = vadd.f32 %v1767_v27, %v553_v51  ;;  %v631_v6 = vadd.f32 %v1767_v27, %v555_v55 }
  0x26   : > { %1478 = vmatpush3.bf16.msra.mxu0 %v1630_v49  ;;  %1591 = vmatpush3.bf16.msra.mxu1 %v1630_v49  ;;  %v662_v46 = vadd.f32 %v1769_v28, %v586_v37  ;;  %v459_v49 = vld [vmem:[%s1745_s26 + $0xb0] sm:$0xff]  ;;  %v661_v7 = vadd.f32 %v1767_v27, %v585_v56  ;;  %v483_v9 = vunpack.c.l.bf16 %v444_v44  ;;  %v663_v11 = vadd.f32 %v1767_v27, %v587_v59  ;;  %v448_v44 = vld [vmem:[%s1745_s26 + $0x58] sm:$0xff] }
  0x27   : > { %1479 = vmatprep.subr.bf16.mxu0 %v1631_v54  ;;  %1584 = vmatprep.subr.bf16.mxu1 %v1631_v54  ;;  %v719_v54 = vpack.c.bf16 %v627_v35, %v625_v32  ;;  %v514_v61 = vunpack.c.h.bf16 %v459_v49  ;;  %v592_v8 = vmul.f32 %v1765_v26, %v516_v1  ;;  %v634_v12 = vadd.f32 %v1769_v28, %v558_v60 }
  0x28   : > { %v738_v63 = vpack.c.bf16 %v664_v50, %v662_v46  ;;  %v513_v13 = vunpack.c.l.bf16 %v459_v49  ;;  %v515_v14 = vunpack.c.l.bf16 %v460_v53  ;;  %v636_v16 = vadd.f32 %v1769_v28, %v560_v0  ;;  %v463_v49 = vld [vmem:[%s1745_s26 + $0xd0] sm:$0xff] }
  0x29   : > { %v590_v3 = vmul.f32 %v1765_v26, %v514_v61  ;;  %v668_v18 = vadd.f32 %v1769_v28, %v592_v8  ;;  %v486_v19 = vunpack.c.h.bf16 %v445_v5  ;;  %v559_v22 = vmul.f32 %v1763_v25, %v483_v9  ;;  %v449_v8 = vld [vmem:[%s1745_s26 + $0x60] sm:$0xff]  ;;  %v450_v9 = vld [vmem:[%s1745_s26 + $0x68] sm:$0xff] }
  0x2a   : > { %1480 = vmatpush3.bf16.msra.mxu0 %v1632_v4  ;;  %1592 = vmatpush3.bf16.msra.mxu1 %v1632_v4  ;;  %v481_v4 = vunpack.c.l.bf16 %v443_v39  ;;  %v589_v23 = vmul.f32 %v1763_v25, %v513_v13  ;;  %v721_v29 = vpack.c.bf16 %v631_v6, %v629_v2  ;;  %v591_v30 = vmul.f32 %v1763_v25, %v515_v14  ;;  %v447_v39 = vld [vmem:[%s1745_s26 + $0x50] sm:$0xff]  ;;  %v465_v13 = vld [vmem:[%s1745_s26 + $0xe0] sm:$0xff] }
  0x2b   : > { %v666_v17 = vadd.f32 %v1769_v28, %v590_v3  ;;  %v737_v32 = vpack.c.bf16 %v663_v11, %v661_v7  ;;  %v562_v33 = vmul.f32 %v1765_v26, %v486_v19  ;;  %v724_v36 = vpack.c.bf16 %v636_v16, %v634_v12 }
  0x2c   : > { %v557_v21 = vmul.f32 %v1763_v25, %v481_v4  ;;  %v635_v41 = vadd.f32 %v1767_v27, %v559_v22  ;;  %v665_v42 = vadd.f32 %v1767_v27, %v589_v23  ;;  %v667_v45 = vadd.f32 %v1767_v27, %v591_v30 }
  0x2d   : > { %910 = vmatmul.mubr.bf16.vlgmr.msra.gmra.mxu0 %v717_v15  ;;  %974 = vmatmul.mubr.bf16.vlgmr.msra.gmra.mxu1 %v733_v20  ;;  %v461_v15 = vld [vmem:[%s1745_s26 + $0xc0] sm:$0xff]  ;;  %v462_v20 = vld [vmem:[%s1745_s26 + $0xc8] sm:$0xff]  ;;  %v740_v37 = vpack.c.bf16 %v668_v18, %v666_v17  ;;  %v485_v46 = vunpack.c.l.bf16 %v445_v5  ;;  %v487_v47 = vunpack.c.l.bf16 %v446_v10  ;;  %v638_v50 = vadd.f32 %v1769_v28, %v562_v33 }
  0x2e   : > { %917 = vmatprep.mubr.bf16.mxu0 %v720_v24  ;;  %981 = vmatprep.mubr.bf16.mxu1 %v736_v31  ;;  %v488_v24 = vunpack.c.h.bf16 %v446_v10  ;;  %v518_v31 = vunpack.c.h.bf16 %v461_v15  ;;  %v520_v35 = vunpack.c.h.bf16 %v462_v20  ;;  %v633_v40 = vadd.f32 %v1767_v27, %v557_v21  ;;  %v466_v18 = vld [vmem:[%s1745_s26 + $0xe8] sm:$0xff] }
  0x2f   : > { %v517_v48 = vunpack.c.l.bf16 %v461_v15  ;;  %v519_v52 = vunpack.c.l.bf16 %v462_v20  ;;  %v490_v53 = vunpack.c.h.bf16 %v447_v39  ;;  %v492_v57 = vunpack.c.h.bf16 %v448_v44 }
  0x30   : > { %v564_v34 = vmul.f32 %v1765_v26, %v488_v24  ;;  %v594_v38 = vmul.f32 %v1765_v26, %v518_v31  ;;  %v596_v43 = vmul.f32 %v1765_v26, %v520_v35  ;;  %v522_v59 = vunpack.c.h.bf16 %v463_v49 }
  0x31   : > { %v561_v60 = vmul.f32 %v1763_v25, %v485_v46  ;;  %v563_v61 = vmul.f32 %v1763_v25, %v487_v47  ;;  %v739_v0 = vpack.c.bf16 %v667_v45, %v665_v42  ;;  %v595_v2 = vmul.f32 %v1763_v25, %v519_v52 }
  0x32   : > { %v640_v51 = vadd.f32 %v1769_v28, %v564_v34  ;;  %v670_v55 = vadd.f32 %v1769_v28, %v594_v38  ;;  %v672_v56 = vadd.f32 %v1769_v28, %v596_v43  ;;  %v566_v3 = vmul.f32 %v1765_v26, %v490_v53 }
  0x33   : > { %v568_v5 = vmul.f32 %v1765_v26, %v492_v57  ;;  %v598_v6 = vmul.f32 %v1765_v26, %v522_v59  ;;  %v489_v10 = vunpack.c.l.bf16 %v447_v39  ;;  %v491_v11 = vunpack.c.l.bf16 %v448_v44  ;;  %v451_v44 = vld [vmem:[%s1745_s26 + $0x70] sm:$0xff] }
  0x34   : > { %v726_v1 = vpack.c.bf16 %v640_v51, %v638_v50  ;;  %v742_v4 = vpack.c.bf16 %v672_v56, %v670_v55  ;;  %v521_v12 = vunpack.c.l.bf16 %v463_v49  ;;  %v637_v14 = vadd.f32 %v1767_v27, %v561_v60  ;;  %v452_v49 = vld [vmem:[%s1745_s26 + $0x78] sm:$0xff]  ;;  %v467_v50 = vld [vmem:[%s1745_s26 + $0xf0] sm:$0xff] }
  0x35   : > { %918 = vmatmul.mubr.bf16.gmra.mxu0 %v719_v54  ;;  %982 = vmatmul.mubr.bf16.gmra.mxu1 %v735_v58  ;;  %v464_v54 = vld [vmem:[%s1745_s26 + $0xd8] sm:$0xff]  ;;  %v723_v58 = vpack.c.bf16 %v635_v41, %v633_v40  ;;  %v639_v15 = vadd.f32 %v1767_v27, %v563_v61  ;;  %v671_v19 = vadd.f32 %v1767_v27, %v595_v2  ;;  %v494_v21 = vunpack.c.h.bf16 %v449_v8 }
  0x36   : > { %925 = vmatprep.mubr.bf16.mxu0 %v722_v62  ;;  %989 = vmatprep.mubr.bf16.mxu1 %v738_v63  ;;  %v593_v62 = vmul.f32 %v1763_v25, %v517_v48  ;;  %v524_v63 = vunpack.c.h.bf16 %v464_v54  ;;  %v523_v17 = vunpack.c.l.bf16 %v464_v54  ;;  %v642_v20 = vadd.f32 %v1769_v28, %v566_v3  ;;  %v468_v51 = vld [vmem:[%s1745_s26 + $0xf8] sm:$0xff] }
  0x37   : > { %v496_v22 = vunpack.c.h.bf16 %v450_v9  ;;  %v644_v23 = vadd.f32 %v1769_v28, %v568_v5  ;;  %v674_v24 = vadd.f32 %v1769_v28, %v598_v6  ;;  %v526_v30 = vunpack.c.h.bf16 %v465_v13 }
  0x38   : > { %v600_v7 = vmul.f32 %v1765_v26, %v524_v63  ;;  %v669_v16 = vadd.f32 %v1767_v27, %v593_v62  ;;  %v565_v31 = vmul.f32 %v1763_v25, %v489_v10  ;;  %v597_v33 = vmul.f32 %v1763_v25, %v521_v12 }
  0x39   : > { %v528_v34 = vunpack.c.h.bf16 %v466_v18  ;;  %v725_v35 = vpack.c.bf16 %v639_v15, %v637_v14  ;;  %v570_v38 = vmul.f32 %v1765_v26, %v494_v21  ;;  %v572_v39 = vmul.f32 %v1765_v26, %v496_v22 }
  0x3a   : > { %v602_v40 = vmul.f32 %v1765_v26, %v526_v30  ;;  %v728_v41 = vpack.c.bf16 %v644_v23, %v642_v20  ;;  %v641_v45 = vadd.f32 %v1767_v27, %v565_v31  ;;  %v673_v47 = vadd.f32 %v1767_v27, %v597_v33 }
  0x3b   : > { %v604_v43 = vmul.f32 %v1765_v26, %v528_v34  ;;  %v493_v48 = vunpack.c.l.bf16 %v449_v8  ;;  %v495_v53 = vunpack.c.l.bf16 %v450_v9  ;;  %v525_v54 = vunpack.c.l.bf16 %v465_v13 }
  0x3c   : > { %v527_v55 = vunpack.c.l.bf16 %v466_v18  ;;  %v646_v56 = vadd.f32 %v1769_v28, %v570_v38  ;;  %v648_v57 = vadd.f32 %v1769_v28, %v572_v39  ;;  %v498_v59 = vunpack.c.h.bf16 %v451_v44 }
  0x3d   : > { %926 = vmatmul.mubr.bf16.gmra.mxu0 %v721_v29  ;;  %990 = vmatmul.mubr.bf16.gmra.mxu1 %v737_v32  ;;  %v676_v29 = vadd.f32 %v1769_v28, %v600_v7  ;;  %v567_v32 = vmul.f32 %v1763_v25, %v491_v11  ;;  %v680_v60 = vadd.f32 %v1769_v28, %v604_v43  ;;  %v500_v61 = vunpack.c.h.bf16 %v452_v49 }
  0x3e   : > { %933 = vmatprep.mubr.bf16.mxu0 %v724_v36  ;;  %997 = vmatprep.mubr.bf16.mxu1 %v740_v37  ;;  %v599_v36 = vmul.f32 %v1763_v25, %v523_v17  ;;  %v741_v37 = vpack.c.bf16 %v671_v19, %v669_v16  ;;  %v530_v62 = vunpack.c.h.bf16 %v467_v50  ;;  %v532_v63 = vunpack.c.h.bf16 %v468_v51 }
  0x3f   : > { %v744_v42 = vpack.c.bf16 %v676_v29, %v674_v24  ;;  %v643_v46 = vadd.f32 %v1767_v27, %v567_v32  ;;  %v601_v2 = vmul.f32 %v1763_v25, %v525_v54  ;;  %v603_v3 = vmul.f32 %v1763_v25, %v527_v55 }
  0x40   : > { %v675_v52 = vadd.f32 %v1767_v27, %v599_v36  ;;  %v730_v6 = vpack.c.bf16 %v648_v57, %v646_v56  ;;  %v574_v7 = vmul.f32 %v1765_v26, %v498_v59  ;;  %v576_v9 = vmul.f32 %v1765_v26, %v500_v61 }
  0x41   : > { %v606_v10 = vmul.f32 %v1765_v26, %v530_v62  ;;  %v608_v11 = vmul.f32 %v1765_v26, %v532_v63  ;;  %v677_v14 = vadd.f32 %v1767_v27, %v601_v2  ;;  %v679_v15 = vadd.f32 %v1767_v27, %v603_v3 }
  0x42   : > { %v743_v5 = vpack.c.bf16 %v675_v52, %v673_v47  ;;  %v497_v16 = vunpack.c.l.bf16 %v451_v44  ;;  %v650_v17 = vadd.f32 %v1769_v28, %v574_v7  ;;  %v499_v18 = vunpack.c.l.bf16 %v452_v49 }
  0x43   : > { %v529_v19 = vunpack.c.l.bf16 %v467_v50  ;;  %v531_v20 = vunpack.c.l.bf16 %v468_v51  ;;  %v652_v26 = vadd.f32 %v1769_v28, %v576_v9  ;;  %v682_v21 = vadd.f32 %v1769_v28, %v606_v10 }
  0x44   : > { %v684_v22 = vadd.f32 %v1769_v28, %v608_v11  ;;  %v573_v24 = vmul.f32 %v1763_v25, %v497_v16  ;;  %v745_v29 = vpack.c.bf16 %v679_v15, %v677_v14  ;;  %v575_v30 = vmul.f32 %v1763_v25, %v499_v18 }
  0x45   : > { %934 = vmatmul.mubr.bf16.gmra.mxu0 %v723_v58  ;;  %998 = vmatmul.mubr.bf16.gmra.mxu1 %v739_v0  ;;  %v678_v58 = vadd.f32 %v1769_v28, %v602_v40  ;;  %v569_v0 = vmul.f32 %v1763_v25, %v493_v48  ;;  %v605_v31 = vmul.f32 %v1763_v25, %v529_v19 }
  0x46   : > { %941 = vmatprep.mubr.bf16.mxu0 %v726_v1  ;;  %1005 = vmatprep.mubr.bf16.mxu1 %v742_v4  ;;  %v571_v1 = vmul.f32 %v1763_v25, %v495_v53  ;;  %v727_v4 = vpack.c.bf16 %v643_v46, %v641_v45  ;;  %v607_v32 = vmul.f32 %v1763_v25, %v531_v20 }
  0x47   : > { %v746_v8 = vpack.c.bf16 %v680_v60, %v678_v58  ;;  %v645_v12 = vadd.f32 %v1767_v27, %v569_v0  ;;  %v732_v33 = vpack.c.bf16 %v652_v26, %v650_v17  ;;  %v748_v34 = vpack.c.bf16 %v684_v22, %v682_v21 }
  0x48   : > { %v647_v13 = vadd.f32 %v1767_v27, %v571_v1  ;;  %v651_v36 = vadd.f32 %v1767_v27, %v575_v30  ;;  %v681_v28 = vadd.f32 %v1767_v27, %v605_v31 }
  0x4a   : > { %v729_v23 = vpack.c.bf16 %v647_v13, %v645_v12 }
  0x4d   : > { %942 = vmatmul.mubr.bf16.gmra.mxu0 %v725_v35  ;;  %1006 = vmatmul.mubr.bf16.gmra.mxu1 %v741_v37  ;;  %v649_v35 = vadd.f32 %v1767_v27, %v573_v24  ;;  %v683_v37 = vadd.f32 %v1767_v27, %v607_v32  ;;  %v1950_v27 = vld [vmem:[%s2069_s5] ss:$0 sm:$0xff] }
  0x4e   : > { %949 = vmatprep.mubr.bf16.mxu0 %v728_v41  ;;  %1013 = vmatprep.mubr.bf16.mxu1 %v744_v42  ;;  %v1945_v42 = vld [vmem:[%s2068_s4] ss:$0 sm:$0xff] }
  0x4f   : > { %v731_v38 = vpack.c.bf16 %v651_v36, %v649_v35  ;;  %v747_v39 = vpack.c.bf16 %v683_v37, %v681_v28 }
  0x55   : > { %950 = vmatmul.mubr.bf16.gmra.mxu0 %v727_v4  ;;  %1014 = vmatmul.mubr.bf16.gmra.mxu1 %v743_v5 }
  0x56   : > { %957 = vmatprep.mubr.bf16.mxu0 %v730_v6  ;;  %1021 = vmatprep.mubr.bf16.mxu1 %v746_v8 }
  0x5d   : > { %958 = vmatmul.mubr.bf16.gmra.mxu0 %v729_v23  ;;  %1022 = vmatmul.mubr.bf16.gmra.mxu1 %v745_v29 }
  0x5e   : > { %965 = vmatprep.mubr.bf16.mxu0 %v732_v33  ;;  %1029 = vmatprep.mubr.bf16.mxu1 %v748_v34 }
  0x65   : > { %966 = vmatmul.mubr.bf16.gmra.mxu0 %v731_v38  ;;  %1030 = vmatmul.mubr.bf16.gmra.mxu1 %v747_v39 }
  0xed   : > { %v1481_v40 = vpop.f32.mrf.mxu0  ;;  %v1529_v25 = vpop.f32.mrf.mxu1 }
  0xef   : > { %v1482_v41 = vpop.f32.mrf.mxu0  ;;  %v1530_v43 = vpop.f32.mrf.mxu1 }
  0xf0   : > { %v1483_v44 = vadd.f32 %v1482_v41, %v1481_v40  ;;  %v1531_v45 = vadd.f32 %v1530_v43, %v1529_v25 }
  0xf1   : > { %v1484_v46 = vpop.f32.mrf.mxu0  ;;  %v1532_v47 = vpop.f32.mrf.mxu1 }
  0xf2   : > { %v1144_v48 = vmul.f32 %v1483_v44, %v1945_v42  ;;  %v1160_v49 = vmul.f32 %v1531_v45, %v1945_v42 }
  0xf3   : > { %v1485_v50 = vpop.f32.mrf.mxu0  ;;  %v1533_v51 = vpop.f32.mrf.mxu1 }
  0xf4   : > { %v1183_v52 = vadd.f32 %v1950_v27, %v1144_v48  ;;  %v1199_v53 = vadd.f32 %v1950_v27, %v1160_v49  ;;  %v1486_v54 = vadd.f32 %v1485_v50, %v1484_v46  ;;  %v1534_v55 = vadd.f32 %v1533_v51, %v1532_v47 }
  0xf5   : > { %v1487_v56 = vpop.f32.mrf.mxu0  ;;  %v1535_v57 = vpop.f32.mrf.mxu1 }
  0xf6   : > { %v1215_v58 = vmax.f32 %v1183_v52, 0.0  ;;  %v1231_v59 = vmax.f32 %v1199_v53, 0.0  ;;  %v1145_v60 = vmul.f32 %v1486_v54, %v1945_v42  ;;  %v1161_v61 = vmul.f32 %v1534_v55, %v1945_v42 }
  0xf7   : > { %v1488_v62 = vpop.f32.mrf.mxu0  ;;  %v1536_v63 = vpop.f32.mrf.mxu1 }
  0xf8   : > { %1247 = vst [vmem:[%s1961_s9] sm:$0xff] %v1215_v58  ;;  %1263 = vst [vmem:[%s1961_s9 + $0x80] sm:$0xff] %v1231_v59  ;;  %v1184_v0 = vadd.f32 %v1950_v27, %v1145_v60  ;;  %v1200_v1 = vadd.f32 %v1950_v27, %v1161_v61  ;;  %v1489_v2 = vadd.f32 %v1488_v62, %v1487_v56 }
  0xf9   : > { %v1537_v3 = vadd.f32 %v1536_v63, %v1535_v57  ;;  %v1490_v4 = vpop.f32.mrf.mxu0  ;;  %v1538_v5 = vpop.f32.mrf.mxu1 }
  0xfa   : > { %v1216_v6 = vmax.f32 %v1184_v0, 0.0  ;;  %v1232_v7 = vmax.f32 %v1200_v1, 0.0  ;;  %v1146_v8 = vmul.f32 %v1489_v2, %v1945_v42 }
  0xfb   : > { %v1162_v9 = vmul.f32 %v1537_v3, %v1945_v42  ;;  %v1491_v10 = vpop.f32.mrf.mxu0  ;;  %v1539_v11 = vpop.f32.mrf.mxu1 }
  0xfc   : > { %1248 = vst [vmem:[%s1961_s9 + $0x8] sm:$0xff] %v1216_v6  ;;  %1264 = vst [vmem:[%s1961_s9 + $0x88] sm:$0xff] %v1232_v7  ;;  %v1185_v12 = vadd.f32 %v1950_v27, %v1146_v8  ;;  %v1492_v14 = vadd.f32 %v1491_v10, %v1490_v4  ;;  %v1540_v15 = vadd.f32 %v1539_v11, %v1538_v5 }
  0xfd   : > { %v1201_v13 = vadd.f32 %v1950_v27, %v1162_v9  ;;  %v1493_v16 = vpop.f32.mrf.mxu0  ;;  %v1541_v17 = vpop.f32.mrf.mxu1 }
  0xfe   : > { %v1217_v18 = vmax.f32 %v1185_v12, 0.0  ;;  %v1147_v20 = vmul.f32 %v1492_v14, %v1945_v42  ;;  %v1163_v26 = vmul.f32 %v1540_v15, %v1945_v42 }
  0xff   : > { %v1233_v19 = vmax.f32 %v1201_v13, 0.0  ;;  %v1494_v21 = vpop.f32.mrf.mxu0  ;;  %v1542_v22 = vpop.f32.mrf.mxu1 }
 0x100   : > { %1249 = vst [vmem:[%s1961_s9 + $0x10] sm:$0xff] %v1217_v18  ;;  %v1186_v23 = vadd.f32 %v1950_v27, %v1147_v20  ;;  %v1202_v24 = vadd.f32 %v1950_v27, %v1163_v26  ;;  %v1495_v29 = vadd.f32 %v1494_v21, %v1493_v16  ;;  %v1543_v30 = vadd.f32 %v1542_v22, %v1541_v17 }
 0x101   : > { %1265 = vst [vmem:[%s1961_s9 + $0x90] sm:$0xff] %v1233_v19  ;;  %v1496_v31 = vpop.f32.mrf.mxu0  ;;  %v1544_v32 = vpop.f32.mrf.mxu1 }
 0x102   : > { %v1218_v33 = vmax.f32 %v1186_v23, 0.0  ;;  %v1234_v34 = vmax.f32 %v1202_v24, 0.0  ;;  %v1148_v35 = vmul.f32 %v1495_v29, %v1945_v42  ;;  %v1164_v36 = vmul.f32 %v1543_v30, %v1945_v42 }
 0x103   : > { %v1497_v28 = vpop.f32.mrf.mxu0  ;;  %v1545_v37 = vpop.f32.mrf.mxu1 }
 0x104   : > { %1250 = vst [vmem:[%s1961_s9 + $0x18] sm:$0xff] %v1218_v33  ;;  %1266 = vst [vmem:[%s1961_s9 + $0x98] sm:$0xff] %v1234_v34  ;;  %v1187_v38 = vadd.f32 %v1950_v27, %v1148_v35  ;;  %v1203_v39 = vadd.f32 %v1950_v27, %v1164_v36  ;;  %v1498_v40 = vadd.f32 %v1497_v28, %v1496_v31 }
 0x105   : > { %v1546_v25 = vadd.f32 %v1545_v37, %v1544_v32  ;;  %v1499_v41 = vpop.f32.mrf.mxu0  ;;  %v1547_v43 = vpop.f32.mrf.mxu1 }
 0x106   : > { %v1219_v44 = vmax.f32 %v1187_v38, 0.0  ;;  %v1235_v45 = vmax.f32 %v1203_v39, 0.0  ;;  %v1149_v46 = vmul.f32 %v1498_v40, %v1945_v42 }
 0x107   : > { %v1165_v47 = vmul.f32 %v1546_v25, %v1945_v42  ;;  %v1500_v48 = vpop.f32.mrf.mxu0  ;;  %v1548_v49 = vpop.f32.mrf.mxu1 }
 0x108   : > { %1251 = vst [vmem:[%s1961_s9 + $0x20] sm:$0xff] %v1219_v44  ;;  %1267 = vst [vmem:[%s1961_s9 + $0xa0] sm:$0xff] %v1235_v45  ;;  %v1188_v50 = vadd.f32 %v1950_v27, %v1149_v46  ;;  %v1501_v52 = vadd.f32 %v1500_v48, %v1499_v41  ;;  %v1549_v53 = vadd.f32 %v1548_v49, %v1547_v43 }
 0x109   : > { %v1204_v51 = vadd.f32 %v1950_v27, %v1165_v47  ;;  %v1502_v54 = vpop.f32.mrf.mxu0  ;;  %v1550_v55 = vpop.f32.mrf.mxu1 }
 0x10a   : > { %v1220_v56 = vmax.f32 %v1188_v50, 0.0  ;;  %v1150_v58 = vmul.f32 %v1501_v52, %v1945_v42  ;;  %v1166_v59 = vmul.f32 %v1549_v53, %v1945_v42 }
 0x10b   : > { %v1236_v57 = vmax.f32 %v1204_v51, 0.0  ;;  %v1503_v60 = vpop.f32.mrf.mxu0  ;;  %v1551_v61 = vpop.f32.mrf.mxu1 }
 0x10c   : > { %1252 = vst [vmem:[%s1961_s9 + $0x28] sm:$0xff] %v1220_v56  ;;  %v1189_v62 = vadd.f32 %v1950_v27, %v1150_v58  ;;  %v1205_v63 = vadd.f32 %v1950_v27, %v1166_v59  ;;  %v1504_v0 = vadd.f32 %v1503_v60, %v1502_v54  ;;  %v1552_v1 = vadd.f32 %v1551_v61, %v1550_v55 }
 0x10d   : > { %1268 = vst [vmem:[%s1961_s9 + $0xa8] sm:$0xff] %v1236_v57  ;;  %v1505_v2 = vpop.f32.mrf.mxu0  ;;  %v1553_v3 = vpop.f32.mrf.mxu1 }
 0x10e   : > { %v1221_v4 = vmax.f32 %v1189_v62, 0.0  ;;  %v1237_v5 = vmax.f32 %v1205_v63, 0.0  ;;  %v1151_v6 = vmul.f32 %v1504_v0, %v1945_v42  ;;  %v1167_v7 = vmul.f32 %v1552_v1, %v1945_v42 }
 0x10f   : > { %v1506_v8 = vpop.f32.mrf.mxu0  ;;  %v1554_v9 = vpop.f32.mrf.mxu1 }
 0x110   : > { %1253 = vst [vmem:[%s1961_s9 + $0x30] sm:$0xff] %v1221_v4  ;;  %1269 = vst [vmem:[%s1961_s9 + $0xb0] sm:$0xff] %v1237_v5  ;;  %v1190_v10 = vadd.f32 %v1950_v27, %v1151_v6  ;;  %v1206_v11 = vadd.f32 %v1950_v27, %v1167_v7  ;;  %v1507_v12 = vadd.f32 %v1506_v8, %v1505_v2 }
 0x111   : > { %v1555_v13 = vadd.f32 %v1554_v9, %v1553_v3  ;;  %v1508_v14 = vpop.f32.mrf.mxu0  ;;  %v1556_v15 = vpop.f32.mrf.mxu1 }
 0x112   : > { %v1222_v16 = vmax.f32 %v1190_v10, 0.0  ;;  %v1238_v17 = vmax.f32 %v1206_v11, 0.0  ;;  %v1152_v18 = vmul.f32 %v1507_v12, %v1945_v42 }
 0x113   : > { %v1168_v19 = vmul.f32 %v1555_v13, %v1945_v42  ;;  %v1509_v20 = vpop.f32.mrf.mxu0  ;;  %v1557_v26 = vpop.f32.mrf.mxu1 }
 0x114   : > { %1254 = vst [vmem:[%s1961_s9 + $0x38] sm:$0xff] %v1222_v16  ;;  %1270 = vst [vmem:[%s1961_s9 + $0xb8] sm:$0xff] %v1238_v17  ;;  %v1191_v21 = vadd.f32 %v1950_v27, %v1152_v18  ;;  %v1510_v23 = vadd.f32 %v1509_v20, %v1508_v14  ;;  %v1558_v24 = vadd.f32 %v1557_v26, %v1556_v15 }
 0x115   : > { %v1207_v22 = vadd.f32 %v1950_v27, %v1168_v19  ;;  %v1511_v29 = vpop.f32.mrf.mxu0  ;;  %v1559_v30 = vpop.f32.mrf.mxu1 }
 0x116   : > { %v1223_v31 = vmax.f32 %v1191_v21, 0.0  ;;  %v1153_v33 = vmul.f32 %v1510_v23, %v1945_v42  ;;  %v1169_v34 = vmul.f32 %v1558_v24, %v1945_v42 }
 0x117   : > { %v1239_v32 = vmax.f32 %v1207_v22, 0.0  ;;  %v1512_v35 = vpop.f32.mrf.mxu0  ;;  %v1560_v36 = vpop.f32.mrf.mxu1 }
 0x118   : > { %1255 = vst [vmem:[%s1961_s9 + $0x40] sm:$0xff] %v1223_v31  ;;  %v1192_v28 = vadd.f32 %v1950_v27, %v1153_v33  ;;  %v1208_v37 = vadd.f32 %v1950_v27, %v1169_v34  ;;  %v1513_v38 = vadd.f32 %v1512_v35, %v1511_v29  ;;  %v1561_v39 = vadd.f32 %v1560_v36, %v1559_v30 }
 0x119   : > { %1271 = vst [vmem:[%s1961_s9 + $0xc0] sm:$0xff] %v1239_v32  ;;  %v1514_v40 = vpop.f32.mrf.mxu0  ;;  %v1562_v25 = vpop.f32.mrf.mxu1 }
 0x11a   : > { %v1224_v41 = vmax.f32 %v1192_v28, 0.0  ;;  %v1240_v43 = vmax.f32 %v1208_v37, 0.0  ;;  %v1154_v44 = vmul.f32 %v1513_v38, %v1945_v42  ;;  %v1170_v45 = vmul.f32 %v1561_v39, %v1945_v42 }
 0x11b   : > { %v1515_v46 = vpop.f32.mrf.mxu0  ;;  %v1563_v47 = vpop.f32.mrf.mxu1 }
 0x11c   : > { %1256 = vst [vmem:[%s1961_s9 + $0x48] sm:$0xff] %v1224_v41  ;;  %1272 = vst [vmem:[%s1961_s9 + $0xc8] sm:$0xff] %v1240_v43  ;;  %v1193_v48 = vadd.f32 %v1950_v27, %v1154_v44  ;;  %v1209_v49 = vadd.f32 %v1950_v27, %v1170_v45  ;;  %v1516_v50 = vadd.f32 %v1515_v46, %v1514_v40 }
 0x11d   : > { %v1564_v51 = vadd.f32 %v1563_v47, %v1562_v25  ;;  %v1517_v52 = vpop.f32.mrf.mxu0  ;;  %v1565_v53 = vpop.f32.mrf.mxu1 }
 0x11e   : > { %v1225_v54 = vmax.f32 %v1193_v48, 0.0  ;;  %v1241_v55 = vmax.f32 %v1209_v49, 0.0  ;;  %v1155_v56 = vmul.f32 %v1516_v50, %v1945_v42 }
 0x11f   : > { %v1171_v57 = vmul.f32 %v1564_v51, %v1945_v42  ;;  %v1518_v58 = vpop.f32.mrf.mxu0  ;;  %v1566_v59 = vpop.f32.mrf.mxu1 }
 0x120   : > { %1257 = vst [vmem:[%s1961_s9 + $0x50] sm:$0xff] %v1225_v54  ;;  %1273 = vst [vmem:[%s1961_s9 + $0xd0] sm:$0xff] %v1241_v55  ;;  %v1194_v60 = vadd.f32 %v1950_v27, %v1155_v56  ;;  %v1519_v62 = vadd.f32 %v1518_v58, %v1517_v52  ;;  %v1567_v63 = vadd.f32 %v1566_v59, %v1565_v53 }
 0x121   : > { %v1210_v61 = vadd.f32 %v1950_v27, %v1171_v57  ;;  %v1520_v0 = vpop.f32.mrf.mxu0  ;;  %v1568_v1 = vpop.f32.mrf.mxu1 }
 0x122   : > { %v1226_v2 = vmax.f32 %v1194_v60, 0.0  ;;  %v1156_v4 = vmul.f32 %v1519_v62, %v1945_v42  ;;  %v1172_v5 = vmul.f32 %v1567_v63, %v1945_v42 }
 0x123   : > { %v1242_v3 = vmax.f32 %v1210_v61, 0.0  ;;  %v1521_v6 = vpop.f32.mrf.mxu0  ;;  %v1569_v7 = vpop.f32.mrf.mxu1 }
 0x124   : > { %1258 = vst [vmem:[%s1961_s9 + $0x58] sm:$0xff] %v1226_v2  ;;  %v1195_v8 = vadd.f32 %v1950_v27, %v1156_v4  ;;  %v1211_v9 = vadd.f32 %v1950_v27, %v1172_v5  ;;  %v1522_v10 = vadd.f32 %v1521_v6, %v1520_v0  ;;  %v1570_v11 = vadd.f32 %v1569_v7, %v1568_v1 }
 0x125   : > { %1274 = vst [vmem:[%s1961_s9 + $0xd8] sm:$0xff] %v1242_v3  ;;  %v1523_v12 = vpop.f32.mrf.mxu0  ;;  %v1571_v13 = vpop.f32.mrf.mxu1 }
 0x126   : > { %v1227_v14 = vmax.f32 %v1195_v8, 0.0  ;;  %v1243_v15 = vmax.f32 %v1211_v9, 0.0  ;;  %v1157_v16 = vmul.f32 %v1522_v10, %v1945_v42  ;;  %v1173_v17 = vmul.f32 %v1570_v11, %v1945_v42 }
 0x127   : > { %v1524_v18 = vpop.f32.mrf.mxu0  ;;  %v1572_v19 = vpop.f32.mrf.mxu1 }
 0x128   : > { %1259 = vst [vmem:[%s1961_s9 + $0x60] sm:$0xff] %v1227_v14  ;;  %1275 = vst [vmem:[%s1961_s9 + $0xe0] sm:$0xff] %v1243_v15  ;;  %v1196_v20 = vadd.f32 %v1950_v27, %v1157_v16  ;;  %v1212_v26 = vadd.f32 %v1950_v27, %v1173_v17  ;;  %v1525_v21 = vadd.f32 %v1524_v18, %v1523_v12 }
 0x129   : > { %v1573_v22 = vadd.f32 %v1572_v19, %v1571_v13  ;;  %v1526_v23 = vpop.f32.mrf.mxu0  ;;  %v1574_v24 = vpop.f32.mrf.mxu1 }
 0x12a   : > { %v1228_v29 = vmax.f32 %v1196_v20, 0.0  ;;  %v1244_v30 = vmax.f32 %v1212_v26, 0.0  ;;  %v1158_v31 = vmul.f32 %v1525_v21, %v1945_v42 }
 0x12b   : > { %v1174_v32 = vmul.f32 %v1573_v22, %v1945_v42  ;;  %v1527_v33 = vpop.f32.mrf.mxu0  ;;  %v1575_v34 = vpop.f32.mrf.mxu1 }
 0x12c   : > { %1260 = vst [vmem:[%s1961_s9 + $0x68] sm:$0xff] %v1228_v29  ;;  %1276 = vst [vmem:[%s1961_s9 + $0xe8] sm:$0xff] %v1244_v30  ;;  %v1197_v35 = vadd.f32 %v1950_v27, %v1158_v31  ;;  %v1528_v28 = vadd.f32 %v1527_v33, %v1526_v23  ;;  %v1576_v37 = vadd.f32 %v1575_v34, %v1574_v24 }
 0x12d   : > { %v1213_v36 = vadd.f32 %v1950_v27, %v1174_v32 }
 0x12e   : > { %v1229_v38 = vmax.f32 %v1197_v35, 0.0  ;;  %v1159_v40 = vmul.f32 %v1528_v28, %v1945_v42  ;;  %v1175_v25 = vmul.f32 %v1576_v37, %v1945_v42 }
 0x12f   : > { %v1245_v39 = vmax.f32 %v1213_v36, 0.0 }
 0x130   : > { %1261 = vst [vmem:[%s1961_s9 + $0x70] sm:$0xff] %v1229_v38  ;;  %v1198_v41 = vadd.f32 %v1950_v27, %v1159_v40  ;;  %v1214_v43 = vadd.f32 %v1950_v27, %v1175_v25 }
 0x131   : > { %1277 = vst [vmem:[%s1961_s9 + $0xf0] sm:$0xff] %v1245_v39 }
 0x132   : > { %v1230_v44 = vmax.f32 %v1198_v41, 0.0  ;;  %v1246_v45 = vmax.f32 %v1214_v43, 0.0 }
 0x134   : > { %1262 = vst [vmem:[%s1961_s9 + $0x78] sm:$0xff] %v1230_v44  ;;  %1278 = vst [vmem:[%s1961_s9 + $0xf8] sm:$0xff] %v1246_v45 }
 0x135 PF: > { %s16_s23 = sadd.s32 1, %s1655_s23   ;;  %s2071_s21 = smov %s1651_s22 }
 0x136   : > { %p13_p5 = scmp.ge.s32.totalorder %s16_s23, 4   ;;  %s2072_s22 = smov %s2074_s24 }
 0x138   :  { %15 = sbr.rel (!%p13_p5) target bundleno = 2 (0x2), region = 97 }

// kernel: densenet_forward.15
= control target key start
LH: loop header
LB: loop body
LE: loop exit
PB: predicated region body
PF: predicated region fallthrough
CT: control target
= control target key end

     0   :  { %vm264_vm0 = vcmask 1040384   ;;  %vm1417_vm1 = vcmask 1041409   ;;  %vm1419_vm2 = vcmask 1042434   ;;  %vm1421_vm3 = vcmask 1043459   ;;  %s3022_s0 = inlined_call_operand.vmem [shape: f32[128,9,128], index: 0, kind: input, shape index: {}]   ;;  %s3023_s1 = inlined_call_operand.vmem [shape: f32[128,128], index: 1, kind: output, shape index: {}]  }
   0x1   :  { %v9_v0 = vld [vmem:[%s3022_s0 + $0x8] sm:$0x1]  ;;  %v8_v1 = vld [vmem:[%s3022_s0] sm:$0xff]  ;;  %v11_v2 = vld [vmem:[%s3022_s0 + $0x18] sm:$0x1]  ;;  %vm1423_vm4 = vcmask 1044484  }
   0x2   :  { %v265_v3 = vsel %vm264_vm0, %v9_v0, -inf  ;;  %v13_v4 = vld [vmem:[%s3022_s0 + $0x28] sm:$0x1]  ;;  %v15_v5 = vld [vmem:[%s3022_s0 + $0x38] sm:$0x1]  ;;  %v10_v7 = vld [vmem:[%s3022_s0 + $0x10] sm:$0xff] }
   0x3   :  { %v17_v6 = vld [vmem:[%s3022_s0 + $0x48] sm:$0x1]  ;;  %v266_v8 = vmax.f32 %v8_v1, %v265_v3  ;;  %v273_v9 = vsel %vm264_vm0, %v11_v2, -inf  ;;  %v12_v10 = vld [vmem:[%s3022_s0 + $0x20] sm:$0xff]  ;;  %v281_v11 = vsel %vm264_vm0, %v13_v4, -inf  ;;  %v14_v12 = vld [vmem:[%s3022_s0 + $0x30] sm:$0xff] }
   0x4   :  { %v16_v13 = vld [vmem:[%s3022_s0 + $0x40] sm:$0xff]  ;;  %v289_v14 = vsel %vm264_vm0, %v15_v5, -inf  ;;  %v297_v15 = vsel %vm264_vm0, %v17_v6, -inf  ;;  %v274_v16 = vmax.f32 %v10_v7, %v273_v9  ;;  %v19_v17 = vld [vmem:[%s3022_s0 + $0x58] sm:$0x1]  ;;  %v282_v19 = vmax.f32 %v12_v10, %v281_v11  ;;  %v18_v22 = vld [vmem:[%s3022_s0 + $0x50] sm:$0xff] }
   0x5   :  { %v267_v18 = vrot.slane %v266_v8, 4  ;;  %v290_v20 = vmax.f32 %v14_v12, %v289_v14  ;;  %v298_v21 = vmax.f32 %v16_v13, %v297_v15  ;;  %v305_v24 = vsel %vm264_vm0, %v19_v17, -inf  ;;  %v21_v27 = vld [vmem:[%s3022_s0 + $0x68] sm:$0x1]  ;;  %v23_v28 = vld [vmem:[%s3022_s0 + $0x78] sm:$0x1] }
   0x6   :  { %v275_v23 = vrot.slane %v274_v16, 4  ;;  %v283_v26 = vrot.slane %v282_v19, 4  ;;  %v306_v31 = vmax.f32 %v18_v22, %v305_v24  ;;  %v20_v33 = vld [vmem:[%s3022_s0 + $0x60] sm:$0xff]  ;;  %v22_v34 = vld [vmem:[%s3022_s0 + $0x70] sm:$0xff]  ;;  %v313_v37 = vsel %vm264_vm0, %v21_v27, -inf }
   0x7   :  { %v268_v25 = vmax.f32 %v266_v8, %v267_v18  ;;  %v291_v29 = vrot.slane %v290_v20, 4  ;;  %v299_v30 = vrot.slane %v298_v21, 4  ;;  %v321_v38 = vsel %vm264_vm0, %v23_v28, -inf  ;;  %v25_v39 = vld [vmem:[%s3022_s0 + $0x88] sm:$0x1]  ;;  %v24_v47 = vld [vmem:[%s3022_s0 + $0x80] sm:$0xff] }
   0x8   :  { %v276_v32 = vmax.f32 %v274_v16, %v275_v23  ;;  %v284_v36 = vmax.f32 %v282_v19, %v283_v26  ;;  %v27_v42 = vld [vmem:[%s3022_s0 + $0x98] sm:$0x1]  ;;  %v29_v43 = vld [vmem:[%s3022_s0 + $0xa8] sm:$0x1]  ;;  %v307_v44 = vrot.slane %v306_v31, 4  ;;  %v314_v45 = vmax.f32 %v20_v33, %v313_v37  ;;  %v26_v52 = vld [vmem:[%s3022_s0 + $0x90] sm:$0xff] }
   0x9   :  { %v269_v35 = vrot.slane %v268_v25, 2  ;;  %v292_v40 = vmax.f32 %v290_v20, %v291_v29  ;;  %v300_v41 = vmax.f32 %v298_v21, %v299_v30  ;;  %v322_v46 = vmax.f32 %v22_v34, %v321_v38  ;;  %v28_v53 = vld [vmem:[%s3022_s0 + $0xa0] sm:$0xff]  ;;  %v31_v58 = vld [vmem:[%s3022_s0 + $0xb8] sm:$0x1]  ;;  %v33_v60 = vld [vmem:[%s3022_s0 + $0xc8] sm:$0x1] }
   0xa   :  { %v277_v49 = vrot.slane %v276_v32, 2  ;;  %v285_v50 = vrot.slane %v284_v36, 2  ;;  %v329_v51 = vsel %vm264_vm0, %v25_v39, -inf  ;;  %v337_v56 = vsel %vm264_vm0, %v27_v42, -inf  ;;  %v35_v61 = vld [vmem:[%s3022_s0 + $0xd8] sm:$0x1] }
   0xb   :  { %v270_v48 = vmax.f32 %v268_v25, %v269_v35  ;;  %v293_v54 = vrot.slane %v292_v40, 2  ;;  %v301_v55 = vrot.slane %v300_v41, 2  ;;  %v345_v57 = vsel %vm264_vm0, %v29_v43, -inf  ;;  %v37_v1 = vld [vmem:[%s3022_s0 + $0xe8] sm:$0x1]  ;;  %v30_v6 = vld [vmem:[%s3022_s0 + $0xb0] sm:$0xff] }
   0xc   :  { %v308_v59 = vmax.f32 %v306_v31, %v307_v44  ;;  %v315_v62 = vrot.slane %v314_v45, 4  ;;  %v323_v63 = vrot.slane %v322_v46, 4  ;;  %v330_v0 = vmax.f32 %v24_v47, %v329_v51  ;;  %v32_v10 = vld [vmem:[%s3022_s0 + $0xc0] sm:$0xff]  ;;  %v34_v11 = vld [vmem:[%s3022_s0 + $0xd0] sm:$0xff]  ;;  %v39_v17 = vld [vmem:[%s3022_s0 + $0xf8] sm:$0x1] }
   0xd   :  { %v278_v2 = vmax.f32 %v276_v32, %v277_v49  ;;  %v286_v3 = vmax.f32 %v284_v36, %v285_v50  ;;  %v338_v4 = vmax.f32 %v26_v52, %v337_v56  ;;  %v346_v5 = vmax.f32 %v28_v53, %v345_v57  ;;  %v36_v16 = vld [vmem:[%s3022_s0 + $0xe0] sm:$0xff]  ;;  %v38_v30 = vld [vmem:[%s3022_s0 + $0xf0] sm:$0xff]  ;;  %v41_v39 = vld [vmem:[%s3022_s0 + $0x108] sm:$0x1] }
   0xe   :  { %v271_v7 = vrot.slane %v270_v48, 1  ;;  %v294_v8 = vmax.f32 %v292_v40, %v293_v54  ;;  %v302_v9 = vmax.f32 %v300_v41, %v301_v55  ;;  %v309_v12 = vrot.slane %v308_v59, 2  ;;  %v43_v40 = vld [vmem:[%s3022_s0 + $0x118] sm:$0x1]  ;;  %v40_v54 = vld [vmem:[%s3022_s0 + $0x100] sm:$0xff]  ;;  %v42_v55 = vld [vmem:[%s3022_s0 + $0x110] sm:$0xff] }
   0xf   :  { %v353_v13 = vsel %vm264_vm0, %v31_v58, -inf  ;;  %v361_v14 = vsel %vm264_vm0, %v33_v60, -inf  ;;  %v369_v15 = vsel %vm264_vm0, %v35_v61, -inf  ;;  %v316_v18 = vmax.f32 %v314_v45, %v315_v62  ;;  %v45_v45 = vld [vmem:[%s3022_s0 + $0x128] sm:$0x1]  ;;  %v44_v61 = vld [vmem:[%s3022_s0 + $0x120] sm:$0xff] }
  0x10   :  { %v324_v19 = vmax.f32 %v322_v46, %v323_v63  ;;  %v331_v20 = vrot.slane %v330_v0, 4  ;;  %v377_v21 = vsel %vm264_vm0, %v37_v1, -inf  ;;  %v279_v22 = vrot.slane %v278_v2, 1  ;;  %v47_v56 = vld [vmem:[%s3022_s0 + $0x138] sm:$0x1]  ;;  %v46_v62 = vld [vmem:[%s3022_s0 + $0x130] sm:$0xff] }
  0x11   :  { %v287_v23 = vrot.slane %v286_v3, 1  ;;  %v339_v24 = vrot.slane %v338_v4, 4  ;;  %v347_v25 = vrot.slane %v346_v5, 4  ;;  %v295_v26 = vrot.slane %v294_v8, 1 }
  0x12   :  { %v354_v27 = vmax.f32 %v30_v6, %v353_v13  ;;  %v362_v28 = vmax.f32 %v32_v10, %v361_v14  ;;  %v370_v29 = vmax.f32 %v34_v11, %v369_v15  ;;  %v303_v31 = vrot.slane %v302_v9, 1  ;;  %v49_v11 = vld [vmem:[%s3022_s0 + $0x148] sm:$0x1] }
  0x13   :  { %v310_v32 = vmax.f32 %v308_v59, %v309_v12  ;;  %v378_v33 = vmax.f32 %v36_v16, %v377_v21  ;;  %v385_v34 = vsel %vm264_vm0, %v39_v17, -inf  ;;  %v1694_v35 = vmax.f32 %v270_v48, %v271_v7  ;;  %v51_v12 = vld [vmem:[%s3022_s0 + $0x158] sm:$0x1]  ;;  %v48_v21 = vld [vmem:[%s3022_s0 + $0x140] sm:$0xff] }
  0x14   :  { %v317_v36 = vrot.slane %v316_v18, 2  ;;  %v325_v37 = vrot.slane %v324_v19, 2  ;;  %v332_v38 = vmax.f32 %v330_v0, %v331_v20  ;;  %v1702_v41 = vmax.f32 %v278_v2, %v279_v22  ;;  %v50_v22 = vld [vmem:[%s3022_s0 + $0x150] sm:$0xff] }
  0x15   :  { %v1704_v42 = vmax.f32 %v286_v3, %v287_v23  ;;  %v340_v43 = vmax.f32 %v338_v4, %v339_v24  ;;  %v348_v44 = vmax.f32 %v346_v5, %v347_v25  ;;  %v355_v46 = vrot.slane %v354_v27, 4 }
  0x16   :  { %v363_v47 = vrot.slane %v362_v28, 4  ;;  %v371_v48 = vrot.slane %v370_v29, 4  ;;  %v386_v49 = vmax.f32 %v38_v30, %v385_v34  ;;  %v1709_v50 = vmax.f32 %v294_v8, %v295_v26 }
  0x17   :  { %v1711_v51 = vmax.f32 %v302_v9, %v303_v31  ;;  %v311_v52 = vrot.slane %v310_v32, 1  ;;  %v379_v53 = vrot.slane %v378_v33, 4  ;;  %v318_v57 = vmax.f32 %v316_v18, %v317_v36  ;;  %v53_v36 = vld [vmem:[%s3022_s0 + $0x168] sm:$0x1] }
  0x18   :  { %v326_v58 = vmax.f32 %v324_v19, %v325_v37  ;;  %v333_v59 = vrot.slane %v332_v38, 2  ;;  %v393_v60 = vsel %vm264_vm0, %v41_v39, -inf  ;;  %v341_v63 = vrot.slane %v340_v43, 2 }
  0x19   :  { %v349_v0 = vrot.slane %v348_v44, 2  ;;  %v401_v1 = vsel %vm264_vm0, %v43_v40, -inf  ;;  %v409_v2 = vsel %vm264_vm0, %v45_v45, -inf  ;;  %v356_v3 = vmax.f32 %v354_v27, %v355_v46 }
  0x1a   :  { %v364_v4 = vmax.f32 %v362_v28, %v363_v47  ;;  %v372_v5 = vmax.f32 %v370_v29, %v371_v48  ;;  %v387_v6 = vrot.slane %v386_v49, 4  ;;  %v1731_v7 = vmax.f32 %v310_v32, %v311_v52  ;;  %v52_v47 = vld [vmem:[%s3022_s0 + $0x160] sm:$0xff] }
  0x1b   :  { %v380_v8 = vmax.f32 %v378_v33, %v379_v53  ;;  %v394_v9 = vmax.f32 %v40_v54, %v393_v60  ;;  %v417_v10 = vsel %vm264_vm0, %v47_v56, -inf  ;;  %v319_v13 = vrot.slane %v318_v57, 1 }
  0x1c   :  { %v402_v14 = vmax.f32 %v42_v55, %v401_v1  ;;  %v410_v15 = vmax.f32 %v44_v61, %v409_v2  ;;  %v418_v16 = vmax.f32 %v46_v62, %v417_v10  ;;  %v327_v17 = vrot.slane %v326_v58, 1 }
  0x1d   :  { %v334_v18 = vmax.f32 %v332_v38, %v333_v59  ;;  %v342_v19 = vmax.f32 %v340_v43, %v341_v63  ;;  %v350_v20 = vmax.f32 %v348_v44, %v349_v0  ;;  %v357_v23 = vrot.slane %v356_v3, 2  ;;  %v55_v63 = vld [vmem:[%s3022_s0 + $0x178] sm:$0x1]  ;;  %v57_v0 = vld [vmem:[%s3022_s0 + $0x188] sm:$0x1] }
  0x1e   :  { %v365_v24 = vrot.slane %v364_v4, 2  ;;  %v373_v25 = vrot.slane %v372_v5, 2  ;;  %v388_v26 = vmax.f32 %v386_v49, %v387_v6  ;;  %v381_v27 = vrot.slane %v380_v8, 2  ;;  %v59_v6 = vld [vmem:[%s3022_s0 + $0x198] sm:$0x1] }
  0x1f   :  { %v395_v28 = vrot.slane %v394_v9, 4  ;;  %v425_v29 = vsel %vm264_vm0, %v49_v11, -inf  ;;  %v433_v30 = vsel %vm264_vm0, %v51_v12, -inf  ;;  %v1748_v31 = vmax.f32 %v318_v57, %v319_v13  ;;  %v58_v12 = vld [vmem:[%s3022_s0 + $0x190] sm:$0xff] }
  0x20   :  { %v403_v32 = vrot.slane %v402_v14, 4  ;;  %v411_v33 = vrot.slane %v410_v15, 4  ;;  %v419_v34 = vrot.slane %v418_v16, 4  ;;  %v335_v37 = vrot.slane %v334_v18, 1 }
  0x21   :  { %v343_v38 = vrot.slane %v342_v19, 1  ;;  %v426_v39 = vmax.f32 %v48_v21, %v425_v29  ;;  %v434_v40 = vmax.f32 %v50_v22, %v433_v30  ;;  %v1753_v43 = vmax.f32 %v326_v58, %v327_v17  ;;  %v54_v58 = vld [vmem:[%s3022_s0 + $0x170] sm:$0xff]  ;;  %v61_v29 = vld [vmem:[%s3022_s0 + $0x1a8] sm:$0x1]  ;;  %v63_v30 = vld [vmem:[%s3022_s0 + $0x1b8] sm:$0x1] }
  0x22   :  { %v351_v44 = vrot.slane %v350_v20, 1  ;;  %v358_v45 = vmax.f32 %v356_v3, %v357_v23  ;;  %v366_v46 = vmax.f32 %v364_v4, %v365_v24  ;;  %v374_v48 = vmax.f32 %v372_v5, %v373_v25  ;;  %v56_v5 = vld [vmem:[%s3022_s0 + $0x180] sm:$0xff] }
  0x23   :  { %v382_v49 = vmax.f32 %v380_v8, %v381_v27  ;;  %v389_v52 = vrot.slane %v388_v26, 2  ;;  %v396_v53 = vmax.f32 %v394_v9, %v395_v28  ;;  %v404_v54 = vmax.f32 %v402_v14, %v403_v32 }
  0x24   :  { %v412_v55 = vmax.f32 %v410_v15, %v411_v33  ;;  %v420_v56 = vmax.f32 %v418_v16, %v419_v34  ;;  %v441_v57 = vsel %vm264_vm0, %v53_v36, -inf  ;;  %v1762_v59 = vmax.f32 %v334_v18, %v335_v37  ;;  %v60_v37 = vld [vmem:[%s3022_s0 + $0x1a0] sm:$0xff] }
  0x25   :  { %v1764_v60 = vmax.f32 %v342_v19, %v343_v38  ;;  %v427_v61 = vrot.slane %v426_v39, 4  ;;  %v435_v62 = vrot.slane %v434_v40, 4  ;;  %v1772_v1 = vmax.f32 %v350_v20, %v351_v44  ;;  %v62_v38 = vld [vmem:[%s3022_s0 + $0x1b0] sm:$0xff] }
  0x26   :  { %v359_v2 = vrot.slane %v358_v45, 1  ;;  %v367_v3 = vrot.slane %v366_v46, 1  ;;  %v442_v4 = vmax.f32 %v52_v47, %v441_v57  ;;  %v375_v8 = vrot.slane %v374_v48, 1 }
  0x27   :  { %v383_v9 = vrot.slane %v382_v49, 1  ;;  %v390_v10 = vmax.f32 %v388_v26, %v389_v52  ;;  %v397_v11 = vrot.slane %v396_v53, 2  ;;  %v405_v13 = vrot.slane %v404_v54, 2 }
  0x28   :  { %v413_v14 = vrot.slane %v412_v55, 2  ;;  %v421_v15 = vrot.slane %v420_v56, 2  ;;  %v443_v16 = vrot.slane %v442_v4, 4  ;;  %v428_v17 = vmax.f32 %v426_v39, %v427_v61 }
  0x29   :  { %v436_v18 = vmax.f32 %v434_v40, %v435_v62  ;;  %v449_v19 = vsel %vm264_vm0, %v55_v63, -inf  ;;  %v457_v20 = vsel %vm264_vm0, %v57_v0, -inf  ;;  %v465_v24 = vsel %vm264_vm0, %v59_v6, -inf }
  0x2a   :  { %v444_v21 = vmax.f32 %v442_v4, %v443_v16  ;;  %v450_v22 = vmax.f32 %v54_v58, %v449_v19  ;;  %v458_v23 = vmax.f32 %v56_v5, %v457_v20  ;;  %v1786_v25 = vmax.f32 %v358_v45, %v359_v2  ;;  %v66_v20 = vld [vmem:[%s3022_s0 + $0x1d0] sm:$0xff] }
  0x2b   :  { %v1788_v26 = vmax.f32 %v366_v46, %v367_v3  ;;  %v1790_v27 = vmax.f32 %v374_v48, %v375_v8  ;;  %v466_v28 = vmax.f32 %v58_v12, %v465_v24  ;;  %v1798_v32 = vmax.f32 %v382_v49, %v383_v9  ;;  %v64_v9 = vld [vmem:[%s3022_s0 + $0x1c0] sm:$0xff] }
  0x2c   :  { %v391_v33 = vrot.slane %v390_v10, 1  ;;  %v398_v34 = vmax.f32 %v396_v53, %v397_v11  ;;  %v406_v36 = vmax.f32 %v404_v54, %v405_v13  ;;  %v414_v39 = vmax.f32 %v412_v55, %v413_v14  ;;  %v65_v55 = vld [vmem:[%s3022_s0 + $0x1c8] sm:$0x1] }
  0x2d   :  { %v422_v40 = vmax.f32 %v420_v56, %v421_v15  ;;  %v451_v44 = vrot.slane %v450_v22, 4  ;;  %v459_v45 = vrot.slane %v458_v23, 4  ;;  %v429_v46 = vrot.slane %v428_v17, 2 }
  0x2e   :  { %v437_v47 = vrot.slane %v436_v18, 2  ;;  %v445_v48 = vrot.slane %v444_v21, 2  ;;  %v467_v49 = vrot.slane %v466_v28, 4  ;;  %v473_v53 = vsel %vm264_vm0, %v61_v29, -inf }
  0x2f   :  { %v452_v52 = vmax.f32 %v450_v22, %v451_v44  ;;  %v460_v57 = vmax.f32 %v458_v23, %v459_v45  ;;  %v481_v54 = vsel %vm264_vm0, %v63_v30, -inf  ;;  %v1808_v58 = vmax.f32 %v390_v10, %v391_v33 }
  0x30   :  { %v468_v61 = vmax.f32 %v466_v28, %v467_v49  ;;  %v474_v62 = vmax.f32 %v60_v37, %v473_v53  ;;  %v482_v63 = vmax.f32 %v62_v38, %v481_v54  ;;  %v399_v56 = vrot.slane %v398_v34, 1  ;;  %v69_v28 = vld [vmem:[%s3022_s0 + $0x1e8] sm:$0x1] }
  0x31   :  { %v407_v0 = vrot.slane %v406_v36, 1  ;;  %v453_v2 = vrot.slane %v452_v52, 2  ;;  %v461_v3 = vrot.slane %v460_v57, 2  ;;  %v415_v4 = vrot.slane %v414_v39, 1 }
  0x32   :  { %v423_v5 = vrot.slane %v422_v40, 1  ;;  %v430_v6 = vmax.f32 %v428_v17, %v429_v46  ;;  %v469_v8 = vrot.slane %v468_v61, 2  ;;  %v438_v10 = vmax.f32 %v436_v18, %v437_v47  ;;  %v67_v18 = vld [vmem:[%s3022_s0 + $0x1d8] sm:$0x1]  ;;  %v70_v46 = vld [vmem:[%s3022_s0 + $0x1f0] sm:$0xff] }
  0x33   :  { %v446_v11 = vmax.f32 %v444_v21, %v445_v48  ;;  %v475_v12 = vrot.slane %v474_v62, 4  ;;  %v483_v13 = vrot.slane %v482_v63, 4  ;;  %v454_v14 = vmax.f32 %v452_v52, %v453_v2  ;;  %v68_v21 = vld [vmem:[%s3022_s0 + $0x1e0] sm:$0xff] }
  0x34   :  { %v462_v15 = vmax.f32 %v460_v57, %v461_v3  ;;  %v470_v16 = vmax.f32 %v468_v61, %v469_v8  ;;  %v489_v19 = vsel %vm264_vm0, %v65_v55, -inf  ;;  %v1820_v22 = vmax.f32 %v398_v34, %v399_v56  ;;  %v73_v3 = vld [vmem:[%s3022_s0 + $0x208] sm:$0x1] }
  0x35   :  { %v1822_v17 = vmax.f32 %v406_v36, %v407_v0  ;;  %v476_v23 = vmax.f32 %v474_v62, %v475_v12  ;;  %v484_v24 = vmax.f32 %v482_v63, %v483_v13  ;;  %v1833_v29 = vmax.f32 %v414_v39, %v415_v4  ;;  %v71_v36 = vld [vmem:[%s3022_s0 + $0x1f8] sm:$0x1]  ;;  %v74_v13 = vld [vmem:[%s3022_s0 + $0x210] sm:$0xff] }
  0x36   :  { %v1835_v30 = vmax.f32 %v422_v40, %v423_v5  ;;  %v431_v33 = vrot.slane %v430_v6, 1  ;;  %v490_v34 = vmax.f32 %v64_v9, %v489_v19  ;;  %v439_v37 = vrot.slane %v438_v10, 1  ;;  %v75_v4 = vld [vmem:[%s3022_s0 + $0x218] sm:$0x1] }
  0x37   :  { %v447_v38 = vrot.slane %v446_v11, 1  ;;  %v477_v44 = vrot.slane %v476_v23, 2  ;;  %v485_v45 = vrot.slane %v484_v24, 2  ;;  %v455_v47 = vrot.slane %v454_v14, 1 }
  0x38   :  { %v463_v48 = vrot.slane %v462_v15, 1  ;;  %v471_v39 = vrot.slane %v470_v16, 1  ;;  %v491_v49 = vrot.slane %v490_v34, 4  ;;  %v497_v57 = vsel %vm264_vm0, %v67_v18, -inf }
  0x39   :  { %v478_v40 = vmax.f32 %v476_v23, %v477_v44  ;;  %v486_v52 = vmax.f32 %v484_v24, %v485_v45  ;;  %v505_v53 = vsel %vm264_vm0, %v69_v28, -inf  ;;  %v498_v61 = vmax.f32 %v66_v20, %v497_v57 }
  0x3a   :  { %v492_v54 = vmax.f32 %v490_v34, %v491_v49  ;;  %v506_v62 = vmax.f32 %v68_v21, %v505_v53  ;;  %v513_v63 = vsel %vm264_vm0, %v71_v36, -inf  ;;  %v1846_v55 = vmax.f32 %v430_v6, %v431_v33  ;;  %v72_v6 = vld [vmem:[%s3022_s0 + $0x200] sm:$0xff] }
  0x3b   :  { %v479_v56 = vrot.slane %v478_v40, 1  ;;  %v487_v0 = vrot.slane %v486_v52, 1  ;;  %v514_v2 = vmax.f32 %v70_v46, %v513_v63  ;;  %v1854_v5 = vmax.f32 %v438_v10, %v439_v37  ;;  %v76_v36 = vld [vmem:[%s3022_s0 + $0x220] sm:$0xff]  ;;  %v78_v37 = vld [vmem:[%s3022_s0 + $0x230] sm:$0xff] }
  0x3c   :  { %v1856_v8 = vmax.f32 %v446_v11, %v447_v38  ;;  %v1858_v9 = vmax.f32 %v454_v14, %v455_v47  ;;  %v493_v12 = vrot.slane %v492_v54, 2  ;;  %v1866_v19 = vmax.f32 %v462_v15, %v463_v48  ;;  %v77_v11 = vld [vmem:[%s3022_s0 + $0x228] sm:$0x1]  ;;  %v79_v14 = vld [vmem:[%s3022_s0 + $0x238] sm:$0x1] }
  0x3d   :  { %v1868_v20 = vmax.f32 %v470_v16, %v471_v39  ;;  %v499_v23 = vrot.slane %v498_v61, 4  ;;  %v507_v10 = vrot.slane %v506_v62, 4  ;;  %v1876_v24 = vmax.f32 %v478_v40, %v479_v56  ;;  %v81_v47 = vld [vmem:[%s3022_s0 + $0x248] sm:$0x1] }
  0x3e   :  { %v1878_v18 = vmax.f32 %v486_v52, %v487_v0  ;;  %v494_v21 = vmax.f32 %v492_v54, %v493_v12  ;;  %v515_v28 = vrot.slane %v514_v2, 4  ;;  %v521_v16 = vsel %vm264_vm0, %v73_v3, -inf }
  0x3f   :  { %v500_v15 = vmax.f32 %v498_v61, %v499_v23  ;;  %v508_v33 = vmax.f32 %v506_v62, %v507_v10  ;;  %v529_v34 = vsel %vm264_vm0, %v75_v4, -inf  ;;  %v522_v45 = vmax.f32 %v72_v6, %v521_v16  ;;  %v80_v61 = vld [vmem:[%s3022_s0 + $0x240] sm:$0xff]  ;;  %v83_v6 = vld [vmem:[%s3022_s0 + $0x258] sm:$0x1]  ;;  %v82_v16 = vld [vmem:[%s3022_s0 + $0x250] sm:$0xff] }
  0x40   :  { %v495_v38 = vrot.slane %v494_v21, 1  ;;  %v516_v44 = vmax.f32 %v514_v2, %v515_v28  ;;  %v530_v46 = vmax.f32 %v74_v13, %v529_v34  ;;  %v537_v49 = vsel %vm264_vm0, %v77_v11, -inf }
  0x41   :  { %v501_v48 = vrot.slane %v500_v15, 2  ;;  %v509_v39 = vrot.slane %v508_v33, 2  ;;  %v545_v40 = vsel %vm264_vm0, %v79_v14, -inf  ;;  %v523_v53 = vrot.slane %v522_v45, 4  ;;  %v85_v14 = vld [vmem:[%s3022_s0 + $0x268] sm:$0x1] }
  0x42   :  { %v1893_v52 = vmax.f32 %v494_v21, %v495_v38  ;;  %v517_v57 = vrot.slane %v516_v44, 2  ;;  %v531_v54 = vrot.slane %v530_v46, 4  ;;  %v538_v56 = vmax.f32 %v76_v36, %v537_v49 }
  0x43   :  { %v502_v62 = vmax.f32 %v500_v15, %v501_v48  ;;  %v510_v63 = vmax.f32 %v508_v33, %v509_v39  ;;  %v546_v0 = vmax.f32 %v78_v37, %v545_v40  ;;  %v524_v3 = vmax.f32 %v522_v45, %v523_v53  ;;  %v87_v45 = vld [vmem:[%s3022_s0 + $0x278] sm:$0x1] }
  0x44   :  { %v518_v2 = vmax.f32 %v516_v44, %v517_v57  ;;  %v532_v4 = vmax.f32 %v530_v46, %v531_v54  ;;  %v553_v12 = vsel %vm264_vm0, %v81_v47, -inf  ;;  %v539_v10 = vrot.slane %v538_v56, 4  ;;  %v84_v44 = vld [vmem:[%s3022_s0 + $0x260] sm:$0xff]  ;;  %v86_v54 = vld [vmem:[%s3022_s0 + $0x270] sm:$0xff] }
  0x45   :  { %v503_v13 = vrot.slane %v502_v62, 1  ;;  %v511_v23 = vrot.slane %v510_v63, 1  ;;  %v547_v11 = vrot.slane %v546_v0, 4  ;;  %v525_v28 = vrot.slane %v524_v3, 2 }
  0x46   :  { %v519_v21 = vrot.slane %v518_v2, 1  ;;  %v533_v15 = vrot.slane %v532_v4, 2  ;;  %v554_v33 = vmax.f32 %v80_v61, %v553_v12  ;;  %v540_v37 = vmax.f32 %v538_v56, %v539_v10 }
  0x47   :  { %v1908_v34 = vmax.f32 %v502_v62, %v503_v13  ;;  %v1910_v36 = vmax.f32 %v510_v63, %v511_v23  ;;  %v548_v38 = vmax.f32 %v546_v0, %v547_v11  ;;  %v526_v47 = vmax.f32 %v524_v3, %v525_v28  ;;  %v89_v0 = vld [vmem:[%s3022_s0 + $0x288] sm:$0x1] }
  0x48   :  { %v1918_v46 = vmax.f32 %v518_v2, %v519_v21  ;;  %v534_v48 = vmax.f32 %v532_v4, %v533_v15  ;;  %v555_v39 = vrot.slane %v554_v33, 4  ;;  %v541_v49 = vrot.slane %v540_v37, 2  ;;  %v91_v2 = vld [vmem:[%s3022_s0 + $0x298] sm:$0x1]  ;;  %v90_v21 = vld [vmem:[%s3022_s0 + $0x290] sm:$0xff] }
  0x49   :  { %3024 = vst [vmem:[#allocation2_spill] sm:$0xff] %v1910_v36  ;;  %v549_v40 = vrot.slane %v548_v38, 2  ;;  %v561_v57 = vsel %vm264_vm0, %v83_v6, -inf  ;;  %v569_v53 = vsel %vm264_vm0, %v85_v14, -inf  ;;  %v527_v61 = vrot.slane %v526_v47, 1  ;;  %v88_v14 = vld [vmem:[%s3022_s0 + $0x280] sm:$0xff] }
  0x4a   :  { %3025 = vst [vmem:[#allocation3_spill] sm:$0xff] %v1918_v46  ;;  %v535_v62 = vrot.slane %v534_v48, 1  ;;  %v556_v63 = vmax.f32 %v554_v33, %v555_v39  ;;  %v562_v56 = vmax.f32 %v82_v16, %v561_v57  ;;  %v542_v3 = vmax.f32 %v540_v37, %v541_v49  ;;  %v93_v37 = vld [vmem:[%s3022_s0 + $0x2a8] sm:$0x1] }
  0x4b   :  { %v550_v4 = vmax.f32 %v548_v38, %v549_v40  ;;  %v570_v12 = vmax.f32 %v84_v44, %v569_v53  ;;  %v577_v6 = vsel %vm264_vm0, %v87_v45, -inf  ;;  %v1932_v13 = vmax.f32 %v526_v47, %v527_v61  ;;  %v95_v38 = vld [vmem:[%s3022_s0 + $0x2b8] sm:$0x1]  ;;  %v92_v53 = vld [vmem:[%s3022_s0 + $0x2a0] sm:$0xff] }
  0x4c   :  { %v1934_v23 = vmax.f32 %v534_v48, %v535_v62  ;;  %v557_v10 = vrot.slane %v556_v63, 2  ;;  %v563_v11 = vrot.slane %v562_v56, 4  ;;  %v543_v28 = vrot.slane %v542_v3, 1 }
  0x4d   :  { %v551_v15 = vrot.slane %v550_v4, 1  ;;  %v571_v33 = vrot.slane %v570_v12, 4  ;;  %v578_v16 = vmax.f32 %v86_v54, %v577_v6  ;;  %v585_v47 = vsel %vm264_vm0, %v89_v0, -inf  ;;  %v94_v54 = vld [vmem:[%s3022_s0 + $0x2b0] sm:$0xff]  ;;  %v97_v0 = vld [vmem:[%s3022_s0 + $0x2c8] sm:$0x1] }
  0x4e   :  { %v558_v44 = vmax.f32 %v556_v63, %v557_v10  ;;  %v564_v45 = vmax.f32 %v562_v56, %v563_v11  ;;  %v593_v48 = vsel %vm264_vm0, %v91_v2, -inf  ;;  %v1950_v39 = vmax.f32 %v542_v3, %v543_v28 }
  0x4f   :  { %v1952_v49 = vmax.f32 %v550_v4, %v551_v15  ;;  %v572_v40 = vmax.f32 %v570_v12, %v571_v33  ;;  %v579_v57 = vrot.slane %v578_v16, 4  ;;  %v586_v63 = vmax.f32 %v88_v14, %v585_v47  ;;  %v96_v14 = vld [vmem:[%s3022_s0 + $0x2c0] sm:$0xff] }
  0x50   :  { %v559_v61 = vrot.slane %v558_v44, 1  ;;  %v565_v62 = vrot.slane %v564_v45, 2  ;;  %v594_v56 = vmax.f32 %v90_v21, %v593_v48  ;;  %v601_v4 = vsel %vm264_vm0, %v93_v37, -inf }
  0x51   :  { %3026 = vst [vmem:[#allocation4_spill] sm:$0xff] %v1952_v49  ;;  %v573_v2 = vrot.slane %v572_v40, 2  ;;  %v580_v3 = vmax.f32 %v578_v16, %v579_v57  ;;  %v609_v12 = vsel %vm264_vm0, %v95_v38, -inf  ;;  %v587_v11 = vrot.slane %v586_v63, 4  ;;  %v99_v38 = vld [vmem:[%s3022_s0 + $0x2d8] sm:$0x1] }
  0x52   :  { %v1965_v6 = vmax.f32 %v558_v44, %v559_v61  ;;  %v566_v10 = vmax.f32 %v564_v45, %v565_v62  ;;  %v595_v28 = vrot.slane %v594_v56, 4  ;;  %v602_v33 = vmax.f32 %v92_v53, %v601_v4 }
  0x53   :  { %v574_v21 = vmax.f32 %v572_v40, %v573_v2  ;;  %v581_v15 = vrot.slane %v580_v3, 2  ;;  %v610_v47 = vmax.f32 %v94_v54, %v609_v12  ;;  %v588_v46 = vmax.f32 %v586_v63, %v587_v11  ;;  %v98_v40 = vld [vmem:[%s3022_s0 + $0x2d0] sm:$0xff]  ;;  %v100_v12 = vld [vmem:[%s3022_s0 + $0x2e0] sm:$0xff] }
  0x54   :  { %3027 = vst [vmem:[#allocation5_spill] sm:$0xff] %v1965_v6  ;;  %v567_v48 = vrot.slane %v566_v10, 1  ;;  %v596_v16 = vmax.f32 %v594_v56, %v595_v28  ;;  %v617_v37 = vsel %vm264_vm0, %v97_v0, -inf  ;;  %v603_v57 = vrot.slane %v602_v33, 4  ;;  %v101_v56 = vld [vmem:[%s3022_s0 + $0x2e8] sm:$0x1] }
  0x55   :  { %v575_v44 = vrot.slane %v574_v21, 1  ;;  %v582_v45 = vmax.f32 %v580_v3, %v581_v15  ;;  %v611_v61 = vrot.slane %v610_v47, 4  ;;  %v589_v53 = vrot.slane %v588_v46, 2  ;;  %v110_v6 = vld [vmem:[%s3022_s0 + $0x330] sm:$0xff] }
  0x56   :  { %v1977_v62 = vmax.f32 %v566_v10, %v567_v48  ;;  %v597_v54 = vrot.slane %v596_v16, 2  ;;  %v618_v63 = vmax.f32 %v96_v14, %v617_v37  ;;  %v604_v4 = vmax.f32 %v602_v33, %v603_v57  ;;  %v103_v14 = vld [vmem:[%s3022_s0 + $0x2f8] sm:$0x1] }
  0x57   :  { %v1982_v0 = vmax.f32 %v574_v21, %v575_v44  ;;  %v583_v2 = vrot.slane %v582_v45, 1  ;;  %v612_v3 = vmax.f32 %v610_v47, %v611_v61  ;;  %v590_v11 = vmax.f32 %v588_v46, %v589_v53  ;;  %v102_v46 = vld [vmem:[%s3022_s0 + $0x2f0] sm:$0xff] }
  0x58   :  { %3028 = vst [vmem:[#allocation6_spill] sm:$0xff] %v1977_v62  ;;  %v598_v28 = vmax.f32 %v596_v16, %v597_v54  ;;  %v619_v10 = vrot.slane %v618_v63, 4  ;;  %v625_v15 = vsel %vm264_vm0, %v99_v38, -inf  ;;  %v605_v21 = vrot.slane %v604_v4, 2  ;;  %v105_v16 = vld [vmem:[%s3022_s0 + $0x308] sm:$0x1] }
  0x59   :  { %3029 = vst [vmem:[#allocation7_spill] sm:$0xff] %v1982_v0  ;;  %v1991_v48 = vmax.f32 %v582_v45, %v583_v2  ;;  %v613_v37 = vrot.slane %v612_v3, 2  ;;  %v626_v44 = vmax.f32 %v98_v40, %v625_v15  ;;  %v591_v33 = vrot.slane %v590_v11, 1  ;;  %v107_v38 = vld [vmem:[%s3022_s0 + $0x318] sm:$0x1]  ;;  %v104_v15 = vld [vmem:[%s3022_s0 + $0x300] sm:$0xff] }
  0x5a   :  { %v599_v47 = vrot.slane %v598_v28, 1  ;;  %v620_v57 = vmax.f32 %v618_v63, %v619_v10  ;;  %v633_v61 = vsel %vm264_vm0, %v101_v56, -inf  ;;  %v606_v45 = vmax.f32 %v604_v4, %v605_v21  ;;  %v108_v62 = vld [vmem:[%s3022_s0 + $0x320] sm:$0xff] }
  0x5b   :  { %3030 = vst [vmem:[#allocation8_spill] sm:$0xff] %v1991_v48  ;;  %v614_v53 = vmax.f32 %v612_v3, %v613_v37  ;;  %v627_v40 = vrot.slane %v626_v44, 4  ;;  %v634_v54 = vmax.f32 %v100_v12, %v633_v61  ;;  %v2003_v2 = vmax.f32 %v590_v11, %v591_v33  ;;  %v106_v48 = vld [vmem:[%s3022_s0 + $0x310] sm:$0xff]  ;;  %v109_v12 = vld [vmem:[%s3022_s0 + $0x328] sm:$0x1] }
  0x5c   :  { %v2005_v63 = vmax.f32 %v598_v28, %v599_v47  ;;  %v621_v56 = vrot.slane %v620_v57, 2  ;;  %v641_v10 = vsel %vm264_vm0, %v103_v14, -inf  ;;  %v607_v0 = vrot.slane %v606_v45, 1  ;;  %v111_v11 = vld [vmem:[%s3022_s0 + $0x338] sm:$0x1] }
  0x5d   :  { %v615_v4 = vrot.slane %v614_v53, 1  ;;  %v628_v3 = vmax.f32 %v626_v44, %v627_v40  ;;  %v635_v21 = vrot.slane %v634_v54, 4  ;;  %v642_v14 = vmax.f32 %v102_v46, %v641_v10 }
  0x5e   :  { %v622_v28 = vmax.f32 %v620_v57, %v621_v56  ;;  %v649_v37 = vsel %vm264_vm0, %v105_v16, -inf  ;;  %v657_v33 = vsel %vm264_vm0, %v107_v38, -inf  ;;  %v2022_v47 = vmax.f32 %v606_v45, %v607_v0  ;;  %v113_v0 = vld [vmem:[%s3022_s0 + $0x348] sm:$0x1] }
  0x5f   :  { %v2024_v61 = vmax.f32 %v614_v53, %v615_v4  ;;  %v629_v44 = vrot.slane %v628_v3, 2  ;;  %v636_v40 = vmax.f32 %v634_v54, %v635_v21  ;;  %v643_v46 = vrot.slane %v642_v14, 4 }
  0x60   :  { %3031 = vst [vmem:[#allocation9_spill] sm:$0xff] %v2022_v47  ;;  %v623_v57 = vrot.slane %v622_v28, 1  ;;  %v650_v56 = vmax.f32 %v104_v15, %v649_v37  ;;  %v658_v16 = vmax.f32 %v106_v48, %v657_v33  ;;  %v665_v53 = vsel %vm264_vm0, %v109_v12, -inf  ;;  %v112_v15 = vld [vmem:[%s3022_s0 + $0x340] sm:$0xff] }
  0x61   :  { %3032 = vst [vmem:[#allocation10_spill] sm:$0xff] %v2024_v61  ;;  %v630_v38 = vmax.f32 %v628_v3, %v629_v44  ;;  %v637_v45 = vrot.slane %v636_v40, 2  ;;  %v673_v54 = vsel %vm264_vm0, %v111_v11, -inf  ;;  %v644_v4 = vmax.f32 %v642_v14, %v643_v46  ;;  %v115_v3 = vld [vmem:[%s3022_s0 + $0x358] sm:$0x1] }
  0x62   :  { %v2037_v10 = vmax.f32 %v622_v28, %v623_v57  ;;  %v651_v21 = vrot.slane %v650_v56, 4  ;;  %v659_v61 = vrot.slane %v658_v16, 4  ;;  %v666_v33 = vmax.f32 %v108_v62, %v665_v53 }
  0x63   :  { %v631_v48 = vrot.slane %v630_v38, 1  ;;  %v638_v37 = vmax.f32 %v636_v40, %v637_v45  ;;  %v674_v47 = vmax.f32 %v110_v6, %v673_v54  ;;  %v645_v12 = vrot.slane %v644_v4, 2  ;;  %v114_v40 = vld [vmem:[%s3022_s0 + $0x350] sm:$0xff]  ;;  %v117_v6 = vld [vmem:[%s3022_s0 + $0x368] sm:$0x1]  ;;  %v116_v54 = vld [vmem:[%s3022_s0 + $0x360] sm:$0xff] }
  0x64   :  { %3033 = vst [vmem:[#allocation11_spill] sm:$0xff] %v2037_v10  ;;  %v652_v44 = vmax.f32 %v650_v56, %v651_v21  ;;  %v660_v11 = vmax.f32 %v658_v16, %v659_v61  ;;  %v681_v28 = vsel %vm264_vm0, %v113_v0, -inf  ;;  %v667_v46 = vrot.slane %v666_v33, 4 }
  0x65   :  { %v2046_v14 = vmax.f32 %v630_v38, %v631_v48  ;;  %v639_v57 = vrot.slane %v638_v37, 1  ;;  %v675_v10 = vrot.slane %v674_v47, 4  ;;  %v646_v62 = vmax.f32 %v644_v4, %v645_v12  ;;  %v119_v4 = vld [vmem:[%s3022_s0 + $0x378] sm:$0x1] }
  0x66   :  { %v653_v45 = vrot.slane %v652_v44, 2  ;;  %v661_v53 = vrot.slane %v660_v11, 2  ;;  %v682_v56 = vmax.f32 %v112_v15, %v681_v28  ;;  %v668_v16 = vmax.f32 %v666_v33, %v667_v46 }
  0x67   :  { %3034 = vst [vmem:[#allocation12_spill] sm:$0xff] %v2046_v14  ;;  %v2054_v61 = vmax.f32 %v638_v37, %v639_v57  ;;  %v676_v0 = vmax.f32 %v674_v47, %v675_v10  ;;  %v689_v38 = vsel %vm264_vm0, %v115_v3, -inf  ;;  %v647_v21 = vrot.slane %v646_v62, 1  ;;  %v123_v57 = vld [vmem:[%s3022_s0 + $0x398] sm:$0x1] }
  0x68   :  { %v654_v48 = vmax.f32 %v652_v44, %v653_v45  ;;  %v662_v14 = vmax.f32 %v660_v11, %v661_v53  ;;  %v683_v49 = vrot.slane %v682_v56, 4  ;;  %v669_v12 = vrot.slane %v668_v16, 2  ;;  %v118_v44 = vld [vmem:[%s3022_s0 + $0x370] sm:$0xff]  ;;  %v121_v11 = vld [vmem:[%s3022_s0 + $0x388] sm:$0x1] }
  0x69   :  { %3035 = vst [vmem:[#allocation13_spill] sm:$0xff] %v2054_v61  ;;  %v677_v15 = vrot.slane %v676_v0, 2  ;;  %v690_v37 = vmax.f32 %v114_v40, %v689_v38  ;;  %v697_v33 = vsel %vm264_vm0, %v117_v6, -inf  ;;  %v2064_v47 = vmax.f32 %v646_v62, %v647_v21  ;;  %v120_v38 = vld [vmem:[%s3022_s0 + $0x380] sm:$0xff]  ;;  %v122_v21 = vld [vmem:[%s3022_s0 + $0x390] sm:$0xff] }
  0x6a   :  { %v655_v10 = vrot.slane %v654_v48, 1  ;;  %v663_v3 = vrot.slane %v662_v14, 1  ;;  %v684_v28 = vmax.f32 %v682_v56, %v683_v49  ;;  %v670_v46 = vmax.f32 %v668_v16, %v669_v12  ;;  %v124_v61 = vld [vmem:[%s3022_s0 + $0x3a0] sm:$0xff] }
  0x6b   :  { %3036 = vst [vmem:[#allocation14_spill] sm:$0xff] %v2064_v47  ;;  %v678_v40 = vmax.f32 %v676_v0, %v677_v15  ;;  %v691_v6 = vrot.slane %v690_v37, 4  ;;  %v698_v62 = vmax.f32 %v116_v54, %v697_v33  ;;  %v705_v56 = vsel %vm264_vm0, %v119_v4, -inf  ;;  %v127_v54 = vld [vmem:[%s3022_s0 + $0x3b8] sm:$0x1] }
  0x6c   :  { %v2075_v45 = vmax.f32 %v654_v48, %v655_v10  ;;  %v2077_v53 = vmax.f32 %v662_v14, %v663_v3  ;;  %v685_v49 = vrot.slane %v684_v28, 2  ;;  %v671_v47 = vrot.slane %v670_v46, 1  ;;  %v125_v14 = vld [vmem:[%s3022_s0 + $0x3a8] sm:$0x1] }
  0x6d   :  { %v679_v16 = vrot.slane %v678_v40, 1  ;;  %v692_v0 = vmax.f32 %v690_v37, %v691_v6  ;;  %v699_v12 = vrot.slane %v698_v62, 4  ;;  %v706_v4 = vmax.f32 %v118_v44, %v705_v56 }
  0x6e   :  { %3037 = vst [vmem:[#allocation15_spill] sm:$0xff] %v2075_v45  ;;  %3038 = vst [vmem:[#allocation16_spill] sm:$0xff] %v2077_v53  ;;  %v686_v48 = vmax.f32 %v684_v28, %v685_v49  ;;  %v713_v15 = vsel %vm264_vm0, %v121_v11, -inf  ;;  %v721_v33 = vsel %vm264_vm0, %v123_v57, -inf  ;;  %v2094_v10 = vmax.f32 %v670_v46, %v671_v47  ;;  %v126_v53 = vld [vmem:[%s3022_s0 + $0x3b0] sm:$0xff] }
  0x6f   :  { %v2096_v3 = vmax.f32 %v678_v40, %v679_v16  ;;  %v693_v37 = vrot.slane %v692_v0, 2  ;;  %v700_v6 = vmax.f32 %v698_v62, %v699_v12  ;;  %v707_v44 = vrot.slane %v706_v4, 4  ;;  %v129_v47 = vld [vmem:[%s3022_s0 + $0x3c8] sm:$0x1] }
  0x70   :  { %3039 = vst [vmem:[#allocation17_spill] sm:$0xff] %v2094_v10  ;;  %v687_v28 = vrot.slane %v686_v48, 1  ;;  %v714_v49 = vmax.f32 %v120_v38, %v713_v15  ;;  %v722_v11 = vmax.f32 %v122_v21, %v721_v33  ;;  %v729_v40 = vsel %vm264_vm0, %v125_v14, -inf  ;;  %v128_v38 = vld [vmem:[%s3022_s0 + $0x3c0] sm:$0xff] }
  0x71   :  { %3040 = vst [vmem:[#allocation18_spill] sm:$0xff] %v2096_v3  ;;  %v694_v57 = vmax.f32 %v692_v0, %v693_v37  ;;  %v701_v46 = vrot.slane %v700_v6, 2  ;;  %v737_v62 = vsel %vm264_vm0, %v127_v54, -inf  ;;  %v708_v16 = vmax.f32 %v706_v4, %v707_v44  ;;  %v131_v0 = vld [vmem:[%s3022_s0 + $0x3d8] sm:$0x1] }
  0x72   :  { %v2109_v56 = vmax.f32 %v686_v48, %v687_v28  ;;  %v715_v12 = vrot.slane %v714_v49, 4  ;;  %v723_v3 = vrot.slane %v722_v11, 4  ;;  %v730_v33 = vmax.f32 %v124_v61, %v729_v40  ;;  %v133_v61 = vld [vmem:[%s3022_s0 + $0x3e8] sm:$0x1] }
  0x73   :  { %v695_v21 = vrot.slane %v694_v57, 1  ;;  %v702_v15 = vmax.f32 %v700_v6, %v701_v46  ;;  %v738_v10 = vmax.f32 %v126_v53, %v737_v62  ;;  %v709_v14 = vrot.slane %v708_v16, 2  ;;  %v130_v6 = vld [vmem:[%s3022_s0 + $0x3d0] sm:$0xff]  ;;  %v132_v62 = vld [vmem:[%s3022_s0 + $0x3e0] sm:$0xff] }
  0x74   :  { %3041 = vst [vmem:[#allocation19_spill] sm:$0xff] %v2109_v56  ;;  %v716_v37 = vmax.f32 %v714_v49, %v715_v12  ;;  %v724_v54 = vmax.f32 %v722_v11, %v723_v3  ;;  %v745_v48 = vsel %vm264_vm0, %v129_v47, -inf  ;;  %v731_v44 = vrot.slane %v730_v33, 4 }
  0x75   :  { %v2118_v4 = vmax.f32 %v694_v57, %v695_v21  ;;  %v703_v28 = vrot.slane %v702_v15, 1  ;;  %v739_v56 = vrot.slane %v738_v10, 4  ;;  %v710_v53 = vmax.f32 %v708_v16, %v709_v14  ;;  %v135_v16 = vld [vmem:[%s3022_s0 + $0x3f8] sm:$0x1] }
  0x76   :  { %v717_v46 = vrot.slane %v716_v37, 2  ;;  %v725_v40 = vrot.slane %v724_v54, 2  ;;  %v746_v49 = vmax.f32 %v128_v38, %v745_v48  ;;  %v732_v11 = vmax.f32 %v730_v33, %v731_v44 }
  0x77   :  { %3042 = vst [vmem:[#allocation20_spill] sm:$0xff] %v2118_v4  ;;  %v2126_v3 = vmax.f32 %v702_v15, %v703_v28  ;;  %v740_v47 = vmax.f32 %v738_v10, %v739_v56  ;;  %v753_v57 = vsel %vm264_vm0, %v131_v0, -inf  ;;  %v711_v12 = vrot.slane %v710_v53, 1  ;;  %v139_v28 = vld [vmem:[%s3022_s0 + $0x418] sm:$0x1] }
  0x78   :  { %v718_v21 = vmax.f32 %v716_v37, %v717_v46  ;;  %v726_v4 = vmax.f32 %v724_v54, %v725_v40  ;;  %v747_v45 = vrot.slane %v746_v49, 4  ;;  %v733_v14 = vrot.slane %v732_v11, 2  ;;  %v134_v37 = vld [vmem:[%s3022_s0 + $0x3f0] sm:$0xff]  ;;  %v137_v54 = vld [vmem:[%s3022_s0 + $0x408] sm:$0x1] }
  0x79   :  { %3043 = vst [vmem:[#allocation21_spill] sm:$0xff] %v2126_v3  ;;  %v741_v38 = vrot.slane %v740_v47, 2  ;;  %v754_v15 = vmax.f32 %v130_v6, %v753_v57  ;;  %v761_v33 = vsel %vm264_vm0, %v133_v61, -inf  ;;  %v2136_v10 = vmax.f32 %v710_v53, %v711_v12  ;;  %v136_v57 = vld [vmem:[%s3022_s0 + $0x400] sm:$0xff]  ;;  %v138_v12 = vld [vmem:[%s3022_s0 + $0x410] sm:$0xff] }
  0x7a   :  { %v719_v56 = vrot.slane %v718_v21, 1  ;;  %v727_v0 = vrot.slane %v726_v4, 1  ;;  %v748_v48 = vmax.f32 %v746_v49, %v747_v45  ;;  %v734_v44 = vmax.f32 %v732_v11, %v733_v14  ;;  %v140_v3 = vld [vmem:[%s3022_s0 + $0x420] sm:$0xff] }
  0x7b   :  { %3044 = vst [vmem:[#allocation22_spill] sm:$0xff] %v2136_v10  ;;  %v742_v6 = vmax.f32 %v740_v47, %v741_v38  ;;  %v755_v61 = vrot.slane %v754_v15, 4  ;;  %v762_v53 = vmax.f32 %v132_v62, %v761_v33  ;;  %v769_v49 = vsel %vm264_vm0, %v135_v16, -inf  ;;  %v143_v62 = vld [vmem:[%s3022_s0 + $0x438] sm:$0x1] }
  0x7c   :  { %v2147_v46 = vmax.f32 %v718_v21, %v719_v56  ;;  %v2149_v40 = vmax.f32 %v726_v4, %v727_v0  ;;  %v749_v45 = vrot.slane %v748_v48, 2  ;;  %v735_v10 = vrot.slane %v734_v44, 1  ;;  %v141_v4 = vld [vmem:[%s3022_s0 + $0x428] sm:$0x1] }
  0x7d   :  { %v743_v11 = vrot.slane %v742_v6, 1  ;;  %v756_v47 = vmax.f32 %v754_v15, %v755_v61  ;;  %v763_v14 = vrot.slane %v762_v53, 4  ;;  %v770_v16 = vmax.f32 %v134_v37, %v769_v49 }
  0x7e   :  { %3045 = vst [vmem:[#allocation23_spill] sm:$0xff] %v2147_v46  ;;  %3046 = vst [vmem:[#allocation24_spill] sm:$0xff] %v2149_v40  ;;  %v750_v21 = vmax.f32 %v748_v48, %v749_v45  ;;  %v777_v38 = vsel %vm264_vm0, %v137_v54, -inf  ;;  %v785_v33 = vsel %vm264_vm0, %v139_v28, -inf  ;;  %v2166_v56 = vmax.f32 %v734_v44, %v735_v10  ;;  %v142_v40 = vld [vmem:[%s3022_s0 + $0x430] sm:$0xff] }
  0x7f   :  { %v2168_v0 = vmax.f32 %v742_v6, %v743_v11  ;;  %v757_v15 = vrot.slane %v756_v47, 2  ;;  %v764_v61 = vmax.f32 %v762_v53, %v763_v14  ;;  %v771_v37 = vrot.slane %v770_v16, 4  ;;  %v145_v10 = vld [vmem:[%s3022_s0 + $0x448] sm:$0x1] }
  0x80   :  { %3047 = vst [vmem:[#allocation25_spill] sm:$0xff] %v2166_v56  ;;  %v751_v48 = vrot.slane %v750_v21, 1  ;;  %v778_v45 = vmax.f32 %v136_v57, %v777_v38  ;;  %v786_v54 = vmax.f32 %v138_v12, %v785_v33  ;;  %v793_v6 = vsel %vm264_vm0, %v141_v4, -inf  ;;  %v144_v57 = vld [vmem:[%s3022_s0 + $0x440] sm:$0xff] }
  0x81   :  { %3048 = vst [vmem:[#allocation26_spill] sm:$0xff] %v2168_v0  ;;  %v758_v28 = vmax.f32 %v756_v47, %v757_v15  ;;  %v765_v44 = vrot.slane %v764_v61, 2  ;;  %v801_v53 = vsel %vm264_vm0, %v143_v62, -inf  ;;  %v772_v11 = vmax.f32 %v770_v16, %v771_v37  ;;  %v147_v47 = vld [vmem:[%s3022_s0 + $0x458] sm:$0x1] }
  0x82   :  { %v2181_v49 = vmax.f32 %v750_v21, %v751_v48  ;;  %v779_v14 = vrot.slane %v778_v45, 4  ;;  %v787_v0 = vrot.slane %v786_v54, 4  ;;  %v794_v33 = vmax.f32 %v140_v3, %v793_v6  ;;  %v149_v3 = vld [vmem:[%s3022_s0 + $0x468] sm:$0x1] }
  0x83   :  { %v759_v12 = vrot.slane %v758_v28, 1  ;;  %v766_v38 = vmax.f32 %v764_v61, %v765_v44  ;;  %v802_v56 = vmax.f32 %v142_v40, %v801_v53  ;;  %v773_v4 = vrot.slane %v772_v11, 2  ;;  %v146_v61 = vld [vmem:[%s3022_s0 + $0x450] sm:$0xff]  ;;  %v148_v53 = vld [vmem:[%s3022_s0 + $0x460] sm:$0xff] }
  0x84   :  { %3049 = vst [vmem:[#allocation27_spill] sm:$0xff] %v2181_v49  ;;  %v780_v15 = vmax.f32 %v778_v45, %v779_v14  ;;  %v788_v62 = vmax.f32 %v786_v54, %v787_v0  ;;  %v809_v21 = vsel %vm264_vm0, %v145_v10, -inf  ;;  %v795_v37 = vrot.slane %v794_v33, 4 }
  0x85   :  { %v2190_v16 = vmax.f32 %v758_v28, %v759_v12  ;;  %v767_v48 = vrot.slane %v766_v38, 1  ;;  %v803_v49 = vrot.slane %v802_v56, 4  ;;  %v774_v40 = vmax.f32 %v772_v11, %v773_v4  ;;  %v151_v11 = vld [vmem:[%s3022_s0 + $0x478] sm:$0x1] }
  0x86   :  { %v781_v44 = vrot.slane %v780_v15, 2  ;;  %v789_v6 = vrot.slane %v788_v62, 2  ;;  %v810_v45 = vmax.f32 %v144_v57, %v809_v21  ;;  %v796_v54 = vmax.f32 %v794_v33, %v795_v37 }
  0x87   :  { %3050 = vst [vmem:[#allocation28_spill] sm:$0xff] %v2190_v16  ;;  %v2198_v0 = vmax.f32 %v766_v38, %v767_v48  ;;  %v804_v10 = vmax.f32 %v802_v56, %v803_v49  ;;  %v817_v28 = vsel %vm264_vm0, %v147_v47, -inf  ;;  %v775_v14 = vrot.slane %v774_v40, 1  ;;  %v155_v48 = vld [vmem:[%s3022_s0 + $0x498] sm:$0x1] }
  0x88   :  { %v782_v12 = vmax.f32 %v780_v15, %v781_v44  ;;  %v790_v16 = vmax.f32 %v788_v62, %v789_v6  ;;  %v811_v46 = vrot.slane %v810_v45, 4  ;;  %v797_v4 = vrot.slane %v796_v54, 2  ;;  %v150_v15 = vld [vmem:[%s3022_s0 + $0x470] sm:$0xff]  ;;  %v153_v62 = vld [vmem:[%s3022_s0 + $0x488] sm:$0x1] }
  0x89   :  { %3051 = vst [vmem:[#allocation29_spill] sm:$0xff] %v2198_v0  ;;  %v805_v57 = vrot.slane %v804_v10, 2  ;;  %v818_v38 = vmax.f32 %v146_v61, %v817_v28  ;;  %v825_v33 = vsel %vm264_vm0, %v149_v3, -inf  ;;  %v2208_v56 = vmax.f32 %v774_v40, %v775_v14  ;;  %v152_v28 = vld [vmem:[%s3022_s0 + $0x480] sm:$0xff]  ;;  %v154_v14 = vld [vmem:[%s3022_s0 + $0x490] sm:$0xff] }
  0x8a   :  { %v783_v49 = vrot.slane %v782_v12, 1  ;;  %v791_v47 = vrot.slane %v790_v16, 1  ;;  %v812_v21 = vmax.f32 %v810_v45, %v811_v46  ;;  %v798_v37 = vmax.f32 %v796_v54, %v797_v4  ;;  %v156_v0 = vld [vmem:[%s3022_s0 + $0x4a0] sm:$0xff] }
  0x8b   :  { %3052 = vst [vmem:[#allocation30_spill] sm:$0xff] %v2208_v56  ;;  %v806_v61 = vmax.f32 %v804_v10, %v805_v57  ;;  %v819_v3 = vrot.slane %v818_v38, 4  ;;  %v826_v40 = vmax.f32 %v148_v53, %v825_v33  ;;  %v833_v45 = vsel %vm264_vm0, %v151_v11, -inf  ;;  %v159_v53 = vld [vmem:[%s3022_s0 + $0x4b8] sm:$0x1] }
  0x8c   :  { %v2219_v44 = vmax.f32 %v782_v12, %v783_v49  ;;  %v2221_v6 = vmax.f32 %v790_v16, %v791_v47  ;;  %v813_v46 = vrot.slane %v812_v21, 2  ;;  %v799_v56 = vrot.slane %v798_v37, 1  ;;  %v157_v16 = vld [vmem:[%s3022_s0 + $0x4a8] sm:$0x1] }
  0x8d   :  { %v807_v54 = vrot.slane %v806_v61, 1  ;;  %v820_v10 = vmax.f32 %v818_v38, %v819_v3  ;;  %v827_v4 = vrot.slane %v826_v40, 4  ;;  %v834_v11 = vmax.f32 %v150_v15, %v833_v45 }
  0x8e   :  { %3053 = vst [vmem:[#allocation31_spill] sm:$0xff] %v2219_v44  ;;  %3054 = vst [vmem:[#allocation32_spill] sm:$0xff] %v2221_v6  ;;  %v814_v12 = vmax.f32 %v812_v21, %v813_v46  ;;  %v841_v57 = vsel %vm264_vm0, %v153_v62, -inf  ;;  %v849_v33 = vsel %vm264_vm0, %v155_v48, -inf  ;;  %v2238_v49 = vmax.f32 %v798_v37, %v799_v56  ;;  %v158_v6 = vld [vmem:[%s3022_s0 + $0x4b0] sm:$0xff] }
  0x8f   :  { %v2240_v47 = vmax.f32 %v806_v61, %v807_v54  ;;  %v821_v38 = vrot.slane %v820_v10, 2  ;;  %v828_v3 = vmax.f32 %v826_v40, %v827_v4  ;;  %v835_v15 = vrot.slane %v834_v11, 4  ;;  %v161_v56 = vld [vmem:[%s3022_s0 + $0x4c8] sm:$0x1] }
  0x90   :  { %3055 = vst [vmem:[#allocation33_spill] sm:$0xff] %v2238_v49  ;;  %v815_v21 = vrot.slane %v814_v12, 1  ;;  %v842_v46 = vmax.f32 %v152_v28, %v841_v57  ;;  %v850_v62 = vmax.f32 %v154_v14, %v849_v33  ;;  %v857_v61 = vsel %vm264_vm0, %v157_v16, -inf  ;;  %v160_v28 = vld [vmem:[%s3022_s0 + $0x4c0] sm:$0xff] }
  0x91   :  { %3056 = vst [vmem:[#allocation34_spill] sm:$0xff] %v2240_v47  ;;  %v822_v48 = vmax.f32 %v820_v10, %v821_v38  ;;  %v829_v37 = vrot.slane %v828_v3, 2  ;;  %v865_v40 = vsel %vm264_vm0, %v159_v53, -inf  ;;  %v836_v54 = vmax.f32 %v834_v11, %v835_v15  ;;  %v163_v10 = vld [vmem:[%s3022_s0 + $0x4d8] sm:$0x1] }
  0x92   :  { %v2253_v45 = vmax.f32 %v814_v12, %v815_v21  ;;  %v843_v4 = vrot.slane %v842_v46, 4  ;;  %v851_v47 = vrot.slane %v850_v62, 4  ;;  %v858_v33 = vmax.f32 %v156_v0, %v857_v61  ;;  %v165_v0 = vld [vmem:[%s3022_s0 + $0x4e8] sm:$0x1] }
  0x93   :  { %v823_v14 = vrot.slane %v822_v48, 1  ;;  %v830_v57 = vmax.f32 %v828_v3, %v829_v37  ;;  %v866_v49 = vmax.f32 %v158_v6, %v865_v40  ;;  %v837_v16 = vrot.slane %v836_v54, 2  ;;  %v162_v3 = vld [vmem:[%s3022_s0 + $0x4d0] sm:$0xff]  ;;  %v164_v40 = vld [vmem:[%s3022_s0 + $0x4e0] sm:$0xff] }
  0x94   :  { %3057 = vst [vmem:[#allocation35_spill] sm:$0xff] %v2253_v45  ;;  %v844_v38 = vmax.f32 %v842_v46, %v843_v4  ;;  %v852_v53 = vmax.f32 %v850_v62, %v851_v47  ;;  %v873_v12 = vsel %vm264_vm0, %v161_v56, -inf  ;;  %v859_v15 = vrot.slane %v858_v33, 4 }
  0x95   :  { %v2262_v11 = vmax.f32 %v822_v48, %v823_v14  ;;  %v831_v21 = vrot.slane %v830_v57, 1  ;;  %v867_v45 = vrot.slane %v866_v49, 4  ;;  %v838_v6 = vmax.f32 %v836_v54, %v837_v16  ;;  %v167_v54 = vld [vmem:[%s3022_s0 + $0x4f8] sm:$0x1] }
  0x96   :  { %v845_v37 = vrot.slane %v844_v38, 2  ;;  %v853_v61 = vrot.slane %v852_v53, 2  ;;  %v874_v46 = vmax.f32 %v160_v28, %v873_v12  ;;  %v860_v62 = vmax.f32 %v858_v33, %v859_v15 }
  0x97   :  { %3058 = vst [vmem:[#allocation36_spill] sm:$0xff] %v2262_v11  ;;  %v2270_v47 = vmax.f32 %v830_v57, %v831_v21  ;;  %v868_v56 = vmax.f32 %v866_v49, %v867_v45  ;;  %v881_v48 = vsel %vm264_vm0, %v163_v10, -inf  ;;  %v839_v4 = vrot.slane %v838_v6, 1  ;;  %v171_v21 = vld [vmem:[%s3022_s0 + $0x518] sm:$0x1] }
  0x98   :  { %v846_v14 = vmax.f32 %v844_v38, %v845_v37  ;;  %v854_v11 = vmax.f32 %v852_v53, %v853_v61  ;;  %v875_v44 = vrot.slane %v874_v46, 4  ;;  %v861_v16 = vrot.slane %v860_v62, 2  ;;  %v166_v38 = vld [vmem:[%s3022_s0 + $0x4f0] sm:$0xff]  ;;  %v169_v53 = vld [vmem:[%s3022_s0 + $0x508] sm:$0x1] }
  0x99   :  { %3059 = vst [vmem:[#allocation37_spill] sm:$0xff] %v2270_v47  ;;  %v869_v28 = vrot.slane %v868_v56, 2  ;;  %v882_v57 = vmax.f32 %v162_v3, %v881_v48  ;;  %v889_v33 = vsel %vm264_vm0, %v165_v0, -inf  ;;  %v2280_v49 = vmax.f32 %v838_v6, %v839_v4  ;;  %v168_v48 = vld [vmem:[%s3022_s0 + $0x500] sm:$0xff]  ;;  %v170_v4 = vld [vmem:[%s3022_s0 + $0x510] sm:$0xff] }
  0x9a   :  { %v847_v45 = vrot.slane %v846_v14, 1  ;;  %v855_v10 = vrot.slane %v854_v11, 1  ;;  %v876_v12 = vmax.f32 %v874_v46, %v875_v44  ;;  %v862_v15 = vmax.f32 %v860_v62, %v861_v16  ;;  %v172_v47 = vld [vmem:[%s3022_s0 + $0x520] sm:$0xff] }
  0x9b   :  { %3060 = vst [vmem:[#allocation38_spill] sm:$0xff] %v2280_v49  ;;  %v870_v3 = vmax.f32 %v868_v56, %v869_v28  ;;  %v883_v0 = vrot.slane %v882_v57, 4  ;;  %v890_v6 = vmax.f32 %v164_v40, %v889_v33  ;;  %v897_v46 = vsel %vm264_vm0, %v167_v54, -inf  ;;  %v175_v40 = vld [vmem:[%s3022_s0 + $0x538] sm:$0x1] }
  0x9c   :  { %v2291_v37 = vmax.f32 %v846_v14, %v847_v45  ;;  %v2293_v61 = vmax.f32 %v854_v11, %v855_v10  ;;  %v877_v44 = vrot.slane %v876_v12, 2  ;;  %v863_v49 = vrot.slane %v862_v15, 1  ;;  %v173_v11 = vld [vmem:[%s3022_s0 + $0x528] sm:$0x1] }
  0x9d   :  { %v871_v62 = vrot.slane %v870_v3, 1  ;;  %v884_v56 = vmax.f32 %v882_v57, %v883_v0  ;;  %v891_v16 = vrot.slane %v890_v6, 4  ;;  %v898_v54 = vmax.f32 %v166_v38, %v897_v46 }
  0x9e   :  { %3061 = vst [vmem:[#allocation39_spill] sm:$0xff] %v2291_v37  ;;  %3062 = vst [vmem:[#allocation40_spill] sm:$0xff] %v2293_v61  ;;  %v878_v14 = vmax.f32 %v876_v12, %v877_v44  ;;  %v905_v28 = vsel %vm264_vm0, %v169_v53, -inf  ;;  %v913_v33 = vsel %vm264_vm0, %v171_v21, -inf  ;;  %v2310_v45 = vmax.f32 %v862_v15, %v863_v49  ;;  %v174_v61 = vld [vmem:[%s3022_s0 + $0x530] sm:$0xff] }
  0x9f   :  { %v2312_v10 = vmax.f32 %v870_v3, %v871_v62  ;;  %v885_v57 = vrot.slane %v884_v56, 2  ;;  %v892_v0 = vmax.f32 %v890_v6, %v891_v16  ;;  %v899_v38 = vrot.slane %v898_v54, 4  ;;  %v177_v49 = vld [vmem:[%s3022_s0 + $0x548] sm:$0x1] }
  0xa0   :  { %3063 = vst [vmem:[#allocation41_spill] sm:$0xff] %v2310_v45  ;;  %v879_v12 = vrot.slane %v878_v14, 1  ;;  %v906_v44 = vmax.f32 %v168_v48, %v905_v28  ;;  %v914_v53 = vmax.f32 %v170_v4, %v913_v33  ;;  %v921_v3 = vsel %vm264_vm0, %v173_v11, -inf  ;;  %v176_v48 = vld [vmem:[%s3022_s0 + $0x540] sm:$0xff] }
  0xa1   :  { %3064 = vst [vmem:[#allocation42_spill] sm:$0xff] %v2312_v10  ;;  %v886_v21 = vmax.f32 %v884_v56, %v885_v57  ;;  %v893_v15 = vrot.slane %v892_v0, 2  ;;  %v929_v6 = vsel %vm264_vm0, %v175_v40, -inf  ;;  %v900_v62 = vmax.f32 %v898_v54, %v899_v38  ;;  %v179_v56 = vld [vmem:[%s3022_s0 + $0x558] sm:$0x1] }
  0xa2   :  { %v2325_v46 = vmax.f32 %v878_v14, %v879_v12  ;;  %v907_v16 = vrot.slane %v906_v44, 4  ;;  %v915_v10 = vrot.slane %v914_v53, 4  ;;  %v922_v33 = vmax.f32 %v172_v47, %v921_v3  ;;  %v181_v47 = vld [vmem:[%s3022_s0 + $0x568] sm:$0x1] }
  0xa3   :  { %v887_v4 = vrot.slane %v886_v21, 1  ;;  %v894_v28 = vmax.f32 %v892_v0, %v893_v15  ;;  %v930_v45 = vmax.f32 %v174_v61, %v929_v6  ;;  %v901_v11 = vrot.slane %v900_v62, 2  ;;  %v178_v0 = vld [vmem:[%s3022_s0 + $0x550] sm:$0xff]  ;;  %v180_v6 = vld [vmem:[%s3022_s0 + $0x560] sm:$0xff] }
  0xa4   :  { %3065 = vst [vmem:[#allocation43_spill] sm:$0xff] %v2325_v46  ;;  %v908_v57 = vmax.f32 %v906_v44, %v907_v16  ;;  %v916_v40 = vmax.f32 %v914_v53, %v915_v10  ;;  %v937_v14 = vsel %vm264_vm0, %v177_v49, -inf  ;;  %v923_v38 = vrot.slane %v922_v33, 4 }
  0xa5   :  { %v2334_v54 = vmax.f32 %v886_v21, %v887_v4  ;;  %v895_v12 = vrot.slane %v894_v28, 1  ;;  %v931_v46 = vrot.slane %v930_v45, 4  ;;  %v902_v61 = vmax.f32 %v900_v62, %v901_v11  ;;  %v183_v62 = vld [vmem:[%s3022_s0 + $0x578] sm:$0x1] }
  0xa6   :  { %v909_v15 = vrot.slane %v908_v57, 2  ;;  %v917_v3 = vrot.slane %v916_v40, 2  ;;  %v938_v44 = vmax.f32 %v176_v48, %v937_v14  ;;  %v924_v53 = vmax.f32 %v922_v33, %v923_v38 }
  0xa7   :  { %3066 = vst [vmem:[#allocation44_spill] sm:$0xff] %v2334_v54  ;;  %v2342_v10 = vmax.f32 %v894_v28, %v895_v12  ;;  %v932_v49 = vmax.f32 %v930_v45, %v931_v46  ;;  %v945_v21 = vsel %vm264_vm0, %v179_v56, -inf  ;;  %v903_v16 = vrot.slane %v902_v61, 1  ;;  %v187_v12 = vld [vmem:[%s3022_s0 + $0x598] sm:$0x1] }
  0xa8   :  { %v910_v4 = vmax.f32 %v908_v57, %v909_v15  ;;  %v918_v54 = vmax.f32 %v916_v40, %v917_v3  ;;  %v939_v37 = vrot.slane %v938_v44, 4  ;;  %v925_v11 = vrot.slane %v924_v53, 2  ;;  %v182_v57 = vld [vmem:[%s3022_s0 + $0x570] sm:$0xff]  ;;  %v185_v40 = vld [vmem:[%s3022_s0 + $0x588] sm:$0x1] }
  0xa9   :  { %3067 = vst [vmem:[#allocation45_spill] sm:$0xff] %v2342_v10  ;;  %v933_v48 = vrot.slane %v932_v49, 2  ;;  %v946_v28 = vmax.f32 %v178_v0, %v945_v21  ;;  %v953_v33 = vsel %vm264_vm0, %v181_v47, -inf  ;;  %v2352_v45 = vmax.f32 %v902_v61, %v903_v16  ;;  %v184_v21 = vld [vmem:[%s3022_s0 + $0x580] sm:$0xff]  ;;  %v186_v16 = vld [vmem:[%s3022_s0 + $0x590] sm:$0xff] }
  0xaa   :  { %v911_v46 = vrot.slane %v910_v4, 1  ;;  %v919_v56 = vrot.slane %v918_v54, 1  ;;  %v940_v14 = vmax.f32 %v938_v44, %v939_v37  ;;  %v926_v38 = vmax.f32 %v924_v53, %v925_v11  ;;  %v188_v10 = vld [vmem:[%s3022_s0 + $0x5a0] sm:$0xff] }
  0xab   :  { %3068 = vst [vmem:[#allocation46_spill] sm:$0xff] %v2352_v45  ;;  %v934_v0 = vmax.f32 %v932_v49, %v933_v48  ;;  %v947_v47 = vrot.slane %v946_v28, 4  ;;  %v954_v61 = vmax.f32 %v180_v6, %v953_v33  ;;  %v961_v44 = vsel %vm264_vm0, %v183_v62, -inf  ;;  %v191_v6 = vld [vmem:[%s3022_s0 + $0x5b8] sm:$0x1] }
  0xac   :  { %v2363_v15 = vmax.f32 %v910_v4, %v911_v46  ;;  %v2365_v3 = vmax.f32 %v918_v54, %v919_v56  ;;  %v941_v37 = vrot.slane %v940_v14, 2  ;;  %v927_v45 = vrot.slane %v926_v38, 1  ;;  %v189_v54 = vld [vmem:[%s3022_s0 + $0x5a8] sm:$0x1] }
  0xad   :  { %v935_v53 = vrot.slane %v934_v0, 1  ;;  %v948_v49 = vmax.f32 %v946_v28, %v947_v47  ;;  %v955_v11 = vrot.slane %v954_v61, 4  ;;  %v962_v62 = vmax.f32 %v182_v57, %v961_v44 }
  0xae   :  { %3069 = vst [vmem:[#allocation47_spill] sm:$0xff] %v2363_v15  ;;  %3070 = vst [vmem:[#allocation48_spill] sm:$0xff] %v2365_v3  ;;  %v942_v4 = vmax.f32 %v940_v14, %v941_v37  ;;  %v969_v48 = vsel %vm264_vm0, %v185_v40, -inf  ;;  %v977_v33 = vsel %vm264_vm0, %v187_v12, -inf  ;;  %v2382_v46 = vmax.f32 %v926_v38, %v927_v45  ;;  %v190_v3 = vld [vmem:[%s3022_s0 + $0x5b0] sm:$0xff] }
  0xaf   :  { %v2384_v56 = vmax.f32 %v934_v0, %v935_v53  ;;  %v949_v28 = vrot.slane %v948_v49, 2  ;;  %v956_v47 = vmax.f32 %v954_v61, %v955_v11  ;;  %v963_v57 = vrot.slane %v962_v62, 4  ;;  %v193_v45 = vld [vmem:[%s3022_s0 + $0x5c8] sm:$0x1] }
  0xb0   :  { %3071 = vst [vmem:[#allocation49_spill] sm:$0xff] %v2382_v46  ;;  %v943_v14 = vrot.slane %v942_v4, 1  ;;  %v970_v37 = vmax.f32 %v184_v21, %v969_v48  ;;  %v978_v40 = vmax.f32 %v186_v16, %v977_v33  ;;  %v985_v0 = vsel %vm264_vm0, %v189_v54, -inf  ;;  %v192_v21 = vld [vmem:[%s3022_s0 + $0x5c0] sm:$0xff] }
  0xb1   :  { %3072 = vst [vmem:[#allocation50_spill] sm:$0xff] %v2384_v56  ;;  %v950_v12 = vmax.f32 %v948_v49, %v949_v28  ;;  %v957_v38 = vrot.slane %v956_v47, 2  ;;  %v993_v61 = vsel %vm264_vm0, %v191_v6, -inf  ;;  %v964_v53 = vmax.f32 %v962_v62, %v963_v57  ;;  %v195_v49 = vld [vmem:[%s3022_s0 + $0x5d8] sm:$0x1] }
  0xb2   :  { %v2397_v44 = vmax.f32 %v942_v4, %v943_v14  ;;  %v971_v11 = vrot.slane %v970_v37, 4  ;;  %v979_v56 = vrot.slane %v978_v40, 4  ;;  %v986_v33 = vmax.f32 %v188_v10, %v985_v0  ;;  %v197_v10 = vld [vmem:[%s3022_s0 + $0x5e8] sm:$0x1] }
  0xb3   :  { %v951_v16 = vrot.slane %v950_v12, 1  ;;  %v958_v48 = vmax.f32 %v956_v47, %v957_v38  ;;  %v994_v46 = vmax.f32 %v190_v3, %v993_v61  ;;  %v965_v54 = vrot.slane %v964_v53, 2  ;;  %v194_v47 = vld [vmem:[%s3022_s0 + $0x5d0] sm:$0xff]  ;;  %v196_v61 = vld [vmem:[%s3022_s0 + $0x5e0] sm:$0xff] }
  0xb4   :  { %3073 = vst [vmem:[#allocation51_spill] sm:$0xff] %v2397_v44  ;;  %v972_v28 = vmax.f32 %v970_v37, %v971_v11  ;;  %v980_v6 = vmax.f32 %v978_v40, %v979_v56  ;;  %v1001_v4 = vsel %vm264_vm0, %v193_v45, -inf  ;;  %v987_v57 = vrot.slane %v986_v33, 4 }
  0xb5   :  { %v2406_v62 = vmax.f32 %v950_v12, %v951_v16  ;;  %v959_v14 = vrot.slane %v958_v48, 1  ;;  %v995_v44 = vrot.slane %v994_v46, 4  ;;  %v966_v3 = vmax.f32 %v964_v53, %v965_v54  ;;  %v199_v53 = vld [vmem:[%s3022_s0 + $0x5f8] sm:$0x1] }
  0xb6   :  { %v973_v38 = vrot.slane %v972_v28, 2  ;;  %v981_v0 = vrot.slane %v980_v6, 2  ;;  %v1002_v37 = vmax.f32 %v192_v21, %v1001_v4  ;;  %v988_v40 = vmax.f32 %v986_v33, %v987_v57 }
  0xb7   :  { %3074 = vst [vmem:[#allocation52_spill] sm:$0xff] %v2406_v62  ;;  %v2414_v56 = vmax.f32 %v958_v48, %v959_v14  ;;  %v996_v45 = vmax.f32 %v994_v46, %v995_v44  ;;  %v1009_v12 = vsel %vm264_vm0, %v195_v49, -inf  ;;  %v967_v11 = vrot.slane %v966_v3, 1  ;;  %v203_v14 = vld [vmem:[%s3022_s0 + $0x618] sm:$0x1] }
  0xb8   :  { %v974_v16 = vmax.f32 %v972_v28, %v973_v38  ;;  %v982_v62 = vmax.f32 %v980_v6, %v981_v0  ;;  %v1003_v15 = vrot.slane %v1002_v37, 4  ;;  %v989_v54 = vrot.slane %v988_v40, 2  ;;  %v198_v28 = vld [vmem:[%s3022_s0 + $0x5f0] sm:$0xff]  ;;  %v201_v6 = vld [vmem:[%s3022_s0 + $0x608] sm:$0x1] }
  0xb9   :  { %3075 = vst [vmem:[#allocation53_spill] sm:$0xff] %v2414_v56  ;;  %v997_v21 = vrot.slane %v996_v45, 2  ;;  %v1010_v48 = vmax.f32 %v194_v47, %v1009_v12  ;;  %v1017_v33 = vsel %vm264_vm0, %v197_v10, -inf  ;;  %v2424_v46 = vmax.f32 %v966_v3, %v967_v11  ;;  %v200_v12 = vld [vmem:[%s3022_s0 + $0x600] sm:$0xff]  ;;  %v202_v11 = vld [vmem:[%s3022_s0 + $0x610] sm:$0xff] }
  0xba   :  { %v975_v44 = vrot.slane %v974_v16, 1  ;;  %v983_v49 = vrot.slane %v982_v62, 1  ;;  %v1004_v4 = vmax.f32 %v1002_v37, %v1003_v15  ;;  %v990_v57 = vmax.f32 %v988_v40, %v989_v54  ;;  %v204_v56 = vld [vmem:[%s3022_s0 + $0x620] sm:$0xff] }
  0xbb   :  { %3076 = vst [vmem:[#allocation54_spill] sm:$0xff] %v2424_v46  ;;  %v998_v47 = vmax.f32 %v996_v45, %v997_v21  ;;  %v1011_v10 = vrot.slane %v1010_v48, 4  ;;  %v1018_v3 = vmax.f32 %v196_v61, %v1017_v33  ;;  %v1025_v37 = vsel %vm264_vm0, %v199_v53, -inf  ;;  %v207_v61 = vld [vmem:[%s3022_s0 + $0x638] sm:$0x1] }
  0xbc   :  { %v2435_v38 = vmax.f32 %v974_v16, %v975_v44  ;;  %v2437_v0 = vmax.f32 %v982_v62, %v983_v49  ;;  %v1005_v15 = vrot.slane %v1004_v4, 2  ;;  %v991_v46 = vrot.slane %v990_v57, 1  ;;  %v205_v62 = vld [vmem:[%s3022_s0 + $0x628] sm:$0x1] }
  0xbd   :  { %v999_v40 = vrot.slane %v998_v47, 1  ;;  %v1012_v45 = vmax.f32 %v1010_v48, %v1011_v10  ;;  %v1019_v54 = vrot.slane %v1018_v3, 4  ;;  %v1026_v53 = vmax.f32 %v198_v28, %v1025_v37 }
  0xbe   :  { %3077 = vst [vmem:[#allocation55_spill] sm:$0xff] %v2435_v38  ;;  %3078 = vst [vmem:[#allocation56_spill] sm:$0xff] %v2437_v0  ;;  %v1006_v16 = vmax.f32 %v1004_v4, %v1005_v15  ;;  %v1033_v21 = vsel %vm264_vm0, %v201_v6, -inf  ;;  %v1041_v33 = vsel %vm264_vm0, %v203_v14, -inf  ;;  %v2454_v44 = vmax.f32 %v990_v57, %v991_v46  ;;  %v206_v0 = vld [vmem:[%s3022_s0 + $0x630] sm:$0xff] }
  0xbf   :  { %v2456_v49 = vmax.f32 %v998_v47, %v999_v40  ;;  %v1013_v48 = vrot.slane %v1012_v45, 2  ;;  %v1020_v10 = vmax.f32 %v1018_v3, %v1019_v54  ;;  %v1027_v28 = vrot.slane %v1026_v53, 4  ;;  %v209_v46 = vld [vmem:[%s3022_s0 + $0x648] sm:$0x1] }
  0xc0   :  { %3079 = vst [vmem:[#allocation57_spill] sm:$0xff] %v2454_v44  ;;  %v1007_v4 = vrot.slane %v1006_v16, 1  ;;  %v1034_v15 = vmax.f32 %v200_v12, %v1033_v21  ;;  %v1042_v6 = vmax.f32 %v202_v11, %v1041_v33  ;;  %v1049_v47 = vsel %vm264_vm0, %v205_v62, -inf  ;;  %v208_v12 = vld [vmem:[%s3022_s0 + $0x640] sm:$0xff] }
  0xc1   :  { %3080 = vst [vmem:[#allocation58_spill] sm:$0xff] %v2456_v49  ;;  %v1014_v14 = vmax.f32 %v1012_v45, %v1013_v48  ;;  %v1021_v57 = vrot.slane %v1020_v10, 2  ;;  %v1057_v3 = vsel %vm264_vm0, %v207_v61, -inf  ;;  %v1028_v40 = vmax.f32 %v1026_v53, %v1027_v28  ;;  %v211_v45 = vld [vmem:[%s3022_s0 + $0x658] sm:$0x1] }
  0xc2   :  { %v2469_v37 = vmax.f32 %v1006_v16, %v1007_v4  ;;  %v1035_v54 = vrot.slane %v1034_v15, 4  ;;  %v1043_v49 = vrot.slane %v1042_v6, 4  ;;  %v1050_v33 = vmax.f32 %v204_v56, %v1049_v47  ;;  %v213_v56 = vld [vmem:[%s3022_s0 + $0x668] sm:$0x1] }
  0xc3   :  { %v1015_v11 = vrot.slane %v1014_v14, 1  ;;  %v1022_v21 = vmax.f32 %v1020_v10, %v1021_v57  ;;  %v1058_v44 = vmax.f32 %v206_v0, %v1057_v3  ;;  %v1029_v62 = vrot.slane %v1028_v40, 2  ;;  %v210_v10 = vld [vmem:[%s3022_s0 + $0x650] sm:$0xff]  ;;  %v212_v3 = vld [vmem:[%s3022_s0 + $0x660] sm:$0xff] }
  0xc4   :  { %3081 = vst [vmem:[#allocation59_spill] sm:$0xff] %v2469_v37  ;;  %v1036_v48 = vmax.f32 %v1034_v15, %v1035_v54  ;;  %v1044_v61 = vmax.f32 %v1042_v6, %v1043_v49  ;;  %v1065_v16 = vsel %vm264_vm0, %v209_v46, -inf  ;;  %v1051_v28 = vrot.slane %v1050_v33, 4 }
  0xc5   :  { %v2478_v53 = vmax.f32 %v1014_v14, %v1015_v11  ;;  %v1023_v4 = vrot.slane %v1022_v21, 1  ;;  %v1059_v37 = vrot.slane %v1058_v44, 4  ;;  %v1030_v0 = vmax.f32 %v1028_v40, %v1029_v62  ;;  %v215_v40 = vld [vmem:[%s3022_s0 + $0x678] sm:$0x1] }
  0xc6   :  { %v1037_v57 = vrot.slane %v1036_v48, 2  ;;  %v1045_v47 = vrot.slane %v1044_v61, 2  ;;  %v1066_v15 = vmax.f32 %v208_v12, %v1065_v16  ;;  %v1052_v6 = vmax.f32 %v1050_v33, %v1051_v28 }
  0xc7   :  { %3082 = vst [vmem:[#allocation60_spill] sm:$0xff] %v2478_v53  ;;  %v2486_v49 = vmax.f32 %v1022_v21, %v1023_v4  ;;  %v1060_v46 = vmax.f32 %v1058_v44, %v1059_v37  ;;  %v1073_v14 = vsel %vm264_vm0, %v211_v45, -inf  ;;  %v1031_v54 = vrot.slane %v1030_v0, 1  ;;  %v219_v4 = vld [vmem:[%s3022_s0 + $0x698] sm:$0x1] }
  0xc8   :  { %v1038_v11 = vmax.f32 %v1036_v48, %v1037_v57  ;;  %v1046_v53 = vmax.f32 %v1044_v61, %v1045_v47  ;;  %v1067_v38 = vrot.slane %v1066_v15, 4  ;;  %v1053_v62 = vrot.slane %v1052_v6, 2  ;;  %v214_v48 = vld [vmem:[%s3022_s0 + $0x670] sm:$0xff]  ;;  %v217_v61 = vld [vmem:[%s3022_s0 + $0x688] sm:$0x1] }
  0xc9   :  { %3083 = vst [vmem:[#allocation61_spill] sm:$0xff] %v2486_v49  ;;  %v1061_v12 = vrot.slane %v1060_v46, 2  ;;  %v1074_v21 = vmax.f32 %v210_v10, %v1073_v14  ;;  %v1081_v33 = vsel %vm264_vm0, %v213_v56, -inf  ;;  %v2496_v44 = vmax.f32 %v1030_v0, %v1031_v54  ;;  %v216_v14 = vld [vmem:[%s3022_s0 + $0x680] sm:$0xff]  ;;  %v218_v54 = vld [vmem:[%s3022_s0 + $0x690] sm:$0xff] }
  0xca   :  { %v1039_v37 = vrot.slane %v1038_v11, 1  ;;  %v1047_v45 = vrot.slane %v1046_v53, 1  ;;  %v1068_v16 = vmax.f32 %v1066_v15, %v1067_v38  ;;  %v1054_v28 = vmax.f32 %v1052_v6, %v1053_v62  ;;  %v220_v49 = vld [vmem:[%s3022_s0 + $0x6a0] sm:$0xff] }
  0xcb   :  { %3084 = vst [vmem:[#allocation62_spill] sm:$0xff] %v2496_v44  ;;  %v1062_v10 = vmax.f32 %v1060_v46, %v1061_v12  ;;  %v1075_v56 = vrot.slane %v1074_v21, 4  ;;  %v1082_v0 = vmax.f32 %v212_v3, %v1081_v33  ;;  %v1089_v15 = vsel %vm264_vm0, %v215_v40, -inf  ;;  %v223_v3 = vld [vmem:[%s3022_s0 + $0x6b8] sm:$0x1] }
  0xcc   :  { %v2507_v57 = vmax.f32 %v1038_v11, %v1039_v37  ;;  %v2509_v47 = vmax.f32 %v1046_v53, %v1047_v45  ;;  %v1069_v38 = vrot.slane %v1068_v16, 2  ;;  %v1055_v44 = vrot.slane %v1054_v28, 1  ;;  %v221_v53 = vld [vmem:[%s3022_s0 + $0x6a8] sm:$0x1] }
  0xcd   :  { %v1063_v6 = vrot.slane %v1062_v10, 1  ;;  %v1076_v46 = vmax.f32 %v1074_v21, %v1075_v56  ;;  %v1083_v62 = vrot.slane %v1082_v0, 4  ;;  %v1090_v40 = vmax.f32 %v214_v48, %v1089_v15 }
  0xce   :  { %3085 = vst [vmem:[#allocation63_spill] sm:$0xff] %v2507_v57  ;;  %3086 = vst [vmem:[#allocation64_spill] sm:$0xff] %v2509_v47  ;;  %v1070_v11 = vmax.f32 %v1068_v16, %v1069_v38  ;;  %v1097_v12 = vsel %vm264_vm0, %v217_v61, -inf  ;;  %v1105_v33 = vsel %vm264_vm0, %v219_v4, -inf  ;;  %v2526_v37 = vmax.f32 %v1054_v28, %v1055_v44  ;;  %v222_v47 = vld [vmem:[%s3022_s0 + $0x6b0] sm:$0xff] }
  0xcf   :  { %v2528_v45 = vmax.f32 %v1062_v10, %v1063_v6  ;;  %v1077_v21 = vrot.slane %v1076_v46, 2  ;;  %v1084_v56 = vmax.f32 %v1082_v0, %v1083_v62  ;;  %v1091_v48 = vrot.slane %v1090_v40, 4  ;;  %v225_v44 = vld [vmem:[%s3022_s0 + $0x6c8] sm:$0x1] }
  0xd0   :  { %3087 = vst [vmem:[#allocation65_spill] sm:$0xff] %v2526_v37  ;;  %v1071_v16 = vrot.slane %v1070_v11, 1  ;;  %v1098_v38 = vmax.f32 %v216_v14, %v1097_v12  ;;  %v1106_v61 = vmax.f32 %v218_v54, %v1105_v33  ;;  %v1113_v10 = vsel %vm264_vm0, %v221_v53, -inf  ;;  %v224_v14 = vld [vmem:[%s3022_s0 + $0x6c0] sm:$0xff] }
  0xd1   :  { %3088 = vst [vmem:[#allocation66_spill] sm:$0xff] %v2528_v45  ;;  %v1078_v4 = vmax.f32 %v1076_v46, %v1077_v21  ;;  %v1085_v28 = vrot.slane %v1084_v56, 2  ;;  %v1121_v0 = vsel %vm264_vm0, %v223_v3, -inf  ;;  %v1092_v6 = vmax.f32 %v1090_v40, %v1091_v48  ;;  %v227_v46 = vld [vmem:[%s3022_s0 + $0x6d8] sm:$0x1] }
  0xd2   :  { %v2541_v15 = vmax.f32 %v1070_v11, %v1071_v16  ;;  %v1099_v62 = vrot.slane %v1098_v38, 4  ;;  %v1107_v45 = vrot.slane %v1106_v61, 4  ;;  %v1114_v33 = vmax.f32 %v220_v49, %v1113_v10  ;;  %v229_v49 = vld [vmem:[%s3022_s0 + $0x6e8] sm:$0x1] }
  0xd3   :  { %v1079_v54 = vrot.slane %v1078_v4, 1  ;;  %v1086_v12 = vmax.f32 %v1084_v56, %v1085_v28  ;;  %v1122_v37 = vmax.f32 %v222_v47, %v1121_v0  ;;  %v1093_v53 = vrot.slane %v1092_v6, 2  ;;  %v226_v56 = vld [vmem:[%s3022_s0 + $0x6d0] sm:$0xff]  ;;  %v228_v0 = vld [vmem:[%s3022_s0 + $0x6e0] sm:$0xff] }
  0xd4   :  { %3089 = vst [vmem:[#allocation67_spill] sm:$0xff] %v2541_v15  ;;  %v1100_v21 = vmax.f32 %v1098_v38, %v1099_v62  ;;  %v1108_v3 = vmax.f32 %v1106_v61, %v1107_v45  ;;  %v1129_v11 = vsel %vm264_vm0, %v225_v44, -inf  ;;  %v1115_v48 = vrot.slane %v1114_v33, 4 }
  0xd5   :  { %v2550_v40 = vmax.f32 %v1078_v4, %v1079_v54  ;;  %v1087_v16 = vrot.slane %v1086_v12, 1  ;;  %v1123_v15 = vrot.slane %v1122_v37, 4  ;;  %v1094_v47 = vmax.f32 %v1092_v6, %v1093_v53  ;;  %v231_v6 = vld [vmem:[%s3022_s0 + $0x6f8] sm:$0x1] }
  0xd6   :  { %v1101_v28 = vrot.slane %v1100_v21, 2  ;;  %v1109_v10 = vrot.slane %v1108_v3, 2  ;;  %v1130_v38 = vmax.f32 %v224_v14, %v1129_v11  ;;  %v1116_v61 = vmax.f32 %v1114_v33, %v1115_v48 }
  0xd7   :  { %3090 = vst [vmem:[#allocation68_spill] sm:$0xff] %v2550_v40  ;;  %v2558_v45 = vmax.f32 %v1086_v12, %v1087_v16  ;;  %v1124_v44 = vmax.f32 %v1122_v37, %v1123_v15  ;;  %v1137_v4 = vsel %vm264_vm0, %v227_v46, -inf  ;;  %v1095_v62 = vrot.slane %v1094_v47, 1  ;;  %v235_v16 = vld [vmem:[%s3022_s0 + $0x718] sm:$0x1] }
  0xd8   :  { %v1102_v54 = vmax.f32 %v1100_v21, %v1101_v28  ;;  %v1110_v40 = vmax.f32 %v1108_v3, %v1109_v10  ;;  %v1131_v57 = vrot.slane %v1130_v38, 4  ;;  %v1117_v53 = vrot.slane %v1116_v61, 2  ;;  %v230_v21 = vld [vmem:[%s3022_s0 + $0x6f0] sm:$0xff]  ;;  %v233_v3 = vld [vmem:[%s3022_s0 + $0x708] sm:$0x1] }
  0xd9   :  { %3091 = vst [vmem:[#allocation69_spill] sm:$0xff] %v2558_v45  ;;  %v1125_v14 = vrot.slane %v1124_v44, 2  ;;  %v1138_v12 = vmax.f32 %v226_v56, %v1137_v4  ;;  %v1145_v33 = vsel %vm264_vm0, %v229_v49, -inf  ;;  %v2568_v37 = vmax.f32 %v1094_v47, %v1095_v62  ;;  %v232_v4 = vld [vmem:[%s3022_s0 + $0x700] sm:$0xff]  ;;  %v234_v62 = vld [vmem:[%s3022_s0 + $0x710] sm:$0xff] }
  0xda   :  { %v1103_v15 = vrot.slane %v1102_v54, 1  ;;  %v1111_v46 = vrot.slane %v1110_v40, 1  ;;  %v1132_v11 = vmax.f32 %v1130_v38, %v1131_v57  ;;  %v1118_v48 = vmax.f32 %v1116_v61, %v1117_v53  ;;  %v236_v45 = vld [vmem:[%s3022_s0 + $0x720] sm:$0xff] }
  0xdb   :  { %3092 = vst [vmem:[#allocation70_spill] sm:$0xff] %v2568_v37  ;;  %v1126_v56 = vmax.f32 %v1124_v44, %v1125_v14  ;;  %v1139_v49 = vrot.slane %v1138_v12, 4  ;;  %v1146_v47 = vmax.f32 %v228_v0, %v1145_v33  ;;  %v1153_v38 = vsel %vm264_vm0, %v231_v6, -inf  ;;  %v239_v0 = vld [vmem:[%s3022_s0 + $0x738] sm:$0x1] }
  0xdc   :  { %v2579_v28 = vmax.f32 %v1102_v54, %v1103_v15  ;;  %v2581_v10 = vmax.f32 %v1110_v40, %v1111_v46  ;;  %v1133_v57 = vrot.slane %v1132_v11, 2  ;;  %v1119_v37 = vrot.slane %v1118_v48, 1  ;;  %v237_v40 = vld [vmem:[%s3022_s0 + $0x728] sm:$0x1] }
  0xdd   :  { %v1127_v61 = vrot.slane %v1126_v56, 1  ;;  %v1140_v44 = vmax.f32 %v1138_v12, %v1139_v49  ;;  %v1147_v53 = vrot.slane %v1146_v47, 4  ;;  %v1154_v6 = vmax.f32 %v230_v21, %v1153_v38 }
  0xde   :  { %3093 = vst [vmem:[#allocation71_spill] sm:$0xff] %v2579_v28  ;;  %3094 = vst [vmem:[#allocation72_spill] sm:$0xff] %v2581_v10  ;;  %v1134_v54 = vmax.f32 %v1132_v11, %v1133_v57  ;;  %v1161_v14 = vsel %vm264_vm0, %v233_v3, -inf  ;;  %v1169_v33 = vsel %vm264_vm0, %v235_v16, -inf  ;;  %v2598_v15 = vmax.f32 %v1118_v48, %v1119_v37  ;;  %v238_v10 = vld [vmem:[%s3022_s0 + $0x730] sm:$0xff] }
  0xdf   :  { %v2600_v46 = vmax.f32 %v1126_v56, %v1127_v61  ;;  %v1141_v12 = vrot.slane %v1140_v44, 2  ;;  %v1148_v49 = vmax.f32 %v1146_v47, %v1147_v53  ;;  %v1155_v21 = vrot.slane %v1154_v6, 4  ;;  %v241_v37 = vld [vmem:[%s3022_s0 + $0x748] sm:$0x1] }
  0xe0   :  { %3095 = vst [vmem:[#allocation73_spill] sm:$0xff] %v2598_v15  ;;  %v1135_v11 = vrot.slane %v1134_v54, 1  ;;  %v1162_v57 = vmax.f32 %v232_v4, %v1161_v14  ;;  %v1170_v3 = vmax.f32 %v234_v62, %v1169_v33  ;;  %v1177_v56 = vsel %vm264_vm0, %v237_v40, -inf  ;;  %v240_v4 = vld [vmem:[%s3022_s0 + $0x740] sm:$0xff] }
  0xe1   :  { %3096 = vst [vmem:[#allocation74_spill] sm:$0xff] %v2600_v46  ;;  %v1142_v16 = vmax.f32 %v1140_v44, %v1141_v12  ;;  %v1149_v48 = vrot.slane %v1148_v49, 2  ;;  %v1185_v47 = vsel %vm264_vm0, %v239_v0, -inf  ;;  %v1156_v61 = vmax.f32 %v1154_v6, %v1155_v21  ;;  %v243_v44 = vld [vmem:[%s3022_s0 + $0x758] sm:$0x1] }
  0xe2   :  { %v2613_v38 = vmax.f32 %v1134_v54, %v1135_v11  ;;  %v1163_v53 = vrot.slane %v1162_v57, 4  ;;  %v1171_v46 = vrot.slane %v1170_v3, 4  ;;  %v1178_v33 = vmax.f32 %v236_v45, %v1177_v56  ;;  %v245_v45 = vld [vmem:[%s3022_s0 + $0x768] sm:$0x1] }
  0xe3   :  { %v1143_v62 = vrot.slane %v1142_v16, 1  ;;  %v1150_v14 = vmax.f32 %v1148_v49, %v1149_v48  ;;  %v1186_v15 = vmax.f32 %v238_v10, %v1185_v47  ;;  %v1157_v40 = vrot.slane %v1156_v61, 2  ;;  %v242_v49 = vld [vmem:[%s3022_s0 + $0x750] sm:$0xff]  ;;  %v244_v47 = vld [vmem:[%s3022_s0 + $0x760] sm:$0xff] }
  0xe4   :  { %3097 = vst [vmem:[#allocation75_spill] sm:$0xff] %v2613_v38  ;;  %v1164_v12 = vmax.f32 %v1162_v57, %v1163_v53  ;;  %v1172_v0 = vmax.f32 %v1170_v3, %v1171_v46  ;;  %v1193_v54 = vsel %vm264_vm0, %v241_v37, -inf  ;;  %v1179_v21 = vrot.slane %v1178_v33, 4 }
  0xe5   :  { %v2622_v6 = vmax.f32 %v1142_v16, %v1143_v62  ;;  %v1151_v11 = vrot.slane %v1150_v14, 1  ;;  %v1187_v38 = vrot.slane %v1186_v15, 4  ;;  %v1158_v10 = vmax.f32 %v1156_v61, %v1157_v40  ;;  %v247_v61 = vld [vmem:[%s3022_s0 + $0x778] sm:$0x1] }
  0xe6   :  { %v1165_v48 = vrot.slane %v1164_v12, 2  ;;  %v1173_v56 = vrot.slane %v1172_v0, 2  ;;  %v1194_v57 = vmax.f32 %v240_v4, %v1193_v54  ;;  %v1180_v3 = vmax.f32 %v1178_v33, %v1179_v21 }
  0xe7   :  { %3098 = vst [vmem:[#allocation76_spill] sm:$0xff] %v2622_v6  ;;  %v2630_v46 = vmax.f32 %v1150_v14, %v1151_v11  ;;  %v1188_v37 = vmax.f32 %v1186_v15, %v1187_v38  ;;  %v1201_v16 = vsel %vm264_vm0, %v243_v44, -inf  ;;  %v1159_v53 = vrot.slane %v1158_v10, 1  ;;  %v251_v11 = vld [vmem:[%s3022_s0 + $0x798] sm:$0x1] }
  0xe8   :  { %v1166_v62 = vmax.f32 %v1164_v12, %v1165_v48  ;;  %v1174_v6 = vmax.f32 %v1172_v0, %v1173_v56  ;;  %v1195_v28 = vrot.slane %v1194_v57, 4  ;;  %v1181_v40 = vrot.slane %v1180_v3, 2  ;;  %v246_v12 = vld [vmem:[%s3022_s0 + $0x770] sm:$0xff]  ;;  %v249_v0 = vld [vmem:[%s3022_s0 + $0x788] sm:$0x1] }
  0xe9   :  { %3099 = vst [vmem:[#allocation77_spill] sm:$0xff] %v2630_v46  ;;  %v1189_v4 = vrot.slane %v1188_v37, 2  ;;  %v1202_v14 = vmax.f32 %v242_v49, %v1201_v16  ;;  %v1209_v33 = vsel %vm264_vm0, %v245_v45, -inf  ;;  %v2640_v15 = vmax.f32 %v1158_v10, %v1159_v53  ;;  %v248_v16 = vld [vmem:[%s3022_s0 + $0x780] sm:$0xff]  ;;  %v250_v53 = vld [vmem:[%s3022_s0 + $0x790] sm:$0xff] }
  0xea   :  { %v1167_v38 = vrot.slane %v1166_v62, 1  ;;  %v1175_v44 = vrot.slane %v1174_v6, 1  ;;  %v1196_v54 = vmax.f32 %v1194_v57, %v1195_v28  ;;  %v1182_v21 = vmax.f32 %v1180_v3, %v1181_v40  ;;  %v252_v46 = vld [vmem:[%s3022_s0 + $0x7a0] sm:$0xff] }
  0xeb   :  { %3100 = vst [vmem:[#allocation78_spill] sm:$0xff] %v2640_v15  ;;  %v1190_v49 = vmax.f32 %v1188_v37, %v1189_v4  ;;  %v1203_v45 = vrot.slane %v1202_v14, 4  ;;  %v1210_v10 = vmax.f32 %v244_v47, %v1209_v33  ;;  %v1217_v57 = vsel %vm264_vm0, %v247_v61, -inf  ;;  %v255_v47 = vld [vmem:[%s3022_s0 + $0x7b8] sm:$0x1] }
  0xec   :  { %v2651_v48 = vmax.f32 %v1166_v62, %v1167_v38  ;;  %v2653_v56 = vmax.f32 %v1174_v6, %v1175_v44  ;;  %v1197_v28 = vrot.slane %v1196_v54, 2  ;;  %v1183_v15 = vrot.slane %v1182_v21, 1  ;;  %v253_v6 = vld [vmem:[%s3022_s0 + $0x7a8] sm:$0x1] }
  0xed   :  { %v1191_v3 = vrot.slane %v1190_v49, 1  ;;  %v1204_v37 = vmax.f32 %v1202_v14, %v1203_v45  ;;  %v1211_v40 = vrot.slane %v1210_v10, 4  ;;  %v1218_v61 = vmax.f32 %v246_v12, %v1217_v57 }
  0xee   :  { %3101 = vst [vmem:[#allocation79_spill] sm:$0xff] %v2651_v48  ;;  %3102 = vst [vmem:[#allocation80_spill] sm:$0xff] %v2653_v56  ;;  %v1198_v62 = vmax.f32 %v1196_v54, %v1197_v28  ;;  %v1225_v4 = vsel %vm264_vm0, %v249_v0, -inf  ;;  %v1233_v33 = vsel %vm264_vm0, %v251_v11, -inf  ;;  %v2670_v38 = vmax.f32 %v1182_v21, %v1183_v15  ;;  %v254_v56 = vld [vmem:[%s3022_s0 + $0x7b0] sm:$0xff] }
  0xef   :  { %v2672_v44 = vmax.f32 %v1190_v49, %v1191_v3  ;;  %v1205_v14 = vrot.slane %v1204_v37, 2  ;;  %v1212_v45 = vmax.f32 %v1210_v10, %v1211_v40  ;;  %v1219_v12 = vrot.slane %v1218_v61, 4  ;;  %v257_v15 = vld [vmem:[%s3022_s0 + $0x7c8] sm:$0x1] }
  0xf0   :  { %3103 = vst [vmem:[#allocation81_spill] sm:$0xff] %v2670_v38  ;;  %v1199_v54 = vrot.slane %v1198_v62, 1  ;;  %v1226_v28 = vmax.f32 %v248_v16, %v1225_v4  ;;  %v1234_v0 = vmax.f32 %v250_v53, %v1233_v33  ;;  %v1241_v49 = vsel %vm264_vm0, %v253_v6, -inf  ;;  %v256_v16 = vld [vmem:[%s3022_s0 + $0x7c0] sm:$0xff] }
  0xf1   :  { %3104 = vst [vmem:[#allocation82_spill] sm:$0xff] %v2672_v44  ;;  %v1206_v11 = vmax.f32 %v1204_v37, %v1205_v14  ;;  %v1213_v21 = vrot.slane %v1212_v45, 2  ;;  %v1249_v10 = vsel %vm264_vm0, %v255_v47, -inf  ;;  %v1220_v3 = vmax.f32 %v1218_v61, %v1219_v12  ;;  %v259_v37 = vld [vmem:[%s3022_s0 + $0x7d8] sm:$0x1] }
  0xf2   :  { %v2685_v57 = vmax.f32 %v1198_v62, %v1199_v54  ;;  %v1227_v40 = vrot.slane %v1226_v28, 4  ;;  %v1235_v44 = vrot.slane %v1234_v0, 4  ;;  %v1242_v33 = vmax.f32 %v252_v46, %v1241_v49  ;;  %v261_v46 = vld [vmem:[%s3022_s0 + $0x7e8] sm:$0x1] }
  0xf3   :  { %v1207_v53 = vrot.slane %v1206_v11, 1  ;;  %v1214_v4 = vmax.f32 %v1212_v45, %v1213_v21  ;;  %v1250_v38 = vmax.f32 %v254_v56, %v1249_v10  ;;  %v1221_v6 = vrot.slane %v1220_v3, 2  ;;  %v258_v45 = vld [vmem:[%s3022_s0 + $0x7d0] sm:$0xff]  ;;  %v260_v10 = vld [vmem:[%s3022_s0 + $0x7e0] sm:$0xff] }
  0xf4   :  { %3105 = vst [vmem:[#allocation83_spill] sm:$0xff] %v2685_v57  ;;  %v1228_v14 = vmax.f32 %v1226_v28, %v1227_v40  ;;  %v1236_v47 = vmax.f32 %v1234_v0, %v1235_v44  ;;  %v1257_v62 = vsel %vm264_vm0, %v257_v15, -inf  ;;  %v1243_v12 = vrot.slane %v1242_v33, 4 }
  0xf5   :  { %v2694_v61 = vmax.f32 %v1206_v11, %v1207_v53  ;;  %v1215_v54 = vrot.slane %v1214_v4, 1  ;;  %v1251_v57 = vrot.slane %v1250_v38, 4  ;;  %v1222_v56 = vmax.f32 %v1220_v3, %v1221_v6  ;;  %v263_v3 = vld [vmem:[%s3022_s0 + $0x7f8] sm:$0x1] }
  0xf6   :  { %v1229_v21 = vrot.slane %v1228_v14, 2  ;;  %v1237_v49 = vrot.slane %v1236_v47, 2  ;;  %v1258_v28 = vmax.f32 %v256_v16, %v1257_v62  ;;  %v1244_v0 = vmax.f32 %v1242_v33, %v1243_v12 }
  0xf7   :  { %3106 = vst [vmem:[#allocation84_spill] sm:$0xff] %v2694_v61  ;;  %v2702_v44 = vmax.f32 %v1214_v4, %v1215_v54  ;;  %v1252_v15 = vmax.f32 %v1250_v38, %v1251_v57  ;;  %v1265_v11 = vsel %vm264_vm0, %v259_v37, -inf  ;;  %v1223_v40 = vrot.slane %v1222_v56, 1 }
  0xf8   :  { %v1230_v53 = vmax.f32 %v1228_v14, %v1229_v21  ;;  %v1238_v61 = vmax.f32 %v1236_v47, %v1237_v49  ;;  %v1259_v48 = vrot.slane %v1258_v28, 4  ;;  %v1245_v6 = vrot.slane %v1244_v0, 2  ;;  %v262_v14 = vld [vmem:[%s3022_s0 + $0x7f0] sm:$0xff] }
  0xf9   :  { %3107 = vst [vmem:[#allocation85_spill] sm:$0xff] %v2702_v44  ;;  %v1253_v16 = vrot.slane %v1252_v15, 2  ;;  %v1266_v4 = vmax.f32 %v258_v45, %v1265_v11  ;;  %v1273_v33 = vsel %vm264_vm0, %v261_v46, -inf  ;;  %v2712_v38 = vmax.f32 %v1222_v56, %v1223_v40 }
  0xfa   :  { %v1231_v57 = vrot.slane %v1230_v53, 1  ;;  %v1239_v37 = vrot.slane %v1238_v61, 1  ;;  %v1260_v62 = vmax.f32 %v1258_v28, %v1259_v48  ;;  %v1246_v47 = vmax.f32 %v1244_v0, %v1245_v6 }
  0xfb   :  { %3108 = vst [vmem:[#allocation86_spill] sm:$0xff] %v2712_v38  ;;  %v1254_v54 = vmax.f32 %v1252_v15, %v1253_v16  ;;  %v1267_v12 = vrot.slane %v1266_v4, 4  ;;  %v1274_v21 = vmax.f32 %v260_v10, %v1273_v33  ;;  %v1281_v46 = vsel %vm264_vm0, %v263_v3, -inf }
  0xfc   :  { %v2717_v49 = vmax.f32 %v1230_v53, %v1231_v57  ;;  %v2719_v44 = vmax.f32 %v1238_v61, %v1239_v37  ;;  %v1261_v45 = vrot.slane %v1260_v62, 2  ;;  %v1247_v56 = vrot.slane %v1246_v47, 1 }
  0xfd   :  { %v1255_v11 = vrot.slane %v1254_v54, 1  ;;  %v1268_v40 = vmax.f32 %v1266_v4, %v1267_v12  ;;  %v1275_v38 = vrot.slane %v1274_v21, 4  ;;  %v1282_v28 = vmax.f32 %v262_v14, %v1281_v46  ;;  %v3111_v46 = vld [vmem:[#allocation9_spill] sm:$0xff] }
  0xfe   :  { %v1262_v48 = vmax.f32 %v1260_v62, %v1261_v45  ;;  %v2722_v36 = vmax.f32 %v1246_v47, %v1247_v56  ;;  %v1418_v3 = vsel %vm1417_vm1, %v1702_v41, %v1694_v35  ;;  %vm1425_vm5 = vcmask 1045509   ;;  %v3112_v56 = vld [vmem:[#allocation3_spill] sm:$0xff] }
  0xff   :  { %v2724_v0 = vmax.f32 %v1254_v54, %v1255_v11  ;;  %v1269_v15 = vrot.slane %v1268_v40, 2  ;;  %v1276_v10 = vmax.f32 %v1274_v21, %v1275_v38  ;;  %v1283_v61 = vrot.slane %v1282_v28, 4 }
 0x100   :  { %v1263_v53 = vrot.slane %v1262_v48, 1  ;;  %v1420_v4 = vsel %vm1419_vm2, %v1704_v42, %v1418_v3  ;;  %vm1427_vm6 = vcmask 1046534   ;;  %vm1429_vm7 = vcmask 1047559  }
 0x101   :  { %v1270_v6 = vmax.f32 %v1268_v40, %v1269_v15  ;;  %v1277_v16 = vrot.slane %v1276_v10, 2  ;;  %v1284_v57 = vmax.f32 %v1282_v28, %v1283_v61  ;;  %v1422_v37 = vsel %vm1421_vm3, %v1709_v50, %v1420_v4  ;;  %v3114_v40 = vld [vmem:[#allocation10_spill] sm:$0xff]  ;;  %v3115_v28 = vld [vmem:[#allocation15_spill] sm:$0xff] }
 0x102   :  { %v2731_v33 = vmax.f32 %v1262_v48, %v1263_v53  ;;  %v1424_v14 = vsel %vm1423_vm4, %v1711_v51, %v1422_v37  ;;  %v1431_v42 = vsel %vm1417_vm1, %v1764_v60, %v1762_v59  ;;  %v1438_v59 = vsel %vm1417_vm1, %v1822_v17, %v1820_v22  ;;  %v3118_v61 = vld [vmem:[#allocation11_spill] sm:$0xff] }
 0x103   :  { %v1271_v38 = vrot.slane %v1270_v6, 1  ;;  %v1278_v62 = vmax.f32 %v1276_v10, %v1277_v16  ;;  %v1285_v35 = vrot.slane %v1284_v57, 2  ;;  %v1426_v41 = vsel %vm1425_vm5, %v1731_v7, %v1424_v14  ;;  %v3117_v10 = vld [vmem:[#allocation6_spill] sm:$0xff]  ;;  %v3120_v4 = vld [vmem:[#allocation23_spill] sm:$0xff]  ;;  %v3123_v14 = vld [vmem:[#allocation12_spill] sm:$0xff] }
 0x104   :  { %v1428_v50 = vsel %vm1427_vm6, %v1748_v31, %v1426_v41  ;;  %v1432_v12 = vsel %vm1419_vm2, %v1772_v1, %v1431_v42  ;;  %v1439_v31 = vsel %vm1419_vm2, %v1833_v29, %v1438_v59  ;;  %v1445_v1 = vsel %vm1417_vm1, %v1868_v20, %v1866_v19  ;;  %v3124_v41 = vld [vmem:[#allocation18_spill] sm:$0xff]  ;;  %v3128_v59 = vld [vmem:[#allocation19_spill] sm:$0xff] }
 0x105   :  { %v2742_v47 = vmax.f32 %v1270_v6, %v1271_v38  ;;  %v1279_v54 = vrot.slane %v1278_v62, 1  ;;  %v1286_v51 = vmax.f32 %v1284_v57, %v1285_v35  ;;  %v1430_v21 = vsel %vm1429_vm7, %v1753_v43, %v1428_v50  ;;  %v3119_v6 = vld [vmem:[#allocation17_spill] sm:$0xff]  ;;  %v3121_v57 = vld [vmem:[#allocation24_spill] sm:$0xff]  ;;  %v3122_v38 = vld [vmem:[#allocation7_spill] sm:$0xff] }
 0x106   :  { %v1433_v7 = vsel %vm1421_vm3, %v1786_v25, %v1432_v12  ;;  %1552 = vst [vmem:[%s3023_s1] sm:$0xff] %v1430_v21  ;;  %v1440_v22 = vsel %vm1421_vm3, %v1835_v30, %v1439_v31  ;;  %v1452_v20 = vsel %vm1417_vm1, %v1934_v23, %v1932_v13  ;;  %v1459_v23 = vsel %vm1417_vm1, %v2005_v63, %v2003_v2  ;;  %v3113_v2 = vld [vmem:[#allocation5_spill] sm:$0xff]  ;;  %v3126_v12 = vld [vmem:[#allocation8_spill] sm:$0xff]  ;;  %v3129_v31 = vld [vmem:[#allocation26_spill] sm:$0xff] }
 0x107   :  { %v2755_v60 = vmax.f32 %v1278_v62, %v1279_v54  ;;  %v1434_v45 = vsel %vm1423_vm4, %v1788_v26, %v1433_v7  ;;  %v1287_v43 = vrot.slane %v1286_v51, 1  ;;  %v1446_v26 = vsel %vm1419_vm2, %v1876_v24, %v1445_v1  ;;  %v3125_v54 = vld [vmem:[#allocation25_spill] sm:$0xff] }
 0x108   :  { %v1435_v25 = vsel %vm1425_vm5, %v1790_v27, %v1434_v45  ;;  %v1441_v29 = vsel %vm1423_vm4, %v1846_v55, %v1440_v22  ;;  %v1447_v19 = vsel %vm1421_vm3, %v1878_v18, %v1446_v26  ;;  %v1453_v13 = vsel %vm1419_vm2, %v1950_v39, %v1452_v20  ;;  %v3127_v21 = vld [vmem:[#allocation13_spill] sm:$0xff]  ;;  %v3131_v22 = vld [vmem:[#allocation20_spill] sm:$0xff] }
 0x109   :  { %v1436_v17 = vsel %vm1427_vm6, %v1798_v32, %v1435_v25  ;;  %v2782_v27 = vmax.f32 %v1286_v51, %v1287_v43  ;;  %v1442_v24 = vsel %vm1425_vm5, %v1854_v5, %v1441_v29  ;;  %v1448_v32 = vsel %vm1423_vm4, %v1893_v52, %v1447_v19  ;;  %v3109_v5 = vld [vmem:[#allocation2_spill] sm:$0xff]  ;;  %v3110_v52 = vld [vmem:[#allocation4_spill] sm:$0xff]  ;;  %v3133_v19 = vld [vmem:[#allocation31_spill] sm:$0xff] }
 0x10a   :  { %v1437_v30 = vsel %vm1429_vm7, %v1808_v58, %v1436_v17  ;;  %v1443_v55 = vsel %vm1427_vm6, %v1856_v8, %v1442_v24  ;;  %v1449_v18 = vsel %vm1425_vm5, %v1908_v34, %v1448_v32  ;;  %v1454_v34 = vsel %vm1421_vm3, %v3110_v52, %v1453_v13  ;;  %v3130_v43 = vld [vmem:[#allocation14_spill] sm:$0xff]  ;;  %v3132_v17 = vld [vmem:[#allocation27_spill] sm:$0xff]  ;;  %v3134_v20 = vld [vmem:[#allocation32_spill] sm:$0xff] }
 0x10b   :  { %1553 = vst [vmem:[%s3023_s1 + $0x8] sm:$0xff] %v1437_v30  ;;  %v1444_v58 = vsel %vm1429_vm7, %v1858_v9, %v1443_v55  ;;  %v1450_v8 = vsel %vm1427_vm6, %v3109_v5, %v1449_v18  ;;  %v1460_v39 = vsel %vm1419_vm2, %v3111_v46, %v1459_v23  ;;  %v1455_v63 = vsel %vm1423_vm4, %v3113_v2, %v1454_v34  ;;  %v3116_v9 = vld [vmem:[#allocation16_spill] sm:$0xff]  ;;  %v3135_v24 = vld [vmem:[#allocation21_spill] sm:$0xff]  ;;  %v3140_v52 = vld [vmem:[#allocation22_spill] sm:$0xff] }
 0x10c   :  { %v1451_v11 = vsel %vm1429_vm7, %v3112_v56, %v1450_v8  ;;  %v1461_v48 = vsel %vm1421_vm3, %v3114_v40, %v1460_v39  ;;  %v1466_v15 = vsel %vm1417_vm1, %v3116_v9, %v3115_v28  ;;  %1554 = vst [vmem:[%s3023_s1 + $0x10] sm:$0xff] %v1444_v58  ;;  %v1456_v53 = vsel %vm1425_vm5, %v3117_v10, %v1455_v63  ;;  %v3136_v55 = vld [vmem:[#allocation28_spill] sm:$0xff]  ;;  %v3137_v13 = vld [vmem:[#allocation33_spill] sm:$0xff]  ;;  %v3138_v58 = vld [vmem:[#allocation39_spill] sm:$0xff] }
 0x10d   :  { %v1462_v3 = vsel %vm1423_vm4, %v3118_v61, %v1461_v48  ;;  %v1467_v16 = vsel %vm1419_vm2, %v3119_v6, %v1466_v15  ;;  %v1473_v37 = vsel %vm1417_vm1, %v3121_v57, %v3120_v4  ;;  %1555 = vst [vmem:[%s3023_s1 + $0x18] sm:$0xff] %v1451_v11  ;;  %v1457_v62 = vsel %vm1427_vm6, %v3122_v38, %v1456_v53  ;;  %v3139_v5 = vld [vmem:[#allocation40_spill] sm:$0xff]  ;;  %v3141_v46 = vld [vmem:[#allocation29_spill] sm:$0xff]  ;;  %v3142_v56 = vld [vmem:[#allocation34_spill] sm:$0xff] }
 0x10e   :  { %v1463_v35 = vsel %vm1425_vm5, %v3123_v14, %v1462_v3  ;;  %v1468_v42 = vsel %vm1421_vm3, %v3124_v41, %v1467_v16  ;;  %v1474_v50 = vsel %vm1419_vm2, %v3125_v54, %v1473_v37  ;;  %v1458_v51 = vsel %vm1429_vm7, %v3126_v12, %v1457_v62  ;;  %v3143_v2 = vld [vmem:[#allocation41_spill] sm:$0xff]  ;;  %v3144_v40 = vld [vmem:[#allocation30_spill] sm:$0xff]  ;;  %v3145_v28 = vld [vmem:[#allocation35_spill] sm:$0xff] }
 0x10f   :  { %v1464_v7 = vsel %vm1427_vm6, %v3127_v21, %v1463_v35  ;;  %v1469_v45 = vsel %vm1423_vm4, %v3128_v59, %v1468_v42  ;;  %v1475_v1 = vsel %vm1421_vm3, %v3129_v31, %v1474_v50  ;;  %v1480_v30 = vsel %vm1417_vm1, %v3134_v20, %v3133_v19  ;;  %1556 = vst [vmem:[%s3023_s1 + $0x20] sm:$0xff] %v1458_v51  ;;  %v3146_v15 = vld [vmem:[#allocation42_spill] sm:$0xff]  ;;  %v3147_v53 = vld [vmem:[#allocation47_spill] sm:$0xff]  ;;  %v3148_v61 = vld [vmem:[#allocation48_spill] sm:$0xff] }
 0x110   :  { %v1465_v25 = vsel %vm1429_vm7, %v3130_v43, %v1464_v7  ;;  %v1470_v26 = vsel %vm1425_vm5, %v3131_v22, %v1469_v45  ;;  %v1476_v29 = vsel %vm1423_vm4, %v3132_v17, %v1475_v1  ;;  %v1481_v23 = vsel %vm1419_vm2, %v3137_v13, %v1480_v30  ;;  %v3149_v6 = vld [vmem:[#allocation36_spill] sm:$0xff]  ;;  %v3150_v4 = vld [vmem:[#allocation43_spill] sm:$0xff]  ;;  %v3151_v37 = vld [vmem:[#allocation49_spill] sm:$0xff] }
 0x111   :  { %v1471_v32 = vsel %vm1427_vm6, %v3135_v24, %v1470_v26  ;;  %v1477_v18 = vsel %vm1425_vm5, %v3136_v55, %v1476_v29  ;;  %v1487_v8 = vsel %vm1417_vm1, %v3139_v5, %v3138_v58  ;;  %1557 = vst [vmem:[%s3023_s1 + $0x28] sm:$0xff] %v1465_v25  ;;  %v1482_v11 = vsel %vm1421_vm3, %v3142_v56, %v1481_v23  ;;  %v3152_v62 = vld [vmem:[#allocation55_spill] sm:$0xff]  ;;  %v3153_v14 = vld [vmem:[#allocation56_spill] sm:$0xff]  ;;  %v3154_v41 = vld [vmem:[#allocation37_spill] sm:$0xff] }
 0x112   :  { %v1472_v34 = vsel %vm1429_vm7, %v3140_v52, %v1471_v32  ;;  %v1478_v39 = vsel %vm1427_vm6, %v3141_v46, %v1477_v18  ;;  %v1488_v63 = vsel %vm1419_vm2, %v3143_v2, %v1487_v8  ;;  %v1483_v9 = vsel %vm1423_vm4, %v3145_v28, %v1482_v11  ;;  %v3155_v54 = vld [vmem:[#allocation44_spill] sm:$0xff]  ;;  %v3156_v12 = vld [vmem:[#allocation50_spill] sm:$0xff]  ;;  %v3157_v21 = vld [vmem:[#allocation57_spill] sm:$0xff] }
 0x113   :  { %v1479_v48 = vsel %vm1429_vm7, %v3144_v40, %v1478_v39  ;;  %v1489_v10 = vsel %vm1421_vm3, %v3146_v15, %v1488_v63  ;;  %v1494_v3 = vsel %vm1417_vm1, %v3148_v61, %v3147_v53  ;;  %1558 = vst [vmem:[%s3023_s1 + $0x30] sm:$0xff] %v1472_v34  ;;  %v1484_v16 = vsel %vm1425_vm5, %v3149_v6, %v1483_v9  ;;  %v3158_v59 = vld [vmem:[#allocation38_spill] sm:$0xff]  ;;  %v3159_v31 = vld [vmem:[#allocation45_spill] sm:$0xff]  ;;  %v3160_v43 = vld [vmem:[#allocation51_spill] sm:$0xff] }
 0x114   :  { %v1490_v57 = vsel %vm1423_vm4, %v3150_v4, %v1489_v10  ;;  %v1495_v38 = vsel %vm1419_vm2, %v3151_v37, %v1494_v3  ;;  %v1501_v35 = vsel %vm1417_vm1, %v3153_v14, %v3152_v62  ;;  %1559 = vst [vmem:[%s3023_s1 + $0x38] sm:$0xff] %v1479_v48  ;;  %v1485_v42 = vsel %vm1427_vm6, %v3154_v41, %v1484_v16  ;;  %v3161_v22 = vld [vmem:[#allocation58_spill] sm:$0xff]  ;;  %v3163_v19 = vld [vmem:[#allocation52_spill] sm:$0xff]  ;;  %v3164_v30 = vld [vmem:[#allocation59_spill] sm:$0xff] }
 0x115   :  { %v1491_v50 = vsel %vm1425_vm5, %v3155_v54, %v1490_v57  ;;  %v1496_v51 = vsel %vm1421_vm3, %v3156_v12, %v1495_v38  ;;  %v1502_v7 = vsel %vm1419_vm2, %v3157_v21, %v1501_v35  ;;  %v1486_v45 = vsel %vm1429_vm7, %v3158_v59, %v1485_v42  ;;  %v3162_v17 = vld [vmem:[#allocation46_spill] sm:$0xff]  ;;  %v3165_v32 = vld [vmem:[#allocation63_spill] sm:$0xff]  ;;  %v3166_v55 = vld [vmem:[#allocation64_spill] sm:$0xff] }
 0x116   :  { %v1492_v1 = vsel %vm1427_vm6, %v3159_v31, %v1491_v50  ;;  %v1497_v25 = vsel %vm1423_vm4, %v3160_v43, %v1496_v51  ;;  %v1503_v26 = vsel %vm1421_vm3, %v3161_v22, %v1502_v7  ;;  %v1508_v18 = vsel %vm1417_vm1, %v3166_v55, %v3165_v32  ;;  %1560 = vst [vmem:[%s3023_s1 + $0x40] sm:$0xff] %v1486_v45  ;;  %v3167_v13 = vld [vmem:[#allocation53_spill] sm:$0xff]  ;;  %v3168_v58 = vld [vmem:[#allocation60_spill] sm:$0xff]  ;;  %v3170_v34 = vld [vmem:[#allocation71_spill] sm:$0xff] }
 0x117   :  { %v1493_v29 = vsel %vm1429_vm7, %v3162_v17, %v1492_v1  ;;  %v1498_v20 = vsel %vm1425_vm5, %v3163_v19, %v1497_v25  ;;  %v1504_v24 = vsel %vm1423_vm4, %v3164_v30, %v1503_v26  ;;  %v3169_v8 = vld [vmem:[#allocation65_spill] sm:$0xff]  ;;  %v3171_v46 = vld [vmem:[#allocation72_spill] sm:$0xff]  ;;  %v3172_v56 = vld [vmem:[#allocation54_spill] sm:$0xff]  ;;  %v1529_v42 = vsel %vm1417_vm1, %v2719_v44, %v2717_v49 }
 0x118   :  { %v1499_v23 = vsel %vm1427_vm6, %v3167_v13, %v1498_v20  ;;  %v1505_v5 = vsel %vm1425_vm5, %v3168_v58, %v1504_v24  ;;  %v1509_v52 = vsel %vm1419_vm2, %v3169_v8, %v1508_v18  ;;  %v1515_v39 = vsel %vm1417_vm1, %v3171_v46, %v3170_v34  ;;  %1561 = vst [vmem:[%s3023_s1 + $0x48] sm:$0xff] %v1493_v29  ;;  %v3173_v2 = vld [vmem:[#allocation61_spill] sm:$0xff]  ;;  %v3174_v40 = vld [vmem:[#allocation66_spill] sm:$0xff]  ;;  %v3177_v53 = vld [vmem:[#allocation67_spill] sm:$0xff] }
 0x119   :  { %v1500_v11 = vsel %vm1429_vm7, %v3172_v56, %v1499_v23  ;;  %v1506_v63 = vsel %vm1427_vm6, %v3173_v2, %v1505_v5  ;;  %v1510_v48 = vsel %vm1421_vm3, %v3174_v40, %v1509_v52  ;;  %v3175_v28 = vld [vmem:[#allocation73_spill] sm:$0xff]  ;;  %v3176_v15 = vld [vmem:[#allocation62_spill] sm:$0xff]  ;;  %v3179_v16 = vld [vmem:[#allocation79_spill] sm:$0xff]  ;;  %v1530_v59 = vsel %vm1419_vm2, %v2722_v36, %v1529_v42 }
 0x11a   :  { %v1516_v9 = vsel %vm1419_vm2, %v3175_v28, %v1515_v39  ;;  %v1507_v10 = vsel %vm1429_vm7, %v3176_v15, %v1506_v63  ;;  %v1511_v61 = vsel %vm1423_vm4, %v3177_v53, %v1510_v48  ;;  %v3178_v3 = vld [vmem:[#allocation74_spill] sm:$0xff]  ;;  %v3180_v4 = vld [vmem:[#allocation80_spill] sm:$0xff]  ;;  %1562 = vst [vmem:[%s3023_s1 + $0x50] sm:$0xff] %v1500_v11  ;;  %v3182_v62 = vld [vmem:[#allocation75_spill] sm:$0xff]  ;;  %v1531_v25 = vsel %vm1421_vm3, %v2724_v0, %v1530_v59 }
 0x11b   :  { %v1517_v6 = vsel %vm1421_vm3, %v3178_v3, %v1516_v9  ;;  %v1522_v57 = vsel %vm1417_vm1, %v3180_v4, %v3179_v16  ;;  %v3181_v37 = vld [vmem:[#allocation68_spill] sm:$0xff]  ;;  %v3183_v35 = vld [vmem:[#allocation81_spill] sm:$0xff]  ;;  %1563 = vst [vmem:[%s3023_s1 + $0x58] sm:$0xff] %v1507_v10  ;;  %v3186_v21 = vld [vmem:[#allocation82_spill] sm:$0xff]  ;;  %v1532_v36 = vsel %vm1423_vm4, %v2731_v33, %v1531_v25 }
 0x11c   :  { %v1512_v38 = vsel %vm1425_vm5, %v3181_v37, %v1511_v61  ;;  %v1518_v14 = vsel %vm1423_vm4, %v3182_v62, %v1517_v6  ;;  %v1523_v41 = vsel %vm1419_vm2, %v3183_v35, %v1522_v57  ;;  %v3184_v54 = vld [vmem:[#allocation69_spill] sm:$0xff]  ;;  %v3185_v12 = vld [vmem:[#allocation76_spill] sm:$0xff]  ;;  %v3187_v45 = vld [vmem:[#allocation70_spill] sm:$0xff]  ;;  %v1533_v30 = vsel %vm1425_vm5, %v2742_v47, %v1532_v36 }
 0x11d   :  { %v1513_v50 = vsel %vm1427_vm6, %v3184_v54, %v1512_v38  ;;  %v1519_v51 = vsel %vm1425_vm5, %v3185_v12, %v1518_v14  ;;  %v1524_v7 = vsel %vm1421_vm3, %v3186_v21, %v1523_v41  ;;  %v3188_v44 = vld [vmem:[#allocation77_spill] sm:$0xff]  ;;  %v3189_v1 = vld [vmem:[#allocation83_spill] sm:$0xff]  ;;  %v3190_v22 = vld [vmem:[#allocation78_spill] sm:$0xff]  ;;  %v1534_v33 = vsel %vm1427_vm6, %v2755_v60, %v1533_v30 }
 0x11e   :  { %v1514_v31 = vsel %vm1429_vm7, %v3187_v45, %v1513_v50  ;;  %v1520_v49 = vsel %vm1427_vm6, %v3188_v44, %v1519_v51  ;;  %v1525_v43 = vsel %vm1423_vm4, %v3189_v1, %v1524_v7  ;;  %v3191_v17 = vld [vmem:[#allocation84_spill] sm:$0xff]  ;;  %v3192_v19 = vld [vmem:[#allocation85_spill] sm:$0xff]  ;;  %v3193_v0 = vld [vmem:[#allocation86_spill] sm:$0xff]  ;;  %v1535_v32 = vsel %vm1429_vm7, %v2782_v27, %v1534_v33 }
 0x11f   :  { %v1521_v26 = vsel %vm1429_vm7, %v3190_v22, %v1520_v49  ;;  %v1526_v29 = vsel %vm1425_vm5, %v3191_v17, %v1525_v43  ;;  %1564 = vst [vmem:[%s3023_s1 + $0x60] sm:$0xff] %v1514_v31  ;;  %1567 = vst [vmem:[%s3023_s1 + $0x78] sm:$0xff] %v1535_v32 }
 0x120   :  { %v1527_v20 = vsel %vm1427_vm6, %v3192_v19, %v1526_v29  ;;  %1565 = vst [vmem:[%s3023_s1 + $0x68] sm:$0xff] %v1521_v26 }
 0x121   :  { %v1528_v24 = vsel %vm1429_vm7, %v3193_v0, %v1527_v20 }
 0x122   :  { %1566 = vst [vmem:[%s3023_s1 + $0x70] sm:$0xff] %v1528_v24 }

// kernel: densenet_forward.16
= control target key start
LH: loop header
LB: loop body
LE: loop exit
PB: predicated region body
PF: predicated region fallthrough
CT: control target
= control target key end

     0   :  { %s794_s1 = inlined_call_operand.vmem [shape: bf16[128,128], index: 1, kind: input, shape index: {}]   ;;  %s795_s0 = inlined_call_operand.vmem [shape: bf16[128,128], index: 0, kind: input, shape index: {}]   ;;  %s796_s2 = inlined_call_operand.vmem [shape: f32[1,128], index: 2, kind: input, shape index: {}]   ;;  %s797_s3 = inlined_call_operand.vmem [shape: f32[1,128], index: 3, kind: input, shape index: {}]   ;;  %s798_s4 = inlined_call_operand.vmem [shape: f32[1,128], index: 4, kind: input, shape index: {}]   ;;  %s799_s5 = inlined_call_operand.vmem [shape: f32[1,128], index: 5, kind: input, shape index: {}]   ;;  %s800_s6 = inlined_call_operand.vmem [shape: f32[128,128], index: 6, kind: output, shape index: {}]  }
   0x1   :  { %v571_v0 = vld [vmem:[%s794_s1 + $0x38] sm:$0xff]   ;;  %v572_v1 = vld [vmem:[%s794_s1 + $0x30] sm:$0xff]   ;;  %v573_v2 = vld [vmem:[%s794_s1 + $0x28] sm:$0xff]  }
   0x2   :  { %523 = vmatprep.subr.bf16.mxu0 %v571_v0  ;;  %555 = vmatprep.subr.bf16.mxu1 %v571_v0  ;;  %v574_v3 = vld [vmem:[%s794_s1 + $0x20] sm:$0xff]   ;;  %v500_v9 = vld [vmem:[%s795_s0 + $0x8] sm:$0xff]   ;;  %v501_v16 = vld [vmem:[%s795_s0 + $0x10] sm:$0xff]  }
   0x3   :  { %524 = vmatpush3.bf16.msra.mxu0 %v571_v0  ;;  %563 = vmatpush3.bf16.msra.mxu1 %v571_v0  ;;  %v469_v4 = vld [vmem:[%s795_s0] sm:$0xff]   ;;  %v504_v13 = vld [vmem:[%s795_s0 + $0x28] sm:$0xff]   ;;  %v575_v17 = vld [vmem:[%s794_s1 + $0x18] sm:$0xff]   ;;  %v474_v20 = vunpack.c.l.bf16 %v500_v9  ;;  %v475_v21 = vunpack.c.h.bf16 %v500_v9  ;;  %v478_v28 = vunpack.c.l.bf16 %v501_v16  ;;  %v479_v40 = vunpack.c.h.bf16 %v501_v16 }
   0x4   :  { %525 = vmatprep.subr.bf16.mxu0 %v572_v1  ;;  %556 = vmatprep.subr.bf16.mxu1 %v572_v1  ;;  %v632_v5 = vld [vmem:[%s796_s2] ss:$0 sm:$0xff]  ;;  %v470_v6 = vunpack.c.l.bf16 %v469_v4  ;;  %v471_v7 = vunpack.c.h.bf16 %v469_v4  ;;  %v490_v24 = vunpack.c.l.bf16 %v504_v13  ;;  %v491_v25 = vunpack.c.h.bf16 %v504_v13  ;;  %v505_v31 = vld [vmem:[%s795_s0 + $0x30] sm:$0xff]   ;;  %v502_v44 = vld [vmem:[%s795_s0 + $0x18] sm:$0xff]  }
   0x5   :  { %v503_v8 = vld [vmem:[%s795_s0 + $0x20] sm:$0xff]   ;;  %v576_v32 = vld [vmem:[%s794_s1 + $0x10] sm:$0xff]   ;;  %v85_v35 = vmul.f32 %v474_v20, %v632_v5  ;;  %v86_v36 = vmul.f32 %v475_v21, %v632_v5  ;;  %v87_v42 = vmul.f32 %v478_v28, %v632_v5  ;;  %v494_v43 = vunpack.c.l.bf16 %v505_v31  ;;  %v506_v47 = vld [vmem:[%s795_s0 + $0x38] sm:$0xff]  }
   0x6   :  { %v643_v10 = vld [vmem:[%s797_s3] ss:$0 sm:$0xff]  ;;  %v486_v11 = vunpack.c.l.bf16 %v503_v8  ;;  %v487_v12 = vunpack.c.h.bf16 %v503_v8  ;;  %v83_v14 = vmul.f32 %v470_v6, %v632_v5  ;;  %v84_v15 = vmul.f32 %v471_v7, %v632_v5  ;;  %v577_v48 = vld [vmem:[%s794_s1 + $0x8] sm:$0xff]  }
   0x7   :  { %526 = vmatpush3.bf16.msra.mxu0 %v572_v1  ;;  %564 = vmatpush3.bf16.msra.mxu1 %v572_v1  ;;  %v93_v38 = vmul.f32 %v490_v24, %v632_v5  ;;  %v94_v39 = vmul.f32 %v491_v25, %v632_v5  ;;  %v88_v45 = vmul.f32 %v479_v40, %v632_v5  ;;  %v495_v46 = vunpack.c.h.bf16 %v505_v31  ;;  %v578_v63 = vld [vmem:[%s794_s1] sm:$0xff]  }
   0x8   :  { %527 = vmatprep.subr.bf16.mxu0 %v573_v2  ;;  %557 = vmatprep.subr.bf16.mxu1 %v573_v2  ;;  %v91_v18 = vmul.f32 %v486_v11, %v632_v5  ;;  %v92_v19 = vmul.f32 %v487_v12, %v632_v5  ;;  %v106_v22 = vadd.f32 %v643_v10, %v83_v14  ;;  %v482_v55 = vunpack.c.l.bf16 %v502_v44  ;;  %v712_v28 = vld [vmem:[%s799_s5] ss:$0 sm:$0xff] }
   0x9   :  { %v107_v23 = vadd.f32 %v643_v10, %v84_v15  ;;  %v108_v49 = vadd.f32 %v643_v10, %v85_v35  ;;  %v109_v50 = vadd.f32 %v643_v10, %v86_v36  ;;  %v95_v51 = vmul.f32 %v494_v43, %v632_v5 }
   0xa   :  { %v114_v26 = vadd.f32 %v643_v10, %v91_v18  ;;  %v115_v27 = vadd.f32 %v643_v10, %v92_v19  ;;  %v122_v29 = vmax.f32 %v106_v22, 0.0  ;;  %v116_v52 = vadd.f32 %v643_v10, %v93_v38 }
   0xb   :  { %528 = vmatpush3.bf16.msra.mxu0 %v573_v2  ;;  %565 = vmatpush3.bf16.msra.mxu1 %v573_v2  ;;  %v123_v30 = vmax.f32 %v107_v23, 0.0  ;;  %v117_v53 = vadd.f32 %v643_v10, %v94_v39  ;;  %v96_v54 = vmul.f32 %v495_v46, %v632_v5  ;;  %v110_v56 = vadd.f32 %v643_v10, %v87_v42 }
   0xc   :  { %529 = vmatprep.subr.bf16.mxu0 %v574_v3  ;;  %558 = vmatprep.subr.bf16.mxu1 %v574_v3  ;;  %v130_v33 = vmax.f32 %v114_v26, 0.0  ;;  %v131_v34 = vmax.f32 %v115_v27, 0.0  ;;  %v483_v57 = vunpack.c.h.bf16 %v502_v44  ;;  %v498_v58 = vunpack.c.l.bf16 %v506_v47 }
   0xd   :  { %v154_v37 = vpack.c.bf16 %v123_v30, %v122_v29  ;;  %v499_v59 = vunpack.c.h.bf16 %v506_v47  ;;  %v111_v60 = vadd.f32 %v643_v10, %v88_v45  ;;  %v118_v61 = vadd.f32 %v643_v10, %v95_v51 }
   0xe   :  { %v158_v41 = vpack.c.bf16 %v131_v34, %v130_v33  ;;  %v119_v62 = vadd.f32 %v643_v10, %v96_v54  ;;  %v124_v0 = vmax.f32 %v108_v49, 0.0  ;;  %v125_v1 = vmax.f32 %v109_v50, 0.0 }
   0xf   :  { %530 = vmatpush3.bf16.msra.mxu0 %v574_v3  ;;  %566 = vmatpush3.bf16.msra.mxu1 %v574_v3  ;;  %v132_v2 = vmax.f32 %v116_v52, 0.0  ;;  %v133_v3 = vmax.f32 %v117_v53, 0.0  ;;  %v89_v4 = vmul.f32 %v482_v55, %v632_v5  ;;  %v90_v6 = vmul.f32 %v483_v57, %v632_v5 }
  0x10   :  { %531 = vmatprep.subr.bf16.mxu0 %v575_v17  ;;  %559 = vmatprep.subr.bf16.mxu1 %v575_v17  ;;  %v97_v7 = vmul.f32 %v498_v58, %v632_v5  ;;  %v98_v8 = vmul.f32 %v499_v59, %v632_v5  ;;  %v126_v9 = vmax.f32 %v110_v56, 0.0  ;;  %v127_v11 = vmax.f32 %v111_v60, 0.0 }
  0x11   :  { %539 = vmatprep.mubr.bf16.mxu0 %v154_v37  ;;  %547 = vmatprep.mubr.bf16.mxu1 %v158_v41  ;;  %v134_v12 = vmax.f32 %v118_v61, 0.0  ;;  %v135_v13 = vmax.f32 %v119_v62, 0.0  ;;  %v155_v14 = vpack.c.bf16 %v125_v1, %v124_v0  ;;  %v159_v15 = vpack.c.bf16 %v133_v3, %v132_v2 }
  0x12   :  { %v112_v16 = vadd.f32 %v643_v10, %v89_v4  ;;  %v120_v18 = vadd.f32 %v643_v10, %v97_v7  ;;  %v121_v19 = vadd.f32 %v643_v10, %v98_v8  ;;  %v156_v5 = vpack.c.bf16 %v127_v11, %v126_v9 }
  0x13   :  { %532 = vmatpush3.bf16.msra.mxu0 %v575_v17  ;;  %567 = vmatpush3.bf16.msra.mxu1 %v575_v17  ;;  %v113_v17 = vadd.f32 %v643_v10, %v90_v6  ;;  %v160_v20 = vpack.c.bf16 %v135_v13, %v134_v12  ;;  %v707_v10 = vld [vmem:[%s798_s4] ss:$0 sm:$0xff] }
  0x14   :  { %533 = vmatprep.subr.bf16.mxu0 %v576_v32  ;;  %560 = vmatprep.subr.bf16.mxu1 %v576_v32  ;;  %v128_v21 = vmax.f32 %v112_v16, 0.0  ;;  %v136_v23 = vmax.f32 %v120_v18, 0.0  ;;  %v137_v24 = vmax.f32 %v121_v19, 0.0 }
  0x15   :  { %v129_v22 = vmax.f32 %v113_v17, 0.0 }
  0x16   :  { %v161_v26 = vpack.c.bf16 %v137_v24, %v136_v23 }
  0x17   :  { %534 = vmatpush3.bf16.msra.mxu0 %v576_v32  ;;  %568 = vmatpush3.bf16.msra.mxu1 %v576_v32  ;;  %v157_v25 = vpack.c.bf16 %v129_v22, %v128_v21 }
  0x18   :  { %535 = vmatprep.subr.bf16.mxu0 %v577_v48  ;;  %561 = vmatprep.subr.bf16.mxu1 %v577_v48 }
  0x1b   :  { %536 = vmatpush3.bf16.msra.mxu0 %v577_v48  ;;  %569 = vmatpush3.bf16.msra.mxu1 %v577_v48 }
  0x1c   :  { %537 = vmatprep.subr.bf16.mxu0 %v578_v63  ;;  %562 = vmatprep.subr.bf16.mxu1 %v578_v63 }
  0x1f   :  { %538 = vmatpush3.bf16.msra.mxu0 %v578_v63  ;;  %570 = vmatpush3.bf16.msra.mxu1 %v578_v63 }
  0x22   :  { %540 = vmatmul.mubr.bf16.vlgmr.msra.gmra.mxu0 %v155_v14  ;;  %548 = vmatmul.mubr.bf16.vlgmr.msra.gmra.mxu1 %v159_v15 }
  0x23   :  { %543 = vmatprep.mubr.bf16.mxu0 %v156_v5  ;;  %551 = vmatprep.mubr.bf16.mxu1 %v160_v20 }
  0x2a   :  { %544 = vmatmul.mubr.bf16.gmra.mxu0 %v157_v25  ;;  %552 = vmatmul.mubr.bf16.gmra.mxu1 %v161_v26 }
  0xe2   :  { %v541_v27 = vpop.f32.mrf.mxu0  ;;  %v549_v29 = vpop.f32.mrf.mxu1 }
  0xe3   :  { %v383_v30 = vmul.f32 %v541_v27, %v707_v10  ;;  %v391_v31 = vmul.f32 %v549_v29, %v707_v10 }
  0xe4   :  { %v260_v32 = vpop.f32.mrf.mxu0  ;;  %v292_v33 = vpop.f32.mrf.mxu1 }
  0xe5   :  { %v406_v34 = vadd.f32 %v712_v28, %v383_v30  ;;  %v414_v35 = vadd.f32 %v712_v28, %v391_v31  ;;  %v381_v36 = vmul.f32 %v707_v10, %v260_v32  ;;  %v389_v37 = vmul.f32 %v707_v10, %v292_v33 }
  0xe6   :  { %v542_v38 = vpop.f32.mrf.mxu0  ;;  %v550_v39 = vpop.f32.mrf.mxu1 }
  0xe7   :  { %v422_v40 = vmax.f32 %v406_v34, 0.0  ;;  %v430_v41 = vmax.f32 %v414_v35, 0.0  ;;  %v404_v42 = vadd.f32 %v712_v28, %v381_v36  ;;  %v412_v43 = vadd.f32 %v712_v28, %v389_v37 }
  0xe8   :  { %v384_v44 = vmul.f32 %v542_v38, %v707_v10  ;;  %v392_v45 = vmul.f32 %v550_v39, %v707_v10  ;;  %v263_v46 = vpop.f32.mrf.mxu0  ;;  %v295_v47 = vpop.f32.mrf.mxu1 }
  0xe9   :  { %438 = vst [vmem:[%s800_s6 + $0x10] sm:$0xff] %v422_v40  ;;  %446 = vst [vmem:[%s800_s6 + $0x50] sm:$0xff] %v430_v41  ;;  %v420_v48 = vmax.f32 %v404_v42, 0.0  ;;  %v428_v49 = vmax.f32 %v412_v43, 0.0  ;;  %v382_v50 = vmul.f32 %v707_v10, %v263_v46  ;;  %v390_v51 = vmul.f32 %v707_v10, %v295_v47 }
  0xea   :  { %v407_v52 = vadd.f32 %v712_v28, %v384_v44  ;;  %v415_v53 = vadd.f32 %v712_v28, %v392_v45  ;;  %v545_v54 = vpop.f32.mrf.mxu0  ;;  %v553_v55 = vpop.f32.mrf.mxu1 }
  0xeb   :  { %436 = vst [vmem:[%s800_s6] sm:$0xff] %v420_v48  ;;  %444 = vst [vmem:[%s800_s6 + $0x40] sm:$0xff] %v428_v49  ;;  %v405_v56 = vadd.f32 %v712_v28, %v382_v50  ;;  %v413_v57 = vadd.f32 %v712_v28, %v390_v51  ;;  %v387_v58 = vmul.f32 %v545_v54, %v707_v10 }
  0xec   :  { %v395_v59 = vmul.f32 %v553_v55, %v707_v10  ;;  %v423_v60 = vmax.f32 %v407_v52, 0.0  ;;  %v431_v61 = vmax.f32 %v415_v53, 0.0  ;;  %v276_v62 = vpop.f32.mrf.mxu0  ;;  %v308_v63 = vpop.f32.mrf.mxu1 }
  0xed   :  { %v421_v0 = vmax.f32 %v405_v56, 0.0  ;;  %v429_v1 = vmax.f32 %v413_v57, 0.0  ;;  %v410_v2 = vadd.f32 %v712_v28, %v387_v58  ;;  %v385_v4 = vmul.f32 %v707_v10, %v276_v62 }
  0xee   :  { %v418_v3 = vadd.f32 %v712_v28, %v395_v59  ;;  %439 = vst [vmem:[%s800_s6 + $0x18] sm:$0xff] %v423_v60  ;;  %447 = vst [vmem:[%s800_s6 + $0x58] sm:$0xff] %v431_v61  ;;  %v393_v6 = vmul.f32 %v707_v10, %v308_v63  ;;  %v546_v7 = vpop.f32.mrf.mxu0  ;;  %v554_v8 = vpop.f32.mrf.mxu1 }
  0xef   :  { %437 = vst [vmem:[%s800_s6 + $0x8] sm:$0xff] %v421_v0  ;;  %445 = vst [vmem:[%s800_s6 + $0x48] sm:$0xff] %v429_v1  ;;  %v426_v9 = vmax.f32 %v410_v2, 0.0  ;;  %v388_v12 = vmul.f32 %v546_v7, %v707_v10  ;;  %v396_v13 = vmul.f32 %v554_v8, %v707_v10  ;;  %v408_v14 = vadd.f32 %v712_v28, %v385_v4 }
  0xf0   :  { %v434_v11 = vmax.f32 %v418_v3, 0.0  ;;  %v416_v15 = vadd.f32 %v712_v28, %v393_v6  ;;  %v279_v16 = vpop.f32.mrf.mxu0  ;;  %v311_v17 = vpop.f32.mrf.mxu1 }
  0xf1   :  { %442 = vst [vmem:[%s800_s6 + $0x30] sm:$0xff] %v426_v9  ;;  %v411_v18 = vadd.f32 %v712_v28, %v388_v12  ;;  %v419_v19 = vadd.f32 %v712_v28, %v396_v13  ;;  %v386_v5 = vmul.f32 %v707_v10, %v279_v16  ;;  %v394_v20 = vmul.f32 %v707_v10, %v311_v17 }
  0xf2   :  { %450 = vst [vmem:[%s800_s6 + $0x70] sm:$0xff] %v434_v11  ;;  %v424_v21 = vmax.f32 %v408_v14, 0.0  ;;  %v432_v22 = vmax.f32 %v416_v15, 0.0 }
  0xf3   :  { %v427_v23 = vmax.f32 %v411_v18, 0.0  ;;  %v435_v24 = vmax.f32 %v419_v19, 0.0  ;;  %v409_v25 = vadd.f32 %v712_v28, %v386_v5  ;;  %v417_v26 = vadd.f32 %v712_v28, %v394_v20 }
  0xf4   :  { %440 = vst [vmem:[%s800_s6 + $0x20] sm:$0xff] %v424_v21  ;;  %448 = vst [vmem:[%s800_s6 + $0x60] sm:$0xff] %v432_v22 }
  0xf5   :  { %443 = vst [vmem:[%s800_s6 + $0x38] sm:$0xff] %v427_v23  ;;  %451 = vst [vmem:[%s800_s6 + $0x78] sm:$0xff] %v435_v24  ;;  %v425_v10 = vmax.f32 %v409_v25, 0.0  ;;  %v433_v27 = vmax.f32 %v417_v26, 0.0 }
  0xf7   :  { %441 = vst [vmem:[%s800_s6 + $0x28] sm:$0xff] %v425_v10  ;;  %449 = vst [vmem:[%s800_s6 + $0x68] sm:$0xff] %v433_v27 }

// kernel: densenet_forward.17
= control target key start
LH: loop header
LB: loop body
LE: loop exit
PB: predicated region body
PF: predicated region fallthrough
CT: control target
= control target key end

     0   :  { %v126_v13 = vlaneseq  ;;  %s1342_s1 = inlined_call_operand.vmem [shape: bf16[384,128], index: 1, kind: input, shape index: {}]   ;;  %s1343_s0 = inlined_call_operand.vmem [shape: bf16[128,384], index: 0, kind: input, shape index: {}]   ;;  %s1344_s2 = inlined_call_operand.vmem [shape: f32[1,384], index: 2, kind: input, shape index: {}]   ;;  %s1345_s3 = inlined_call_operand.vmem [shape: f32[1,384], index: 3, kind: input, shape index: {}]   ;;  %s1346_s4 = inlined_call_operand.vmem [shape: f32[1,128], index: 4, kind: input, shape index: {}]   ;;  %s1347_s5 = inlined_call_operand.vmem [shape: f32[1,128], index: 5, kind: input, shape index: {}]   ;;  %s1348_s6 = inlined_call_operand.vmem [shape: f32[128,128], index: 6, kind: output, shape index: {}]  }
   0x1   :  { %v935_v0 = vld [vmem:[%s1342_s1 + $0x78] sm:$0xff]   ;;  %v938_v3 = vld [vmem:[%s1342_s1 + $0x70] sm:$0xff]   ;;  %v941_v6 = vld [vmem:[%s1342_s1 + $0x68] sm:$0xff]  }
   0x2   :  { %v936_v1 = vld [vmem:[%s1342_s1 + $0x38] sm:$0xff]   ;;  %823 = vmatprep.subr.bf16.mxu0 %v935_v0  ;;  %v939_v4 = vld [vmem:[%s1342_s1 + $0x30] sm:$0xff]   ;;  %v942_v7 = vld [vmem:[%s1342_s1 + $0x28] sm:$0xff]   ;;  %v127_v17 = vshrl.u32 %v126_v13, 7 }
   0x3   :  { %v937_v2 = vld [vmem:[%s1342_s1 + $0xb8] sm:$0xff]   ;;  %824 = vmatpush3.bf16.msra.mxu0 %v936_v1  ;;  %v940_v5 = vld [vmem:[%s1342_s1 + $0xb0] sm:$0xff]   ;;  %v943_v8 = vld [vmem:[%s1342_s1 + $0xa8] sm:$0xff]  }
   0x4   :  { %903 = vmatprep.subr.bf16.mxu1 %v937_v2  ;;  %825 = vmatprep.subr.bf16.mxu0 %v938_v3  ;;  %v944_v9 = vld [vmem:[%s1342_s1 + $0x60] sm:$0xff]   ;;  %v947_v12 = vld [vmem:[%s1342_s1 + $0x58] sm:$0xff]   ;;  %v950_v16 = vld [vmem:[%s1342_s1 + $0x50] sm:$0xff]   ;;  %v132_v22 = vsub.s32 1, %v127_v17  ;;  %v128_v24 = vsub.s32 0, %v127_v17  ;;  %v136_v26 = vsub.s32 2, %v127_v17 }
   0x5   :  { %904 = vmatpush3.bf16.msra.mxu1 %v937_v2  ;;  %v945_v10 = vld [vmem:[%s1342_s1 + $0x20] sm:$0xff]   ;;  %v949_v14 = vld [vmem:[%s1342_s1 + $0x98] sm:$0xff]   ;;  %v952_v18 = vld [vmem:[%s1342_s1 + $0x90] sm:$0xff]  }
   0x6   :  { %905 = vmatprep.subr.bf16.mxu1 %v940_v5  ;;  %v946_v11 = vld [vmem:[%s1342_s1 + $0xa0] sm:$0xff]   ;;  %v948_v15 = vld [vmem:[%s1342_s1 + $0x18] sm:$0xff]   ;;  %v951_v19 = vld [vmem:[%s1342_s1 + $0x10] sm:$0xff]  }
   0x7   :  { %826 = vmatpush3.bf16.msra.mxu0 %v939_v4  ;;  %v953_v20 = vld [vmem:[%s1342_s1 + $0x48] sm:$0xff]   ;;  %v956_v25 = vld [vmem:[%s1342_s1 + $0x40] sm:$0xff]   ;;  %v48_v55 = vld [vmem:[%s1343_s0 + $0x18] sm:$0xff] }
   0x8   :  { %827 = vmatprep.subr.bf16.mxu0 %v941_v6  ;;  %v954_v21 = vld [vmem:[%s1342_s1 + $0x8] sm:$0xff]   ;;  %v44_v27 = vld [vmem:[%s1343_s0] sm:$0xff]  ;;  %v52_v1 = vld [vmem:[%s1343_s0 + $0x30] sm:$0xff]  ;;  %v83_v4 = vunpack.c.h.bf16 %v48_v55 }
   0x9   :  { %906 = vmatpush3.bf16.msra.mxu1 %v940_v5  ;;  %v955_v23 = vld [vmem:[%s1342_s1 + $0x88] sm:$0xff]   ;;  %v124_v29 = vld [vmem:[%s1344_s2] sm:$0x7]  ;;  %v76_v30 = vunpack.c.l.bf16 %v44_v27  ;;  %v77_v31 = vunpack.c.h.bf16 %v44_v27 }
   0xa   :  { %907 = vmatprep.subr.bf16.mxu1 %v943_v8  ;;  %v46_v28 = vld [vmem:[%s1343_s0 + $0xc] sm:$0xff]  ;;  %v189_v34 = vld [vmem:[%s1345_s3] sm:$0x7]  ;;  %v45_v35 = vld [vmem:[%s1343_s0 + $0x8] ss:$12 sps:$4 sm:$0xff]   ;;  %v1078_v37 = vrot.slane %v124_v29, %v132_v22  ;;  %v1082_v39 = vrot.slane %v124_v29, %v128_v24  ;;  %v1092_v45 = vrot.slane %v124_v29, %v136_v26 }
   0xb   :  { %828 = vmatpush3.bf16.msra.mxu0 %v942_v7  ;;  %v79_v32 = vunpack.c.l.bf16 %v46_v28  ;;  %v80_v33 = vunpack.c.h.bf16 %v46_v28  ;;  %v958_v36 = vld [vmem:[%s1342_s1 + $0x80] sm:$0xff]   ;;  %v1080_v38 = vrot.slane %v189_v34, %v132_v22  ;;  %v1084_v40 = vrot.slane %v189_v34, %v128_v24  ;;  %v57_v28 = vld [vmem:[%s1343_s0 + $0x50] ss:$12 sps:$4 sm:$0xff]  }
   0xc   :  { %829 = vmatprep.subr.bf16.mxu0 %v944_v9  ;;  %v49_v41 = vld [vmem:[%s1343_s0 + $0x20] ss:$12 sps:$4 sm:$0xff]   ;;  %v78_v43 = vunpack.c.l.bf16 %v45_v35  ;;  %v81_v44 = vunpack.c.h.bf16 %v45_v35  ;;  %v1094_v46 = vrot.slane %v189_v34, %v136_v26  ;;  %v142_v47 = vmul.f32 %v1078_v37, %v77_v31  ;;  %v50_v56 = vld [vmem:[%s1343_s0 + $0x24] sm:$0xff] }
   0xd   :  { %908 = vmatpush3.bf16.msra.mxu1 %v943_v8  ;;  %v957_v42 = vld [vmem:[%s1342_s1] sm:$0xff]   ;;  %v145_v48 = vmul.f32 %v1078_v37, %v80_v33  ;;  %v141_v49 = vmul.f32 %v1082_v39, %v76_v30  ;;  %v144_v50 = vmul.f32 %v1082_v39, %v79_v32  ;;  %v84_v53 = vunpack.c.l.bf16 %v49_v41  ;;  %v56_v33 = vld [vmem:[%s1343_s0 + $0x48] sm:$0xff] }
   0xe   :  { %909 = vmatprep.subr.bf16.mxu1 %v946_v11  ;;  %v143_v51 = vmul.f32 %v1092_v45, %v78_v43  ;;  %v146_v52 = vmul.f32 %v1092_v45, %v81_v44  ;;  %v87_v54 = vunpack.c.h.bf16 %v49_v41  ;;  %v207_v57 = vadd.f32 %v1080_v38, %v142_v47  ;;  %v54_v6 = vld [vmem:[%s1343_s0 + $0x3c] sm:$0xff]  ;;  %v58_v41 = vld [vmem:[%s1343_s0 + $0x54] sm:$0xff] }
   0xf   :  { %830 = vmatpush3.bf16.msra.mxu0 %v945_v10  ;;  %v210_v58 = vadd.f32 %v1080_v38, %v145_v48  ;;  %v206_v59 = vadd.f32 %v1084_v40, %v141_v49  ;;  %v209_v60 = vadd.f32 %v1084_v40, %v144_v50  ;;  %v149_v63 = vmul.f32 %v1092_v45, %v84_v53 }
  0x10   :  { %831 = vmatprep.subr.bf16.mxu0 %v947_v12  ;;  %v208_v61 = vadd.f32 %v1094_v46, %v143_v51  ;;  %v211_v62 = vadd.f32 %v1094_v46, %v146_v52  ;;  %v152_v0 = vmul.f32 %v1092_v45, %v87_v54  ;;  %v86_v5 = vunpack.c.h.bf16 %v50_v56 }
  0x11   :  { %910 = vmatpush3.bf16.msra.mxu1 %v946_v11  ;;  %v271_v2 = vpack.c.bf16 %v210_v58, %v207_v57  ;;  %v270_v3 = vpack.c.bf16 %v209_v60, %v206_v59  ;;  %v214_v8 = vadd.f32 %v1094_v46, %v149_v63  ;;  %v82_v10 = vunpack.c.l.bf16 %v48_v55 }
  0x12   :  { %911 = vmatprep.subr.bf16.mxu1 %v949_v14  ;;  %v272_v7 = vpack.c.bf16 %v211_v62, %v208_v61  ;;  %v217_v9 = vadd.f32 %v1094_v46, %v152_v0  ;;  %v148_v11 = vmul.f32 %v1078_v37, %v83_v4  ;;  %v151_v12 = vmul.f32 %v1078_v37, %v86_v5  ;;  %v62_v61 = vld [vmem:[%s1343_s0 + $0x6c] sm:$0xff] }
  0x13   :  { %832 = vmatpush3.bf16.msra.mxu0 %v948_v15  ;;  %518 = vmatprep.mubr.bf16.mxu0 %v271_v2  ;;  %v85_v13 = vunpack.c.l.bf16 %v50_v56  ;;  %v92_v17 = vunpack.c.h.bf16 %v54_v6  ;;  %v91_v26 = vunpack.c.l.bf16 %v54_v6  ;;  %v96_v44 = vunpack.c.l.bf16 %v57_v28  ;;  %v60_v56 = vld [vmem:[%s1343_s0 + $0x60] sm:$0xff]  ;;  %v61_v6 = vld [vmem:[%s1343_s0 + $0x68] ss:$12 sps:$4 sm:$0xff]  }
  0x14   :  { %833 = vmatprep.subr.bf16.mxu0 %v950_v16  ;;  %919 = vmatprep.mubr.bf16.mxu1 %v272_v7  ;;  %v275_v15 = vpack.c.bf16 %v217_v9, %v214_v8  ;;  %v147_v16 = vmul.f32 %v1082_v39, %v82_v10  ;;  %v99_v47 = vunpack.c.h.bf16 %v57_v28  ;;  %v95_v51 = vunpack.c.h.bf16 %v56_v33 }
  0x15   :  { %912 = vmatpush3.bf16.msra.mxu1 %v949_v14  ;;  %v89_v14 = vunpack.c.h.bf16 %v52_v1  ;;  %v150_v22 = vmul.f32 %v1082_v39, %v85_v13  ;;  %v156_v35 = vmul.f32 %v1082_v39, %v91_v26  ;;  %v161_v53 = vmul.f32 %v1092_v45, %v96_v44  ;;  %v65_v13 = vld [vmem:[%s1343_s0 + $0x80] ss:$12 sps:$4 sm:$0xff]  }
  0x16   :  { %913 = vmatprep.subr.bf16.mxu1 %v952_v18  ;;  %v212_v24 = vadd.f32 %v1084_v40, %v147_v16  ;;  %v164_v54 = vmul.f32 %v1092_v45, %v99_v47  ;;  %v98_v55 = vunpack.c.h.bf16 %v58_v41  ;;  %v160_v59 = vmul.f32 %v1078_v37, %v95_v51  ;;  %v68_v51 = vld [vmem:[%s1343_s0 + $0x90] sm:$0xff] }
  0x17   :  { %834 = vmatpush3.bf16.msra.mxu0 %v951_v19  ;;  %v53_v19 = vld [vmem:[%s1343_s0 + $0x38] ss:$12 sps:$4 sm:$0xff]   ;;  %v215_v30 = vadd.f32 %v1084_v40, %v150_v22  ;;  %v221_v57 = vadd.f32 %v1084_v40, %v156_v35  ;;  %v94_v60 = vunpack.c.l.bf16 %v56_v33  ;;  %v226_v62 = vadd.f32 %v1094_v46, %v161_v53 }
  0x18   :  { %835 = vmatprep.subr.bf16.mxu0 %v953_v20  ;;  %v213_v20 = vadd.f32 %v1080_v38, %v148_v11  ;;  %v90_v32 = vunpack.c.l.bf16 %v53_v19  ;;  %v229_v63 = vadd.f32 %v1094_v46, %v164_v54  ;;  %v163_v0 = vmul.f32 %v1078_v37, %v98_v55  ;;  %v70_v54 = vld [vmem:[%s1343_s0 + $0x9c] sm:$0xff] }
  0x19   :  { %914 = vmatpush3.bf16.msra.mxu1 %v952_v18  ;;  %v88_v18 = vunpack.c.l.bf16 %v52_v1  ;;  %v97_v1 = vunpack.c.l.bf16 %v58_v41  ;;  %v159_v4 = vmul.f32 %v1082_v39, %v94_v60  ;;  %v101_v5 = vunpack.c.h.bf16 %v60_v56 }
  0x1a   :  { %915 = vmatprep.subr.bf16.mxu1 %v955_v23  ;;  %v155_v43 = vmul.f32 %v1092_v45, %v90_v32  ;;  %v281_v7 = vpack.c.bf16 %v229_v63, %v226_v62  ;;  %v228_v8 = vadd.f32 %v1080_v38, %v163_v0  ;;  %v104_v9 = vunpack.c.h.bf16 %v62_v61 }
  0x1b   :  { %836 = vmatpush3.bf16.msra.mxu0 %v954_v21  ;;  %v216_v21 = vadd.f32 %v1080_v38, %v151_v12  ;;  %v153_v27 = vmul.f32 %v1082_v39, %v88_v18  ;;  %v162_v11 = vmul.f32 %v1082_v39, %v97_v1  ;;  %v166_v12 = vmul.f32 %v1078_v37, %v101_v5 }
  0x1c   :  { %837 = vmatprep.subr.bf16.mxu0 %v956_v25  ;;  %v157_v25 = vmul.f32 %v1078_v37, %v92_v17  ;;  %v220_v52 = vadd.f32 %v1094_v46, %v155_v43  ;;  %v102_v16 = vunpack.c.l.bf16 %v61_v6  ;;  %v224_v17 = vadd.f32 %v1084_v40, %v159_v4 }
  0x1d   :  { %916 = vmatpush3.bf16.msra.mxu1 %v955_v23  ;;  %v154_v23 = vmul.f32 %v1078_v37, %v89_v14  ;;  %v274_v29 = vpack.c.bf16 %v216_v21, %v213_v20  ;;  %v218_v49 = vadd.f32 %v1084_v40, %v153_v27  ;;  %v105_v18 = vunpack.c.h.bf16 %v61_v6 }
  0x1e   :  { %917 = vmatprep.subr.bf16.mxu1 %v958_v36  ;;  %v222_v34 = vadd.f32 %v1080_v38, %v157_v25  ;;  %v100_v20 = vunpack.c.l.bf16 %v60_v56  ;;  %v103_v21 = vunpack.c.l.bf16 %v62_v61  ;;  %v167_v22 = vmul.f32 %v1092_v45, %v102_v16 }
  0x1f   :  { %838 = vmatpush3.bf16.msra.mxu0 %v957_v42  ;;  %v219_v31 = vadd.f32 %v1080_v38, %v154_v23  ;;  %v273_v42 = vpack.c.bf16 %v215_v30, %v212_v24  ;;  %v276_v10 = vpack.c.bf16 %v221_v57, %v218_v49  ;;  %v108_v23 = vunpack.c.l.bf16 %v65_v13  ;;  %v66_v24 = vld [vmem:[%s1343_s0 + $0x84] sm:$0xff] }
  0x20   :  { %v227_v25 = vadd.f32 %v1084_v40, %v162_v11  ;;  %v231_v26 = vadd.f32 %v1080_v38, %v166_v12  ;;  %v170_v27 = vmul.f32 %v1092_v45, %v105_v18  ;;  %v111_v28 = vunpack.c.h.bf16 %v65_v13  ;;  %v72_v18 = vld [vmem:[%s1343_s0 + $0xa8] sm:$0xff] }
  0x21   :  { %918 = vmatpush3.bf16.msra.mxu1 %v958_v36  ;;  %v93_v36 = vunpack.c.h.bf16 %v53_v19  ;;  %v277_v48 = vpack.c.bf16 %v222_v34, %v219_v31  ;;  %v64_v19 = vld [vmem:[%s1343_s0 + $0x78] sm:$0xff]  ;;  %v232_v30 = vadd.f32 %v1094_v46, %v167_v22  ;;  %v173_v31 = vmul.f32 %v1092_v45, %v108_v23 }
  0x22   :  { %519 = vmatmul.mubr.bf16.vlgmr.msra.gmra.mxu0 %v270_v3  ;;  %v225_v3 = vadd.f32 %v1080_v38, %v160_v59  ;;  %v107_v32 = vunpack.c.h.bf16 %v64_v19  ;;  %v235_v33 = vadd.f32 %v1094_v46, %v170_v27  ;;  %v176_v34 = vmul.f32 %v1092_v45, %v111_v28 }
  0x23   :  { %526 = vmatprep.mubr.bf16.mxu0 %v274_v29  ;;  %v158_v50 = vmul.f32 %v1092_v45, %v93_v36  ;;  %v110_v35 = vunpack.c.h.bf16 %v66_v24  ;;  %v165_v36 = vmul.f32 %v1082_v39, %v100_v20  ;;  %v168_v41 = vmul.f32 %v1082_v39, %v103_v21 }
  0x24   :  { %920 = vmatmul.mubr.bf16.vlgmr.msra.gmra.mxu1 %v275_v15  ;;  %v280_v14 = vpack.c.bf16 %v228_v8, %v225_v3  ;;  %v169_v15 = vmul.f32 %v1078_v37, %v104_v9  ;;  %v279_v43 = vpack.c.bf16 %v227_v25, %v224_v17  ;;  %v284_v44 = vpack.c.bf16 %v235_v33, %v232_v30 }
  0x25   :  { %v223_v58 = vadd.f32 %v1094_v46, %v158_v50  ;;  %v241_v47 = vadd.f32 %v1094_v46, %v176_v34  ;;  %v172_v49 = vmul.f32 %v1078_v37, %v107_v32  ;;  %v175_v50 = vmul.f32 %v1078_v37, %v110_v35 }
  0x26   :  { %v234_v29 = vadd.f32 %v1080_v38, %v169_v15  ;;  %v230_v55 = vadd.f32 %v1084_v40, %v165_v36  ;;  %v233_v56 = vadd.f32 %v1084_v40, %v168_v41  ;;  %v106_v57 = vunpack.c.l.bf16 %v64_v19  ;;  %v74_v19 = vld [vmem:[%s1343_s0 + $0xb4] sm:$0xff] }
  0x27   :  { %v278_v2 = vpack.c.bf16 %v223_v58, %v220_v52  ;;  %v69_v52 = vld [vmem:[%s1343_s0 + $0x98] ss:$12 sps:$4 sm:$0xff]   ;;  %v73_v58 = vld [vmem:[%s1343_s0 + $0xb0] ss:$12 sps:$4 sm:$0xff]   ;;  %v109_v59 = vunpack.c.l.bf16 %v66_v24  ;;  %v113_v60 = vunpack.c.h.bf16 %v68_v51  ;;  %v237_v62 = vadd.f32 %v1080_v38, %v172_v49 }
  0x28   :  { %v114_v61 = vunpack.c.l.bf16 %v69_v52  ;;  %v240_v63 = vadd.f32 %v1080_v38, %v175_v50  ;;  %v116_v0 = vunpack.c.h.bf16 %v70_v54  ;;  %v117_v1 = vunpack.c.h.bf16 %v69_v52 }
  0x29   :  { %923 = vmatprep.mubr.bf16.mxu1 %v278_v2  ;;  %v120_v3 = vunpack.c.l.bf16 %v73_v58  ;;  %v123_v4 = vunpack.c.h.bf16 %v73_v58  ;;  %v282_v5 = vpack.c.bf16 %v233_v56, %v230_v55  ;;  %v171_v6 = vmul.f32 %v1082_v39, %v106_v57  ;;  %v1255_v57 = vld [vmem:[%s1346_s4] ss:$0 sm:$0xff] }
  0x2a   :  { %527 = vmatmul.mubr.bf16.gmra.mxu0 %v273_v42  ;;  %v238_v42 = vadd.f32 %v1094_v46, %v173_v31  ;;  %v179_v2 = vmul.f32 %v1092_v45, %v114_v61  ;;  %v174_v8 = vmul.f32 %v1082_v39, %v109_v59  ;;  %v286_v12 = vpack.c.bf16 %v240_v63, %v237_v62  ;;  %v1260_v58 = vld [vmem:[%s1347_s5] ss:$0 sm:$0xff] }
  0x2b   :  { %534 = vmatprep.mubr.bf16.mxu0 %v277_v48  ;;  %v283_v48 = vpack.c.bf16 %v234_v29, %v231_v26  ;;  %v188_v11 = vmul.f32 %v1092_v45, %v123_v4  ;;  %v178_v13 = vmul.f32 %v1078_v37, %v113_v60  ;;  %v236_v21 = vadd.f32 %v1084_v40, %v171_v6 }
  0x2c   :  { %924 = vmatmul.mubr.bf16.gmra.mxu1 %v281_v7  ;;  %v287_v53 = vpack.c.bf16 %v241_v47, %v238_v42  ;;  %v182_v7 = vmul.f32 %v1092_v45, %v117_v1  ;;  %v244_v9 = vadd.f32 %v1094_v46, %v179_v2  ;;  %v239_v22 = vadd.f32 %v1084_v40, %v174_v8 }
  0x2d   :  { %927 = vmatprep.mubr.bf16.mxu1 %v284_v44  ;;  %v253_v17 = vadd.f32 %v1094_v46, %v188_v11  ;;  %v115_v23 = vunpack.c.l.bf16 %v70_v54  ;;  %v119_v26 = vunpack.c.h.bf16 %v72_v18  ;;  %v122_v27 = vunpack.c.h.bf16 %v74_v19 }
  0x2e   :  { %v247_v15 = vadd.f32 %v1094_v46, %v182_v7  ;;  %v285_v28 = vpack.c.bf16 %v239_v22, %v236_v21  ;;  %v118_v36 = vunpack.c.l.bf16 %v72_v18  ;;  %v121_v41 = vunpack.c.l.bf16 %v74_v19 }
  0x2f   :  { %v180_v30 = vmul.f32 %v1082_v39, %v115_v23  ;;  %v184_v32 = vmul.f32 %v1078_v37, %v119_v26  ;;  %v187_v33 = vmul.f32 %v1078_v37, %v122_v27 }
  0x30   :  { %v290_v20 = vpack.c.bf16 %v247_v15, %v244_v9  ;;  %v183_v47 = vmul.f32 %v1082_v39, %v118_v36 }
  0x31   :  { %v245_v35 = vadd.f32 %v1084_v40, %v180_v30  ;;  %v249_v42 = vadd.f32 %v1080_v38, %v184_v32 }
  0x32   :  { %535 = vmatmul.mubr.bf16.gmra.mxu0 %v276_v10  ;;  %v185_v10 = vmul.f32 %v1092_v45, %v120_v3  ;;  %v112_v45 = vunpack.c.l.bf16 %v68_v51 }
  0x33   :  { %542 = vmatprep.mubr.bf16.mxu0 %v280_v14  ;;  %v181_v14 = vmul.f32 %v1078_v37, %v116_v0  ;;  %v248_v37 = vadd.f32 %v1084_v40, %v183_v47 }
  0x34   :  { %928 = vmatmul.mubr.bf16.gmra.mxu1 %v287_v53  ;;  %v250_v16 = vadd.f32 %v1094_v46, %v185_v10  ;;  %v243_v46 = vadd.f32 %v1080_v38, %v178_v13  ;;  %v177_v29 = vmul.f32 %v1082_v39, %v112_v45 }
  0x35   :  { %v246_v25 = vadd.f32 %v1080_v38, %v181_v14  ;;  %931 = vmatprep.mubr.bf16.mxu1 %v290_v20 }
  0x36   :  { %v293_v24 = vpack.c.bf16 %v253_v17, %v250_v16  ;;  %v242_v34 = vadd.f32 %v1084_v40, %v177_v29 }
  0x37   :  { %v289_v31 = vpack.c.bf16 %v246_v25, %v243_v46 }
  0x38   :  { %v288_v44 = vpack.c.bf16 %v245_v35, %v242_v34 }
  0x3a   :  { %543 = vmatmul.mubr.bf16.gmra.mxu0 %v279_v43  ;;  %v252_v43 = vadd.f32 %v1080_v38, %v187_v33 }
  0x3b   :  { %550 = vmatprep.mubr.bf16.mxu0 %v283_v48  ;;  %v186_v48 = vmul.f32 %v1082_v39, %v121_v41 }
  0x3c   :  { %932 = vmatmul.mubr.bf16.gmra.mxu1 %v293_v24  ;;  %v292_v49 = vpack.c.bf16 %v252_v43, %v249_v42 }
  0x3d   :  { %v251_v50 = vadd.f32 %v1084_v40, %v186_v48 }
  0x3f   :  { %v291_v51 = vpack.c.bf16 %v251_v50, %v248_v37 }
  0x42   :  { %551 = vmatmul.mubr.bf16.gmra.mxu0 %v282_v5 }
  0x43   :  { %558 = vmatprep.mubr.bf16.mxu0 %v286_v12 }
  0x4a   :  { %559 = vmatmul.mubr.bf16.gmra.mxu0 %v285_v28 }
  0x4b   :  { %566 = vmatprep.mubr.bf16.mxu0 %v289_v31 }
  0x52   :  { %567 = vmatmul.mubr.bf16.gmra.mxu0 %v288_v44 }
  0x53   :  { %574 = vmatprep.mubr.bf16.mxu0 %v292_v49 }
  0x5a   :  { %575 = vmatmul.mubr.bf16.gmra.mxu0 %v291_v51 }
  0xe2   :  { %v839_v52 = vpop.f32.mrf.mxu0 }
  0xe4   :  { %v840_v53 = vpop.f32.mrf.mxu0  ;;  %v921_v54 = vpop.f32.mrf.mxu1 }
  0xe5   :  { %v841_v55 = vadd.f32 %v840_v53, %v839_v52 }
  0xe6   :  { %v842_v56 = vpop.f32.mrf.mxu0  ;;  %v617_v38 = vpop.f32.mrf.mxu1 }
  0xe7   :  { %v618_v39 = vadd.f32 %v841_v55, %v617_v38 }
  0xe8   :  { %v843_v40 = vpop.f32.mrf.mxu0  ;;  %v922_v59 = vpop.f32.mrf.mxu1 }
  0xe9   :  { %v738_v60 = vmul.f32 %v1255_v57, %v618_v39  ;;  %v844_v61 = vadd.f32 %v843_v40, %v842_v56 }
  0xea   :  { %v845_v62 = vpop.f32.mrf.mxu0  ;;  %v620_v63 = vpop.f32.mrf.mxu1 }
  0xeb   :  { %v761_v0 = vadd.f32 %v1260_v58, %v738_v60  ;;  %v621_v1 = vadd.f32 %v844_v61, %v620_v63 }
  0xec   :  { %v846_v2 = vpop.f32.mrf.mxu0  ;;  %v925_v8 = vpop.f32.mrf.mxu1 }
  0xed   :  { %777 = vst [vmem:[%s1348_s6] sm:$0xff] %v761_v0  ;;  %v739_v3 = vmul.f32 %v1255_v57, %v621_v1  ;;  %v847_v4 = vadd.f32 %v846_v2, %v845_v62 }
  0xee   :  { %v848_v5 = vpop.f32.mrf.mxu0  ;;  %v633_v12 = vpop.f32.mrf.mxu1 }
  0xef   :  { %v762_v6 = vadd.f32 %v1260_v58, %v739_v3  ;;  %v626_v7 = vadd.f32 %v921_v54, %v847_v4 }
  0xf0   :  { %v849_v9 = vpop.f32.mrf.mxu0  ;;  %v926_v17 = vpop.f32.mrf.mxu1 }
  0xf1   :  { %778 = vst [vmem:[%s1348_s6 + $0x8] sm:$0xff] %v762_v6  ;;  %v740_v10 = vmul.f32 %v1255_v57, %v626_v7  ;;  %v850_v11 = vadd.f32 %v849_v9, %v848_v5 }
  0xf2   :  { %v851_v13 = vpop.f32.mrf.mxu0  ;;  %v636_v23 = vpop.f32.mrf.mxu1 }
  0xf3   :  { %v763_v14 = vadd.f32 %v1260_v58, %v740_v10  ;;  %v629_v15 = vadd.f32 %v922_v59, %v850_v11 }
  0xf4   :  { %v852_v16 = vpop.f32.mrf.mxu0  ;;  %v929_v29 = vpop.f32.mrf.mxu1 }
  0xf5   :  { %779 = vst [vmem:[%s1348_s6 + $0x10] sm:$0xff] %v763_v14  ;;  %v741_v18 = vmul.f32 %v1255_v57, %v629_v15  ;;  %v853_v19 = vadd.f32 %v852_v16, %v851_v13 }
  0xf6   :  { %v854_v45 = vpop.f32.mrf.mxu0  ;;  %v649_v36 = vpop.f32.mrf.mxu1 }
  0xf7   :  { %v764_v20 = vadd.f32 %v1260_v58, %v741_v18  ;;  %v634_v21 = vadd.f32 %v853_v19, %v633_v12 }
  0xf8   :  { %v855_v22 = vpop.f32.mrf.mxu0  ;;  %v930_v49 = vpop.f32.mrf.mxu1 }
  0xf9   :  { %780 = vst [vmem:[%s1348_s6 + $0x18] sm:$0xff] %v764_v20  ;;  %v742_v24 = vmul.f32 %v1255_v57, %v634_v21  ;;  %v856_v46 = vadd.f32 %v855_v22, %v854_v45 }
  0xfa   :  { %v857_v25 = vpop.f32.mrf.mxu0  ;;  %v652_v55 = vpop.f32.mrf.mxu1 }
  0xfb   :  { %v765_v26 = vadd.f32 %v1260_v58, %v742_v24  ;;  %v637_v27 = vadd.f32 %v856_v46, %v636_v23 }
  0xfc   :  { %v858_v28 = vpop.f32.mrf.mxu0  ;;  %v933_v61 = vpop.f32.mrf.mxu1 }
  0xfd   :  { %781 = vst [vmem:[%s1348_s6 + $0x20] sm:$0xff] %v765_v26  ;;  %v743_v30 = vmul.f32 %v1255_v57, %v637_v27  ;;  %v859_v31 = vadd.f32 %v858_v28, %v857_v25 }
  0xfe   :  { %v860_v32 = vpop.f32.mrf.mxu0  ;;  %v665_v4 = vpop.f32.mrf.mxu1 }
  0xff   :  { %v766_v33 = vadd.f32 %v1260_v58, %v743_v30  ;;  %v642_v34 = vadd.f32 %v925_v8, %v859_v31 }
 0x100   :  { %v861_v35 = vpop.f32.mrf.mxu0  ;;  %v934_v11 = vpop.f32.mrf.mxu1 }
 0x101   :  { %782 = vst [vmem:[%s1348_s6 + $0x28] sm:$0xff] %v766_v33  ;;  %v744_v41 = vmul.f32 %v1255_v57, %v642_v34  ;;  %v862_v42 = vadd.f32 %v861_v35, %v860_v32 }
 0x102   :  { %v863_v43 = vpop.f32.mrf.mxu0  ;;  %v668_v18 = vpop.f32.mrf.mxu1 }
 0x103   :  { %v767_v44 = vadd.f32 %v1260_v58, %v744_v41  ;;  %v645_v47 = vadd.f32 %v926_v17, %v862_v42 }
 0x104   :  { %v864_v48 = vpop.f32.mrf.mxu0 }
 0x105   :  { %783 = vst [vmem:[%s1348_s6 + $0x30] sm:$0xff] %v767_v44  ;;  %v745_v37 = vmul.f32 %v1255_v57, %v645_v47  ;;  %v865_v50 = vadd.f32 %v864_v48, %v863_v43 }
 0x106   :  { %v866_v51 = vpop.f32.mrf.mxu0 }
 0x107   :  { %v768_v52 = vadd.f32 %v1260_v58, %v745_v37  ;;  %v650_v53 = vadd.f32 %v865_v50, %v649_v36 }
 0x108   :  { %v867_v54 = vpop.f32.mrf.mxu0 }
 0x109   :  { %784 = vst [vmem:[%s1348_s6 + $0x38] sm:$0xff] %v768_v52  ;;  %v746_v56 = vmul.f32 %v1255_v57, %v650_v53  ;;  %v868_v38 = vadd.f32 %v867_v54, %v866_v51 }
 0x10a   :  { %v869_v39 = vpop.f32.mrf.mxu0 }
 0x10b   :  { %v769_v40 = vadd.f32 %v1260_v58, %v746_v56  ;;  %v653_v59 = vadd.f32 %v868_v38, %v652_v55 }
 0x10c   :  { %v870_v60 = vpop.f32.mrf.mxu0 }
 0x10d   :  { %785 = vst [vmem:[%s1348_s6 + $0x40] sm:$0xff] %v769_v40  ;;  %v747_v62 = vmul.f32 %v1255_v57, %v653_v59  ;;  %v871_v63 = vadd.f32 %v870_v60, %v869_v39 }
 0x10e   :  { %v872_v0 = vpop.f32.mrf.mxu0 }
 0x10f   :  { %v770_v1 = vadd.f32 %v1260_v58, %v747_v62  ;;  %v658_v2 = vadd.f32 %v929_v29, %v871_v63 }
 0x110   :  { %v873_v3 = vpop.f32.mrf.mxu0 }
 0x111   :  { %786 = vst [vmem:[%s1348_s6 + $0x48] sm:$0xff] %v770_v1  ;;  %v748_v5 = vmul.f32 %v1255_v57, %v658_v2  ;;  %v874_v6 = vadd.f32 %v873_v3, %v872_v0 }
 0x112   :  { %v875_v7 = vpop.f32.mrf.mxu0 }
 0x113   :  { %v771_v8 = vadd.f32 %v1260_v58, %v748_v5  ;;  %v661_v9 = vadd.f32 %v930_v49, %v874_v6 }
 0x114   :  { %v876_v10 = vpop.f32.mrf.mxu0 }
 0x115   :  { %787 = vst [vmem:[%s1348_s6 + $0x50] sm:$0xff] %v771_v8  ;;  %v749_v12 = vmul.f32 %v1255_v57, %v661_v9  ;;  %v877_v13 = vadd.f32 %v876_v10, %v875_v7 }
 0x116   :  { %v878_v14 = vpop.f32.mrf.mxu0 }
 0x117   :  { %v772_v15 = vadd.f32 %v1260_v58, %v749_v12  ;;  %v666_v16 = vadd.f32 %v877_v13, %v665_v4 }
 0x118   :  { %v879_v17 = vpop.f32.mrf.mxu0 }
 0x119   :  { %788 = vst [vmem:[%s1348_s6 + $0x58] sm:$0xff] %v772_v15  ;;  %v750_v19 = vmul.f32 %v1255_v57, %v666_v16  ;;  %v880_v45 = vadd.f32 %v879_v17, %v878_v14 }
 0x11a   :  { %v881_v20 = vpop.f32.mrf.mxu0 }
 0x11b   :  { %v773_v21 = vadd.f32 %v1260_v58, %v750_v19  ;;  %v669_v22 = vadd.f32 %v880_v45, %v668_v18 }
 0x11c   :  { %v882_v23 = vpop.f32.mrf.mxu0 }
 0x11d   :  { %789 = vst [vmem:[%s1348_s6 + $0x60] sm:$0xff] %v773_v21  ;;  %v751_v24 = vmul.f32 %v1255_v57, %v669_v22  ;;  %v883_v46 = vadd.f32 %v882_v23, %v881_v20 }
 0x11e   :  { %v884_v25 = vpop.f32.mrf.mxu0 }
 0x11f   :  { %v774_v26 = vadd.f32 %v1260_v58, %v751_v24  ;;  %v674_v27 = vadd.f32 %v933_v61, %v883_v46 }
 0x120   :  { %v885_v28 = vpop.f32.mrf.mxu0 }
 0x121   :  { %790 = vst [vmem:[%s1348_s6 + $0x68] sm:$0xff] %v774_v26  ;;  %v752_v29 = vmul.f32 %v1255_v57, %v674_v27  ;;  %v886_v30 = vadd.f32 %v885_v28, %v884_v25 }
 0x123   :  { %v775_v31 = vadd.f32 %v1260_v58, %v752_v29  ;;  %v677_v32 = vadd.f32 %v934_v11, %v886_v30 }
 0x125   :  { %791 = vst [vmem:[%s1348_s6 + $0x70] sm:$0xff] %v775_v31  ;;  %v753_v33 = vmul.f32 %v1255_v57, %v677_v32 }
 0x127   :  { %v776_v34 = vadd.f32 %v1260_v58, %v753_v33 }
 0x129   :  { %792 = vst [vmem:[%s1348_s6 + $0x78] sm:$0xff] %v776_v34 }

// kernel: densenet_forward.20
= control target key start
LH: loop header
LB: loop body
LE: loop exit
PB: predicated region body
PF: predicated region fallthrough
CT: control target
= control target key end

     0   :  { %s742_s1 = inlined_call_operand.vmem [shape: bf16[128,128], index: 1, kind: input, shape index: {}]   ;;  %s743_s0 = inlined_call_operand.vmem [shape: bf16[128,128], index: 0, kind: input, shape index: {}]   ;;  %s744_s2 = inlined_call_operand.vmem [shape: f32[1,128], index: 2, kind: input, shape index: {}]   ;;  %s745_s3 = inlined_call_operand.vmem [shape: f32[1,128], index: 3, kind: input, shape index: {}]   ;;  %s746_s4 = inlined_call_operand.vmem [shape: f32[1,128], index: 4, kind: input, shape index: {}]   ;;  %s747_s5 = inlined_call_operand.vmem [shape: f32[1,128], index: 5, kind: input, shape index: {}]   ;;  %s748_s6 = inlined_call_operand.vmem [shape: f32[128,128], index: 6, kind: output, shape index: {}]  }
   0x1   :  { %v555_v0 = vld [vmem:[%s742_s1 + $0x38] sm:$0xff]   ;;  %v556_v1 = vld [vmem:[%s742_s1 + $0x30] sm:$0xff]   ;;  %v557_v2 = vld [vmem:[%s742_s1 + $0x28] sm:$0xff]  }
   0x2   :  { %507 = vmatprep.subr.bf16.mxu0 %v555_v0  ;;  %539 = vmatprep.subr.bf16.mxu1 %v555_v0  ;;  %v558_v3 = vld [vmem:[%s742_s1 + $0x20] sm:$0xff]   ;;  %v484_v9 = vld [vmem:[%s743_s0 + $0x8] sm:$0xff]   ;;  %v485_v16 = vld [vmem:[%s743_s0 + $0x10] sm:$0xff]  }
   0x3   :  { %508 = vmatpush3.bf16.msra.mxu0 %v555_v0  ;;  %547 = vmatpush3.bf16.msra.mxu1 %v555_v0  ;;  %v453_v4 = vld [vmem:[%s743_s0] sm:$0xff]   ;;  %v488_v13 = vld [vmem:[%s743_s0 + $0x28] sm:$0xff]   ;;  %v559_v17 = vld [vmem:[%s742_s1 + $0x18] sm:$0xff]   ;;  %v458_v20 = vunpack.c.l.bf16 %v484_v9  ;;  %v459_v21 = vunpack.c.h.bf16 %v484_v9  ;;  %v462_v28 = vunpack.c.l.bf16 %v485_v16  ;;  %v463_v40 = vunpack.c.h.bf16 %v485_v16 }
   0x4   :  { %509 = vmatprep.subr.bf16.mxu0 %v556_v1  ;;  %540 = vmatprep.subr.bf16.mxu1 %v556_v1  ;;  %v616_v5 = vld [vmem:[%s744_s2] ss:$0 sm:$0xff]  ;;  %v454_v6 = vunpack.c.l.bf16 %v453_v4  ;;  %v455_v7 = vunpack.c.h.bf16 %v453_v4  ;;  %v474_v24 = vunpack.c.l.bf16 %v488_v13  ;;  %v475_v25 = vunpack.c.h.bf16 %v488_v13  ;;  %v489_v31 = vld [vmem:[%s743_s0 + $0x30] sm:$0xff]   ;;  %v486_v44 = vld [vmem:[%s743_s0 + $0x18] sm:$0xff]  }
   0x5   :  { %v487_v8 = vld [vmem:[%s743_s0 + $0x20] sm:$0xff]   ;;  %v560_v32 = vld [vmem:[%s742_s1 + $0x10] sm:$0xff]   ;;  %v85_v35 = vmul.f32 %v458_v20, %v616_v5  ;;  %v86_v36 = vmul.f32 %v459_v21, %v616_v5  ;;  %v87_v42 = vmul.f32 %v462_v28, %v616_v5  ;;  %v478_v43 = vunpack.c.l.bf16 %v489_v31  ;;  %v490_v47 = vld [vmem:[%s743_s0 + $0x38] sm:$0xff]  }
   0x6   :  { %v627_v10 = vld [vmem:[%s745_s3] ss:$0 sm:$0xff]  ;;  %v470_v11 = vunpack.c.l.bf16 %v487_v8  ;;  %v471_v12 = vunpack.c.h.bf16 %v487_v8  ;;  %v83_v14 = vmul.f32 %v454_v6, %v616_v5  ;;  %v84_v15 = vmul.f32 %v455_v7, %v616_v5  ;;  %v561_v48 = vld [vmem:[%s742_s1 + $0x8] sm:$0xff]  }
   0x7   :  { %510 = vmatpush3.bf16.msra.mxu0 %v556_v1  ;;  %548 = vmatpush3.bf16.msra.mxu1 %v556_v1  ;;  %v93_v38 = vmul.f32 %v474_v24, %v616_v5  ;;  %v94_v39 = vmul.f32 %v475_v25, %v616_v5  ;;  %v88_v45 = vmul.f32 %v463_v40, %v616_v5  ;;  %v479_v46 = vunpack.c.h.bf16 %v489_v31  ;;  %v562_v63 = vld [vmem:[%s742_s1] sm:$0xff]  }
   0x8   :  { %511 = vmatprep.subr.bf16.mxu0 %v557_v2  ;;  %541 = vmatprep.subr.bf16.mxu1 %v557_v2  ;;  %v91_v18 = vmul.f32 %v470_v11, %v616_v5  ;;  %v92_v19 = vmul.f32 %v471_v12, %v616_v5  ;;  %v106_v22 = vadd.f32 %v627_v10, %v83_v14  ;;  %v466_v55 = vunpack.c.l.bf16 %v486_v44  ;;  %v451_v28 = vld [vmem:[%s747_s5] ss:$0 sm:$0xff] }
   0x9   :  { %v107_v23 = vadd.f32 %v627_v10, %v84_v15  ;;  %v108_v49 = vadd.f32 %v627_v10, %v85_v35  ;;  %v109_v50 = vadd.f32 %v627_v10, %v86_v36  ;;  %v95_v51 = vmul.f32 %v478_v43, %v616_v5 }
   0xa   :  { %v114_v26 = vadd.f32 %v627_v10, %v91_v18  ;;  %v115_v27 = vadd.f32 %v627_v10, %v92_v19  ;;  %v122_v29 = vmax.f32 %v106_v22, 0.0  ;;  %v116_v52 = vadd.f32 %v627_v10, %v93_v38 }
   0xb   :  { %512 = vmatpush3.bf16.msra.mxu0 %v557_v2  ;;  %549 = vmatpush3.bf16.msra.mxu1 %v557_v2  ;;  %v123_v30 = vmax.f32 %v107_v23, 0.0  ;;  %v117_v53 = vadd.f32 %v627_v10, %v94_v39  ;;  %v96_v54 = vmul.f32 %v479_v46, %v616_v5  ;;  %v110_v56 = vadd.f32 %v627_v10, %v87_v42 }
   0xc   :  { %513 = vmatprep.subr.bf16.mxu0 %v558_v3  ;;  %542 = vmatprep.subr.bf16.mxu1 %v558_v3  ;;  %v130_v33 = vmax.f32 %v114_v26, 0.0  ;;  %v131_v34 = vmax.f32 %v115_v27, 0.0  ;;  %v467_v57 = vunpack.c.h.bf16 %v486_v44  ;;  %v482_v58 = vunpack.c.l.bf16 %v490_v47 }
   0xd   :  { %v154_v37 = vpack.c.bf16 %v123_v30, %v122_v29  ;;  %v483_v59 = vunpack.c.h.bf16 %v490_v47  ;;  %v111_v60 = vadd.f32 %v627_v10, %v88_v45  ;;  %v118_v61 = vadd.f32 %v627_v10, %v95_v51 }
   0xe   :  { %v158_v41 = vpack.c.bf16 %v131_v34, %v130_v33  ;;  %v119_v62 = vadd.f32 %v627_v10, %v96_v54  ;;  %v124_v0 = vmax.f32 %v108_v49, 0.0  ;;  %v125_v1 = vmax.f32 %v109_v50, 0.0 }
   0xf   :  { %514 = vmatpush3.bf16.msra.mxu0 %v558_v3  ;;  %550 = vmatpush3.bf16.msra.mxu1 %v558_v3  ;;  %v132_v2 = vmax.f32 %v116_v52, 0.0  ;;  %v133_v3 = vmax.f32 %v117_v53, 0.0  ;;  %v89_v4 = vmul.f32 %v466_v55, %v616_v5  ;;  %v90_v6 = vmul.f32 %v467_v57, %v616_v5 }
  0x10   :  { %515 = vmatprep.subr.bf16.mxu0 %v559_v17  ;;  %543 = vmatprep.subr.bf16.mxu1 %v559_v17  ;;  %v97_v7 = vmul.f32 %v482_v58, %v616_v5  ;;  %v98_v8 = vmul.f32 %v483_v59, %v616_v5  ;;  %v126_v9 = vmax.f32 %v110_v56, 0.0  ;;  %v127_v11 = vmax.f32 %v111_v60, 0.0 }
  0x11   :  { %523 = vmatprep.mubr.bf16.mxu0 %v154_v37  ;;  %531 = vmatprep.mubr.bf16.mxu1 %v158_v41  ;;  %v134_v12 = vmax.f32 %v118_v61, 0.0  ;;  %v135_v13 = vmax.f32 %v119_v62, 0.0  ;;  %v155_v14 = vpack.c.bf16 %v125_v1, %v124_v0  ;;  %v159_v15 = vpack.c.bf16 %v133_v3, %v132_v2 }
  0x12   :  { %v112_v16 = vadd.f32 %v627_v10, %v89_v4  ;;  %v120_v18 = vadd.f32 %v627_v10, %v97_v7  ;;  %v121_v19 = vadd.f32 %v627_v10, %v98_v8  ;;  %v156_v5 = vpack.c.bf16 %v127_v11, %v126_v9 }
  0x13   :  { %516 = vmatpush3.bf16.msra.mxu0 %v559_v17  ;;  %551 = vmatpush3.bf16.msra.mxu1 %v559_v17  ;;  %v113_v17 = vadd.f32 %v627_v10, %v90_v6  ;;  %v160_v20 = vpack.c.bf16 %v135_v13, %v134_v12  ;;  %v450_v10 = vld [vmem:[%s746_s4] ss:$0 sm:$0xff] }
  0x14   :  { %517 = vmatprep.subr.bf16.mxu0 %v560_v32  ;;  %544 = vmatprep.subr.bf16.mxu1 %v560_v32  ;;  %v128_v21 = vmax.f32 %v112_v16, 0.0  ;;  %v136_v23 = vmax.f32 %v120_v18, 0.0  ;;  %v137_v24 = vmax.f32 %v121_v19, 0.0 }
  0x15   :  { %v129_v22 = vmax.f32 %v113_v17, 0.0 }
  0x16   :  { %v161_v26 = vpack.c.bf16 %v137_v24, %v136_v23 }
  0x17   :  { %518 = vmatpush3.bf16.msra.mxu0 %v560_v32  ;;  %552 = vmatpush3.bf16.msra.mxu1 %v560_v32  ;;  %v157_v25 = vpack.c.bf16 %v129_v22, %v128_v21 }
  0x18   :  { %519 = vmatprep.subr.bf16.mxu0 %v561_v48  ;;  %545 = vmatprep.subr.bf16.mxu1 %v561_v48 }
  0x1b   :  { %520 = vmatpush3.bf16.msra.mxu0 %v561_v48  ;;  %553 = vmatpush3.bf16.msra.mxu1 %v561_v48 }
  0x1c   :  { %521 = vmatprep.subr.bf16.mxu0 %v562_v63  ;;  %546 = vmatprep.subr.bf16.mxu1 %v562_v63 }
  0x1f   :  { %522 = vmatpush3.bf16.msra.mxu0 %v562_v63  ;;  %554 = vmatpush3.bf16.msra.mxu1 %v562_v63 }
  0x22   :  { %524 = vmatmul.mubr.bf16.vlgmr.msra.gmra.mxu0 %v155_v14  ;;  %532 = vmatmul.mubr.bf16.vlgmr.msra.gmra.mxu1 %v159_v15 }
  0x23   :  { %527 = vmatprep.mubr.bf16.mxu0 %v156_v5  ;;  %535 = vmatprep.mubr.bf16.mxu1 %v160_v20 }
  0x2a   :  { %528 = vmatmul.mubr.bf16.gmra.mxu0 %v157_v25  ;;  %536 = vmatmul.mubr.bf16.gmra.mxu1 %v161_v26 }
  0xe2   :  { %v525_v27 = vpop.f32.mrf.mxu0  ;;  %v533_v29 = vpop.f32.mrf.mxu1 }
  0xe3   :  { %v383_v30 = vmul.f32 %v525_v27, %v450_v10  ;;  %v391_v31 = vmul.f32 %v533_v29, %v450_v10 }
  0xe4   :  { %v260_v32 = vpop.f32.mrf.mxu0  ;;  %v292_v33 = vpop.f32.mrf.mxu1 }
  0xe5   :  { %v406_v34 = vadd.f32 %v451_v28, %v383_v30  ;;  %v414_v35 = vadd.f32 %v451_v28, %v391_v31  ;;  %v381_v36 = vmul.f32 %v450_v10, %v260_v32  ;;  %v389_v37 = vmul.f32 %v450_v10, %v292_v33 }
  0xe6   :  { %v526_v38 = vpop.f32.mrf.mxu0  ;;  %v534_v39 = vpop.f32.mrf.mxu1 }
  0xe7   :  { %422 = vst [vmem:[%s748_s6 + $0x10] sm:$0xff] %v406_v34  ;;  %430 = vst [vmem:[%s748_s6 + $0x50] sm:$0xff] %v414_v35  ;;  %v404_v40 = vadd.f32 %v451_v28, %v381_v36  ;;  %v412_v41 = vadd.f32 %v451_v28, %v389_v37  ;;  %v384_v42 = vmul.f32 %v526_v38, %v450_v10 }
  0xe8   :  { %v392_v43 = vmul.f32 %v534_v39, %v450_v10  ;;  %v263_v44 = vpop.f32.mrf.mxu0  ;;  %v295_v45 = vpop.f32.mrf.mxu1 }
  0xe9   :  { %420 = vst [vmem:[%s748_s6] sm:$0xff] %v404_v40  ;;  %428 = vst [vmem:[%s748_s6 + $0x40] sm:$0xff] %v412_v41  ;;  %v407_v46 = vadd.f32 %v451_v28, %v384_v42  ;;  %v382_v48 = vmul.f32 %v450_v10, %v263_v44  ;;  %v390_v49 = vmul.f32 %v450_v10, %v295_v45 }
  0xea   :  { %v415_v47 = vadd.f32 %v451_v28, %v392_v43  ;;  %v529_v50 = vpop.f32.mrf.mxu0  ;;  %v537_v51 = vpop.f32.mrf.mxu1 }
  0xeb   :  { %423 = vst [vmem:[%s748_s6 + $0x18] sm:$0xff] %v407_v46  ;;  %v405_v52 = vadd.f32 %v451_v28, %v382_v48  ;;  %v413_v53 = vadd.f32 %v451_v28, %v390_v49  ;;  %v387_v54 = vmul.f32 %v529_v50, %v450_v10  ;;  %v395_v55 = vmul.f32 %v537_v51, %v450_v10 }
  0xec   :  { %431 = vst [vmem:[%s748_s6 + $0x58] sm:$0xff] %v415_v47  ;;  %v276_v56 = vpop.f32.mrf.mxu0  ;;  %v308_v57 = vpop.f32.mrf.mxu1 }
  0xed   :  { %421 = vst [vmem:[%s748_s6 + $0x8] sm:$0xff] %v405_v52  ;;  %429 = vst [vmem:[%s748_s6 + $0x48] sm:$0xff] %v413_v53  ;;  %v410_v58 = vadd.f32 %v451_v28, %v387_v54  ;;  %v418_v59 = vadd.f32 %v451_v28, %v395_v55  ;;  %v385_v60 = vmul.f32 %v450_v10, %v276_v56 }
  0xee   :  { %v393_v61 = vmul.f32 %v450_v10, %v308_v57  ;;  %v530_v62 = vpop.f32.mrf.mxu0  ;;  %v538_v63 = vpop.f32.mrf.mxu1 }
  0xef   :  { %426 = vst [vmem:[%s748_s6 + $0x30] sm:$0xff] %v410_v58  ;;  %434 = vst [vmem:[%s748_s6 + $0x70] sm:$0xff] %v418_v59  ;;  %v408_v0 = vadd.f32 %v451_v28, %v385_v60  ;;  %v388_v2 = vmul.f32 %v530_v62, %v450_v10  ;;  %v396_v3 = vmul.f32 %v538_v63, %v450_v10 }
  0xf0   :  { %v416_v1 = vadd.f32 %v451_v28, %v393_v61  ;;  %v279_v4 = vpop.f32.mrf.mxu0  ;;  %v311_v6 = vpop.f32.mrf.mxu1 }
  0xf1   :  { %424 = vst [vmem:[%s748_s6 + $0x20] sm:$0xff] %v408_v0  ;;  %v411_v7 = vadd.f32 %v451_v28, %v388_v2  ;;  %v419_v8 = vadd.f32 %v451_v28, %v396_v3  ;;  %v386_v9 = vmul.f32 %v450_v10, %v279_v4  ;;  %v394_v11 = vmul.f32 %v450_v10, %v311_v6 }
  0xf2   :  { %432 = vst [vmem:[%s748_s6 + $0x60] sm:$0xff] %v416_v1 }
  0xf3   :  { %427 = vst [vmem:[%s748_s6 + $0x38] sm:$0xff] %v411_v7  ;;  %435 = vst [vmem:[%s748_s6 + $0x78] sm:$0xff] %v419_v8  ;;  %v409_v12 = vadd.f32 %v451_v28, %v386_v9  ;;  %v417_v13 = vadd.f32 %v451_v28, %v394_v11 }
  0xf5   :  { %425 = vst [vmem:[%s748_s6 + $0x28] sm:$0xff] %v409_v12  ;;  %433 = vst [vmem:[%s748_s6 + $0x68] sm:$0xff] %v417_v13 }

// kernel: densenet_forward.21
= control target key start
LH: loop header
LB: loop body
LE: loop exit
PB: predicated region body
PF: predicated region fallthrough
CT: control target
= control target key end

     0   :  { %vm40_vm0 = vcmask 1043456   ;;  %vm330_vm1 = vcmask 1041409   ;;  %vm332_vm2 = vcmask 1042434   ;;  %vm334_vm3 = vcmask 1043459   ;;  %s627_s0 = inlined_call_operand.vmem [shape: f32[32,4,128], index: 0, kind: input, shape index: {}]   ;;  %s628_s1 = inlined_call_operand.vmem [shape: f32[32,128], index: 1, kind: output, shape index: {}]  }
   0x1   :  { %v8_v0 = vld [vmem:[%s627_s0] sm:$0xf]  ;;  %v9_v1 = vld [vmem:[%s627_s0 + $0x4] sm:$0xf]  ;;  %v10_v2 = vld [vmem:[%s627_s0 + $0x8] sm:$0xf] }
   0x2   :  { %v11_v3 = vld [vmem:[%s627_s0 + $0xc] sm:$0xf]  ;;  %v12_v4 = vld [vmem:[%s627_s0 + $0x10] sm:$0xf]  ;;  %v13_v5 = vld [vmem:[%s627_s0 + $0x14] sm:$0xf] }
   0x3   :  { %v14_v6 = vld [vmem:[%s627_s0 + $0x18] sm:$0xf]  ;;  %v41_v7 = vsel %vm40_vm0, %v8_v0, 0.0  ;;  %v48_v8 = vsel %vm40_vm0, %v9_v1, 0.0  ;;  %v15_v9 = vld [vmem:[%s627_s0 + $0x1c] sm:$0xf] }
   0x4   :  { %v42_v10 = vrot.slane %v41_v7, 4  ;;  %v49_v11 = vrot.slane %v48_v8, 4  ;;  %v55_v12 = vsel %vm40_vm0, %v10_v2, 0.0  ;;  %v62_v13 = vsel %vm40_vm0, %v11_v3, 0.0  ;;  %v16_v42 = vld [vmem:[%s627_s0 + $0x20] sm:$0xf] }
   0x5   :  { %v56_v14 = vrot.slane %v55_v12, 4  ;;  %v63_v15 = vrot.slane %v62_v13, 4  ;;  %v69_v16 = vsel %vm40_vm0, %v12_v4, 0.0  ;;  %v76_v17 = vsel %vm40_vm0, %v13_v5, 0.0  ;;  %v17_v47 = vld [vmem:[%s627_s0 + $0x24] sm:$0xf] }
   0x6   :  { %v43_v18 = vadd.f32 %v42_v10, %v41_v7  ;;  %v50_v19 = vadd.f32 %v49_v11, %v48_v8  ;;  %v70_v20 = vrot.slane %v69_v16, 4  ;;  %v77_v21 = vrot.slane %v76_v17, 4  ;;  %v18_v52 = vld [vmem:[%s627_s0 + $0x28] sm:$0xf]  ;;  %v19_v57 = vld [vmem:[%s627_s0 + $0x2c] sm:$0xf] }
   0x7   :  { %v57_v22 = vadd.f32 %v56_v14, %v55_v12  ;;  %v64_v23 = vadd.f32 %v63_v15, %v62_v13  ;;  %v83_v24 = vsel %vm40_vm0, %v14_v6, 0.0  ;;  %v90_v25 = vsel %vm40_vm0, %v15_v9, 0.0  ;;  %v20_v58 = vld [vmem:[%s627_s0 + $0x30] sm:$0xf]  ;;  %v21_v59 = vld [vmem:[%s627_s0 + $0x34] sm:$0xf] }
   0x8   :  { %v44_v26 = vrot.slane %v43_v18, 2  ;;  %v51_v27 = vrot.slane %v50_v19, 2  ;;  %v71_v28 = vadd.f32 %v70_v20, %v69_v16  ;;  %v78_v29 = vadd.f32 %v77_v21, %v76_v17  ;;  %v22_v4 = vld [vmem:[%s627_s0 + $0x38] sm:$0xf]  ;;  %v23_v9 = vld [vmem:[%s627_s0 + $0x3c] sm:$0xf] }
   0x9   :  { %v58_v30 = vrot.slane %v57_v22, 2  ;;  %v65_v31 = vrot.slane %v64_v23, 2  ;;  %v84_v32 = vrot.slane %v83_v24, 4  ;;  %v91_v33 = vrot.slane %v90_v25, 4 }
   0xa   :  { %v45_v34 = vadd.f32 %v44_v26, %v43_v18  ;;  %v52_v35 = vadd.f32 %v51_v27, %v50_v19  ;;  %v72_v36 = vrot.slane %v71_v28, 2  ;;  %v79_v37 = vrot.slane %v78_v29, 2 }
   0xb   :  { %v59_v38 = vadd.f32 %v58_v30, %v57_v22  ;;  %v66_v39 = vadd.f32 %v65_v31, %v64_v23  ;;  %v85_v40 = vadd.f32 %v84_v32, %v83_v24  ;;  %v92_v41 = vadd.f32 %v91_v33, %v90_v25 }
   0xc   :  { %v46_v43 = vrot.slane %v45_v34, 1  ;;  %v53_v44 = vrot.slane %v52_v35, 1  ;;  %v73_v45 = vadd.f32 %v72_v36, %v71_v28  ;;  %v80_v46 = vadd.f32 %v79_v37, %v78_v29 }
   0xd   :  { %v60_v48 = vrot.slane %v59_v38, 1  ;;  %v67_v49 = vrot.slane %v66_v39, 1  ;;  %v86_v50 = vrot.slane %v85_v40, 2  ;;  %v93_v51 = vrot.slane %v92_v41, 2 }
   0xe   :  { %v428_v53 = vadd.f32 %v46_v43, %v45_v34  ;;  %v430_v54 = vadd.f32 %v53_v44, %v52_v35  ;;  %v74_v55 = vrot.slane %v73_v45, 1  ;;  %v81_v56 = vrot.slane %v80_v46, 1  ;;  %v25_v43 = vld [vmem:[%s627_s0 + $0x44] sm:$0xf] }
   0xf   :  { %v441_v60 = vadd.f32 %v60_v48, %v59_v38  ;;  %v443_v61 = vadd.f32 %v67_v49, %v66_v39  ;;  %v87_v62 = vadd.f32 %v86_v50, %v85_v40  ;;  %v94_v63 = vadd.f32 %v93_v51, %v92_v41  ;;  %v26_v48 = vld [vmem:[%s627_s0 + $0x48] sm:$0xf] }
  0x10   :  { %v445_v0 = vadd.f32 %v74_v55, %v73_v45  ;;  %v447_v1 = vadd.f32 %v81_v56, %v80_v46  ;;  %v97_v2 = vsel %vm40_vm0, %v16_v42, 0.0  ;;  %v104_v3 = vsel %vm40_vm0, %v17_v47, 0.0  ;;  %v24_v42 = vld [vmem:[%s627_s0 + $0x40] sm:$0xf]  ;;  %v27_v55 = vld [vmem:[%s627_s0 + $0x4c] sm:$0xf] }
  0x11   :  { %v88_v5 = vrot.slane %v87_v62, 1  ;;  %v95_v6 = vrot.slane %v94_v63, 1  ;;  %v98_v7 = vrot.slane %v97_v2, 4  ;;  %v105_v8 = vrot.slane %v104_v3, 4 }
  0x12   :  { %v111_v10 = vsel %vm40_vm0, %v18_v52, 0.0  ;;  %v118_v11 = vsel %vm40_vm0, %v19_v57, 0.0  ;;  %v125_v12 = vsel %vm40_vm0, %v20_v58, 0.0  ;;  %v132_v13 = vsel %vm40_vm0, %v21_v59, 0.0 }
  0x13   :  { %v461_v14 = vadd.f32 %v88_v5, %v87_v62  ;;  %v463_v15 = vadd.f32 %v95_v6, %v94_v63  ;;  %v99_v16 = vadd.f32 %v98_v7, %v97_v2  ;;  %v106_v17 = vadd.f32 %v105_v8, %v104_v3  ;;  %v28_v62 = vld [vmem:[%s627_s0 + $0x50] sm:$0xf]  ;;  %v29_v63 = vld [vmem:[%s627_s0 + $0x54] sm:$0xf] }
  0x14   :  { %v112_v18 = vrot.slane %v111_v10, 4  ;;  %v119_v19 = vrot.slane %v118_v11, 4  ;;  %v126_v20 = vrot.slane %v125_v12, 4  ;;  %v133_v21 = vrot.slane %v132_v13, 4 }
  0x15   :  { %v100_v22 = vrot.slane %v99_v16, 2  ;;  %v107_v23 = vrot.slane %v106_v17, 2  ;;  %v139_v24 = vsel %vm40_vm0, %v22_v4, 0.0  ;;  %v146_v25 = vsel %vm40_vm0, %v23_v9, 0.0 }
  0x16   :  { %v113_v26 = vadd.f32 %v112_v18, %v111_v10  ;;  %v120_v27 = vadd.f32 %v119_v19, %v118_v11  ;;  %v127_v28 = vadd.f32 %v126_v20, %v125_v12  ;;  %v134_v29 = vadd.f32 %v133_v21, %v132_v13  ;;  %v30_v10 = vld [vmem:[%s627_s0 + $0x58] sm:$0xf] }
  0x17   :  { %v101_v30 = vadd.f32 %v100_v22, %v99_v16  ;;  %v108_v31 = vadd.f32 %v107_v23, %v106_v17  ;;  %v140_v32 = vrot.slane %v139_v24, 4  ;;  %v147_v33 = vrot.slane %v146_v25, 4  ;;  %v31_v17 = vld [vmem:[%s627_s0 + $0x5c] sm:$0xf] }
  0x18   :  { %v114_v34 = vrot.slane %v113_v26, 2  ;;  %v121_v35 = vrot.slane %v120_v27, 2  ;;  %v128_v36 = vrot.slane %v127_v28, 2  ;;  %v135_v37 = vrot.slane %v134_v29, 2 }
  0x19   :  { %v102_v38 = vrot.slane %v101_v30, 1  ;;  %v109_v39 = vrot.slane %v108_v31, 1  ;;  %v141_v40 = vadd.f32 %v140_v32, %v139_v24  ;;  %v148_v41 = vadd.f32 %v147_v33, %v146_v25 }
  0x1a   :  { %v115_v44 = vadd.f32 %v114_v34, %v113_v26  ;;  %v122_v45 = vadd.f32 %v121_v35, %v120_v27  ;;  %v129_v46 = vadd.f32 %v128_v36, %v127_v28  ;;  %v136_v47 = vadd.f32 %v135_v37, %v134_v29 }
  0x1b   :  { %v476_v49 = vadd.f32 %v102_v38, %v101_v30  ;;  %v478_v50 = vadd.f32 %v109_v39, %v108_v31  ;;  %v142_v51 = vrot.slane %v141_v40, 2  ;;  %v149_v52 = vrot.slane %v148_v41, 2 }
  0x1c   :  { %v116_v56 = vrot.slane %v115_v44, 1  ;;  %v123_v57 = vrot.slane %v122_v45, 1  ;;  %v130_v58 = vrot.slane %v129_v46, 1  ;;  %v137_v59 = vrot.slane %v136_v47, 1 }
  0x1d   :  { %v143_v2 = vadd.f32 %v142_v51, %v141_v40  ;;  %v150_v3 = vadd.f32 %v149_v52, %v148_v41  ;;  %v153_v4 = vsel %vm40_vm0, %v24_v42, 0.0  ;;  %v160_v5 = vsel %vm40_vm0, %v25_v43, 0.0  ;;  %v32_v52 = vld [vmem:[%s627_s0 + $0x60] sm:$0xf] }
  0x1e   :  { %v491_v6 = vadd.f32 %v116_v56, %v115_v44  ;;  %v493_v7 = vadd.f32 %v123_v57, %v122_v45  ;;  %v495_v8 = vadd.f32 %v130_v58, %v129_v46  ;;  %v497_v9 = vadd.f32 %v137_v59, %v136_v47 }
  0x1f   :  { %v144_v11 = vrot.slane %v143_v2, 1  ;;  %v151_v12 = vrot.slane %v150_v3, 1  ;;  %v154_v13 = vrot.slane %v153_v4, 4  ;;  %v161_v16 = vrot.slane %v160_v5, 4 }
  0x20   :  { %v167_v18 = vsel %vm40_vm0, %v26_v48, 0.0  ;;  %v174_v19 = vsel %vm40_vm0, %v27_v55, 0.0  ;;  %v181_v20 = vsel %vm40_vm0, %v28_v62, 0.0  ;;  %v188_v21 = vsel %vm40_vm0, %v29_v63, 0.0  ;;  %v33_v55 = vld [vmem:[%s627_s0 + $0x64] sm:$0xf] }
  0x21   :  { %v509_v22 = vadd.f32 %v144_v11, %v143_v2  ;;  %v511_v23 = vadd.f32 %v151_v12, %v150_v3  ;;  %v155_v24 = vadd.f32 %v154_v13, %v153_v4  ;;  %v162_v25 = vadd.f32 %v161_v16, %v160_v5  ;;  %v34_v62 = vld [vmem:[%s627_s0 + $0x68] sm:$0xf]  ;;  %v35_v5 = vld [vmem:[%s627_s0 + $0x6c] sm:$0xf]  ;;  %v36_v16 = vld [vmem:[%s627_s0 + $0x70] sm:$0xf] }
  0x22   :  { %v168_v26 = vrot.slane %v167_v18, 4  ;;  %v175_v27 = vrot.slane %v174_v19, 4  ;;  %v182_v28 = vrot.slane %v181_v20, 4  ;;  %v189_v29 = vrot.slane %v188_v21, 4 }
  0x23   :  { %v156_v30 = vrot.slane %v155_v24, 2  ;;  %v163_v31 = vrot.slane %v162_v25, 2  ;;  %v195_v32 = vsel %vm40_vm0, %v30_v10, 0.0  ;;  %v202_v33 = vsel %vm40_vm0, %v31_v17, 0.0  ;;  %v37_v17 = vld [vmem:[%s627_s0 + $0x74] sm:$0xf] }
  0x24   :  { %v169_v34 = vadd.f32 %v168_v26, %v167_v18  ;;  %v176_v35 = vadd.f32 %v175_v27, %v174_v19  ;;  %v183_v36 = vadd.f32 %v182_v28, %v181_v20  ;;  %v190_v37 = vadd.f32 %v189_v29, %v188_v21  ;;  %v38_v28 = vld [vmem:[%s627_s0 + $0x78] sm:$0xf] }
  0x25   :  { %v157_v38 = vadd.f32 %v156_v30, %v155_v24  ;;  %v164_v39 = vadd.f32 %v163_v31, %v162_v25  ;;  %v196_v40 = vrot.slane %v195_v32, 4  ;;  %v203_v41 = vrot.slane %v202_v33, 4 }
  0x26   :  { %v170_v42 = vrot.slane %v169_v34, 2  ;;  %v177_v43 = vrot.slane %v176_v35, 2  ;;  %v184_v44 = vrot.slane %v183_v36, 2  ;;  %v191_v45 = vrot.slane %v190_v37, 2 }
  0x27   :  { %v158_v46 = vrot.slane %v157_v38, 1  ;;  %v165_v47 = vrot.slane %v164_v39, 1  ;;  %v197_v48 = vadd.f32 %v196_v40, %v195_v32  ;;  %v204_v51 = vadd.f32 %v203_v41, %v202_v33  ;;  %v39_v33 = vld [vmem:[%s627_s0 + $0x7c] sm:$0xf] }
  0x28   :  { %v171_v56 = vadd.f32 %v170_v42, %v169_v34  ;;  %v178_v57 = vadd.f32 %v177_v43, %v176_v35  ;;  %v185_v58 = vadd.f32 %v184_v44, %v183_v36  ;;  %v192_v59 = vadd.f32 %v191_v45, %v190_v37 }
  0x29   :  { %v524_v63 = vadd.f32 %v158_v46, %v157_v38  ;;  %v526_v2 = vadd.f32 %v165_v47, %v164_v39  ;;  %v198_v3 = vrot.slane %v197_v48, 2  ;;  %v205_v4 = vrot.slane %v204_v51, 2 }
  0x2a   :  { %v172_v10 = vrot.slane %v171_v56, 1  ;;  %v179_v11 = vrot.slane %v178_v57, 1  ;;  %v186_v12 = vrot.slane %v185_v58, 1  ;;  %v193_v13 = vrot.slane %v192_v59, 1 }
  0x2b   :  { %v199_v18 = vadd.f32 %v198_v3, %v197_v48  ;;  %v206_v19 = vadd.f32 %v205_v4, %v204_v51  ;;  %v209_v20 = vsel %vm40_vm0, %v32_v52, 0.0  ;;  %v216_v21 = vsel %vm40_vm0, %v33_v55, 0.0 }
  0x2c   :  { %v539_v24 = vadd.f32 %v172_v10, %v171_v56  ;;  %v541_v25 = vadd.f32 %v179_v11, %v178_v57  ;;  %v543_v26 = vadd.f32 %v186_v12, %v185_v58  ;;  %v545_v27 = vadd.f32 %v193_v13, %v192_v59 }
  0x2d   :  { %v200_v29 = vrot.slane %v199_v18, 1  ;;  %v207_v30 = vrot.slane %v206_v19, 1  ;;  %v210_v31 = vrot.slane %v209_v20, 4  ;;  %v217_v32 = vrot.slane %v216_v21, 4 }
  0x2e   :  { %v223_v34 = vsel %vm40_vm0, %v34_v62, 0.0  ;;  %v230_v35 = vsel %vm40_vm0, %v35_v5, 0.0  ;;  %v237_v36 = vsel %vm40_vm0, %v36_v16, 0.0  ;;  %v244_v37 = vsel %vm40_vm0, %v37_v17, 0.0 }
  0x2f   :  { %v557_v38 = vadd.f32 %v200_v29, %v199_v18  ;;  %v559_v39 = vadd.f32 %v207_v30, %v206_v19  ;;  %v211_v40 = vadd.f32 %v210_v31, %v209_v20  ;;  %v218_v41 = vadd.f32 %v217_v32, %v216_v21 }
  0x30   :  { %v224_v42 = vrot.slane %v223_v34, 4  ;;  %v231_v43 = vrot.slane %v230_v35, 4  ;;  %v238_v44 = vrot.slane %v237_v36, 4  ;;  %v245_v45 = vrot.slane %v244_v37, 4 }
  0x31   :  { %v212_v46 = vrot.slane %v211_v40, 2  ;;  %v219_v47 = vrot.slane %v218_v41, 2  ;;  %v251_v48 = vsel %vm40_vm0, %v38_v28, 0.0  ;;  %v258_v51 = vsel %vm40_vm0, %v39_v33, 0.0 }
  0x32   :  { %v225_v52 = vadd.f32 %v224_v42, %v223_v34  ;;  %v232_v55 = vadd.f32 %v231_v43, %v230_v35  ;;  %v239_v56 = vadd.f32 %v238_v44, %v237_v36  ;;  %v246_v57 = vadd.f32 %v245_v45, %v244_v37 }
  0x33   :  { %v213_v58 = vadd.f32 %v212_v46, %v211_v40  ;;  %v220_v59 = vadd.f32 %v219_v47, %v218_v41  ;;  %v252_v62 = vrot.slane %v251_v48, 4  ;;  %v259_v3 = vrot.slane %v258_v51, 4 }
  0x34   :  { %v226_v4 = vrot.slane %v225_v52, 2  ;;  %v233_v5 = vrot.slane %v232_v55, 2  ;;  %v240_v10 = vrot.slane %v239_v56, 2  ;;  %v247_v11 = vrot.slane %v246_v57, 2 }
  0x35   :  { %v214_v12 = vrot.slane %v213_v58, 1  ;;  %v221_v13 = vrot.slane %v220_v59, 1  ;;  %v253_v16 = vadd.f32 %v252_v62, %v251_v48  ;;  %v260_v17 = vadd.f32 %v259_v3, %v258_v51 }
  0x36   :  { %v227_v18 = vadd.f32 %v226_v4, %v225_v52  ;;  %v234_v19 = vadd.f32 %v233_v5, %v232_v55  ;;  %v241_v20 = vadd.f32 %v240_v10, %v239_v56  ;;  %v248_v21 = vadd.f32 %v247_v11, %v246_v57 }
  0x37   :  { %v215_v28 = vadd.f32 %v214_v12, %v213_v58  ;;  %v222_v29 = vadd.f32 %v221_v13, %v220_v59  ;;  %v254_v30 = vrot.slane %v253_v16, 2  ;;  %v261_v31 = vrot.slane %v260_v17, 2 }
  0x38   :  { %v228_v32 = vrot.slane %v227_v18, 1  ;;  %v235_v33 = vrot.slane %v234_v19, 1  ;;  %v242_v34 = vrot.slane %v241_v20, 1  ;;  %v249_v35 = vrot.slane %v248_v21, 1 }
  0x39   :  { %v255_v36 = vadd.f32 %v254_v30, %v253_v16  ;;  %v262_v37 = vadd.f32 %v261_v31, %v260_v17  ;;  %v266_v40 = vmul.f32 0.25, %v428_v53  ;;  %v267_v41 = vmul.f32 0.25, %v430_v54 }
  0x3a   :  { %v229_v42 = vadd.f32 %v228_v32, %v227_v18  ;;  %v236_v43 = vadd.f32 %v235_v33, %v234_v19  ;;  %v243_v44 = vadd.f32 %v242_v34, %v241_v20  ;;  %v250_v45 = vadd.f32 %v249_v35, %v248_v21 }
  0x3b   :  { %v256_v46 = vrot.slane %v255_v36, 1  ;;  %v263_v47 = vrot.slane %v262_v37, 1  ;;  %v268_v48 = vmul.f32 0.25, %v441_v60  ;;  %v269_v51 = vmul.f32 0.25, %v443_v61 }
  0x3c   :  { %v270_v52 = vmul.f32 0.25, %v445_v0  ;;  %v271_v55 = vmul.f32 0.25, %v447_v1  ;;  %v272_v53 = vmul.f32 0.25, %v461_v14  ;;  %v273_v54 = vmul.f32 0.25, %v463_v15 }
  0x3d   :  { %v257_v56 = vadd.f32 %v256_v46, %v255_v36  ;;  %v264_v57 = vadd.f32 %v263_v47, %v262_v37  ;;  %v274_v58 = vmul.f32 0.25, %v476_v49  ;;  %v275_v59 = vmul.f32 0.25, %v478_v50 }
  0x3e   :  { %v276_v62 = vmul.f32 0.25, %v491_v6  ;;  %v277_v60 = vmul.f32 0.25, %v493_v7  ;;  %v278_v61 = vmul.f32 0.25, %v495_v8  ;;  %v279_v0 = vmul.f32 0.25, %v497_v9 }
  0x3f   :  { %v280_v1 = vmul.f32 0.25, %v509_v22  ;;  %v281_v14 = vmul.f32 0.25, %v511_v23  ;;  %v282_v15 = vmul.f32 0.25, %v524_v63  ;;  %v283_v3 = vmul.f32 0.25, %v526_v2 }
  0x40   :  { %v284_v49 = vmul.f32 0.25, %v539_v24  ;;  %v285_v50 = vmul.f32 0.25, %v541_v25  ;;  %v286_v6 = vmul.f32 0.25, %v543_v26  ;;  %v287_v7 = vmul.f32 0.25, %v545_v27 }
  0x41   :  { %v288_v8 = vmul.f32 0.25, %v557_v38  ;;  %v289_v9 = vmul.f32 0.25, %v559_v39  ;;  %v290_v4 = vmul.f32 0.25, %v215_v28  ;;  %v291_v22 = vmul.f32 0.25, %v222_v29 }
  0x42   :  { %v292_v5 = vmul.f32 0.25, %v229_v42  ;;  %v293_v23 = vmul.f32 0.25, %v236_v43  ;;  %v294_v10 = vmul.f32 0.25, %v243_v44  ;;  %v295_v63 = vmul.f32 0.25, %v250_v45 }
  0x43   :  { %v296_v11 = vmul.f32 0.25, %v257_v56  ;;  %v297_v2 = vmul.f32 0.25, %v264_v57  ;;  %v331_v24 = vsel %vm330_vm1, %v267_v41, %v266_v40  ;;  %vm336_vm4 = vcmask 1044484  }
  0x44   :  { %v333_v25 = vsel %vm332_vm2, %v268_v48, %v331_v24  ;;  %vm338_vm5 = vcmask 1045509   ;;  %vm340_vm6 = vcmask 1046534   ;;  %vm342_vm7 = vcmask 1047559  }
  0x45   :  { %v335_v26 = vsel %vm334_vm3, %v269_v51, %v333_v25  ;;  %v344_v27 = vsel %vm330_vm1, %v275_v59, %v274_v58  ;;  %v351_v38 = vsel %vm330_vm1, %v283_v3, %v282_v15  ;;  %v358_v39 = vsel %vm330_vm1, %v291_v22, %v290_v4 }
  0x46   :  { %v337_v12 = vsel %vm336_vm4, %v270_v52, %v335_v26  ;;  %v345_v13 = vsel %vm332_vm2, %v276_v62, %v344_v27  ;;  %v352_v16 = vsel %vm332_vm2, %v284_v49, %v351_v38  ;;  %v359_v17 = vsel %vm332_vm2, %v292_v5, %v358_v39 }
  0x47   :  { %v339_v18 = vsel %vm338_vm5, %v271_v55, %v337_v12  ;;  %v346_v19 = vsel %vm334_vm3, %v277_v60, %v345_v13  ;;  %v353_v20 = vsel %vm334_vm3, %v285_v50, %v352_v16  ;;  %v360_v21 = vsel %vm334_vm3, %v293_v23, %v359_v17 }
  0x48   :  { %v341_v28 = vsel %vm340_vm6, %v272_v53, %v339_v18  ;;  %v347_v29 = vsel %vm336_vm4, %v278_v61, %v346_v19  ;;  %v354_v30 = vsel %vm336_vm4, %v286_v6, %v353_v20  ;;  %v361_v31 = vsel %vm336_vm4, %v294_v10, %v360_v21 }
  0x49   :  { %v343_v32 = vsel %vm342_vm7, %v273_v54, %v341_v28  ;;  %v348_v33 = vsel %vm338_vm5, %v279_v0, %v347_v29  ;;  %v355_v34 = vsel %vm338_vm5, %v287_v7, %v354_v30  ;;  %v362_v35 = vsel %vm338_vm5, %v295_v63, %v361_v31 }
  0x4a   :  { %v349_v36 = vsel %vm340_vm6, %v280_v1, %v348_v33  ;;  %v356_v37 = vsel %vm340_vm6, %v288_v8, %v355_v34  ;;  %v363_v40 = vsel %vm340_vm6, %v296_v11, %v362_v35  ;;  %369 = vst [vmem:[%s628_s1] sm:$0xff] %v343_v32 }
  0x4b   :  { %v350_v41 = vsel %vm342_vm7, %v281_v14, %v349_v36  ;;  %v357_v42 = vsel %vm342_vm7, %v289_v9, %v356_v37  ;;  %v364_v43 = vsel %vm342_vm7, %v297_v2, %v363_v40 }
  0x4c   :  { %370 = vst [vmem:[%s628_s1 + $0x8] sm:$0xff] %v350_v41  ;;  %371 = vst [vmem:[%s628_s1 + $0x10] sm:$0xff] %v357_v42 }
  0x4d   :  { %372 = vst [vmem:[%s628_s1 + $0x18] sm:$0xff] %v364_v43 }

// kernel: densenet_forward.22
= control target key start
LH: loop header
LB: loop body
LE: loop exit
PB: predicated region body
PF: predicated region fallthrough
CT: control target
= control target key end

     0   :  { %s382_s1 = inlined_call_operand.vmem [shape: bf16[128,128], index: 1, kind: input, shape index: {}]   ;;  %s383_s0 = inlined_call_operand.vmem [shape: bf16[32,128], index: 0, kind: input, shape index: {}]   ;;  %s384_s2 = inlined_call_operand.vmem [shape: f32[1,128], index: 2, kind: input, shape index: {}]   ;;  %s385_s3 = inlined_call_operand.vmem [shape: f32[1,128], index: 3, kind: input, shape index: {}]   ;;  %s386_s4 = inlined_call_operand.vmem [shape: f32[1,128], index: 4, kind: input, shape index: {}]   ;;  %s387_s5 = inlined_call_operand.vmem [shape: f32[1,128], index: 5, kind: input, shape index: {}]   ;;  %s388_s6 = inlined_call_operand.vmem [shape: f32[32,128], index: 6, kind: output, shape index: {}]  }
   0x1   :  { %v285_v0 = vld [vmem:[%s382_s1 + $0x38] sm:$0xff]   ;;  %v286_v1 = vld [vmem:[%s382_s1 + $0x30] sm:$0xff]   ;;  %v287_v2 = vld [vmem:[%s382_s1 + $0x28] sm:$0xff]  }
   0x2   :  { %265 = vmatprep.subr.bf16.mxu0 %v285_v0  ;;  %v288_v3 = vld [vmem:[%s382_s1 + $0x20] sm:$0xff]   ;;  %v254_v9 = vld [vmem:[%s383_s0 + $0x8] sm:$0xff]   ;;  %v289_v12 = vld [vmem:[%s382_s1 + $0x18] sm:$0xff]  }
   0x3   :  { %266 = vmatpush3.bf16.msra.mxu0 %v285_v0  ;;  %v247_v4 = vld [vmem:[%s383_s0] sm:$0xff]   ;;  %v252_v15 = vunpack.c.l.bf16 %v254_v9  ;;  %v253_v16 = vunpack.c.h.bf16 %v254_v9  ;;  %v290_v19 = vld [vmem:[%s382_s1 + $0x10] sm:$0xff]   ;;  %v291_v23 = vld [vmem:[%s382_s1 + $0x8] sm:$0xff]  }
   0x4   :  { %267 = vmatprep.subr.bf16.mxu0 %v286_v1  ;;  %v234_v5 = vld [vmem:[%s384_s2] ss:$0 sm:$0xff]  ;;  %v248_v6 = vunpack.c.l.bf16 %v247_v4  ;;  %v249_v7 = vunpack.c.h.bf16 %v247_v4 }
   0x5   :  { %v235_v8 = vld [vmem:[%s385_s3] ss:$0 sm:$0xff]  ;;  %v49_v21 = vmul.f32 %v252_v15, %v234_v5  ;;  %v50_v22 = vmul.f32 %v253_v16, %v234_v5 }
   0x6   :  { %v47_v10 = vmul.f32 %v248_v6, %v234_v5  ;;  %v48_v11 = vmul.f32 %v249_v7, %v234_v5  ;;  %v292_v26 = vld [vmem:[%s382_s1] sm:$0xff]  }
   0x7   :  { %268 = vmatpush3.bf16.msra.mxu0 %v286_v1  ;;  %v60_v24 = vadd.f32 %v235_v8, %v49_v21  ;;  %v61_v25 = vadd.f32 %v235_v8, %v50_v22  ;;  %v244_v30 = vld [vmem:[%s386_s4] ss:$0 sm:$0xff] }
   0x8   :  { %269 = vmatprep.subr.bf16.mxu0 %v287_v2  ;;  %v58_v13 = vadd.f32 %v235_v8, %v47_v10  ;;  %v59_v14 = vadd.f32 %v235_v8, %v48_v11  ;;  %v245_v32 = vld [vmem:[%s387_s5] ss:$0 sm:$0xff] }
   0x9   :  { %v64_v27 = vmax.f32 %v60_v24, 0.0  ;;  %v65_v28 = vmax.f32 %v61_v25, 0.0 }
   0xa   :  { %v62_v17 = vmax.f32 %v58_v13, 0.0  ;;  %v63_v18 = vmax.f32 %v59_v14, 0.0 }
   0xb   :  { %270 = vmatpush3.bf16.msra.mxu0 %v287_v2  ;;  %v71_v29 = vpack.c.bf16 %v65_v28, %v64_v27 }
   0xc   :  { %271 = vmatprep.subr.bf16.mxu0 %v288_v3  ;;  %v70_v20 = vpack.c.bf16 %v63_v18, %v62_v17 }
   0xe   :  { %281 = vmatprep.mubr.bf16.mxu0 %v70_v20 }
   0xf   :  { %272 = vmatpush3.bf16.msra.mxu0 %v288_v3 }
  0x10   :  { %273 = vmatprep.subr.bf16.mxu0 %v289_v12 }
  0x13   :  { %274 = vmatpush3.bf16.msra.mxu0 %v289_v12 }
  0x14   :  { %275 = vmatprep.subr.bf16.mxu0 %v290_v19 }
  0x17   :  { %276 = vmatpush3.bf16.msra.mxu0 %v290_v19 }
  0x18   :  { %277 = vmatprep.subr.bf16.mxu0 %v291_v23 }
  0x1b   :  { %278 = vmatpush3.bf16.msra.mxu0 %v291_v23 }
  0x1c   :  { %279 = vmatprep.subr.bf16.mxu0 %v292_v26 }
  0x1f   :  { %280 = vmatpush3.bf16.msra.mxu0 %v292_v26 }
  0x22   :  { %282 = vmatmul.mubr.bf16.vlgmr.msra.gmra.mxu0 %v71_v29 }
  0xe2   :  { %v283_v31 = vpop.f32.mrf.mxu0 }
  0xe3   :  { %v209_v33 = vmul.f32 %v283_v31, %v244_v30 }
  0xe4   :  { %v170_v34 = vpop.f32.mrf.mxu0 }
  0xe5   :  { %v220_v35 = vadd.f32 %v245_v32, %v209_v33  ;;  %v207_v36 = vmul.f32 %v244_v30, %v170_v34 }
  0xe6   :  { %v284_v37 = vpop.f32.mrf.mxu0 }
  0xe7   :  { %v224_v38 = vmax.f32 %v220_v35, 0.0  ;;  %v218_v39 = vadd.f32 %v245_v32, %v207_v36  ;;  %v210_v40 = vmul.f32 %v284_v37, %v244_v30 }
  0xe8   :  { %v173_v41 = vpop.f32.mrf.mxu0 }
  0xe9   :  { %228 = vst [vmem:[%s388_s6 + $0x10] sm:$0xff] %v224_v38  ;;  %v222_v42 = vmax.f32 %v218_v39, 0.0  ;;  %v221_v43 = vadd.f32 %v245_v32, %v210_v40  ;;  %v208_v44 = vmul.f32 %v244_v30, %v173_v41 }
  0xeb   :  { %226 = vst [vmem:[%s388_s6] sm:$0xff] %v222_v42  ;;  %v225_v45 = vmax.f32 %v221_v43, 0.0  ;;  %v219_v46 = vadd.f32 %v245_v32, %v208_v44 }
  0xed   :  { %229 = vst [vmem:[%s388_s6 + $0x18] sm:$0xff] %v225_v45  ;;  %v223_v47 = vmax.f32 %v219_v46, 0.0 }
  0xef   :  { %227 = vst [vmem:[%s388_s6 + $0x8] sm:$0xff] %v223_v47 }

// kernel: densenet_forward.26
= control target key start
LH: loop header
LB: loop body
LE: loop exit
PB: predicated region body
PF: predicated region fallthrough
CT: control target
= control target key end

     0   :  { %vm62_vm0 = vcmask 1041409   ;;  %s113_s0 = inlined_call_operand.vmem [shape: f32[2,16,128], index: 0, kind: input, shape index: {}]   ;;  %s114_s1 = inlined_call_operand.vmem [shape: f32[1,1,128], index: 1, kind: input, shape index: {}]   ;;  %s115_s2 = inlined_call_operand.vmem [shape: f32[1,1,128], index: 2, kind: input, shape index: {}]   ;;  %s116_s3 = inlined_call_operand.vmem [shape: f32[2,128], index: 3, kind: output, shape index: {}]  }
   0x1   :  { %v14_v0 = vld [vmem:[%s113_s0] sm:$0xff]  ;;  %v15_v1 = vld [vmem:[%s113_s0 + $0x8] sm:$0xff]  ;;  %v16_v2 = vld [vmem:[%s113_s0 + $0x10] sm:$0xff] }
   0x2   :  { %v17_v3 = vld [vmem:[%s113_s0 + $0x18] sm:$0xff]  ;;  %v70_v4 = vld [vmem:[%s114_s1] ss:$0 sm:$0xff] }
   0x3   :  { %v71_v5 = vld [vmem:[%s115_s2] ss:$0 sm:$0xff]  ;;  %v25_v6 = vmul.f32 %v70_v4, %v14_v0  ;;  %v26_v7 = vmul.f32 %v70_v4, %v15_v1  ;;  %v27_v8 = vmul.f32 %v70_v4, %v16_v2  ;;  %v28_v9 = vmul.f32 %v70_v4, %v17_v3 }
   0x5   :  { %v36_v10 = vadd.f32 %v71_v5, %v25_v6  ;;  %v37_v11 = vadd.f32 %v71_v5, %v26_v7  ;;  %v38_v12 = vadd.f32 %v71_v5, %v27_v8  ;;  %v39_v13 = vadd.f32 %v71_v5, %v28_v9 }
   0x7   :  { %v40_v14 = vmax.f32 %v36_v10, 0.0  ;;  %v41_v15 = vmax.f32 %v37_v11, 0.0  ;;  %v42_v16 = vmax.f32 %v38_v12, 0.0  ;;  %v43_v17 = vmax.f32 %v39_v13, 0.0 }
   0x9   :  { %v44_v18 = vadd.f32 %v41_v15, %v40_v14  ;;  %v51_v19 = vadd.f32 %v43_v17, %v42_v16 }
   0xb   :  { %v45_v20 = vrot.slane %v44_v18, 4  ;;  %v52_v21 = vrot.slane %v51_v19, 4 }
   0xd   :  { %v46_v22 = vadd.f32 %v45_v20, %v44_v18  ;;  %v53_v23 = vadd.f32 %v52_v21, %v51_v19 }
   0xf   :  { %v47_v24 = vrot.slane %v46_v22, 2  ;;  %v54_v25 = vrot.slane %v53_v23, 2 }
  0x11   :  { %v48_v26 = vadd.f32 %v47_v24, %v46_v22  ;;  %v55_v27 = vadd.f32 %v54_v25, %v53_v23 }
  0x13   :  { %v49_v28 = vrot.slane %v48_v26, 1  ;;  %v56_v29 = vrot.slane %v55_v27, 1 }
  0x15   :  { %v50_v30 = vadd.f32 %v49_v28, %v48_v26  ;;  %v57_v31 = vadd.f32 %v56_v29, %v55_v27 }
  0x17   :  { %v58_v32 = vmul.f32 0.0625, %v50_v30  ;;  %v59_v33 = vmul.f32 0.0625, %v57_v31 }
  0x19   :  { %v63_v34 = vsel %vm62_vm0, %v59_v33, %v58_v32 }
  0x1a   :  { %65 = vst [vmem:[%s116_s3] sm:$0x3] %v63_v34 }

// kernel: densenet_forward.23
= control target key start
LH: loop header
LB: loop body
LE: loop exit
PB: predicated region body
PF: predicated region fallthrough
CT: control target
= control target key end

     0   :  { %v54_v13 = vlaneseq  ;;  %s712_s1 = inlined_call_operand.vmem [shape: bf16[384,128], index: 1, kind: input, shape index: {}]   ;;  %s713_s0 = inlined_call_operand.vmem [shape: bf16[32,384], index: 0, kind: input, shape index: {}]   ;;  %s714_s2 = inlined_call_operand.vmem [shape: f32[1,384], index: 2, kind: input, shape index: {}]   ;;  %s715_s3 = inlined_call_operand.vmem [shape: f32[1,384], index: 3, kind: input, shape index: {}]   ;;  %s716_s4 = inlined_call_operand.vmem [shape: f32[1,128], index: 4, kind: input, shape index: {}]   ;;  %s717_s5 = inlined_call_operand.vmem [shape: f32[1,128], index: 5, kind: input, shape index: {}]   ;;  %s718_s6 = inlined_call_operand.vmem [shape: f32[32,128], index: 6, kind: output, shape index: {}]  }
   0x1   :  { %v539_v0 = vld [vmem:[%s712_s1 + $0x78] sm:$0xff]   ;;  %v542_v3 = vld [vmem:[%s712_s1 + $0x70] sm:$0xff]   ;;  %v545_v6 = vld [vmem:[%s712_s1 + $0x68] sm:$0xff]  }
   0x2   :  { %v540_v1 = vld [vmem:[%s712_s1 + $0x38] sm:$0xff]   ;;  %481 = vmatprep.subr.bf16.mxu0 %v539_v0  ;;  %v543_v4 = vld [vmem:[%s712_s1 + $0x30] sm:$0xff]   ;;  %v546_v7 = vld [vmem:[%s712_s1 + $0x28] sm:$0xff]   ;;  %v55_v17 = vshrl.u32 %v54_v13, 7 }
   0x3   :  { %v541_v2 = vld [vmem:[%s712_s1 + $0xb8] sm:$0xff]   ;;  %482 = vmatpush3.bf16.msra.mxu0 %v540_v1  ;;  %v544_v5 = vld [vmem:[%s712_s1 + $0xb0] sm:$0xff]   ;;  %v547_v8 = vld [vmem:[%s712_s1 + $0xa8] sm:$0xff]  }
   0x4   :  { %519 = vmatprep.subr.bf16.mxu1 %v541_v2  ;;  %483 = vmatprep.subr.bf16.mxu0 %v542_v3  ;;  %v548_v9 = vld [vmem:[%s712_s1 + $0x60] sm:$0xff]   ;;  %v551_v12 = vld [vmem:[%s712_s1 + $0x58] sm:$0xff]   ;;  %v554_v16 = vld [vmem:[%s712_s1 + $0x50] sm:$0xff]   ;;  %v60_v22 = vsub.s32 1, %v55_v17  ;;  %v56_v24 = vsub.s32 0, %v55_v17  ;;  %v64_v26 = vsub.s32 2, %v55_v17 }
   0x5   :  { %520 = vmatpush3.bf16.msra.mxu1 %v541_v2  ;;  %v549_v10 = vld [vmem:[%s712_s1 + $0x20] sm:$0xff]   ;;  %v553_v14 = vld [vmem:[%s712_s1 + $0x98] sm:$0xff]   ;;  %v556_v18 = vld [vmem:[%s712_s1 + $0x90] sm:$0xff]  }
   0x6   :  { %521 = vmatprep.subr.bf16.mxu1 %v544_v5  ;;  %v550_v11 = vld [vmem:[%s712_s1 + $0xa0] sm:$0xff]   ;;  %v552_v15 = vld [vmem:[%s712_s1 + $0x18] sm:$0xff]   ;;  %v555_v19 = vld [vmem:[%s712_s1 + $0x10] sm:$0xff]  }
   0x7   :  { %484 = vmatpush3.bf16.msra.mxu0 %v543_v4  ;;  %v557_v20 = vld [vmem:[%s712_s1 + $0x48] sm:$0xff]   ;;  %v560_v25 = vld [vmem:[%s712_s1 + $0x40] sm:$0xff]   ;;  %v36_v55 = vld [vmem:[%s713_s0 + $0x18] sm:$0xff] }
   0x8   :  { %485 = vmatprep.subr.bf16.mxu0 %v545_v6  ;;  %v558_v21 = vld [vmem:[%s712_s1 + $0x8] sm:$0xff]   ;;  %v32_v27 = vld [vmem:[%s713_s0] sm:$0xff]  ;;  %v47_v3 = vunpack.c.h.bf16 %v36_v55 }
   0x9   :  { %522 = vmatpush3.bf16.msra.mxu1 %v544_v5  ;;  %v559_v23 = vld [vmem:[%s712_s1 + $0x88] sm:$0xff]   ;;  %v52_v29 = vld [vmem:[%s714_s2] sm:$0x7]  ;;  %v40_v30 = vunpack.c.l.bf16 %v32_v27  ;;  %v41_v31 = vunpack.c.h.bf16 %v32_v27 }
   0xa   :  { %523 = vmatprep.subr.bf16.mxu1 %v547_v8  ;;  %v34_v28 = vld [vmem:[%s713_s0 + $0xc] sm:$0xff]  ;;  %v81_v34 = vld [vmem:[%s715_s3] sm:$0x7]  ;;  %v33_v35 = vld [vmem:[%s713_s0 + $0x8] ss:$12 sps:$4 sm:$0xff]   ;;  %v61_v37 = vrot.slane %v52_v29, %v60_v22  ;;  %v57_v39 = vrot.slane %v52_v29, %v56_v24  ;;  %v65_v45 = vrot.slane %v52_v29, %v64_v26 }
   0xb   :  { %486 = vmatpush3.bf16.msra.mxu0 %v546_v7  ;;  %v43_v32 = vunpack.c.l.bf16 %v34_v28  ;;  %v44_v33 = vunpack.c.h.bf16 %v34_v28  ;;  %v562_v36 = vld [vmem:[%s712_s1 + $0x80] sm:$0xff]   ;;  %v90_v38 = vrot.slane %v81_v34, %v60_v22  ;;  %v86_v40 = vrot.slane %v81_v34, %v56_v24 }
   0xc   :  { %487 = vmatprep.subr.bf16.mxu0 %v548_v9  ;;  %v37_v41 = vld [vmem:[%s713_s0 + $0x20] ss:$12 sps:$4 sm:$0xff]   ;;  %v42_v43 = vunpack.c.l.bf16 %v33_v35  ;;  %v45_v44 = vunpack.c.h.bf16 %v33_v35  ;;  %v94_v46 = vrot.slane %v81_v34, %v64_v26  ;;  %v70_v47 = vmul.f32 %v61_v37, %v41_v31  ;;  %v38_v56 = vld [vmem:[%s713_s0 + $0x24] sm:$0xff] }
   0xd   :  { %524 = vmatpush3.bf16.msra.mxu1 %v547_v8  ;;  %v561_v42 = vld [vmem:[%s712_s1] sm:$0xff]   ;;  %v73_v48 = vmul.f32 %v61_v37, %v44_v33  ;;  %v69_v49 = vmul.f32 %v57_v39, %v40_v30  ;;  %v72_v50 = vmul.f32 %v57_v39, %v43_v32  ;;  %v48_v53 = vunpack.c.l.bf16 %v37_v41 }
   0xe   :  { %525 = vmatprep.subr.bf16.mxu1 %v550_v11  ;;  %v71_v51 = vmul.f32 %v65_v45, %v42_v43  ;;  %v74_v52 = vmul.f32 %v65_v45, %v45_v44  ;;  %v51_v54 = vunpack.c.h.bf16 %v37_v41  ;;  %v99_v57 = vadd.f32 %v90_v38, %v70_v47  ;;  %v479_v27 = vld [vmem:[%s716_s4] ss:$0 sm:$0xff] }
   0xf   :  { %488 = vmatpush3.bf16.msra.mxu0 %v549_v10  ;;  %v102_v58 = vadd.f32 %v90_v38, %v73_v48  ;;  %v98_v59 = vadd.f32 %v86_v40, %v69_v49  ;;  %v101_v60 = vadd.f32 %v86_v40, %v72_v50  ;;  %v77_v63 = vmul.f32 %v65_v45, %v48_v53  ;;  %v480_v29 = vld [vmem:[%s717_s5] ss:$0 sm:$0xff] }
  0x10   :  { %489 = vmatprep.subr.bf16.mxu0 %v551_v12  ;;  %v100_v61 = vadd.f32 %v94_v46, %v71_v51  ;;  %v103_v62 = vadd.f32 %v94_v46, %v74_v52  ;;  %v80_v0 = vmul.f32 %v65_v45, %v51_v54  ;;  %v50_v4 = vunpack.c.h.bf16 %v38_v56 }
  0x11   :  { %526 = vmatpush3.bf16.msra.mxu1 %v550_v11  ;;  %v115_v1 = vpack.c.bf16 %v102_v58, %v99_v57  ;;  %v114_v2 = vpack.c.bf16 %v101_v60, %v98_v59  ;;  %v106_v6 = vadd.f32 %v94_v46, %v77_v63  ;;  %v46_v8 = vunpack.c.l.bf16 %v36_v55 }
  0x12   :  { %527 = vmatprep.subr.bf16.mxu1 %v553_v14  ;;  %v116_v5 = vpack.c.bf16 %v103_v62, %v100_v61  ;;  %v109_v7 = vadd.f32 %v94_v46, %v80_v0  ;;  %v76_v9 = vmul.f32 %v61_v37, %v47_v3  ;;  %v79_v10 = vmul.f32 %v61_v37, %v50_v4 }
  0x13   :  { %490 = vmatpush3.bf16.msra.mxu0 %v552_v15  ;;  %344 = vmatprep.mubr.bf16.mxu0 %v115_v1  ;;  %v49_v11 = vunpack.c.l.bf16 %v38_v56  ;;  %v75_v13 = vmul.f32 %v57_v39, %v46_v8 }
  0x14   :  { %491 = vmatprep.subr.bf16.mxu0 %v554_v16  ;;  %535 = vmatprep.mubr.bf16.mxu1 %v116_v5  ;;  %v119_v12 = vpack.c.bf16 %v109_v7, %v106_v6  ;;  %v108_v15 = vadd.f32 %v90_v38, %v79_v10 }
  0x15   :  { %528 = vmatpush3.bf16.msra.mxu1 %v553_v14  ;;  %v105_v14 = vadd.f32 %v90_v38, %v76_v9  ;;  %v78_v16 = vmul.f32 %v57_v39, %v49_v11  ;;  %v104_v17 = vadd.f32 %v86_v40, %v75_v13 }
  0x16   :  { %529 = vmatprep.subr.bf16.mxu1 %v556_v18 }
  0x17   :  { %492 = vmatpush3.bf16.msra.mxu0 %v555_v19  ;;  %v107_v19 = vadd.f32 %v86_v40, %v78_v16 }
  0x18   :  { %493 = vmatprep.subr.bf16.mxu0 %v557_v20 }
  0x19   :  { %530 = vmatpush3.bf16.msra.mxu1 %v556_v18  ;;  %v118_v18 = vpack.c.bf16 %v108_v15, %v105_v14  ;;  %v117_v20 = vpack.c.bf16 %v107_v19, %v104_v17 }
  0x1a   :  { %531 = vmatprep.subr.bf16.mxu1 %v559_v23 }
  0x1b   :  { %494 = vmatpush3.bf16.msra.mxu0 %v558_v21 }
  0x1c   :  { %495 = vmatprep.subr.bf16.mxu0 %v560_v25 }
  0x1d   :  { %532 = vmatpush3.bf16.msra.mxu1 %v559_v23 }
  0x1e   :  { %533 = vmatprep.subr.bf16.mxu1 %v562_v36 }
  0x1f   :  { %496 = vmatpush3.bf16.msra.mxu0 %v561_v42 }
  0x21   :  { %534 = vmatpush3.bf16.msra.mxu1 %v562_v36 }
  0x22   :  { %345 = vmatmul.mubr.bf16.vlgmr.msra.gmra.mxu0 %v114_v2 }
  0x23   :  { %352 = vmatprep.mubr.bf16.mxu0 %v118_v18 }
  0x24   :  { %536 = vmatmul.mubr.bf16.vlgmr.msra.gmra.mxu1 %v119_v12 }
  0x2a   :  { %353 = vmatmul.mubr.bf16.gmra.mxu0 %v117_v20 }
  0xe2   :  { %v497_v21 = vpop.f32.mrf.mxu0 }
  0xe4   :  { %v498_v22 = vpop.f32.mrf.mxu0  ;;  %v537_v23 = vpop.f32.mrf.mxu1 }
  0xe5   :  { %v499_v24 = vadd.f32 %v498_v22, %v497_v21 }
  0xe6   :  { %v500_v25 = vpop.f32.mrf.mxu0  ;;  %v395_v26 = vpop.f32.mrf.mxu1 }
  0xe7   :  { %v396_v28 = vadd.f32 %v499_v24, %v395_v26 }
  0xe8   :  { %v501_v30 = vpop.f32.mrf.mxu0  ;;  %v538_v31 = vpop.f32.mrf.mxu1 }
  0xe9   :  { %v432_v32 = vmul.f32 %v479_v27, %v396_v28  ;;  %v502_v33 = vadd.f32 %v501_v30, %v500_v25 }
  0xea   :  { %v503_v34 = vpop.f32.mrf.mxu0  ;;  %v398_v35 = vpop.f32.mrf.mxu1 }
  0xeb   :  { %v443_v36 = vadd.f32 %v480_v29, %v432_v32  ;;  %v399_v37 = vadd.f32 %v502_v33, %v398_v35 }
  0xec   :  { %v504_v38 = vpop.f32.mrf.mxu0 }
  0xed   :  { %447 = vst [vmem:[%s718_s6] sm:$0xff] %v443_v36  ;;  %v433_v39 = vmul.f32 %v479_v27, %v399_v37  ;;  %v505_v40 = vadd.f32 %v504_v38, %v503_v34 }
  0xee   :  { %v506_v41 = vpop.f32.mrf.mxu0 }
  0xef   :  { %v444_v42 = vadd.f32 %v480_v29, %v433_v39  ;;  %v404_v43 = vadd.f32 %v537_v23, %v505_v40 }
  0xf0   :  { %v507_v44 = vpop.f32.mrf.mxu0 }
  0xf1   :  { %448 = vst [vmem:[%s718_s6 + $0x8] sm:$0xff] %v444_v42  ;;  %v434_v45 = vmul.f32 %v479_v27, %v404_v43  ;;  %v508_v46 = vadd.f32 %v507_v44, %v506_v41 }
  0xf3   :  { %v445_v47 = vadd.f32 %v480_v29, %v434_v45  ;;  %v407_v48 = vadd.f32 %v538_v31, %v508_v46 }
  0xf5   :  { %449 = vst [vmem:[%s718_s6 + $0x10] sm:$0xff] %v445_v47  ;;  %v435_v49 = vmul.f32 %v479_v27, %v407_v48 }
  0xf7   :  { %v446_v50 = vadd.f32 %v480_v29, %v435_v49 }
  0xf9   :  { %450 = vst [vmem:[%s718_s6 + $0x18] sm:$0xff] %v446_v50 }

// kernel: densenet_forward.27
= control target key start
LH: loop header
LB: loop body
LE: loop exit
PB: predicated region body
PF: predicated region fallthrough
CT: control target
= control target key end

     0   :  { %v231_v0 = vmov 0.0   ;;  %vm232_vm0 = vmmov 0   ;;  %s310_s1 = inlined_call_operand.vmem [shape: bf16[128,128], index: 1, kind: input, shape index: {}]   ;;  %s311_s0 = inlined_call_operand.vmem [shape: bf16[8,128], index: 0, kind: input, shape index: {}]   ;;  %s312_s2 = inlined_call_operand.vmem [shape: f32[1,128], index: 2, kind: input, shape index: {}, may-alias: {2,4}]   ;;  %s313_s3 = inlined_call_operand.vmem [shape: f32[1,128], index: 3, kind: input, shape index: {}]   ;;  %s314_s4 = inlined_call_operand.vmem [shape: f32[1,128], index: 4, kind: input, shape index: {}, may-alias: {2,4}]   ;;  %s315_s5 = inlined_call_operand.vmem [shape: f32[1,128], index: 5, kind: input, shape index: {}]   ;;  %s316_s6 = inlined_call_operand.vmem [shape: f32[8,128], index: 6, kind: output, shape index: {}]  }
   0x1   :  { %201 = vmatprep.subr.bf16.mxu0 %v231_v0  ;;  %v223_v1 = vld [vmem:[%s310_s1 + $0x38] sm:$0xff]   ;;  %217 = vmatprep.mubr.msk.bf16.mxu0 %vm232_vm0, %v231_v0  ;;  %v224_v2 = vld [vmem:[%s310_s1 + $0x30] sm:$0xff]   ;;  %v225_v3 = vld [vmem:[%s310_s1 + $0x28] sm:$0xff]  }
   0x2   :  { %202 = vmatpush3.bf16.msra.mxu0 %v223_v1  ;;  %v226_v4 = vld [vmem:[%s310_s1 + $0x20] sm:$0xff]   ;;  %v227_v5 = vld [vmem:[%s310_s1 + $0x18] sm:$0xff]   ;;  %v228_v8 = vld [vmem:[%s310_s1 + $0x10] sm:$0xff]  }
   0x3   :  { %203 = vmatprep.subr.bf16.mxu0 %v231_v0  ;;  %v29_v6 = vld [vmem:[%s311_s0] sm:$0xf]  ;;  %v229_v11 = vld [vmem:[%s310_s1 + $0x8] sm:$0xff]  }
   0x4   :  { %v30_v7 = vunpack.c.l.bf16 %v29_v6  ;;  %v180_v9 = vld [vmem:[%s312_s2] ss:$0 sm:$0xff] }
   0x5   :  { %v181_v12 = vld [vmem:[%s313_s3] ss:$0 sm:$0xff] }
   0x6   :  { %204 = vmatpush3.bf16.msra.mxu0 %v224_v2  ;;  %v38_v10 = vmul.f32 %v180_v9, %v30_v7  ;;  %v230_v14 = vld [vmem:[%s310_s1] sm:$0xff]  }
   0x7   :  { %205 = vmatprep.subr.bf16.mxu0 %v231_v0  ;;  %v190_v16 = vld [vmem:[%s314_s4] ss:$0 sm:$0xff] }
   0x8   :  { %v46_v13 = vadd.f32 %v181_v12, %v38_v10  ;;  %v191_v18 = vld [vmem:[%s315_s5] ss:$0 sm:$0xff] }
   0xa   :  { %206 = vmatpush3.bf16.msra.mxu0 %v225_v3  ;;  %v48_v15 = vpack.c.bf16 %v46_v13, %v46_v13 }
   0xb   :  { %207 = vmatprep.subr.bf16.mxu0 %v231_v0 }
   0xe   :  { %208 = vmatpush3.bf16.msra.mxu0 %v226_v4 }
   0xf   :  { %209 = vmatprep.subr.bf16.mxu0 %v231_v0 }
  0x12   :  { %210 = vmatpush3.bf16.msra.mxu0 %v227_v5 }
  0x13   :  { %211 = vmatprep.subr.bf16.mxu0 %v231_v0 }
  0x16   :  { %212 = vmatpush3.bf16.msra.mxu0 %v228_v8 }
  0x17   :  { %213 = vmatprep.subr.bf16.mxu0 %v231_v0 }
  0x1a   :  { %214 = vmatpush3.bf16.msra.mxu0 %v229_v11 }
  0x1b   :  { %215 = vmatprep.subr.bf16.mxu0 %v231_v0 }
  0x1e   :  { %216 = vmatpush3.bf16.msra.mxu0 %v230_v14 }
  0x21   :  { %218 = vmatmul.mubr.bf16.vlgmr.msra.gmra.mxu0 %v48_v15 }
  0xe1   :  { %v147_v17 = vpop.f32.mrf.mxu0 }
  0xe2   :  { %v166_v19 = vmul.f32 %v190_v16, %v147_v17 }
  0xe3   :  { %v219_v20 = vpop.f32.mrf.mxu0 }
  0xe4   :  { %v174_v21 = vadd.f32 %v191_v18, %v166_v19 }
  0xe5   :  { %v150_v22 = vpop.f32.mrf.mxu0 }
  0xe6   :  { %175 = vst [vmem:[%s316_s6] sm:$0xff] %v174_v21 }
  0xe7   :  { %v220_v23 = vpop.f32.mrf.mxu0 }

</bundles_post_ra>
